<compile_context>
chip_gen: v6e
topology: v6e:2x2x1
jax: 0.10.0
libtpu: 0.0.40
codegen_flags: <defaults>
</compile_context>

<pallas_src>
import jax
import jax.numpy as jnp
from jax import lax
from jax.experimental import pallas as pl
from jax.experimental.pallas import tpu as pltpu


def shortcut_kernel(x_ref, w1_ref, b1_ref, w2_ref, b2_ref, o_ref,
                    acc_ref, mid_ref):
    # x_ref  : (1, H, W, Cin)      bf16  NHWC activation block (one image)
    # w1_ref : (3, 3, Cin, Cmid)   bf16
    # b1_ref : (1, Cmid)           f32
    # w2_ref : (3, 3, Cmid, Cout)  bf16
    # b2_ref : (1, Cout)           f32
    # o_ref  : (1, H, W, Cout)     f32   output block
    # acc_ref: (H, W, Cmid)        f32   conv1 accumulator (VMEM scratch)
    # mid_ref: (H, W, Cmid)        bf16  relu(conv1) staged for conv2's MXU
    _, H, W, _ = x_ref.shape

    def conv3x3_same(load_rows, w_ref, init_fn, add_fn):
        """3x3 SAME conv as 9 shifted matmuls on contiguous row slabs.

        For tap (dh, dw):  out[h, w, :] += src[h+dh, w+dw, :] @ W[dh+1, dw+1]
        Out-of-range taps at the image border contribute nothing (== zero
        padding).  The row slab for a given dh is loaded once and reused for
        all three dw taps; the width shift is applied to the f32 product.
        dh == 0 comes first so the full-image center tap can initialize the
        destination (no explicit zeroing anywhere).
        """
        for dh in (0, -1, 1):
            hs0, hs1 = max(0, dh), H + min(0, dh)        # valid source rows
            r = hs1 - hs0
            src = load_rows(hs0, hs1)                    # (r, W, Cin) bf16
            src2d = src.reshape(r * W, src.shape[-1])    # layout-preserving
            ro0, ro1 = max(0, -dh), H - max(0, dh)       # output rows hit
            for dw in (0, -1, 1):
                p = jnp.dot(src2d, w_ref[dh + 1, dw + 1],
                            preferred_element_type=jnp.float32)
                p = p.reshape(r, W, p.shape[-1])         # f32 tap contribution
                if dh == 0 and dw == 0:
                    init_fn(p)                           # center tap: full image
                elif dw == 0:
                    add_fn(ro0, ro1, 0, W, p)
                elif dw == 1:                            # src col w+1 -> out col w
                    add_fn(ro0, ro1, 0, W - 1, p[:, 1:, :])
                else:                                    # src col w-1 -> out col w
                    add_fn(ro0, ro1, 1, W, p[:, :-1, :])

    # ---- conv1 + bias -> acc_ref (f32 accumulation in VMEM scratch) --------
    def acc_init(p):
        acc_ref[...] = p + b1_ref[...]

    def acc_add(r0, r1, c0, c1, v):
        acc_ref[r0:r1, c0:c1, :] += v

    conv3x3_same(lambda h0, h1: x_ref[0, h0:h1, :, :], w1_ref,
                 acc_init, acc_add)

    # ---- ReLU (f32) then stage as bf16 for conv2's MXU operands ------------
    mid_ref[...] = jnp.maximum(acc_ref[...], 0.0).astype(mid_ref.dtype)

    # ---- conv2 + bias + residual add, accumulated directly into o_ref ------
    def out_init(p):
        o_ref[0] = x_ref[0].astype(jnp.float32) + p + b2_ref[...]

    def out_add(r0, r1, c0, c1, v):
        o_ref[0, r0:r1, c0:c1, :] += v

    conv3x3_same(lambda h0, h1: mid_ref[h0:h1, :, :], w2_ref,
                 out_init, out_add)


def shortcut_block(x_nchw, w1, b1, w2, b2):
    """x_nchw: (N, C, H, W) float32; w1/w2 in HWIO; returns NCHW float32."""
    N, C, H, W = x_nchw.shape
    Cmid = w1.shape[3]
    Cout = w2.shape[3]
    assert Cout == C, "residual add requires Cout == Cin"
    assert W % 8 == 0, "row-slab reshape assumes W is a multiple of 8"

    # bf16 MXU inputs (f32 accumulation happens in-kernel), f32 biases.
    x = jnp.transpose(x_nchw, (0, 2, 3, 1)).astype(jnp.bfloat16)   # NHWC bf16
    w1b = w1.astype(jnp.bfloat16)
    w2b = w2.astype(jnp.bfloat16)
    b1f = b1.reshape(1, Cmid).astype(jnp.float32)
    b2f = b2.reshape(1, Cout).astype(jnp.float32)

    flops = 2 * N * H * W * 9 * (C * Cmid + Cmid * Cout) + 4 * N * H * W * Cout
    bytes_accessed = (N * H * W * C * 2          # bf16 activations in
                      + N * H * W * Cout * 4     # f32 output
                      + 9 * (C * Cmid + Cmid * Cout) * 2
                      + (Cmid + Cout) * 4)

    out = pl.pallas_call(
        shortcut_kernel,
        out_shape=jax.ShapeDtypeStruct((N, H, W, Cout), jnp.float32),
        grid_spec=pltpu.PrefetchScalarGridSpec(
            num_scalar_prefetch=0,
            grid=(N,),
            in_specs=[
                pl.BlockSpec((1, H, W, C), lambda n: (n, 0, 0, 0)),
                pl.BlockSpec((3, 3, C, Cmid), lambda n: (0, 0, 0, 0)),
                pl.BlockSpec((1, Cmid), lambda n: (0, 0)),
                pl.BlockSpec((3, 3, Cmid, Cout), lambda n: (0, 0, 0, 0)),
                pl.BlockSpec((1, Cout), lambda n: (0, 0)),
            ],
            out_specs=pl.BlockSpec((1, H, W, Cout), lambda n: (n, 0, 0, 0)),
            scratch_shapes=[
                pltpu.VMEM((H, W, Cmid), jnp.float32),    # conv1 accumulator
                pltpu.VMEM((H, W, Cmid), jnp.bfloat16),   # relu(conv1) staging
            ],
        ),
        compiler_params=pltpu.CompilerParams(
            dimension_semantics=("parallel",)),
        cost_estimate=pl.CostEstimate(flops=flops, transcendentals=0,
                                      bytes_accessed=bytes_accessed),
    )(x, w1b, b1f, w2b, b2f)

    return jnp.transpose(out, (0, 3, 1, 2))                        # NCHW


def ref_forward(x_nchw, w1, b1, w2, b2):
    """Pure-JAX reference mirroring the kernel's precision choices
    (bf16 MXU inputs / bf16 intermediate, f32 accumulation & epilogue)."""
    f32 = jnp.float32
    x = jnp.transpose(x_nchw, (0, 2, 3, 1)).astype(jnp.bfloat16).astype(f32)
    w1f = w1.astype(jnp.bfloat16).astype(f32)
    w2f = w2.astype(jnp.bfloat16).astype(f32)
    dn1 = lax.conv_dimension_numbers(x.shape, w1f.shape, ('NHWC', 'HWIO', 'NHWC'))
    y = lax.conv_general_dilated(x, w1f, (1, 1), 'SAME', dimension_numbers=dn1,
                                 precision=lax.Precision.HIGHEST) + b1.astype(f32)
    y = jnp.maximum(y, 0.0).astype(jnp.bfloat16).astype(f32)
    dn2 = lax.conv_dimension_numbers(y.shape, w2f.shape, ('NHWC', 'HWIO', 'NHWC'))
    y = lax.conv_general_dilated(y, w2f, (1, 1), 'SAME', dimension_numbers=dn2,
                                 precision=lax.Precision.HIGHEST) + b2.astype(f32)
    return jnp.transpose(x + y, (0, 3, 1, 2))


if __name__ == "__main__":
    key = jax.random.PRNGKey(0)
    k1, k2, k3, k4, k5 = jax.random.split(key, 5)

    N, C, H, W = 2, 4, 16, 16
    Cmid = 4

    x = jax.random.normal(k1, (N, C, H, W), jnp.float32)
    w1 = jax.random.normal(k2, (3, 3, C, Cmid), jnp.float32) * 0.1
    b1 = jax.random.normal(k3, (Cmid,), jnp.float32) * 0.1
    w2 = jax.random.normal(k4, (3, 3, Cmid, C), jnp.float32) * 0.1
    b2 = jax.random.normal(k5, (C,), jnp.float32) * 0.1

    out = shortcut_block(x, w1, b1, w2, b2)
    jax.block_until_ready(out)

    ref = ref_forward(x, w1, b1, w2, b2)
    assert out.shape == (N, C, H, W)
    max_err = jnp.max(jnp.abs(out - ref))
    assert jnp.allclose(out, ref, atol=1e-3, rtol=1e-3), \
        f"mismatch vs reference (max |err| = {max_err})"
    print("KERNEL_OK")
</pallas_src>

<mosaic_0001>
module attributes {stable_mosaic.version = 11 : i64} {
  func.func @shortcut_kernel(%arg0: i32, %arg1: memref<1x16x16x4xbf16, #tpu.memory_space<vmem>>, %arg2: memref<3x3x4x4xbf16, #tpu.memory_space<vmem>>, %arg3: memref<1x4xf32, #tpu.memory_space<vmem>>, %arg4: memref<3x3x4x4xbf16, #tpu.memory_space<vmem>>, %arg5: memref<1x4xf32, #tpu.memory_space<vmem>>, %arg6: memref<1x16x16x4xf32, #tpu.memory_space<vmem>>, %arg7: memref<16x16x4xf32, #tpu.memory_space<vmem>>, %arg8: memref<16x16x4xbf16, #tpu.memory_space<vmem>>) attributes {dimension_semantics = [#tpu.dimension_semantics<parallel>], iteration_bounds = array<i64: 2>, scalar_prefetch = 0 : i64, scratch_operands = 2 : i64, tpu.core_type = #tpu.core_type<tc>, window_params = [{transform_indices = @transform_0, window_bounds = array<i64: 1, 16, 16, 4>}, {pipeline_mode = #tpu.pipeline_mode<synchronous>, transform_indices = @transform_1, window_bounds = array<i64: 3, 3, 4, 4>}, {pipeline_mode = #tpu.pipeline_mode<synchronous>, transform_indices = @transform_2, window_bounds = array<i64: 1, 4>}, {pipeline_mode = #tpu.pipeline_mode<synchronous>, transform_indices = @transform_3, window_bounds = array<i64: 3, 3, 4, 4>}, {pipeline_mode = #tpu.pipeline_mode<synchronous>, transform_indices = @transform_4, window_bounds = array<i64: 1, 4>}, {transform_indices = @transform_5, window_bounds = array<i64: 1, 16, 16, 4>}]} {
    %c0 = arith.constant 0 : index
    %c0_0 = arith.constant 0 : index
    %c0_1 = arith.constant 0 : index
    %c0_2 = arith.constant 0 : index
    %0 = vector.load %arg1[%c0, %c0_0, %c0_1, %c0_2] : memref<1x16x16x4xbf16, #tpu.memory_space<vmem>>, vector<1x16x16x4xbf16>
    %1 = vector.shape_cast %0 : vector<1x16x16x4xbf16> to vector<16x16x4xbf16>
    %2 = vector.shape_cast %1 : vector<16x16x4xbf16> to vector<256x4xbf16>
    %c1 = arith.constant 1 : index
    %c1_3 = arith.constant 1 : index
    %c0_4 = arith.constant 0 : index
    %c0_5 = arith.constant 0 : index
    %3 = vector.load %arg2[%c1, %c1_3, %c0_4, %c0_5] : memref<3x3x4x4xbf16, #tpu.memory_space<vmem>>, vector<1x1x4x4xbf16>
    %4 = vector.shape_cast %3 : vector<1x1x4x4xbf16> to vector<4x4xbf16>
    %cst = arith.constant dense<0.000000e+00> : vector<256x4xf32>
    %5 = tpu.matmul %2, %4, %cst {dimension_numbers = #tpu.dot_dimension_numbers<[1], [0], [0], [1], [0, 0, 1, 1], [], []>} : vector<256x4xbf16>, vector<4x4xbf16>, vector<256x4xf32> -> vector<256x4xf32>
    %6 = vector.shape_cast %5 : vector<256x4xf32> to vector<16x16x4xf32>
    %c0_6 = arith.constant 0 : index
    %c0_7 = arith.constant 0 : index
    %7 = vector.load %arg3[%c0_6, %c0_7] : memref<1x4xf32, #tpu.memory_space<vmem>>, vector<1x4xf32>
    %8 = vector.shape_cast %7 : vector<1x4xf32> to vector<1x1x4xf32>
    %9 = vector.broadcast %8 : vector<1x1x4xf32> to vector<16x16x4xf32>
    %10 = arith.addf %6, %9 : vector<16x16x4xf32>
    %c0_8 = arith.constant 0 : index
    %c0_9 = arith.constant 0 : index
    %c0_10 = arith.constant 0 : index
    %11 = vector.load %arg7[%c0_8, %c0_9, %c0_10] : memref<16x16x4xf32, #tpu.memory_space<vmem>>, vector<16x16x4xf32>
    tpu.vector_store %arg7[%c0_8, %c0_9, %c0_10], %10 {strides = array<i32>} : memref<16x16x4xf32, #tpu.memory_space<vmem>>, vector<16x16x4xf32>,
    %c1_11 = arith.constant 1 : index
    %c0_12 = arith.constant 0 : index
    %c0_13 = arith.constant 0 : index
    %c0_14 = arith.constant 0 : index
    %12 = vector.load %arg2[%c1_11, %c0_12, %c0_13, %c0_14] : memref<3x3x4x4xbf16, #tpu.memory_space<vmem>>, vector<1x1x4x4xbf16>
    %13 = vector.shape_cast %12 : vector<1x1x4x4xbf16> to vector<4x4xbf16>
    %cst_15 = arith.constant dense<0.000000e+00> : vector<256x4xf32>
    %14 = tpu.matmul %2, %13, %cst_15 {dimension_numbers = #tpu.dot_dimension_numbers<[1], [0], [0], [1], [0, 0, 1, 1], [], []>} : vector<256x4xbf16>, vector<4x4xbf16>, vector<256x4xf32> -> vector<256x4xf32>
    %15 = vector.shape_cast %14 : vector<256x4xf32> to vector<16x16x4xf32>
    %16 = vector.extract_strided_slice %15 {offsets = [0, 0, 0], sizes = [16, 15, 4], strides = [1, 1, 1]} : vector<16x16x4xf32> to vector<16x15x4xf32>
    %c0_16 = arith.constant 0 : index
    %c1_17 = arith.constant 1 : index
    %c0_18 = arith.constant 0 : index
    %17 = vector.load %arg7[%c0_16, %c1_17, %c0_18] : memref<16x16x4xf32, #tpu.memory_space<vmem>>, vector<16x15x4xf32>
    %18 = arith.addf %17, %16 : vector<16x15x4xf32>
    %c0_19 = arith.constant 0 : index
    %c1_20 = arith.constant 1 : index
    %c0_21 = arith.constant 0 : index
    %19 = vector.load %arg7[%c0_19, %c1_20, %c0_21] : memref<16x16x4xf32, #tpu.memory_space<vmem>>, vector<16x15x4xf32>
    tpu.vector_store %arg7[%c0_19, %c1_20, %c0_21], %18 {strides = array<i32>} : memref<16x16x4xf32, #tpu.memory_space<vmem>>, vector<16x15x4xf32>,
    %c1_22 = arith.constant 1 : index
    %c2 = arith.constant 2 : index
    %c0_23 = arith.constant 0 : index
    %c0_24 = arith.constant 0 : index
    %20 = vector.load %arg2[%c1_22, %c2, %c0_23, %c0_24] : memref<3x3x4x4xbf16, #tpu.memory_space<vmem>>, vector<1x1x4x4xbf16>
    %21 = vector.shape_cast %20 : vector<1x1x4x4xbf16> to vector<4x4xbf16>
    %cst_25 = arith.constant dense<0.000000e+00> : vector<256x4xf32>
    %22 = tpu.matmul %2, %21, %cst_25 {dimension_numbers = #tpu.dot_dimension_numbers<[1], [0], [0], [1], [0, 0, 1, 1], [], []>} : vector<256x4xbf16>, vector<4x4xbf16>, vector<256x4xf32> -> vector<256x4xf32>
    %23 = vector.shape_cast %22 : vector<256x4xf32> to vector<16x16x4xf32>
    %24 = vector.extract_strided_slice %23 {offsets = [0, 1, 0], sizes = [16, 15, 4], strides = [1, 1, 1]} : vector<16x16x4xf32> to vector<16x15x4xf32>
    %c0_26 = arith.constant 0 : index
    %c0_27 = arith.constant 0 : index
    %c0_28 = arith.constant 0 : index
    %25 = vector.load %arg7[%c0_26, %c0_27, %c0_28] : memref<16x16x4xf32, #tpu.memory_space<vmem>>, vector<16x15x4xf32>
    %26 = arith.addf %25, %24 : vector<16x15x4xf32>
    %c0_29 = arith.constant 0 : index
    %c0_30 = arith.constant 0 : index
    %c0_31 = arith.constant 0 : index
    %27 = vector.load %arg7[%c0_29, %c0_30, %c0_31] : memref<16x16x4xf32, #tpu.memory_space<vmem>>, vector<16x15x4xf32>
    tpu.vector_store %arg7[%c0_29, %c0_30, %c0_31], %26 {strides = array<i32>} : memref<16x16x4xf32, #tpu.memory_space<vmem>>, vector<16x15x4xf32>,
    %c0_32 = arith.constant 0 : index
    %c0_33 = arith.constant 0 : index
    %c0_34 = arith.constant 0 : index
    %c0_35 = arith.constant 0 : index
    %28 = vector.load %arg1[%c0_32, %c0_33, %c0_34, %c0_35] : memref<1x16x16x4xbf16, #tpu.memory_space<vmem>>, vector<1x15x16x4xbf16>
    %29 = vector.shape_cast %28 : vector<1x15x16x4xbf16> to vector<15x16x4xbf16>
    %30 = vector.shape_cast %29 : vector<15x16x4xbf16> to vector<240x4xbf16>
    %c0_36 = arith.constant 0 : index
    %c1_37 = arith.constant 1 : index
    %c0_38 = arith.constant 0 : index
    %c0_39 = arith.constant 0 : index
    %31 = vector.load %arg2[%c0_36, %c1_37, %c0_38, %c0_39] : memref<3x3x4x4xbf16, #tpu.memory_space<vmem>>, vector<1x1x4x4xbf16>
    %32 = vector.shape_cast %31 : vector<1x1x4x4xbf16> to vector<4x4xbf16>
    %cst_40 = arith.constant dense<0.000000e+00> : vector<240x4xf32>
    %33 = tpu.matmul %30, %32, %cst_40 {dimension_numbers = #tpu.dot_dimension_numbers<[1], [0], [0], [1], [0, 0, 1, 1], [], []>} : vector<240x4xbf16>, vector<4x4xbf16>, vector<240x4xf32> -> vector<240x4xf32>
    %34 = vector.shape_cast %33 : vector<240x4xf32> to vector<15x16x4xf32>
    %c1_41 = arith.constant 1 : index
    %c0_42 = arith.constant 0 : index
    %c0_43 = arith.constant 0 : index
    %35 = vector.load %arg7[%c1_41, %c0_42, %c0_43] : memref<16x16x4xf32, #tpu.memory_space<vmem>>, vector<15x16x4xf32>
    %36 = arith.addf %35, %34 : vector<15x16x4xf32>
    %c1_44 = arith.constant 1 : index
    %c0_45 = arith.constant 0 : index
    %c0_46 = arith.constant 0 : index
    %37 = vector.load %arg7[%c1_44, %c0_45, %c0_46] : memref<16x16x4xf32, #tpu.memory_space<vmem>>, vector<15x16x4xf32>
    tpu.vector_store %arg7[%c1_44, %c0_45, %c0_46], %36 {strides = array<i32>} : memref<16x16x4xf32, #tpu.memory_space<vmem>>, vector<15x16x4xf32>,
    %c0_47 = arith.constant 0 : index
    %c0_48 = arith.constant 0 : index
    %c0_49 = arith.constant 0 : index
    %c0_50 = arith.constant 0 : index
    %38 = vector.load %arg2[%c0_47, %c0_48, %c0_49, %c0_50] : memref<3x3x4x4xbf16, #tpu.memory_space<vmem>>, vector<1x1x4x4xbf16>
    %39 = vector.shape_cast %38 : vector<1x1x4x4xbf16> to vector<4x4xbf16>
    %cst_51 = arith.constant dense<0.000000e+00> : vector<240x4xf32>
    %40 = tpu.matmul %30, %39, %cst_51 {dimension_numbers = #tpu.dot_dimension_numbers<[1], [0], [0], [1], [0, 0, 1, 1], [], []>} : vector<240x4xbf16>, vector<4x4xbf16>, vector<240x4xf32> -> vector<240x4xf32>
    %41 = vector.shape_cast %40 : vector<240x4xf32> to vector<15x16x4xf32>
    %42 = vector.extract_strided_slice %41 {offsets = [0, 0, 0], sizes = [15, 15, 4], strides = [1, 1, 1]} : vector<15x16x4xf32> to vector<15x15x4xf32>
    %c1_52 = arith.constant 1 : index
    %c1_53 = arith.constant 1 : index
    %c0_54 = arith.constant 0 : index
    %43 = vector.load %arg7[%c1_52, %c1_53, %c0_54] : memref<16x16x4xf32, #tpu.memory_space<vmem>>, vector<15x15x4xf32>
    %44 = arith.addf %43, %42 : vector<15x15x4xf32>
    %c1_55 = arith.constant 1 : index
    %c1_56 = arith.constant 1 : index
    %c0_57 = arith.constant 0 : index
    %45 = vector.load %arg7[%c1_55, %c1_56, %c0_57] : memref<16x16x4xf32, #tpu.memory_space<vmem>>, vector<15x15x4xf32>
    tpu.vector_store %arg7[%c1_55, %c1_56, %c0_57], %44 {strides = array<i32>} : memref<16x16x4xf32, #tpu.memory_space<vmem>>, vector<15x15x4xf32>,
    %c0_58 = arith.constant 0 : index
    %c2_59 = arith.constant 2 : index
    %c0_60 = arith.constant 0 : index
    %c0_61 = arith.constant 0 : index
    %46 = vector.load %arg2[%c0_58, %c2_59, %c0_60, %c0_61] : memref<3x3x4x4xbf16, #tpu.memory_space<vmem>>, vector<1x1x4x4xbf16>
    %47 = vector.shape_cast %46 : vector<1x1x4x4xbf16> to vector<4x4xbf16>
    %cst_62 = arith.constant dense<0.000000e+00> : vector<240x4xf32>
    %48 = tpu.matmul %30, %47, %cst_62 {dimension_numbers = #tpu.dot_dimension_numbers<[1], [0], [0], [1], [0, 0, 1, 1], [], []>} : vector<240x4xbf16>, vector<4x4xbf16>, vector<240x4xf32> -> vector<240x4xf32>
    %49 = vector.shape_cast %48 : vector<240x4xf32> to vector<15x16x4xf32>
    %50 = vector.extract_strided_slice %49 {offsets = [0, 1, 0], sizes = [15, 15, 4], strides = [1, 1, 1]} : vector<15x16x4xf32> to vector<15x15x4xf32>
    %c1_63 = arith.constant 1 : index
    %c0_64 = arith.constant 0 : index
    %c0_65 = arith.constant 0 : index
    %51 = vector.load %arg7[%c1_63, %c0_64, %c0_65] : memref<16x16x4xf32, #tpu.memory_space<vmem>>, vector<15x15x4xf32>
    %52 = arith.addf %51, %50 : vector<15x15x4xf32>
    %c1_66 = arith.constant 1 : index
    %c0_67 = arith.constant 0 : index
    %c0_68 = arith.constant 0 : index
    %53 = vector.load %arg7[%c1_66, %c0_67, %c0_68] : memref<16x16x4xf32, #tpu.memory_space<vmem>>, vector<15x15x4xf32>
    tpu.vector_store %arg7[%c1_66, %c0_67, %c0_68], %52 {strides = array<i32>} : memref<16x16x4xf32, #tpu.memory_space<vmem>>, vector<15x15x4xf32>,
    %c0_69 = arith.constant 0 : index
    %c1_70 = arith.constant 1 : index
    %c0_71 = arith.constant 0 : index
    %c0_72 = arith.constant 0 : index
    %54 = vector.load %arg1[%c0_69, %c1_70, %c0_71, %c0_72] : memref<1x16x16x4xbf16, #tpu.memory_space<vmem>>, vector<1x15x16x4xbf16>
    %55 = vector.shape_cast %54 : vector<1x15x16x4xbf16> to vector<15x16x4xbf16>
    %56 = vector.shape_cast %55 : vector<15x16x4xbf16> to vector<240x4xbf16>
    %c2_73 = arith.constant 2 : index
    %c1_74 = arith.constant 1 : index
    %c0_75 = arith.constant 0 : index
    %c0_76 = arith.constant 0 : index
    %57 = vector.load %arg2[%c2_73, %c1_74, %c0_75, %c0_76] : memref<3x3x4x4xbf16, #tpu.memory_space<vmem>>, vector<1x1x4x4xbf16>
    %58 = vector.shape_cast %57 : vector<1x1x4x4xbf16> to vector<4x4xbf16>
    %cst_77 = arith.constant dense<0.000000e+00> : vector<240x4xf32>
    %59 = tpu.matmul %56, %58, %cst_77 {dimension_numbers = #tpu.dot_dimension_numbers<[1], [0], [0], [1], [0, 0, 1, 1], [], []>} : vector<240x4xbf16>, vector<4x4xbf16>, vector<240x4xf32> -> vector<240x4xf32>
    %60 = vector.shape_cast %59 : vector<240x4xf32> to vector<15x16x4xf32>
    %c0_78 = arith.constant 0 : index
    %c0_79 = arith.constant 0 : index
    %c0_80 = arith.constant 0 : index
    %61 = vector.load %arg7[%c0_78, %c0_79, %c0_80] : memref<16x16x4xf32, #tpu.memory_space<vmem>>, vector<15x16x4xf32>
    %62 = arith.addf %61, %60 : vector<15x16x4xf32>
    %c0_81 = arith.constant 0 : index
    %c0_82 = arith.constant 0 : index
    %c0_83 = arith.constant 0 : index
    %63 = vector.load %arg7[%c0_81, %c0_82, %c0_83] : memref<16x16x4xf32, #tpu.memory_space<vmem>>, vector<15x16x4xf32>
    tpu.vector_store %arg7[%c0_81, %c0_82, %c0_83], %62 {strides = array<i32>} : memref<16x16x4xf32, #tpu.memory_space<vmem>>, vector<15x16x4xf32>,
    %c2_84 = arith.constant 2 : index
    %c0_85 = arith.constant 0 : index
    %c0_86 = arith.constant 0 : index
    %c0_87 = arith.constant 0 : index
    %64 = vector.load %arg2[%c2_84, %c0_85, %c0_86, %c0_87] : memref<3x3x4x4xbf16, #tpu.memory_space<vmem>>, vector<1x1x4x4xbf16>
    %65 = vector.shape_cast %64 : vector<1x1x4x4xbf16> to vector<4x4xbf16>
    %cst_88 = arith.constant dense<0.000000e+00> : vector<240x4xf32>
    %66 = tpu.matmul %56, %65, %cst_88 {dimension_numbers = #tpu.dot_dimension_numbers<[1], [0], [0], [1], [0, 0, 1, 1], [], []>} : vector<240x4xbf16>, vector<4x4xbf16>, vector<240x4xf32> -> vector<240x4xf32>
    %67 = vector.shape_cast %66 : vector<240x4xf32> to vector<15x16x4xf32>
    %68 = vector.extract_strided_slice %67 {offsets = [0, 0, 0], sizes = [15, 15, 4], strides = [1, 1, 1]} : vector<15x16x4xf32> to vector<15x15x4xf32>
    %c0_89 = arith.constant 0 : index
    %c1_90 = arith.constant 1 : index
    %c0_91 = arith.constant 0 : index
    %69 = vector.load %arg7[%c0_89, %c1_90, %c0_91] : memref<16x16x4xf32, #tpu.memory_space<vmem>>, vector<15x15x4xf32>
    %70 = arith.addf %69, %68 : vector<15x15x4xf32>
    %c0_92 = arith.constant 0 : index
    %c1_93 = arith.constant 1 : index
    %c0_94 = arith.constant 0 : index
    %71 = vector.load %arg7[%c0_92, %c1_93, %c0_94] : memref<16x16x4xf32, #tpu.memory_space<vmem>>, vector<15x15x4xf32>
    tpu.vector_store %arg7[%c0_92, %c1_93, %c0_94], %70 {strides = array<i32>} : memref<16x16x4xf32, #tpu.memory_space<vmem>>, vector<15x15x4xf32>,
    %c2_95 = arith.constant 2 : index
    %c2_96 = arith.constant 2 : index
    %c0_97 = arith.constant 0 : index
    %c0_98 = arith.constant 0 : index
    %72 = vector.load %arg2[%c2_95, %c2_96, %c0_97, %c0_98] : memref<3x3x4x4xbf16, #tpu.memory_space<vmem>>, vector<1x1x4x4xbf16>
    %73 = vector.shape_cast %72 : vector<1x1x4x4xbf16> to vector<4x4xbf16>
    %cst_99 = arith.constant dense<0.000000e+00> : vector<240x4xf32>
    %74 = tpu.matmul %56, %73, %cst_99 {dimension_numbers = #tpu.dot_dimension_numbers<[1], [0], [0], [1], [0, 0, 1, 1], [], []>} : vector<240x4xbf16>, vector<4x4xbf16>, vector<240x4xf32> -> vector<240x4xf32>
    %75 = vector.shape_cast %74 : vector<240x4xf32> to vector<15x16x4xf32>
    %76 = vector.extract_strided_slice %75 {offsets = [0, 1, 0], sizes = [15, 15, 4], strides = [1, 1, 1]} : vector<15x16x4xf32> to vector<15x15x4xf32>
    %c0_100 = arith.constant 0 : index
    %c0_101 = arith.constant 0 : index
    %c0_102 = arith.constant 0 : index
    %77 = vector.load %arg7[%c0_100, %c0_101, %c0_102] : memref<16x16x4xf32, #tpu.memory_space<vmem>>, vector<15x15x4xf32>
    %78 = arith.addf %77, %76 : vector<15x15x4xf32>
    %c0_103 = arith.constant 0 : index
    %c0_104 = arith.constant 0 : index
    %c0_105 = arith.constant 0 : index
    %79 = vector.load %arg7[%c0_103, %c0_104, %c0_105] : memref<16x16x4xf32, #tpu.memory_space<vmem>>, vector<15x15x4xf32>
    tpu.vector_store %arg7[%c0_103, %c0_104, %c0_105], %78 {strides = array<i32>} : memref<16x16x4xf32, #tpu.memory_space<vmem>>, vector<15x15x4xf32>,
    %c0_106 = arith.constant 0 : index
    %c0_107 = arith.constant 0 : index
    %c0_108 = arith.constant 0 : index
    %80 = vector.load %arg7[%c0_106, %c0_107, %c0_108] : memref<16x16x4xf32, #tpu.memory_space<vmem>>, vector<16x16x4xf32>
    %cst_109 = arith.constant 0.000000e+00 : f32
    %81 = vector.broadcast %cst_109 : f32 to vector<16x16x4xf32>
    %82 = arith.maximumf %80, %81 : vector<16x16x4xf32>
    %83 = arith.truncf %82 : vector<16x16x4xf32> to vector<16x16x4xbf16>
    %c0_110 = arith.constant 0 : index
    %c0_111 = arith.constant 0 : index
    %c0_112 = arith.constant 0 : index
    %84 = vector.load %arg8[%c0_110, %c0_111, %c0_112] : memref<16x16x4xbf16, #tpu.memory_space<vmem>>, vector<16x16x4xbf16>
    tpu.vector_store %arg8[%c0_110, %c0_111, %c0_112], %83 {strides = array<i32>} : memref<16x16x4xbf16, #tpu.memory_space<vmem>>, vector<16x16x4xbf16>,
    %c0_113 = arith.constant 0 : index
    %c0_114 = arith.constant 0 : index
    %c0_115 = arith.constant 0 : index
    %85 = vector.load %arg8[%c0_113, %c0_114, %c0_115] : memref<16x16x4xbf16, #tpu.memory_space<vmem>>, vector<16x16x4xbf16>
    %86 = vector.shape_cast %85 : vector<16x16x4xbf16> to vector<256x4xbf16>
    %c1_116 = arith.constant 1 : index
    %c1_117 = arith.constant 1 : index
    %c0_118 = arith.constant 0 : index
    %c0_119 = arith.constant 0 : index
    %87 = vector.load %arg4[%c1_116, %c1_117, %c0_118, %c0_119] : memref<3x3x4x4xbf16, #tpu.memory_space<vmem>>, vector<1x1x4x4xbf16>
    %88 = vector.shape_cast %87 : vector<1x1x4x4xbf16> to vector<4x4xbf16>
    %cst_120 = arith.constant dense<0.000000e+00> : vector<256x4xf32>
    %89 = tpu.matmul %86, %88, %cst_120 {dimension_numbers = #tpu.dot_dimension_numbers<[1], [0], [0], [1], [0, 0, 1, 1], [], []>} : vector<256x4xbf16>, vector<4x4xbf16>, vector<256x4xf32> -> vector<256x4xf32>
    %90 = vector.shape_cast %89 : vector<256x4xf32> to vector<16x16x4xf32>
    %c0_121 = arith.constant 0 : index
    %c0_122 = arith.constant 0 : index
    %c0_123 = arith.constant 0 : index
    %c0_124 = arith.constant 0 : index
    %91 = vector.load %arg1[%c0_121, %c0_122, %c0_123, %c0_124] : memref<1x16x16x4xbf16, #tpu.memory_space<vmem>>, vector<1x16x16x4xbf16>
    %92 = vector.shape_cast %91 : vector<1x16x16x4xbf16> to vector<16x16x4xbf16>
    %93 = arith.extf %92 : vector<16x16x4xbf16> to vector<16x16x4xf32>
    %94 = arith.addf %93, %90 : vector<16x16x4xf32>
    %c0_125 = arith.constant 0 : index
    %c0_126 = arith.constant 0 : index
    %95 = vector.load %arg5[%c0_125, %c0_126] : memref<1x4xf32, #tpu.memory_space<vmem>>, vector<1x4xf32>
    %96 = vector.shape_cast %95 : vector<1x4xf32> to vector<1x1x4xf32>
    %97 = vector.broadcast %96 : vector<1x1x4xf32> to vector<16x16x4xf32>
    %98 = arith.addf %94, %97 : vector<16x16x4xf32>
    %c0_127 = arith.constant 0 : index
    %c0_128 = arith.constant 0 : index
    %c0_129 = arith.constant 0 : index
    %c0_130 = arith.constant 0 : index
    %99 = vector.load %arg6[%c0_127, %c0_128, %c0_129, %c0_130] : memref<1x16x16x4xf32, #tpu.memory_space<vmem>>, vector<1x16x16x4xf32>
    %100 = vector.shape_cast %99 : vector<1x16x16x4xf32> to vector<16x16x4xf32>
    %101 = vector.shape_cast %98 : vector<16x16x4xf32> to vector<1x16x16x4xf32>
    tpu.vector_store %arg6[%c0_127, %c0_128, %c0_129, %c0_130], %101 {strides = array<i32>} : memref<1x16x16x4xf32, #tpu.memory_space<vmem>>, vector<1x16x16x4xf32>,
    %c1_131 = arith.constant 1 : index
    %c0_132 = arith.constant 0 : index
    %c0_133 = arith.constant 0 : index
    %c0_134 = arith.constant 0 : index
    %102 = vector.load %arg4[%c1_131, %c0_132, %c0_133, %c0_134] : memref<3x3x4x4xbf16, #tpu.memory_space<vmem>>, vector<1x1x4x4xbf16>
    %103 = vector.shape_cast %102 : vector<1x1x4x4xbf16> to vector<4x4xbf16>
    %cst_135 = arith.constant dense<0.000000e+00> : vector<256x4xf32>
    %104 = tpu.matmul %86, %103, %cst_135 {dimension_numbers = #tpu.dot_dimension_numbers<[1], [0], [0], [1], [0, 0, 1, 1], [], []>} : vector<256x4xbf16>, vector<4x4xbf16>, vector<256x4xf32> -> vector<256x4xf32>
    %105 = vector.shape_cast %104 : vector<256x4xf32> to vector<16x16x4xf32>
    %106 = vector.extract_strided_slice %105 {offsets = [0, 0, 0], sizes = [16, 15, 4], strides = [1, 1, 1]} : vector<16x16x4xf32> to vector<16x15x4xf32>
    %c0_136 = arith.constant 0 : index
    %c0_137 = arith.constant 0 : index
    %c1_138 = arith.constant 1 : index
    %c0_139 = arith.constant 0 : index
    %107 = vector.load %arg6[%c0_136, %c0_137, %c1_138, %c0_139] : memref<1x16x16x4xf32, #tpu.memory_space<vmem>>, vector<1x16x15x4xf32>
    %108 = vector.shape_cast %107 : vector<1x16x15x4xf32> to vector<16x15x4xf32>
    %109 = arith.addf %108, %106 : vector<16x15x4xf32>
    %c0_140 = arith.constant 0 : index
    %c0_141 = arith.constant 0 : index
    %c1_142 = arith.constant 1 : index
    %c0_143 = arith.constant 0 : index
    %110 = vector.load %arg6[%c0_140, %c0_141, %c1_142, %c0_143] : memref<1x16x16x4xf32, #tpu.memory_space<vmem>>, vector<1x16x15x4xf32>
    %111 = vector.shape_cast %110 : vector<1x16x15x4xf32> to vector<16x15x4xf32>
    %112 = vector.shape_cast %109 : vector<16x15x4xf32> to vector<1x16x15x4xf32>
    tpu.vector_store %arg6[%c0_140, %c0_141, %c1_142, %c0_143], %112 {strides = array<i32>} : memref<1x16x16x4xf32, #tpu.memory_space<vmem>>, vector<1x16x15x4xf32>,
    %c1_144 = arith.constant 1 : index
    %c2_145 = arith.constant 2 : index
    %c0_146 = arith.constant 0 : index
    %c0_147 = arith.constant 0 : index
    %113 = vector.load %arg4[%c1_144, %c2_145, %c0_146, %c0_147] : memref<3x3x4x4xbf16, #tpu.memory_space<vmem>>, vector<1x1x4x4xbf16>
    %114 = vector.shape_cast %113 : vector<1x1x4x4xbf16> to vector<4x4xbf16>
    %cst_148 = arith.constant dense<0.000000e+00> : vector<256x4xf32>
    %115 = tpu.matmul %86, %114, %cst_148 {dimension_numbers = #tpu.dot_dimension_numbers<[1], [0], [0], [1], [0, 0, 1, 1], [], []>} : vector<256x4xbf16>, vector<4x4xbf16>, vector<256x4xf32> -> vector<256x4xf32>
    %116 = vector.shape_cast %115 : vector<256x4xf32> to vector<16x16x4xf32>
    %117 = vector.extract_strided_slice %116 {offsets = [0, 1, 0], sizes = [16, 15, 4], strides = [1, 1, 1]} : vector<16x16x4xf32> to vector<16x15x4xf32>
    %c0_149 = arith.constant 0 : index
    %c0_150 = arith.constant 0 : index
    %c0_151 = arith.constant 0 : index
    %c0_152 = arith.constant 0 : index
    %118 = vector.load %arg6[%c0_149, %c0_150, %c0_151, %c0_152] : memref<1x16x16x4xf32, #tpu.memory_space<vmem>>, vector<1x16x15x4xf32>
    %119 = vector.shape_cast %118 : vector<1x16x15x4xf32> to vector<16x15x4xf32>
    %120 = arith.addf %119, %117 : vector<16x15x4xf32>
    %c0_153 = arith.constant 0 : index
    %c0_154 = arith.constant 0 : index
    %c0_155 = arith.constant 0 : index
    %c0_156 = arith.constant 0 : index
    %121 = vector.load %arg6[%c0_153, %c0_154, %c0_155, %c0_156] : memref<1x16x16x4xf32, #tpu.memory_space<vmem>>, vector<1x16x15x4xf32>
    %122 = vector.shape_cast %121 : vector<1x16x15x4xf32> to vector<16x15x4xf32>
    %123 = vector.shape_cast %120 : vector<16x15x4xf32> to vector<1x16x15x4xf32>
    tpu.vector_store %arg6[%c0_153, %c0_154, %c0_155, %c0_156], %123 {strides = array<i32>} : memref<1x16x16x4xf32, #tpu.memory_space<vmem>>, vector<1x16x15x4xf32>,
    %c0_157 = arith.constant 0 : index
    %c0_158 = arith.constant 0 : index
    %c0_159 = arith.constant 0 : index
    %124 = vector.load %arg8[%c0_157, %c0_158, %c0_159] : memref<16x16x4xbf16, #tpu.memory_space<vmem>>, vector<15x16x4xbf16>
    %125 = vector.shape_cast %124 : vector<15x16x4xbf16> to vector<240x4xbf16>
    %c0_160 = arith.constant 0 : index
    %c1_161 = arith.constant 1 : index
    %c0_162 = arith.constant 0 : index
    %c0_163 = arith.constant 0 : index
    %126 = vector.load %arg4[%c0_160, %c1_161, %c0_162, %c0_163] : memref<3x3x4x4xbf16, #tpu.memory_space<vmem>>, vector<1x1x4x4xbf16>
    %127 = vector.shape_cast %126 : vector<1x1x4x4xbf16> to vector<4x4xbf16>
    %cst_164 = arith.constant dense<0.000000e+00> : vector<240x4xf32>
    %128 = tpu.matmul %125, %127, %cst_164 {dimension_numbers = #tpu.dot_dimension_numbers<[1], [0], [0], [1], [0, 0, 1, 1], [], []>} : vector<240x4xbf16>, vector<4x4xbf16>, vector<240x4xf32> -> vector<240x4xf32>
    %129 = vector.shape_cast %128 : vector<240x4xf32> to vector<15x16x4xf32>
    %c0_165 = arith.constant 0 : index
    %c1_166 = arith.constant 1 : index
    %c0_167 = arith.constant 0 : index
    %c0_168 = arith.constant 0 : index
    %130 = vector.load %arg6[%c0_165, %c1_166, %c0_167, %c0_168] : memref<1x16x16x4xf32, #tpu.memory_space<vmem>>, vector<1x15x16x4xf32>
    %131 = vector.shape_cast %130 : vector<1x15x16x4xf32> to vector<15x16x4xf32>
    %132 = arith.addf %131, %129 : vector<15x16x4xf32>
    %c0_169 = arith.constant 0 : index
    %c1_170 = arith.constant 1 : index
    %c0_171 = arith.constant 0 : index
    %c0_172 = arith.constant 0 : index
    %133 = vector.load %arg6[%c0_169, %c1_170, %c0_171, %c0_172] : memref<1x16x16x4xf32, #tpu.memory_space<vmem>>, vector<1x15x16x4xf32>
    %134 = vector.shape_cast %133 : vector<1x15x16x4xf32> to vector<15x16x4xf32>
    %135 = vector.shape_cast %132 : vector<15x16x4xf32> to vector<1x15x16x4xf32>
    tpu.vector_store %arg6[%c0_169, %c1_170, %c0_171, %c0_172], %135 {strides = array<i32>} : memref<1x16x16x4xf32, #tpu.memory_space<vmem>>, vector<1x15x16x4xf32>,
    %c0_173 = arith.constant 0 : index
    %c0_174 = arith.constant 0 : index
    %c0_175 = arith.constant 0 : index
    %c0_176 = arith.constant 0 : index
    %136 = vector.load %arg4[%c0_173, %c0_174, %c0_175, %c0_176] : memref<3x3x4x4xbf16, #tpu.memory_space<vmem>>, vector<1x1x4x4xbf16>
    %137 = vector.shape_cast %136 : vector<1x1x4x4xbf16> to vector<4x4xbf16>
    %cst_177 = arith.constant dense<0.000000e+00> : vector<240x4xf32>
    %138 = tpu.matmul %125, %137, %cst_177 {dimension_numbers = #tpu.dot_dimension_numbers<[1], [0], [0], [1], [0, 0, 1, 1], [], []>} : vector<240x4xbf16>, vector<4x4xbf16>, vector<240x4xf32> -> vector<240x4xf32>
    %139 = vector.shape_cast %138 : vector<240x4xf32> to vector<15x16x4xf32>
    %140 = vector.extract_strided_slice %139 {offsets = [0, 0, 0], sizes = [15, 15, 4], strides = [1, 1, 1]} : vector<15x16x4xf32> to vector<15x15x4xf32>
    %c0_178 = arith.constant 0 : index
    %c1_179 = arith.constant 1 : index
    %c1_180 = arith.constant 1 : index
    %c0_181 = arith.constant 0 : index
    %141 = vector.load %arg6[%c0_178, %c1_179, %c1_180, %c0_181] : memref<1x16x16x4xf32, #tpu.memory_space<vmem>>, vector<1x15x15x4xf32>
    %142 = vector.shape_cast %141 : vector<1x15x15x4xf32> to vector<15x15x4xf32>
    %143 = arith.addf %142, %140 : vector<15x15x4xf32>
    %c0_182 = arith.constant 0 : index
    %c1_183 = arith.constant 1 : index
    %c1_184 = arith.constant 1 : index
    %c0_185 = arith.constant 0 : index
    %144 = vector.load %arg6[%c0_182, %c1_183, %c1_184, %c0_185] : memref<1x16x16x4xf32, #tpu.memory_space<vmem>>, vector<1x15x15x4xf32>
    %145 = vector.shape_cast %144 : vector<1x15x15x4xf32> to vector<15x15x4xf32>
    %146 = vector.shape_cast %143 : vector<15x15x4xf32> to vector<1x15x15x4xf32>
    tpu.vector_store %arg6[%c0_182, %c1_183, %c1_184, %c0_185], %146 {strides = array<i32>} : memref<1x16x16x4xf32, #tpu.memory_space<vmem>>, vector<1x15x15x4xf32>,
    %c0_186 = arith.constant 0 : index
    %c2_187 = arith.constant 2 : index
    %c0_188 = arith.constant 0 : index
    %c0_189 = arith.constant 0 : index
    %147 = vector.load %arg4[%c0_186, %c2_187, %c0_188, %c0_189] : memref<3x3x4x4xbf16, #tpu.memory_space<vmem>>, vector<1x1x4x4xbf16>
    %148 = vector.shape_cast %147 : vector<1x1x4x4xbf16> to vector<4x4xbf16>
    %cst_190 = arith.constant dense<0.000000e+00> : vector<240x4xf32>
    %149 = tpu.matmul %125, %148, %cst_190 {dimension_numbers = #tpu.dot_dimension_numbers<[1], [0], [0], [1], [0, 0, 1, 1], [], []>} : vector<240x4xbf16>, vector<4x4xbf16>, vector<240x4xf32> -> vector<240x4xf32>
    %150 = vector.shape_cast %149 : vector<240x4xf32> to vector<15x16x4xf32>
    %151 = vector.extract_strided_slice %150 {offsets = [0, 1, 0], sizes = [15, 15, 4], strides = [1, 1, 1]} : vector<15x16x4xf32> to vector<15x15x4xf32>
    %c0_191 = arith.constant 0 : index
    %c1_192 = arith.constant 1 : index
    %c0_193 = arith.constant 0 : index
    %c0_194 = arith.constant 0 : index
    %152 = vector.load %arg6[%c0_191, %c1_192, %c0_193, %c0_194] : memref<1x16x16x4xf32, #tpu.memory_space<vmem>>, vector<1x15x15x4xf32>
    %153 = vector.shape_cast %152 : vector<1x15x15x4xf32> to vector<15x15x4xf32>
    %154 = arith.addf %153, %151 : vector<15x15x4xf32>
    %c0_195 = arith.constant 0 : index
    %c1_196 = arith.constant 1 : index
    %c0_197 = arith.constant 0 : index
    %c0_198 = arith.constant 0 : index
    %155 = vector.load %arg6[%c0_195, %c1_196, %c0_197, %c0_198] : memref<1x16x16x4xf32, #tpu.memory_space<vmem>>, vector<1x15x15x4xf32>
    %156 = vector.shape_cast %155 : vector<1x15x15x4xf32> to vector<15x15x4xf32>
    %157 = vector.shape_cast %154 : vector<15x15x4xf32> to vector<1x15x15x4xf32>
    tpu.vector_store %arg6[%c0_195, %c1_196, %c0_197, %c0_198], %157 {strides = array<i32>} : memref<1x16x16x4xf32, #tpu.memory_space<vmem>>, vector<1x15x15x4xf32>,
    %c1_199 = arith.constant 1 : index
    %c0_200 = arith.constant 0 : index
    %c0_201 = arith.constant 0 : index
    %158 = vector.load %arg8[%c1_199, %c0_200, %c0_201] : memref<16x16x4xbf16, #tpu.memory_space<vmem>>, vector<15x16x4xbf16>
    %159 = vector.shape_cast %158 : vector<15x16x4xbf16> to vector<240x4xbf16>
    %c2_202 = arith.constant 2 : index
    %c1_203 = arith.constant 1 : index
    %c0_204 = arith.constant 0 : index
    %c0_205 = arith.constant 0 : index
    %160 = vector.load %arg4[%c2_202, %c1_203, %c0_204, %c0_205] : memref<3x3x4x4xbf16, #tpu.memory_space<vmem>>, vector<1x1x4x4xbf16>
    %161 = vector.shape_cast %160 : vector<1x1x4x4xbf16> to vector<4x4xbf16>
    %cst_206 = arith.constant dense<0.000000e+00> : vector<240x4xf32>
    %162 = tpu.matmul %159, %161, %cst_206 {dimension_numbers = #tpu.dot_dimension_numbers<[1], [0], [0], [1], [0, 0, 1, 1], [], []>} : vector<240x4xbf16>, vector<4x4xbf16>, vector<240x4xf32> -> vector<240x4xf32>
    %163 = vector.shape_cast %162 : vector<240x4xf32> to vector<15x16x4xf32>
    %c0_207 = arith.constant 0 : index
    %c0_208 = arith.constant 0 : index
    %c0_209 = arith.constant 0 : index
    %c0_210 = arith.constant 0 : index
    %164 = vector.load %arg6[%c0_207, %c0_208, %c0_209, %c0_210] : memref<1x16x16x4xf32, #tpu.memory_space<vmem>>, vector<1x15x16x4xf32>
    %165 = vector.shape_cast %164 : vector<1x15x16x4xf32> to vector<15x16x4xf32>
    %166 = arith.addf %165, %163 : vector<15x16x4xf32>
    %c0_211 = arith.constant 0 : index
    %c0_212 = arith.constant 0 : index
    %c0_213 = arith.constant 0 : index
    %c0_214 = arith.constant 0 : index
    %167 = vector.load %arg6[%c0_211, %c0_212, %c0_213, %c0_214] : memref<1x16x16x4xf32, #tpu.memory_space<vmem>>, vector<1x15x16x4xf32>
    %168 = vector.shape_cast %167 : vector<1x15x16x4xf32> to vector<15x16x4xf32>
    %169 = vector.shape_cast %166 : vector<15x16x4xf32> to vector<1x15x16x4xf32>
    tpu.vector_store %arg6[%c0_211, %c0_212, %c0_213, %c0_214], %169 {strides = array<i32>} : memref<1x16x16x4xf32, #tpu.memory_space<vmem>>, vector<1x15x16x4xf32>,
    %c2_215 = arith.constant 2 : index
    %c0_216 = arith.constant 0 : index
    %c0_217 = arith.constant 0 : index
    %c0_218 = arith.constant 0 : index
    %170 = vector.load %arg4[%c2_215, %c0_216, %c0_217, %c0_218] : memref<3x3x4x4xbf16, #tpu.memory_space<vmem>>, vector<1x1x4x4xbf16>
    %171 = vector.shape_cast %170 : vector<1x1x4x4xbf16> to vector<4x4xbf16>
    %cst_219 = arith.constant dense<0.000000e+00> : vector<240x4xf32>
    %172 = tpu.matmul %159, %171, %cst_219 {dimension_numbers = #tpu.dot_dimension_numbers<[1], [0], [0], [1], [0, 0, 1, 1], [], []>} : vector<240x4xbf16>, vector<4x4xbf16>, vector<240x4xf32> -> vector<240x4xf32>
    %173 = vector.shape_cast %172 : vector<240x4xf32> to vector<15x16x4xf32>
    %174 = vector.extract_strided_slice %173 {offsets = [0, 0, 0], sizes = [15, 15, 4], strides = [1, 1, 1]} : vector<15x16x4xf32> to vector<15x15x4xf32>
    %c0_220 = arith.constant 0 : index
    %c0_221 = arith.constant 0 : index
    %c1_222 = arith.constant 1 : index
    %c0_223 = arith.constant 0 : index
    %175 = vector.load %arg6[%c0_220, %c0_221, %c1_222, %c0_223] : memref<1x16x16x4xf32, #tpu.memory_space<vmem>>, vector<1x15x15x4xf32>
    %176 = vector.shape_cast %175 : vector<1x15x15x4xf32> to vector<15x15x4xf32>
    %177 = arith.addf %176, %174 : vector<15x15x4xf32>
    %c0_224 = arith.constant 0 : index
    %c0_225 = arith.constant 0 : index
    %c1_226 = arith.constant 1 : index
    %c0_227 = arith.constant 0 : index
    %178 = vector.load %arg6[%c0_224, %c0_225, %c1_226, %c0_227] : memref<1x16x16x4xf32, #tpu.memory_space<vmem>>, vector<1x15x15x4xf32>
    %179 = vector.shape_cast %178 : vector<1x15x15x4xf32> to vector<15x15x4xf32>
    %180 = vector.shape_cast %177 : vector<15x15x4xf32> to vector<1x15x15x4xf32>
    tpu.vector_store %arg6[%c0_224, %c0_225, %c1_226, %c0_227], %180 {strides = array<i32>} : memref<1x16x16x4xf32, #tpu.memory_space<vmem>>, vector<1x15x15x4xf32>,
    %c2_228 = arith.constant 2 : index
    %c2_229 = arith.constant 2 : index
    %c0_230 = arith.constant 0 : index
    %c0_231 = arith.constant 0 : index
    %181 = vector.load %arg4[%c2_228, %c2_229, %c0_230, %c0_231] : memref<3x3x4x4xbf16, #tpu.memory_space<vmem>>, vector<1x1x4x4xbf16>
    %182 = vector.shape_cast %181 : vector<1x1x4x4xbf16> to vector<4x4xbf16>
    %cst_232 = arith.constant dense<0.000000e+00> : vector<240x4xf32>
    %183 = tpu.matmul %159, %182, %cst_232 {dimension_numbers = #tpu.dot_dimension_numbers<[1], [0], [0], [1], [0, 0, 1, 1], [], []>} : vector<240x4xbf16>, vector<4x4xbf16>, vector<240x4xf32> -> vector<240x4xf32>
    %184 = vector.shape_cast %183 : vector<240x4xf32> to vector<15x16x4xf32>
    %185 = vector.extract_strided_slice %184 {offsets = [0, 1, 0], sizes = [15, 15, 4], strides = [1, 1, 1]} : vector<15x16x4xf32> to vector<15x15x4xf32>
    %c0_233 = arith.constant 0 : index
    %c0_234 = arith.constant 0 : index
    %c0_235 = arith.constant 0 : index
    %c0_236 = arith.constant 0 : index
    %186 = vector.load %arg6[%c0_233, %c0_234, %c0_235, %c0_236] : memref<1x16x16x4xf32, #tpu.memory_space<vmem>>, vector<1x15x15x4xf32>
    %187 = vector.shape_cast %186 : vector<1x15x15x4xf32> to vector<15x15x4xf32>
    %188 = arith.addf %187, %185 : vector<15x15x4xf32>
    %c0_237 = arith.constant 0 : index
    %c0_238 = arith.constant 0 : index
    %c0_239 = arith.constant 0 : index
    %c0_240 = arith.constant 0 : index
    %189 = vector.load %arg6[%c0_237, %c0_238, %c0_239, %c0_240] : memref<1x16x16x4xf32, #tpu.memory_space<vmem>>, vector<1x15x15x4xf32>
    %190 = vector.shape_cast %189 : vector<1x15x15x4xf32> to vector<15x15x4xf32>
    %191 = vector.shape_cast %188 : vector<15x15x4xf32> to vector<1x15x15x4xf32>
    tpu.vector_store %arg6[%c0_237, %c0_238, %c0_239, %c0_240], %191 {strides = array<i32>} : memref<1x16x16x4xf32, #tpu.memory_space<vmem>>, vector<1x15x15x4xf32>,
    return
  }
  func.func @transform_0(%arg0: i32) -> (i32, i32, i32, i32) {
    %c0_i32 = arith.constant 0 : i32
    %c0_i32_0 = arith.constant 0 : i32
    %c0_i32_1 = arith.constant 0 : i32
    %c0_i32_2 = arith.constant 0 : i32
    return %arg0, %c0_i32, %c0_i32_0, %c0_i32_1 : i32, i32, i32, i32
  }
  func.func @transform_1(%arg0: i32) -> (i32, i32, i32, i32) {
    %c0_i32 = arith.constant 0 : i32
    %c0_i32_0 = arith.constant 0 : i32
    %c0_i32_1 = arith.constant 0 : i32
    %c0_i32_2 = arith.constant 0 : i32
    %c0_i32_3 = arith.constant 0 : i32
    return %c0_i32, %c0_i32_0, %c0_i32_1, %c0_i32_2 : i32, i32, i32, i32
  }
  func.func @transform_2(%arg0: i32) -> (i32, i32) {
    %c0_i32 = arith.constant 0 : i32
    %c0_i32_0 = arith.constant 0 : i32
    %c0_i32_1 = arith.constant 0 : i32
    return %c0_i32, %c0_i32_0 : i32, i32
  }
  func.func @transform_3(%arg0: i32) -> (i32, i32, i32, i32) {
    %c0_i32 = arith.constant 0 : i32
    %c0_i32_0 = arith.constant 0 : i32
    %c0_i32_1 = arith.constant 0 : i32
    %c0_i32_2 = arith.constant 0 : i32
    %c0_i32_3 = arith.constant 0 : i32
    return %c0_i32, %c0_i32_0, %c0_i32_1, %c0_i32_2 : i32, i32, i32, i32
  }
  func.func @transform_4(%arg0: i32) -> (i32, i32) {
    %c0_i32 = arith.constant 0 : i32
    %c0_i32_0 = arith.constant 0 : i32
    %c0_i32_1 = arith.constant 0 : i32
    return %c0_i32, %c0_i32_0 : i32, i32
  }
  func.func @transform_5(%arg0: i32) -> (i32, i32, i32, i32) {
    %c0_i32 = arith.constant 0 : i32
    %c0_i32_0 = arith.constant 0 : i32
    %c0_i32_1 = arith.constant 0 : i32
    %c0_i32_2 = arith.constant 0 : i32
    return %arg0, %c0_i32, %c0_i32_0, %c0_i32_1 : i32, i32, i32, i32
  }
}

</mosaic_0001>

<bundles_post_ra>
// kernel: tpu_custom_call.1
= control target key start
LH: loop header
LB: loop body
LE: loop exit
PB: predicated region body
PF: predicated region fallthrough
CT: control target
= control target key end

     0   :  { %s8813_s18 = smov 0   ;;  %s11296_s0 = inlined_call_operand.vmem [shape: bf16[2,16,16,4], index: 0, kind: input, shape index: {}]   ;;  %s11297_s1 = inlined_call_operand.vmem [shape: bf16[3,3,4,4], index: 1, kind: input, shape index: {}]   ;;  %s11298_s2 = inlined_call_operand.vmem [shape: f32[1,4], index: 2, kind: input, shape index: {}]   ;;  %s11299_s3 = inlined_call_operand.vmem [shape: bf16[3,3,4,4], index: 3, kind: input, shape index: {}]   ;;  %s11300_s4 = inlined_call_operand.vmem [shape: f32[1,4], index: 4, kind: input, shape index: {}]   ;;  %s11301_s5 = inlined_call_operand.vmem [shape: f32[2,16,16,4], index: 5, kind: output, shape index: {}]  }
   0x1 LB: > { %s6670_s19 = sadd.s32 4294967295, %s8779_s18   ;;  %p6674_p0 = scmp.ge.s32.totalorder %s8779_s18, 1  ;;  %s8779_s18 = sphi %s8813_s18, %s15_s18  }
   0x2   : > { %p187_p1 = scmp.lt.s32.totalorder %s8779_s18, 3 }
   0x4   : > { %p188_p2 = pnand %p6674_p0, %p187_p1 }
   0x5   : > { %p215_p3 = scmp.lt.s32.totalorder (!%p188_p2), %s6670_s19, 1 }
   0x6   : > { %191 = sbr.rel (%p188_p2) target bundleno = 1346 (0x542), region = 40 }
   0xb   : > { %v6679_v0 = vld [vmem:[%s11297_s1 + $0x8] sm:$0x3]  ;;  %vm389_vm0 = vcmask 1041408   ;;  %v6713_v1 = vld [vmem:[%s11297_s1 + $0x6] sm:$0x3]  ;;  %s11303_s19 = smov (!%p215_p3, %s6670_s19), 1 }
   0xc   : > { %8664 = vmatprep.subr.msk.bf16.mxu0 %vm389_vm0, %v6679_v0  ;;  %v391_v2 = vsel %vm389_vm0, %v6679_v0, 0  ;;  %8665 = vmatprep.subr.msk.bf16.mxu1 %vm389_vm0, %v6713_v1  ;;  %v628_v3 = vsel %vm389_vm0, %v6713_v1, 0  ;;  %v6730_v4 = vld [vmem:[%s11297_s1 + $0xa] sm:$0x3]  ;;  %v8781_v5 = vmov 0.0   ;;  %s7309_s26 = sshll.u32 %s11303_s19, 7 }
   0xd   : > { %7717 = vmatpush3.bf16.msra.mxu0 %v391_v2  ;;  %7751 = vmatpush3.bf16.msra.mxu1 %v628_v3  ;;  %s8842_s29 = scalar_lea.vmem %s11296_s0, %s7309_s26  ;;  %vm340_vm1 = vcmask 31744   ;;  %v6747_v6 = vld [vmem:[%s11297_s1 + $0x2] sm:$0x3]  ;;  %v891_v9 = vsel %vm389_vm0, %v6730_v4, 0  ;;  %vm8782_vm2 = vmmov 0   ;;  %vm856_vm3 = vcmask 30720  }
   0xe   : > { %8666 = vmatprep.subr.msk.bf16.mxu0 %vm389_vm0, %v6730_v4  ;;  %7818 = vmatprep.subr.bf16.mxu1 %v8781_v5  ;;  %v8680_v7 = vld [vmem:[%s8842_s29] sm:$0xff]   ;;  %v8681_v8 = vld [vmem:[%s8842_s29 + $0x8] sm:$0xff]   ;;  %v8682_v10 = vld [vmem:[%s8842_s29 + $0x10] sm:$0xff]   ;;  %v1416_v11 = vsel %vm389_vm0, %v6747_v6, 0  ;;  %vm1118_vm4 = vcmask 1046528   ;;  %vm3454_vm5 = vcmask 27648  }
   0xf   : > { %7718 = vmatprep.mubr.msk.bf16.mxu0 %vm340_vm1, %v8680_v7  ;;  %7752 = vmatprep.mubr.msk.bf16.mxu1 %vm340_vm1, %v8680_v7  ;;  %v8683_v12 = vld [vmem:[%s8842_s29 + $0x18] sm:$0xff]   ;;  %v8684_v13 = vld [vmem:[%s8842_s29 + $0x20] sm:$0xff]   ;;  %v8685_v14 = vld [vmem:[%s8842_s29 + $0x28] sm:$0xff]   ;;  %s7310_s11 = sshll.u32 %s11303_s19, 8 }
  0x10   : > { %7719 = vmatmul.mubr.msk.bf16.vlgmr.msra.gmra.mxu0 %vm340_vm1, %v8681_v8  ;;  %7753 = vmatmul.mubr.msk.bf16.vlgmr.msra.gmra.mxu1 %vm340_vm1, %v8681_v8  ;;  %v8686_v15 = vld [vmem:[%s8842_s29 + $0x30] sm:$0xff]   ;;  %v8687_v16 = vld [vmem:[%s8842_s29 + $0x38] sm:$0xff]   ;;  %v8688_v17 = vld [vmem:[%s8842_s29 + $0x40] sm:$0xff]   ;;  %s10029_s19 = scalar_lea.vmem %s11301_s5, %s7310_s11 }
  0x11   : > { %7785 = vmatpush3.bf16.msra.mxu0 %v891_v9  ;;  %7722 = vmatprep.mubr.msk.bf16.mxu0 %vm340_vm1, %v8682_v10  ;;  %v8689_v18 = vld [vmem:[%s8842_s29 + $0x48] sm:$0xff]   ;;  %v8690_v19 = vld [vmem:[%s8842_s29 + $0x50] sm:$0xff]   ;;  %v8691_v20 = vld [vmem:[%s8842_s29 + $0x58] sm:$0xff]  }
  0x12   : > { %7756 = vmatprep.mubr.msk.bf16.mxu1 %vm340_vm1, %v8682_v10  ;;  %7819 = vmatpush3.bf16.msra.mxu1 %v1416_v11  ;;  %v8692_v21 = vld [vmem:[%s8842_s29 + $0x60] sm:$0xff]   ;;  %v8693_v22 = vld [vmem:[%s8842_s29 + $0x68] sm:$0xff]   ;;  %v8694_v23 = vld [vmem:[%s8842_s29 + $0x70] sm:$0xff]  }
  0x13   : > { %7880 = vmatprep.subr.bf16.mxu0 %v8781_v5  ;;  %7942 = vmatprep.subr.bf16.mxu1 %v8781_v5  ;;  %v8695_v24 = vld [vmem:[%s8842_s29 + $0x78] sm:$0xff]   ;;  %v1662_v25 = vld [vmem:[%s11297_s1] sm:$0x3]  ;;  %v6793_v27 = vld [vmem:[%s11297_s1 + $0x4] sm:$0x3] }
  0x14   : > { %v8906_v26 = vld [vmem:[%s8842_s29] sm:$0xff]   ;;  %v1664_v28 = vsel %vm389_vm0, %v1662_v25, 0  ;;  %v1912_v29 = vsel %vm389_vm0, %v6793_v27, 0  ;;  %v8922_v30 = vld [vmem:[%s8842_s29 + $0x8] sm:$0xff]   ;;  %v8931_v31 = vld [vmem:[%s8842_s29 + $0x10] sm:$0xff]  }
  0x15   : > { %v8940_v32 = vld [vmem:[%s8842_s29 + $0x18] sm:$0xff]   ;;  %v8949_v33 = vld [vmem:[%s8842_s29 + $0x20] sm:$0xff]   ;;  %v8958_v34 = vld [vmem:[%s8842_s29 + $0x28] sm:$0xff]  }
  0x16   : > { %v8967_v35 = vld [vmem:[%s8842_s29 + $0x30] sm:$0xff]   ;;  %v8976_v36 = vld [vmem:[%s8842_s29 + $0x38] sm:$0xff]   ;;  %v6839_v37 = vld [vmem:[%s11297_s1 + $0xe] sm:$0x3] }
  0x17   : > { %v8989_v38 = vld [vmem:[%s8842_s29 + $0x40] sm:$0xff]   ;;  %v2416_v39 = vsel %vm389_vm0, %v6839_v37, 0  ;;  %v9002_v40 = vld [vmem:[%s8842_s29 + $0x48] sm:$0xff]   ;;  %v9013_v41 = vld [vmem:[%s8842_s29 + $0x50] sm:$0xff]  }
  0x18   : > { %7723 = vmatmul.mubr.msk.bf16.gmra.mxu0 %vm340_vm1, %v8683_v12  ;;  %7757 = vmatmul.mubr.msk.bf16.gmra.mxu1 %vm340_vm1, %v8683_v12  ;;  %v9024_v42 = vld [vmem:[%s8842_s29 + $0x58] sm:$0xff]   ;;  %v9035_v43 = vld [vmem:[%s8842_s29 + $0x60] sm:$0xff]   ;;  %v9046_v44 = vld [vmem:[%s8842_s29 + $0x68] sm:$0xff]  }
  0x19   : > { %7726 = vmatprep.mubr.msk.bf16.mxu0 %vm340_vm1, %v8684_v13  ;;  %7760 = vmatprep.mubr.msk.bf16.mxu1 %vm340_vm1, %v8684_v13  ;;  %v9057_v45 = vld [vmem:[%s8842_s29 + $0x70] sm:$0xff]   ;;  %v6870_v46 = vld [vmem:[%s11297_s1 + $0xc] sm:$0x3]  ;;  %v9082_v48 = vld [vmem:[%s11298_s2] ss:$0 sm:$0xff] }
  0x1a   : > { %v2664_v47 = vsel %vm389_vm0, %v6870_v46, 0 }
  0x20   : > { %7727 = vmatmul.mubr.msk.bf16.gmra.mxu0 %vm340_vm1, %v8685_v14  ;;  %7761 = vmatmul.mubr.msk.bf16.gmra.mxu1 %vm340_vm1, %v8685_v14 }
  0x21   : > { %7730 = vmatprep.mubr.msk.bf16.mxu0 %vm340_vm1, %v8686_v15  ;;  %7764 = vmatprep.mubr.msk.bf16.mxu1 %vm340_vm1, %v8686_v15 }
  0x28   : > { %7731 = vmatmul.mubr.msk.bf16.gmra.mxu0 %vm340_vm1, %v8687_v16  ;;  %7765 = vmatmul.mubr.msk.bf16.gmra.mxu1 %vm340_vm1, %v8687_v16 }
  0x29   : > { %7734 = vmatprep.mubr.msk.bf16.mxu0 %vm340_vm1, %v8688_v17  ;;  %7768 = vmatprep.mubr.msk.bf16.mxu1 %vm340_vm1, %v8688_v17 }
  0x30   : > { %7735 = vmatmul.mubr.msk.bf16.gmra.mxu0 %vm340_vm1, %v8689_v18  ;;  %7769 = vmatmul.mubr.msk.bf16.gmra.mxu1 %vm340_vm1, %v8689_v18 }
  0x31   : > { %7738 = vmatprep.mubr.msk.bf16.mxu0 %vm340_vm1, %v8690_v19  ;;  %7772 = vmatprep.mubr.msk.bf16.mxu1 %vm340_vm1, %v8690_v19 }
  0x38   : > { %7739 = vmatmul.mubr.msk.bf16.gmra.mxu0 %vm340_vm1, %v8691_v20  ;;  %7773 = vmatmul.mubr.msk.bf16.gmra.mxu1 %vm340_vm1, %v8691_v20 }
  0x39   : > { %7742 = vmatprep.mubr.msk.bf16.mxu0 %vm340_vm1, %v8692_v21  ;;  %7776 = vmatprep.mubr.msk.bf16.mxu1 %vm340_vm1, %v8692_v21 }
  0x40   : > { %7743 = vmatmul.mubr.msk.bf16.gmra.mxu0 %vm340_vm1, %v8693_v22  ;;  %7777 = vmatmul.mubr.msk.bf16.gmra.mxu1 %vm340_vm1, %v8693_v22 }
  0x41   : > { %7746 = vmatprep.mubr.msk.bf16.mxu0 %vm340_vm1, %v8694_v23  ;;  %7780 = vmatprep.mubr.msk.bf16.mxu1 %vm340_vm1, %v8694_v23 }
  0x48   : > { %7747 = vmatmul.mubr.msk.bf16.gmra.mxu0 %vm340_vm1, %v8695_v24  ;;  %7781 = vmatmul.mubr.msk.bf16.gmra.mxu1 %vm340_vm1, %v8695_v24 }
  0x49   : > { %7786 = vmatprep.mubr.msk.bf16.mxu0 %vm340_vm1, %v8680_v7  ;;  %7820 = vmatprep.mubr.msk.bf16.mxu1 %vm8782_vm2, %v8781_v5 }
  0x50   : > { %7787 = vmatmul.mubr.msk.bf16.vlgmr.msra.gmra.mxu0 %vm340_vm1, %v8681_v8  ;;  %7821 = vmatmul.mubr.msk.bf16.vlgmr.msra.gmra.mxu1 %vm340_vm1, %v8906_v26 }
  0x51   : > { %7881 = vmatpush3.bf16.msra.mxu0 %v1664_v28  ;;  %7790 = vmatprep.mubr.msk.bf16.mxu0 %vm340_vm1, %v8682_v10 }
  0x52   : > { %7824 = vmatprep.mubr.msk.bf16.mxu1 %vm8782_vm2, %v8781_v5  ;;  %7943 = vmatpush3.bf16.msra.mxu1 %v1912_v29 }
  0x53   : > { %8004 = vmatprep.subr.bf16.mxu0 %v8781_v5  ;;  %8066 = vmatprep.subr.bf16.mxu1 %v8781_v5 }
  0x58   : > { %7791 = vmatmul.mubr.msk.bf16.gmra.mxu0 %vm340_vm1, %v8683_v12  ;;  %7825 = vmatmul.mubr.msk.bf16.gmra.mxu1 %vm340_vm1, %v8922_v30 }
  0x59   : > { %7794 = vmatprep.mubr.msk.bf16.mxu0 %vm340_vm1, %v8684_v13  ;;  %7828 = vmatprep.mubr.msk.bf16.mxu1 %vm8782_vm2, %v8781_v5 }
  0x60   : > { %7795 = vmatmul.mubr.msk.bf16.gmra.mxu0 %vm340_vm1, %v8685_v14  ;;  %7829 = vmatmul.mubr.msk.bf16.gmra.mxu1 %vm340_vm1, %v8931_v31 }
  0x61   : > { %7798 = vmatprep.mubr.msk.bf16.mxu0 %vm340_vm1, %v8686_v15  ;;  %7832 = vmatprep.mubr.msk.bf16.mxu1 %vm8782_vm2, %v8781_v5 }
  0x68   : > { %7799 = vmatmul.mubr.msk.bf16.gmra.mxu0 %vm340_vm1, %v8687_v16  ;;  %7833 = vmatmul.mubr.msk.bf16.gmra.mxu1 %vm340_vm1, %v8940_v32 }
  0x69   : > { %7802 = vmatprep.mubr.msk.bf16.mxu0 %vm340_vm1, %v8688_v17  ;;  %7836 = vmatprep.mubr.msk.bf16.mxu1 %vm8782_vm2, %v8781_v5 }
  0x70   : > { %7803 = vmatmul.mubr.msk.bf16.gmra.mxu0 %vm340_vm1, %v8689_v18  ;;  %7837 = vmatmul.mubr.msk.bf16.gmra.mxu1 %vm340_vm1, %v8949_v33 }
  0x71   : > { %7806 = vmatprep.mubr.msk.bf16.mxu0 %vm340_vm1, %v8690_v19  ;;  %7840 = vmatprep.mubr.msk.bf16.mxu1 %vm8782_vm2, %v8781_v5 }
  0x78   : > { %7807 = vmatmul.mubr.msk.bf16.gmra.mxu0 %vm340_vm1, %v8691_v20  ;;  %7841 = vmatmul.mubr.msk.bf16.gmra.mxu1 %vm340_vm1, %v8958_v34 }
  0x79   : > { %7810 = vmatprep.mubr.msk.bf16.mxu0 %vm340_vm1, %v8692_v21  ;;  %7844 = vmatprep.mubr.msk.bf16.mxu1 %vm8782_vm2, %v8781_v5 }
  0x80   : > { %7811 = vmatmul.mubr.msk.bf16.gmra.mxu0 %vm340_vm1, %v8693_v22  ;;  %7845 = vmatmul.mubr.msk.bf16.gmra.mxu1 %vm340_vm1, %v8967_v35 }
  0x81   : > { %7814 = vmatprep.mubr.msk.bf16.mxu0 %vm340_vm1, %v8694_v23  ;;  %7848 = vmatprep.mubr.msk.bf16.mxu1 %vm8782_vm2, %v8781_v5 }
  0x88   : > { %7815 = vmatmul.mubr.msk.bf16.gmra.mxu0 %vm340_vm1, %v8695_v24  ;;  %7849 = vmatmul.mubr.msk.bf16.gmra.mxu1 %vm340_vm1, %v8976_v36 }
  0x89   : > { %7852 = vmatprep.mubr.msk.bf16.mxu1 %vm8782_vm2, %v8781_v5  ;;  %7882 = vmatprep.mubr.msk.bf16.mxu0 %vm8782_vm2, %v8781_v5 }
  0x90   : > { %7853 = vmatmul.mubr.msk.bf16.gmra.mxu1 %vm340_vm1, %v8989_v38  ;;  %7883 = vmatmul.mubr.msk.bf16.vlgmr.msra.gmra.mxu0 %vm340_vm1, %v8906_v26 }
  0x91   : > { %8005 = vmatpush3.bf16.msra.mxu0 %v2416_v39  ;;  %7856 = vmatprep.mubr.msk.bf16.mxu1 %vm8782_vm2, %v8781_v5 }
  0x92   : > { %7886 = vmatprep.mubr.msk.bf16.mxu0 %vm8782_vm2, %v8781_v5  ;;  %8128 = vmatprep.subr.bf16.mxu0 %v8781_v5 }
  0x98   : > { %7857 = vmatmul.mubr.msk.bf16.gmra.mxu1 %vm340_vm1, %v9002_v40  ;;  %7887 = vmatmul.mubr.msk.bf16.gmra.mxu0 %vm340_vm1, %v8922_v30 }
  0x99   : > { %7860 = vmatprep.mubr.msk.bf16.mxu1 %vm8782_vm2, %v8781_v5  ;;  %7890 = vmatprep.mubr.msk.bf16.mxu0 %vm8782_vm2, %v8781_v5 }
  0xa0   : > { %7861 = vmatmul.mubr.msk.bf16.gmra.mxu1 %vm340_vm1, %v9013_v41  ;;  %7891 = vmatmul.mubr.msk.bf16.gmra.mxu0 %vm340_vm1, %v8931_v31 }
  0xa1   : > { %7864 = vmatprep.mubr.msk.bf16.mxu1 %vm8782_vm2, %v8781_v5  ;;  %7894 = vmatprep.mubr.msk.bf16.mxu0 %vm8782_vm2, %v8781_v5 }
  0xa8   : > { %7865 = vmatmul.mubr.msk.bf16.gmra.mxu1 %vm340_vm1, %v9024_v42  ;;  %7895 = vmatmul.mubr.msk.bf16.gmra.mxu0 %vm340_vm1, %v8940_v32 }
  0xa9   : > { %7868 = vmatprep.mubr.msk.bf16.mxu1 %vm8782_vm2, %v8781_v5  ;;  %7898 = vmatprep.mubr.msk.bf16.mxu0 %vm8782_vm2, %v8781_v5 }
  0xb0   : > { %7869 = vmatmul.mubr.msk.bf16.gmra.mxu1 %vm340_vm1, %v9035_v43  ;;  %7899 = vmatmul.mubr.msk.bf16.gmra.mxu0 %vm340_vm1, %v8949_v33 }
  0xb1   : > { %7872 = vmatprep.mubr.msk.bf16.mxu1 %vm8782_vm2, %v8781_v5  ;;  %7902 = vmatprep.mubr.msk.bf16.mxu0 %vm8782_vm2, %v8781_v5 }
  0xb8   : > { %7873 = vmatmul.mubr.msk.bf16.gmra.mxu1 %vm340_vm1, %v9046_v44  ;;  %7903 = vmatmul.mubr.msk.bf16.gmra.mxu0 %vm340_vm1, %v8958_v34 }
  0xb9   : > { %7876 = vmatprep.mubr.msk.bf16.mxu1 %vm8782_vm2, %v8781_v5  ;;  %7906 = vmatprep.mubr.msk.bf16.mxu0 %vm8782_vm2, %v8781_v5 }
  0xc0   : > { %7877 = vmatmul.mubr.msk.bf16.gmra.mxu1 %vm340_vm1, %v9057_v45  ;;  %7907 = vmatmul.mubr.msk.bf16.gmra.mxu0 %vm340_vm1, %v8967_v35 }
  0xc1   : > { %7910 = vmatprep.mubr.msk.bf16.mxu0 %vm8782_vm2, %v8781_v5  ;;  %7944 = vmatprep.mubr.msk.bf16.mxu1 %vm8782_vm2, %v8781_v5 }
  0xc8   : > { %7911 = vmatmul.mubr.msk.bf16.gmra.mxu0 %vm340_vm1, %v8976_v36  ;;  %7945 = vmatmul.mubr.msk.bf16.vlgmr.msra.gmra.mxu1 %vm340_vm1, %v8906_v26 }
  0xc9   : > { %7914 = vmatprep.mubr.msk.bf16.mxu0 %vm8782_vm2, %v8781_v5  ;;  %7948 = vmatprep.mubr.msk.bf16.mxu1 %vm8782_vm2, %v8781_v5 }
  0xca   : > { %8067 = vmatpush3.bf16.msra.mxu1 %v2664_v47 }
  0xd0   : > { %v7720_v49 = vpop.f32.mrf.mxu0  ;;  %v7754_v50 = vpop.f32.mrf.mxu1  ;;  %7915 = vmatmul.mubr.msk.bf16.gmra.mxu0 %vm340_vm1, %v8989_v38  ;;  %7949 = vmatmul.mubr.msk.bf16.gmra.mxu1 %vm340_vm1, %v8922_v30 }
  0xd1   : > { %v563_v51 = vadd.f32 %v7720_v49, %v9082_v48  ;;  %7918 = vmatprep.mubr.msk.bf16.mxu0 %vm8782_vm2, %v8781_v5  ;;  %7952 = vmatprep.mubr.msk.bf16.mxu1 %vm8782_vm2, %v8781_v5 }
  0xd2   : > { %v427_v52 = vpop.f32.mrf.mxu0  ;;  %v664_v53 = vpop.f32.mrf.mxu1 }
  0xd3   : > { %595 = vst.msk [vmem:[#allocation2 + $0x10] sm:$0xff] %vm340_vm1, %v563_v51  ;;  %v561_v54 = vadd.f32 %v9082_v48, %v427_v52 }
  0xd4   : > { %v7721_v55 = vpop.f32.mrf.mxu0  ;;  %v7755_v56 = vpop.f32.mrf.mxu1 }
  0xd5   : > { %593 = vst.msk [vmem:[#allocation2] sm:$0xff] %vm340_vm1, %v561_v54  ;;  %v564_v57 = vadd.f32 %v7721_v55, %v9082_v48 }
  0xd6   : > { %v430_v58 = vpop.f32.mrf.mxu0  ;;  %v667_v59 = vpop.f32.mrf.mxu1 }
  0xd7   : > { %596 = vst.msk [vmem:[#allocation2 + $0x18] sm:$0xff] %vm340_vm1, %v564_v57  ;;  %v562_v60 = vadd.f32 %v9082_v48, %v430_v58 }
  0xd8   : > { %v7724_v61 = vpop.f32.mrf.mxu0  ;;  %v7758_v62 = vpop.f32.mrf.mxu1  ;;  %7919 = vmatmul.mubr.msk.bf16.gmra.mxu0 %vm340_vm1, %v9002_v40  ;;  %7953 = vmatmul.mubr.msk.bf16.gmra.mxu1 %vm340_vm1, %v8931_v31 }
  0xd9   : > { %594 = vst.msk [vmem:[#allocation2 + $0x8] sm:$0xff] %vm340_vm1, %v562_v60  ;;  %v567_v63 = vadd.f32 %v7724_v61, %v9082_v48  ;;  %7922 = vmatprep.mubr.msk.bf16.mxu0 %vm8782_vm2, %v8781_v5  ;;  %7956 = vmatprep.mubr.msk.bf16.mxu1 %vm8782_vm2, %v8781_v5 }
  0xda   : > { %v443_v0 = vpop.f32.mrf.mxu0  ;;  %v680_v1 = vpop.f32.mrf.mxu1 }
  0xdb   : > { %599 = vst.msk [vmem:[#allocation2 + $0x30] sm:$0xff] %vm340_vm1, %v567_v63  ;;  %v565_v2 = vadd.f32 %v9082_v48, %v443_v0 }
  0xdc   : > { %v7725_v3 = vpop.f32.mrf.mxu0  ;;  %v7759_v4 = vpop.f32.mrf.mxu1 }
  0xdd   : > { %597 = vst.msk [vmem:[#allocation2 + $0x20] sm:$0xff] %vm340_vm1, %v565_v2  ;;  %v568_v6 = vadd.f32 %v7725_v3, %v9082_v48 }
  0xde   : > { %v793_v7 = vld [vmem:[#allocation2 + $0x11] sm:$0xff]  ;;  %v794_v8 = vld [vmem:[#allocation2 + $0x19] sm:$0x7f]  ;;  %v446_v9 = vpop.f32.mrf.mxu0  ;;  %v683_v10 = vpop.f32.mrf.mxu1 }
  0xdf   : > { %v825_v11 = vadd.f32 %v7754_v50, %v793_v7  ;;  %v826_v12 = vadd.f32 %v7755_v56, %v794_v8  ;;  %600 = vst.msk [vmem:[#allocation2 + $0x38] sm:$0xff] %vm340_vm1, %v568_v6  ;;  %v566_v13 = vadd.f32 %v9082_v48, %v446_v9 }
  0xe0   : > { %v791_v14 = vld [vmem:[#allocation2 + $0x1] sm:$0xff]  ;;  %v792_v15 = vld [vmem:[#allocation2 + $0x9] sm:$0x7f]  ;;  %v7728_v16 = vpop.f32.mrf.mxu0  ;;  %v7762_v17 = vpop.f32.mrf.mxu1  ;;  %7923 = vmatmul.mubr.msk.bf16.gmra.mxu0 %vm340_vm1, %v9013_v41  ;;  %7957 = vmatmul.mubr.msk.bf16.gmra.mxu1 %vm340_vm1, %v8940_v32 }
  0xe1   : > { %858 = vst.msk [vmem:[#allocation2 + $0x11] sm:$0xff] %vm340_vm1, %v825_v11  ;;  %v823_v18 = vadd.f32 %v791_v14, %v664_v53  ;;  %v824_v19 = vadd.f32 %v792_v15, %v667_v59  ;;  %598 = vst.msk [vmem:[#allocation2 + $0x28] sm:$0xff] %vm340_vm1, %v566_v13  ;;  %v571_v20 = vadd.f32 %v7728_v16, %v9082_v48  ;;  %7926 = vmatprep.mubr.msk.bf16.mxu0 %vm8782_vm2, %v8781_v5 }
  0xe2   : > { %859 = vst.msk [vmem:[#allocation2 + $0x19] sm:$0x7f] %vm856_vm3, %v826_v12  ;;  %7960 = vmatprep.mubr.msk.bf16.mxu1 %vm8782_vm2, %v8781_v5  ;;  %v459_v21 = vpop.f32.mrf.mxu0  ;;  %v696_v22 = vpop.f32.mrf.mxu1 }
  0xe3   : > { %855 = vst.msk [vmem:[#allocation2 + $0x1] sm:$0xff] %vm340_vm1, %v823_v18  ;;  %603 = vst.msk [vmem:[#allocation2 + $0x50] sm:$0xff] %vm340_vm1, %v571_v20  ;;  %v569_v23 = vadd.f32 %v9082_v48, %v459_v21 }
  0xe4   : > { %857 = vst.msk [vmem:[#allocation2 + $0x9] sm:$0x7f] %vm856_vm3, %v824_v19  ;;  %v7729_v24 = vpop.f32.mrf.mxu0  ;;  %v7763_v25 = vpop.f32.mrf.mxu1 }
  0xe5   : > { %601 = vst.msk [vmem:[#allocation2 + $0x40] sm:$0xff] %vm340_vm1, %v569_v23  ;;  %v572_v26 = vadd.f32 %v7729_v24, %v9082_v48 }
  0xe6   : > { %v797_v27 = vld [vmem:[#allocation2 + $0x31] sm:$0xff]  ;;  %v798_v28 = vld [vmem:[#allocation2 + $0x39] sm:$0x7f]  ;;  %v462_v29 = vpop.f32.mrf.mxu0  ;;  %v699_v30 = vpop.f32.mrf.mxu1 }
  0xe7   : > { %v829_v31 = vadd.f32 %v7758_v62, %v797_v27  ;;  %v830_v32 = vadd.f32 %v7759_v4, %v798_v28  ;;  %604 = vst.msk [vmem:[#allocation2 + $0x58] sm:$0xff] %vm340_vm1, %v572_v26  ;;  %v570_v37 = vadd.f32 %v9082_v48, %v462_v29 }
  0xe8   : > { %v795_v39 = vld [vmem:[#allocation2 + $0x21] sm:$0xff]  ;;  %v796_v46 = vld [vmem:[#allocation2 + $0x29] sm:$0x7f]  ;;  %v7732_v47 = vpop.f32.mrf.mxu0  ;;  %v7766_v49 = vpop.f32.mrf.mxu1  ;;  %7927 = vmatmul.mubr.msk.bf16.gmra.mxu0 %vm340_vm1, %v9024_v42  ;;  %7961 = vmatmul.mubr.msk.bf16.gmra.mxu1 %vm340_vm1, %v8949_v33 }
  0xe9   : > { %862 = vst.msk [vmem:[#allocation2 + $0x31] sm:$0xff] %vm340_vm1, %v829_v31  ;;  %v827_v50 = vadd.f32 %v795_v39, %v680_v1  ;;  %v828_v51 = vadd.f32 %v796_v46, %v683_v10  ;;  %602 = vst.msk [vmem:[#allocation2 + $0x48] sm:$0xff] %vm340_vm1, %v570_v37  ;;  %v575_v52 = vadd.f32 %v7732_v47, %v9082_v48  ;;  %7930 = vmatprep.mubr.msk.bf16.mxu0 %vm8782_vm2, %v8781_v5 }
  0xea   : > { %863 = vst.msk [vmem:[#allocation2 + $0x39] sm:$0x7f] %vm856_vm3, %v830_v32  ;;  %7964 = vmatprep.mubr.msk.bf16.mxu1 %vm8782_vm2, %v8781_v5  ;;  %v475_v53 = vpop.f32.mrf.mxu0  ;;  %v712_v54 = vpop.f32.mrf.mxu1 }
  0xeb   : > { %860 = vst.msk [vmem:[#allocation2 + $0x21] sm:$0xff] %vm340_vm1, %v827_v50  ;;  %607 = vst.msk [vmem:[#allocation2 + $0x70] sm:$0xff] %vm340_vm1, %v575_v52  ;;  %v573_v33 = vadd.f32 %v9082_v48, %v475_v53 }
  0xec   : > { %861 = vst.msk [vmem:[#allocation2 + $0x29] sm:$0x7f] %vm856_vm3, %v828_v51  ;;  %v7733_v55 = vpop.f32.mrf.mxu0  ;;  %v7767_v56 = vpop.f32.mrf.mxu1 }
  0xed   : > { %605 = vst.msk [vmem:[#allocation2 + $0x60] sm:$0xff] %vm340_vm1, %v573_v33  ;;  %v576_v57 = vadd.f32 %v7733_v55, %v9082_v48 }
  0xee   : > { %v801_v58 = vld [vmem:[#allocation2 + $0x51] sm:$0xff]  ;;  %v802_v59 = vld [vmem:[#allocation2 + $0x59] sm:$0x7f]  ;;  %v478_v60 = vpop.f32.mrf.mxu0  ;;  %v715_v61 = vpop.f32.mrf.mxu1 }
  0xef   : > { %v833_v62 = vadd.f32 %v7762_v17, %v801_v58  ;;  %v834_v63 = vadd.f32 %v7763_v25, %v802_v59  ;;  %608 = vst.msk [vmem:[#allocation2 + $0x78] sm:$0xff] %vm340_vm1, %v576_v57  ;;  %v574_v0 = vadd.f32 %v9082_v48, %v478_v60  ;;  %v6886_v60 = vld [vmem:[%s11297_s1 + $0x10] sm:$0x3] }
  0xf0   : > { %v799_v1 = vld [vmem:[#allocation2 + $0x41] sm:$0xff]  ;;  %v800_v2 = vld [vmem:[#allocation2 + $0x49] sm:$0x7f]  ;;  %v7736_v3 = vpop.f32.mrf.mxu0  ;;  %v7770_v4 = vpop.f32.mrf.mxu1  ;;  %7931 = vmatmul.mubr.msk.bf16.gmra.mxu0 %vm340_vm1, %v9035_v43  ;;  %7965 = vmatmul.mubr.msk.bf16.gmra.mxu1 %vm340_vm1, %v8958_v34 }
  0xf1   : > { %866 = vst.msk [vmem:[#allocation2 + $0x51] sm:$0xff] %vm340_vm1, %v833_v62  ;;  %v831_v6 = vadd.f32 %v799_v1, %v696_v22  ;;  %v832_v7 = vadd.f32 %v800_v2, %v699_v30  ;;  %606 = vst.msk [vmem:[#allocation2 + $0x68] sm:$0xff] %vm340_vm1, %v574_v0  ;;  %v579_v8 = vadd.f32 %v7736_v3, %v9082_v48  ;;  %7934 = vmatprep.mubr.msk.bf16.mxu0 %vm8782_vm2, %v8781_v5 }
  0xf2   : > { %867 = vst.msk [vmem:[#allocation2 + $0x59] sm:$0x7f] %vm856_vm3, %v834_v63  ;;  %7968 = vmatprep.mubr.msk.bf16.mxu1 %vm8782_vm2, %v8781_v5  ;;  %v491_v9 = vpop.f32.mrf.mxu0  ;;  %v728_v10 = vpop.f32.mrf.mxu1  ;;  %v9215_v63 = vld [vmem:[%s8842_s29 + $0x8] sm:$0xff]  }
  0xf3   : > { %864 = vst.msk [vmem:[#allocation2 + $0x41] sm:$0xff] %vm340_vm1, %v831_v6  ;;  %611 = vst.msk [vmem:[#allocation2 + $0x90] sm:$0xff] %vm340_vm1, %v579_v8  ;;  %v577_v34 = vadd.f32 %v9082_v48, %v491_v9  ;;  %v2912_v6 = vsel %vm389_vm0, %v6886_v60, 0 }
  0xf4   : > { %865 = vst.msk [vmem:[#allocation2 + $0x49] sm:$0x7f] %vm856_vm3, %v832_v7  ;;  %v7737_v11 = vpop.f32.mrf.mxu0  ;;  %v7771_v12 = vpop.f32.mrf.mxu1 }
  0xf5   : > { %609 = vst.msk [vmem:[#allocation2 + $0x80] sm:$0xff] %vm340_vm1, %v577_v34  ;;  %v580_v13 = vadd.f32 %v7737_v11, %v9082_v48 }
  0xf6   : > { %v805_v14 = vld [vmem:[#allocation2 + $0x71] sm:$0xff]  ;;  %v806_v15 = vld [vmem:[#allocation2 + $0x79] sm:$0x7f]  ;;  %v494_v16 = vpop.f32.mrf.mxu0  ;;  %v731_v17 = vpop.f32.mrf.mxu1 }
  0xf7   : > { %v837_v18 = vadd.f32 %v7766_v49, %v805_v14  ;;  %v838_v19 = vadd.f32 %v7767_v56, %v806_v15  ;;  %612 = vst.msk [vmem:[#allocation2 + $0x98] sm:$0xff] %vm340_vm1, %v580_v13  ;;  %v578_v20 = vadd.f32 %v9082_v48, %v494_v16 }
  0xf8   : > { %v803_v21 = vld [vmem:[#allocation2 + $0x61] sm:$0xff]  ;;  %v804_v22 = vld [vmem:[#allocation2 + $0x69] sm:$0x7f]  ;;  %v7740_v23 = vpop.f32.mrf.mxu0  ;;  %v7774_v24 = vpop.f32.mrf.mxu1  ;;  %7935 = vmatmul.mubr.msk.bf16.gmra.mxu0 %vm340_vm1, %v9046_v44  ;;  %7969 = vmatmul.mubr.msk.bf16.gmra.mxu1 %vm340_vm1, %v8967_v35 }
  0xf9   : > { %870 = vst.msk [vmem:[#allocation2 + $0x71] sm:$0xff] %vm340_vm1, %v837_v18  ;;  %v835_v25 = vadd.f32 %v803_v21, %v712_v54  ;;  %v836_v26 = vadd.f32 %v804_v22, %v715_v61  ;;  %610 = vst.msk [vmem:[#allocation2 + $0x88] sm:$0xff] %vm340_vm1, %v578_v20  ;;  %v583_v27 = vadd.f32 %v7740_v23, %v9082_v48  ;;  %7938 = vmatprep.mubr.msk.bf16.mxu0 %vm8782_vm2, %v8781_v5  ;;  %v9241_v20 = vld [vmem:[%s8842_s29 + $0x10] sm:$0xff]  }
  0xfa   : > { %871 = vst.msk [vmem:[#allocation2 + $0x79] sm:$0x7f] %vm856_vm3, %v838_v19  ;;  %7972 = vmatprep.mubr.msk.bf16.mxu1 %vm8782_vm2, %v8781_v5  ;;  %v507_v28 = vpop.f32.mrf.mxu0  ;;  %v744_v29 = vpop.f32.mrf.mxu1 }
  0xfb   : > { %868 = vst.msk [vmem:[#allocation2 + $0x61] sm:$0xff] %vm340_vm1, %v835_v25  ;;  %615 = vst.msk [vmem:[#allocation2 + $0xb0] sm:$0xff] %vm340_vm1, %v583_v27  ;;  %v581_v35 = vadd.f32 %v9082_v48, %v507_v28 }
  0xfc   : > { %869 = vst.msk [vmem:[#allocation2 + $0x69] sm:$0x7f] %vm856_vm3, %v836_v26  ;;  %v7741_v30 = vpop.f32.mrf.mxu0  ;;  %v7775_v31 = vpop.f32.mrf.mxu1 }
  0xfd   : > { %613 = vst.msk [vmem:[#allocation2 + $0xa0] sm:$0xff] %vm340_vm1, %v581_v35  ;;  %v584_v32 = vadd.f32 %v7741_v30, %v9082_v48 }
  0xfe   : > { %v809_v37 = vld [vmem:[#allocation2 + $0x91] sm:$0xff]  ;;  %v810_v39 = vld [vmem:[#allocation2 + $0x99] sm:$0x7f]  ;;  %v510_v46 = vpop.f32.mrf.mxu0  ;;  %v747_v47 = vpop.f32.mrf.mxu1 }
  0xff   : > { %v841_v49 = vadd.f32 %v7770_v4, %v809_v37  ;;  %v842_v50 = vadd.f32 %v7771_v12, %v810_v39  ;;  %616 = vst.msk [vmem:[#allocation2 + $0xb8] sm:$0xff] %vm340_vm1, %v584_v32  ;;  %v582_v51 = vadd.f32 %v9082_v48, %v510_v46 }
 0x100   : > { %v807_v52 = vld [vmem:[#allocation2 + $0x81] sm:$0xff]  ;;  %v808_v53 = vld [vmem:[#allocation2 + $0x89] sm:$0x7f]  ;;  %v7744_v54 = vpop.f32.mrf.mxu0  ;;  %v7778_v33 = vpop.f32.mrf.mxu1  ;;  %7939 = vmatmul.mubr.msk.bf16.gmra.mxu0 %vm340_vm1, %v9057_v45  ;;  %7973 = vmatmul.mubr.msk.bf16.gmra.mxu1 %vm340_vm1, %v8976_v36 }
 0x101   : > { %874 = vst.msk [vmem:[#allocation2 + $0x91] sm:$0xff] %vm340_vm1, %v841_v49  ;;  %v839_v55 = vadd.f32 %v807_v52, %v728_v10  ;;  %v840_v56 = vadd.f32 %v808_v53, %v731_v17  ;;  %614 = vst.msk [vmem:[#allocation2 + $0xa8] sm:$0xff] %vm340_vm1, %v582_v51  ;;  %v587_v57 = vadd.f32 %v7744_v54, %v9082_v48  ;;  %7976 = vmatprep.mubr.msk.bf16.mxu1 %vm8782_vm2, %v8781_v5  ;;  %v1057_v53 = vld [vmem:[#allocation2 + $0x18] sm:$0x7f] }
 0x102   : > { %875 = vst.msk [vmem:[#allocation2 + $0x99] sm:$0x7f] %vm856_vm3, %v842_v50  ;;  %8006 = vmatprep.mubr.msk.bf16.mxu0 %vm8782_vm2, %v8781_v5  ;;  %v523_v58 = vpop.f32.mrf.mxu0  ;;  %v760_v59 = vpop.f32.mrf.mxu1 }
 0x103   : > { %872 = vst.msk [vmem:[#allocation2 + $0x81] sm:$0xff] %vm340_vm1, %v839_v55  ;;  %619 = vst.msk [vmem:[#allocation2 + $0xd0] sm:$0xff] %vm340_vm1, %v587_v57  ;;  %v585_v36 = vadd.f32 %v9082_v48, %v523_v58  ;;  %v1056_v57 = vld [vmem:[#allocation2 + $0x10] sm:$0xff] }
 0x104   : > { %873 = vst.msk [vmem:[#allocation2 + $0x89] sm:$0x7f] %vm856_vm3, %v840_v56  ;;  %v7745_v61 = vpop.f32.mrf.mxu0  ;;  %v7779_v62 = vpop.f32.mrf.mxu1 }
 0x105   : > { %617 = vst.msk [vmem:[#allocation2 + $0xc0] sm:$0xff] %vm340_vm1, %v585_v36  ;;  %v588_v0 = vadd.f32 %v7745_v61, %v9082_v48 }
 0x106   : > { %v813_v1 = vld [vmem:[#allocation2 + $0xb1] sm:$0xff]  ;;  %v814_v2 = vld [vmem:[#allocation2 + $0xb9] sm:$0x7f]  ;;  %v526_v3 = vpop.f32.mrf.mxu0  ;;  %v763_v4 = vpop.f32.mrf.mxu1 }
 0x107   : > { %v845_v7 = vadd.f32 %v7774_v24, %v813_v1  ;;  %v846_v8 = vadd.f32 %v7775_v31, %v814_v2  ;;  %620 = vst.msk [vmem:[#allocation2 + $0xd8] sm:$0xff] %vm340_vm1, %v588_v0  ;;  %v586_v9 = vadd.f32 %v9082_v48, %v526_v3 }
 0x108   : > { %v811_v10 = vld [vmem:[#allocation2 + $0xa1] sm:$0xff]  ;;  %v812_v34 = vld [vmem:[#allocation2 + $0xa9] sm:$0x7f]  ;;  %v7748_v11 = vpop.f32.mrf.mxu0  ;;  %v7782_v12 = vpop.f32.mrf.mxu1  ;;  %7977 = vmatmul.mubr.msk.bf16.gmra.mxu1 %vm340_vm1, %v8989_v38  ;;  %8007 = vmatmul.mubr.msk.bf16.vlgmr.msra.gmra.mxu0 %vm340_vm1, %v9215_v63 }
 0x109   : > { %878 = vst.msk [vmem:[#allocation2 + $0xb1] sm:$0xff] %vm340_vm1, %v845_v7  ;;  %v843_v13 = vadd.f32 %v811_v10, %v744_v29  ;;  %v844_v14 = vadd.f32 %v812_v34, %v747_v47  ;;  %618 = vst.msk [vmem:[#allocation2 + $0xc8] sm:$0xff] %vm340_vm1, %v586_v9  ;;  %v591_v15 = vadd.f32 %v7748_v11, %v9082_v48  ;;  %8129 = vmatpush3.bf16.msra.mxu0 %v2912_v6  ;;  %v9263_v47 = vld [vmem:[%s8842_s29 + $0x18] sm:$0xff]   ;;  %v1055_v6 = vld [vmem:[#allocation2 + $0x8] sm:$0x7f] }
 0x10a   : > { %879 = vst.msk [vmem:[#allocation2 + $0xb9] sm:$0x7f] %vm856_vm3, %v846_v8  ;;  %7980 = vmatprep.mubr.msk.bf16.mxu1 %vm8782_vm2, %v8781_v5  ;;  %v539_v16 = vpop.f32.mrf.mxu0  ;;  %v9232_v38 = vpop.f32.mrf.mxu1  ;;  %8010 = vmatprep.mubr.msk.bf16.mxu0 %vm8782_vm2, %v8781_v5 }
 0x10b   : > { %876 = vst.msk [vmem:[#allocation2 + $0xa1] sm:$0xff] %vm340_vm1, %v843_v13  ;;  %623 = vst.msk [vmem:[#allocation2 + $0xf0] sm:$0xff] %vm340_vm1, %v591_v15  ;;  %v589_v17 = vadd.f32 %v9082_v48, %v539_v16  ;;  %v9288_v13 = vld [vmem:[%s8842_s29 + $0x20] sm:$0xff]   ;;  %v1061_v16 = vld [vmem:[#allocation2 + $0x38] sm:$0x7f] }
 0x10c   : > { %877 = vst.msk [vmem:[#allocation2 + $0xa9] sm:$0x7f] %vm856_vm3, %v844_v14  ;;  %v7749_v18 = vpop.f32.mrf.mxu0  ;;  %v7783_v19 = vpop.f32.mrf.mxu1 }
 0x10d   : > { %621 = vst.msk [vmem:[#allocation2 + $0xe0] sm:$0xff] %vm340_vm1, %v589_v17  ;;  %v592_v21 = vadd.f32 %v7749_v18, %v9082_v48 }
 0x10e   : > { %v817_v22 = vld [vmem:[#allocation2 + $0xd1] sm:$0xff]  ;;  %v818_v23 = vld [vmem:[#allocation2 + $0xd9] sm:$0x7f]  ;;  %v542_v24 = vpop.f32.mrf.mxu0  ;;  %v779_v25 = vpop.f32.mrf.mxu1 }
 0x10f   : > { %v849_v26 = vadd.f32 %v7778_v33, %v817_v22  ;;  %v850_v27 = vadd.f32 %v7779_v62, %v818_v23  ;;  %624 = vst.msk [vmem:[#allocation2 + $0xf8] sm:$0xff] %vm340_vm1, %v592_v21  ;;  %v590_v28 = vadd.f32 %v9082_v48, %v542_v24 }
 0x110   : > { %v815_v29 = vld [vmem:[#allocation2 + $0xc1] sm:$0xff]  ;;  %v816_v35 = vld [vmem:[#allocation2 + $0xc9] sm:$0x7f]  ;;  %v7788_v30 = vpop.f32.mrf.mxu0  ;;  %v9247_v31 = vpop.f32.mrf.mxu1  ;;  %7981 = vmatmul.mubr.msk.bf16.gmra.mxu1 %vm340_vm1, %v9002_v40  ;;  %8011 = vmatmul.mubr.msk.bf16.gmra.mxu0 %vm340_vm1, %v9241_v20 }
 0x111   : > { %882 = vst.msk [vmem:[#allocation2 + $0xd1] sm:$0xff] %vm340_vm1, %v849_v26  ;;  %v847_v32 = vadd.f32 %v815_v29, %v760_v59  ;;  %v848_v37 = vadd.f32 %v816_v35, %v763_v4  ;;  %622 = vst.msk [vmem:[#allocation2 + $0xe8] sm:$0xff] %vm340_vm1, %v590_v28  ;;  %7984 = vmatprep.mubr.msk.bf16.mxu1 %vm8782_vm2, %v8781_v5  ;;  %8014 = vmatprep.mubr.msk.bf16.mxu0 %vm8782_vm2, %v8781_v5  ;;  %v1122_v49 = vrot.slane %v7788_v30, 1  ;;  %v1059_v26 = vld [vmem:[#allocation2 + $0x28] sm:$0x7f]  ;;  %v1058_v35 = vld [vmem:[#allocation2 + $0x20] sm:$0xff] }
 0x112   : > { %883 = vst.msk [vmem:[#allocation2 + $0xd9] sm:$0x7f] %vm856_vm3, %v850_v27  ;;  %v927_v48 = vpop.f32.mrf.mxu0  ;;  %v7822_v40 = vpop.f32.mrf.mxu1 }
 0x113   : > { %880 = vst.msk [vmem:[#allocation2 + $0xc1] sm:$0xff] %vm340_vm1, %v847_v32  ;;  %v1119_v61 = vrot.slane %v927_v48, 1 }
 0x114   : > { %881 = vst.msk [vmem:[#allocation2 + $0xc9] sm:$0x7f] %vm856_vm3, %v848_v37  ;;  %v7789_v39 = vpop.f32.mrf.mxu0  ;;  %v1455_v46 = vpop.f32.mrf.mxu1 }
 0x115   : > { %v1123_v50 = vrot.slane %v7789_v39, 1 }
 0x116   : > { %v821_v51 = vld [vmem:[#allocation2 + $0xf1] sm:$0xff]  ;;  %v822_v52 = vld [vmem:[#allocation2 + $0xf9] sm:$0x7f]  ;;  %v930_v54 = vpop.f32.mrf.mxu0  ;;  %v7823_v33 = vpop.f32.mrf.mxu1 }
 0x117   : > { %v853_v55 = vadd.f32 %v7782_v12, %v821_v51  ;;  %v854_v56 = vadd.f32 %v7783_v19, %v822_v52  ;;  %v1124_v58 = vsel %vm1118_vm4, %v1122_v49, %v1123_v50  ;;  %v1202_v59 = vadd.f32 %v1123_v50, %v1057_v53  ;;  %v1060_v19 = vld [vmem:[#allocation2 + $0x30] sm:$0xff]  ;;  %v9308_v50 = vld [vmem:[%s8842_s29 + $0x28] sm:$0xff]   ;;  %v1065_v53 = vld [vmem:[#allocation2 + $0x58] sm:$0x7f] }
 0x118   : > { %v819_v36 = vld [vmem:[#allocation2 + $0xe1] sm:$0xff]  ;;  %v820_v60 = vld [vmem:[#allocation2 + $0xe9] sm:$0x7f]  ;;  %v1201_v62 = vadd.f32 %v1124_v58, %v1056_v57  ;;  %v1120_v0 = vrot.slane %v930_v54, 1  ;;  %v7792_v1 = vpop.f32.mrf.mxu0  ;;  %v9266_v2 = vpop.f32.mrf.mxu1  ;;  %7985 = vmatmul.mubr.msk.bf16.gmra.mxu1 %vm340_vm1, %v9013_v41  ;;  %8015 = vmatmul.mubr.msk.bf16.gmra.mxu0 %vm340_vm1, %v9263_v47 }
 0x119   : > { %886 = vst.msk [vmem:[#allocation2 + $0xf1] sm:$0xff] %vm340_vm1, %v853_v55  ;;  %v851_v3 = vadd.f32 %v819_v36, %v9232_v38  ;;  %v852_v4 = vadd.f32 %v820_v60, %v779_v25  ;;  %7988 = vmatprep.mubr.msk.bf16.mxu1 %vm8782_vm2, %v8781_v5  ;;  %8018 = vmatprep.mubr.msk.bf16.mxu0 %vm8782_vm2, %v8781_v5  ;;  %v1054_v41 = vld [vmem:[#allocation2] sm:$0xff]  ;;  %v1128_v14 = vrot.slane %v7792_v1, 1  ;;  %v1063_v60 = vld [vmem:[#allocation2 + $0x48] sm:$0x7f] }
 0x11a   : > { %887 = vst.msk [vmem:[#allocation2 + $0xf9] sm:$0x7f] %vm856_vm3, %v854_v56  ;;  %1234 = vst.msk [vmem:[#allocation2 + $0x18] sm:$0x7f] %vm856_vm3, %v1202_v59  ;;  %v1121_v7 = vsel %vm1118_vm4, %v1119_v61, %v1120_v0  ;;  %v1200_v8 = vadd.f32 %v1120_v0, %v1055_v6  ;;  %v943_v9 = vpop.f32.mrf.mxu0  ;;  %v7826_v10 = vpop.f32.mrf.mxu1  ;;  %v1064_v56 = vld [vmem:[#allocation2 + $0x50] sm:$0xff] }
 0x11b   : > { %1233 = vst.msk [vmem:[#allocation2 + $0x10] sm:$0xff] %vm340_vm1, %v1201_v62  ;;  %884 = vst.msk [vmem:[#allocation2 + $0xe1] sm:$0xff] %vm340_vm1, %v851_v3  ;;  %v1199_v34 = vadd.f32 %v1121_v7, %v1054_v41  ;;  %v1125_v18 = vrot.slane %v943_v9, 1  ;;  %v1062_v3 = vld [vmem:[#allocation2 + $0x40] sm:$0xff] }
 0x11c   : > { %885 = vst.msk [vmem:[#allocation2 + $0xe9] sm:$0x7f] %vm856_vm3, %v852_v4  ;;  %1232 = vst.msk [vmem:[#allocation2 + $0x8] sm:$0x7f] %vm856_vm3, %v1200_v8  ;;  %v7793_v11 = vpop.f32.mrf.mxu0  ;;  %v9285_v12 = vpop.f32.mrf.mxu1 }
 0x11d   : > { %1231 = vst.msk [vmem:[#allocation2] sm:$0xff] %vm340_vm1, %v1199_v34  ;;  %v1129_v15 = vrot.slane %v7793_v11, 1 }
 0x11e   : > { %v946_v38 = vpop.f32.mrf.mxu0  ;;  %v7827_v17 = vpop.f32.mrf.mxu1 }
 0x11f   : > { %v1130_v21 = vsel %vm1118_vm4, %v1128_v14, %v1129_v15  ;;  %v1206_v22 = vadd.f32 %v1129_v15, %v1061_v16  ;;  %v1126_v23 = vrot.slane %v946_v38, 1  ;;  %v9329_v15 = vld [vmem:[%s8842_s29 + $0x30] sm:$0xff]  }
 0x120   : > { %v1205_v25 = vadd.f32 %v1130_v21, %v1060_v19  ;;  %v7796_v27 = vpop.f32.mrf.mxu0  ;;  %v1468_v28 = vpop.f32.mrf.mxu1  ;;  %7989 = vmatmul.mubr.msk.bf16.gmra.mxu1 %vm340_vm1, %v9024_v42  ;;  %8019 = vmatmul.mubr.msk.bf16.gmra.mxu0 %vm340_vm1, %v9288_v13 }
 0x121   : > { %v1573_v24 = vld [vmem:[#allocation2 + $0x18] sm:$0xff]  ;;  %1238 = vst.msk [vmem:[#allocation2 + $0x38] sm:$0x7f] %vm856_vm3, %v1206_v22  ;;  %v1127_v30 = vsel %vm1118_vm4, %v1125_v18, %v1126_v23  ;;  %v1204_v32 = vadd.f32 %v1126_v23, %v1059_v26  ;;  %7992 = vmatprep.mubr.msk.bf16.mxu1 %vm8782_vm2, %v8781_v5  ;;  %8022 = vmatprep.mubr.msk.bf16.mxu0 %vm8782_vm2, %v8781_v5  ;;  %v1134_v51 = vrot.slane %v7796_v27, 1  ;;  %v1068_v22 = vld [vmem:[#allocation2 + $0x70] sm:$0xff] }
 0x122   : > { %v1603_v29 = vadd.f32 %v1573_v24, %v1455_v46  ;;  %v1572_v37 = vld [vmem:[#allocation2 + $0x10] sm:$0xff]  ;;  %1237 = vst.msk [vmem:[#allocation2 + $0x30] sm:$0xff] %vm340_vm1, %v1205_v25  ;;  %v1203_v42 = vadd.f32 %v1127_v30, %v1058_v35  ;;  %v959_v48 = vpop.f32.mrf.mxu0  ;;  %v7830_v40 = vpop.f32.mrf.mxu1  ;;  %v1069_v18 = vld [vmem:[#allocation2 + $0x78] sm:$0x7f]  ;;  %v1067_v27 = vld [vmem:[#allocation2 + $0x68] sm:$0x7f] }
 0x123   : > { %v1602_v39 = vadd.f32 %v1572_v37, %v9247_v31  ;;  %1236 = vst.msk [vmem:[#allocation2 + $0x28] sm:$0x7f] %vm856_vm3, %v1204_v32  ;;  %v1131_v55 = vrot.slane %v959_v48, 1 }
 0x124   : > { %1633 = vst.msk [vmem:[#allocation2 + $0x18] sm:$0xff] %vm340_vm1, %v1603_v29  ;;  %1235 = vst.msk [vmem:[#allocation2 + $0x20] sm:$0xff] %vm340_vm1, %v1203_v42  ;;  %v7797_v46 = vpop.f32.mrf.mxu0  ;;  %v1471_v49 = vpop.f32.mrf.mxu1 }
 0x125   : > { %1632 = vst.msk [vmem:[#allocation2 + $0x10] sm:$0xff] %vm340_vm1, %v1602_v39  ;;  %v1135_v52 = vrot.slane %v7797_v46, 1 }
 0x126   : > { %v962_v54 = vpop.f32.mrf.mxu0  ;;  %v7831_v33 = vpop.f32.mrf.mxu1 }
 0x127   : > { %v1136_v31 = vsel %vm1118_vm4, %v1134_v51, %v1135_v52  ;;  %v1210_v57 = vadd.f32 %v1135_v52, %v1065_v53  ;;  %v1132_v58 = vrot.slane %v962_v54, 1  ;;  %v9350_v54 = vld [vmem:[%s8842_s29 + $0x38] sm:$0xff]  }
 0x128   : > { %v1209_v59 = vadd.f32 %v1136_v31, %v1064_v56  ;;  %v1577_v36 = vld [vmem:[#allocation2 + $0x38] sm:$0xff]  ;;  %v7800_v61 = vpop.f32.mrf.mxu0  ;;  %v1476_v62 = vpop.f32.mrf.mxu1  ;;  %7993 = vmatmul.mubr.msk.bf16.gmra.mxu1 %vm340_vm1, %v9035_v43  ;;  %8023 = vmatmul.mubr.msk.bf16.gmra.mxu0 %vm340_vm1, %v9308_v50 }
 0x129   : > { %v1576_v0 = vld [vmem:[#allocation2 + $0x30] sm:$0xff]  ;;  %1242 = vst.msk [vmem:[#allocation2 + $0x58] sm:$0x7f] %vm856_vm3, %v1210_v57  ;;  %v1607_v1 = vadd.f32 %v1577_v36, %v1471_v49  ;;  %v1133_v4 = vsel %vm1118_vm4, %v1131_v55, %v1132_v58  ;;  %v1208_v6 = vadd.f32 %v1132_v58, %v1063_v60  ;;  %7996 = vmatprep.mubr.msk.bf16.mxu1 %vm8782_vm2, %v8781_v5  ;;  %v1140_v38 = vrot.slane %v7800_v61, 1  ;;  %v1073_v31 = vld [vmem:[#allocation2 + $0x98] sm:$0x7f] }
 0x12a   : > { %8026 = vmatprep.mubr.msk.bf16.mxu0 %vm8782_vm2, %v8781_v5  ;;  %v1606_v41 = vadd.f32 %v1576_v0, %v1468_v28  ;;  %1241 = vst.msk [vmem:[#allocation2 + $0x50] sm:$0xff] %vm340_vm1, %v1209_v59  ;;  %v1207_v43 = vadd.f32 %v1133_v4, %v1062_v3  ;;  %v975_v7 = vpop.f32.mrf.mxu0  ;;  %v7834_v8 = vpop.f32.mrf.mxu1  ;;  %v1575_v9 = vld [vmem:[#allocation2 + $0x28] sm:$0xff]  ;;  %v1072_v36 = vld [vmem:[#allocation2 + $0x90] sm:$0xff] }
 0x12b   : > { %1637 = vst.msk [vmem:[#allocation2 + $0x38] sm:$0xff] %vm340_vm1, %v1607_v1  ;;  %v1574_v10 = vld [vmem:[#allocation2 + $0x20] sm:$0xff]  ;;  %v1605_v34 = vadd.f32 %v1575_v9, %v9285_v12  ;;  %v1137_v12 = vrot.slane %v975_v7, 1  ;;  %v1071_v1 = vld [vmem:[#allocation2 + $0x88] sm:$0x7f] }
 0x12c   : > { %1240 = vst.msk [vmem:[#allocation2 + $0x48] sm:$0x7f] %vm856_vm3, %v1208_v6  ;;  %v7801_v11 = vpop.f32.mrf.mxu0  ;;  %v1479_v14 = vpop.f32.mrf.mxu1  ;;  %v1604_v16 = vadd.f32 %v1574_v10, %v9266_v2  ;;  %v1066_v2 = vld [vmem:[#allocation2 + $0x60] sm:$0xff] }
 0x12d   : > { %1636 = vst.msk [vmem:[#allocation2 + $0x30] sm:$0xff] %vm340_vm1, %v1606_v41  ;;  %1239 = vst.msk [vmem:[#allocation2 + $0x40] sm:$0xff] %vm340_vm1, %v1207_v43  ;;  %v1141_v17 = vrot.slane %v7801_v11, 1  ;;  %v1070_v6 = vld [vmem:[#allocation2 + $0x80] sm:$0xff] }
 0x12e   : > { %1635 = vst.msk [vmem:[#allocation2 + $0x28] sm:$0xff] %vm340_vm1, %v1605_v34  ;;  %v978_v19 = vpop.f32.mrf.mxu0  ;;  %v7835_v21 = vpop.f32.mrf.mxu1  ;;  %1634 = vst.msk [vmem:[#allocation2 + $0x20] sm:$0xff] %vm340_vm1, %v1604_v16  ;;  %v9370_v16 = vld [vmem:[%s8842_s29 + $0x40] sm:$0xff]  }
 0x12f   : > { %v1142_v23 = vsel %vm1118_vm4, %v1140_v38, %v1141_v17  ;;  %v1214_v24 = vadd.f32 %v1141_v17, %v1069_v18  ;;  %v1138_v25 = vrot.slane %v978_v19, 1  ;;  %v1077_v19 = vld [vmem:[#allocation2 + $0xb8] sm:$0x7f] }
 0x130   : > { %v1213_v26 = vadd.f32 %v1142_v23, %v1068_v22  ;;  %v7804_v28 = vpop.f32.mrf.mxu0  ;;  %v1484_v29 = vpop.f32.mrf.mxu1  ;;  %7997 = vmatmul.mubr.msk.bf16.gmra.mxu1 %vm340_vm1, %v9046_v44  ;;  %8027 = vmatmul.mubr.msk.bf16.gmra.mxu0 %vm340_vm1, %v9329_v15  ;;  %v1581_v53 = vld [vmem:[#allocation2 + $0x58] sm:$0xff]  ;;  %v1076_v23 = vld [vmem:[#allocation2 + $0xb0] sm:$0xff] }
 0x131   : > { %1246 = vst.msk [vmem:[#allocation2 + $0x78] sm:$0x7f] %vm856_vm3, %v1214_v24  ;;  %v1139_v35 = vsel %vm1118_vm4, %v1137_v12, %v1138_v25  ;;  %v1212_v30 = vadd.f32 %v1138_v25, %v1067_v27  ;;  %v1580_v32 = vld [vmem:[#allocation2 + $0x50] sm:$0xff]  ;;  %8000 = vmatprep.mubr.msk.bf16.mxu1 %vm8782_vm2, %v8781_v5  ;;  %8030 = vmatprep.mubr.msk.bf16.mxu0 %vm8782_vm2, %v8781_v5  ;;  %v1146_v33 = vrot.slane %v7804_v28, 1  ;;  %v1075_v28 = vld [vmem:[#allocation2 + $0xa8] sm:$0x7f] }
 0x132   : > { %1245 = vst.msk [vmem:[#allocation2 + $0x70] sm:$0xff] %vm340_vm1, %v1213_v26  ;;  %v1211_v37 = vadd.f32 %v1139_v35, %v1066_v2  ;;  %v1610_v42 = vadd.f32 %v1580_v32, %v1484_v29  ;;  %v991_v48 = vpop.f32.mrf.mxu0  ;;  %v7838_v40 = vpop.f32.mrf.mxu1 }
 0x133   : > { %v1579_v44 = vld [vmem:[#allocation2 + $0x48] sm:$0xff]  ;;  %1244 = vst.msk [vmem:[#allocation2 + $0x68] sm:$0x7f] %vm856_vm3, %v1212_v30  ;;  %v1143_v59 = vrot.slane %v991_v48, 1  ;;  %v1074_v30 = vld [vmem:[#allocation2 + $0xa0] sm:$0xff] }
 0x134   : > { %v1578_v39 = vld [vmem:[#allocation2 + $0x40] sm:$0xff]  ;;  %v1609_v46 = vadd.f32 %v1579_v44, %v1479_v14  ;;  %1243 = vst.msk [vmem:[#allocation2 + $0x60] sm:$0xff] %vm340_vm1, %v1211_v37  ;;  %1640 = vst.msk [vmem:[#allocation2 + $0x50] sm:$0xff] %vm340_vm1, %v1610_v42  ;;  %v7805_v51 = vpop.f32.mrf.mxu0  ;;  %v1487_v52 = vpop.f32.mrf.mxu1 }
 0x135   : > { %v1608_v49 = vadd.f32 %v1578_v39, %v1476_v62  ;;  %v1147_v55 = vrot.slane %v7805_v51, 1  ;;  %v1611_v56 = vadd.f32 %v1581_v53, %v1487_v52 }
 0x136   : > { %1639 = vst.msk [vmem:[#allocation2 + $0x48] sm:$0xff] %vm340_vm1, %v1609_v46  ;;  %v994_v57 = vpop.f32.mrf.mxu0  ;;  %v7839_v58 = vpop.f32.mrf.mxu1 }
 0x137   : > { %1638 = vst.msk [vmem:[#allocation2 + $0x40] sm:$0xff] %vm340_vm1, %v1608_v49  ;;  %v1148_v60 = vsel %vm1118_vm4, %v1146_v33, %v1147_v55  ;;  %v1218_v61 = vadd.f32 %v1147_v55, %v1073_v31  ;;  %1641 = vst.msk [vmem:[#allocation2 + $0x58] sm:$0xff] %vm340_vm1, %v1611_v56  ;;  %v1144_v62 = vrot.slane %v994_v57, 1  ;;  %v9390_v49 = vld [vmem:[%s8842_s29 + $0x48] sm:$0xff]   ;;  %v1081_v33 = vld [vmem:[#allocation2 + $0xd8] sm:$0x7f] }
 0x138   : > { %v1217_v0 = vadd.f32 %v1148_v60, %v1072_v36  ;;  %v7808_v3 = vpop.f32.mrf.mxu0  ;;  %v1492_v4 = vpop.f32.mrf.mxu1  ;;  %8001 = vmatmul.mubr.msk.bf16.gmra.mxu1 %vm340_vm1, %v9057_v45  ;;  %8031 = vmatmul.mubr.msk.bf16.gmra.mxu0 %vm340_vm1, %v9350_v54  ;;  %v1585_v46 = vld [vmem:[#allocation2 + $0x78] sm:$0xff]  ;;  %v1080_v57 = vld [vmem:[#allocation2 + $0xd0] sm:$0xff] }
 0x139   : > { %1250 = vst.msk [vmem:[#allocation2 + $0x98] sm:$0x7f] %vm856_vm3, %v1218_v61  ;;  %v1145_v41 = vsel %vm1118_vm4, %v1143_v59, %v1144_v62  ;;  %v1216_v43 = vadd.f32 %v1144_v62, %v1071_v1  ;;  %8034 = vmatprep.mubr.msk.bf16.mxu0 %vm8782_vm2, %v8781_v5  ;;  %8068 = vmatprep.mubr.msk.bf16.mxu1 %vm8782_vm2, %v8781_v5  ;;  %v1152_v38 = vrot.slane %v7808_v3, 1  ;;  %v1584_v35 = vld [vmem:[#allocation2 + $0x70] sm:$0xff]  ;;  %v1079_v61 = vld [vmem:[#allocation2 + $0xc8] sm:$0x7f] }
 0x13a   : > { %1249 = vst.msk [vmem:[#allocation2 + $0x90] sm:$0xff] %vm340_vm1, %v1217_v0  ;;  %v1215_v7 = vadd.f32 %v1145_v41, %v1070_v6  ;;  %v1007_v45 = vpop.f32.mrf.mxu0  ;;  %v7842_v8 = vpop.f32.mrf.mxu1  ;;  %v1583_v14 = vld [vmem:[#allocation2 + $0x68] sm:$0xff]  ;;  %v1078_v3 = vld [vmem:[#allocation2 + $0xc0] sm:$0xff] }
 0x13b   : > { %1248 = vst.msk [vmem:[#allocation2 + $0x88] sm:$0x7f] %vm856_vm3, %v1216_v43  ;;  %v1582_v9 = vld [vmem:[#allocation2 + $0x60] sm:$0xff]  ;;  %v1149_v22 = vrot.slane %v1007_v45, 1 }
 0x13c   : > { %1247 = vst.msk [vmem:[#allocation2 + $0x80] sm:$0xff] %vm340_vm1, %v1215_v7  ;;  %v1612_v10 = vadd.f32 %v1582_v9, %v1492_v4  ;;  %v7809_v34 = vpop.f32.mrf.mxu0  ;;  %v1495_v11 = vpop.f32.mrf.mxu1 }
 0x13d   : > { %v1153_v17 = vrot.slane %v7809_v34, 1  ;;  %v1613_v18 = vadd.f32 %v1583_v14, %v1495_v11  ;;  %v9409_v34 = vld [vmem:[%s8842_s29 + $0x50] sm:$0xff]  }
 0x13e   : > { %1642 = vst.msk [vmem:[#allocation2 + $0x60] sm:$0xff] %vm340_vm1, %v1612_v10  ;;  %v1010_v21 = vpop.f32.mrf.mxu0  ;;  %v7843_v12 = vpop.f32.mrf.mxu1 }
 0x13f   : > { %v1154_v24 = vsel %vm1118_vm4, %v1152_v38, %v1153_v17  ;;  %v1222_v25 = vadd.f32 %v1153_v17, %v1077_v19  ;;  %1643 = vst.msk [vmem:[#allocation2 + $0x68] sm:$0xff] %vm340_vm1, %v1613_v18  ;;  %v1150_v26 = vrot.slane %v1010_v21, 1  ;;  %v1085_v17 = vld [vmem:[#allocation2 + $0xf8] sm:$0x7f]  ;;  %v1084_v12 = vld [vmem:[#allocation2 + $0xf0] sm:$0xff] }
 0x140   : > { %v1221_v27 = vadd.f32 %v1154_v24, %v1076_v23  ;;  %v7812_v29 = vpop.f32.mrf.mxu0  ;;  %v1500_v2 = vpop.f32.mrf.mxu1  ;;  %8035 = vmatmul.mubr.msk.bf16.gmra.mxu0 %vm340_vm1, %v9370_v16  ;;  %8069 = vmatmul.mubr.msk.bf16.vlgmr.msra.gmra.mxu1 %vm340_vm1, %v9215_v63 }
 0x141   : > { %1254 = vst.msk [vmem:[#allocation2 + $0xb8] sm:$0x7f] %vm856_vm3, %v1222_v25  ;;  %v1151_v32 = vsel %vm1118_vm4, %v1149_v22, %v1150_v26  ;;  %v1220_v44 = vadd.f32 %v1150_v26, %v1075_v28  ;;  %v1614_v37 = vadd.f32 %v1584_v35, %v1500_v2  ;;  %8038 = vmatprep.mubr.msk.bf16.mxu0 %vm8782_vm2, %v8781_v5  ;;  %v1158_v51 = vrot.slane %v7812_v29, 1  ;;  %v1083_v26 = vld [vmem:[#allocation2 + $0xe8] sm:$0x7f]  ;;  %v1588_v28 = vld [vmem:[#allocation2 + $0x90] sm:$0xff] }
 0x142   : > { %8072 = vmatprep.mubr.msk.bf16.mxu1 %vm8782_vm2, %v8781_v5  ;;  %1253 = vst.msk [vmem:[#allocation2 + $0xb0] sm:$0xff] %vm340_vm1, %v1221_v27  ;;  %v1219_v42 = vadd.f32 %v1151_v32, %v1074_v30  ;;  %v1023_v48 = vpop.f32.mrf.mxu0  ;;  %v7846_v40 = vpop.f32.mrf.mxu1  ;;  %v1587_v10 = vld [vmem:[#allocation2 + $0x88] sm:$0xff]  ;;  %v1819_v2 = vld [vmem:[#allocation2 + $0x11] sm:$0xff]  ;;  %v1082_v35 = vld [vmem:[#allocation2 + $0xe0] sm:$0xff] }
 0x143   : > { %1252 = vst.msk [vmem:[#allocation2 + $0xa8] sm:$0x7f] %vm856_vm3, %v1220_v44  ;;  %v1155_v31 = vrot.slane %v1023_v48, 1  ;;  %v1586_v1 = vld [vmem:[#allocation2 + $0x80] sm:$0xff] }
 0x144   : > { %1644 = vst.msk [vmem:[#allocation2 + $0x70] sm:$0xff] %vm340_vm1, %v1614_v37  ;;  %1251 = vst.msk [vmem:[#allocation2 + $0xa0] sm:$0xff] %vm340_vm1, %v1219_v42  ;;  %v7813_v63 = vpop.f32.mrf.mxu0  ;;  %v1503_v39 = vpop.f32.mrf.mxu1 }
 0x145   : > { %v1159_v52 = vrot.slane %v7813_v63, 1  ;;  %v1615_v53 = vadd.f32 %v1585_v46, %v1503_v39  ;;  %v1589_v39 = vld [vmem:[#allocation2 + $0x98] sm:$0xff] }
 0x146   : > { %v1026_v55 = vpop.f32.mrf.mxu0  ;;  %v7847_v56 = vpop.f32.mrf.mxu1 }
 0x147   : > { %v1160_v58 = vsel %vm1118_vm4, %v1158_v51, %v1159_v52  ;;  %v1226_v59 = vadd.f32 %v1159_v52, %v1081_v33  ;;  %1645 = vst.msk [vmem:[#allocation2 + $0x78] sm:$0xff] %vm340_vm1, %v1615_v53  ;;  %v1156_v36 = vrot.slane %v1026_v55, 1  ;;  %v1820_v51 = vld [vmem:[#allocation2 + $0x19] sm:$0x7f] }
 0x148   : > { %v1225_v60 = vadd.f32 %v1160_v58, %v1080_v57  ;;  %v7816_v62 = vpop.f32.mrf.mxu0  ;;  %v1508_v0 = vpop.f32.mrf.mxu1  ;;  %8039 = vmatmul.mubr.msk.bf16.gmra.mxu0 %vm340_vm1, %v9390_v49  ;;  %8073 = vmatmul.mubr.msk.bf16.gmra.mxu1 %vm340_vm1, %v9241_v20  ;;  %v9429_v52 = vld [vmem:[%s8842_s29 + $0x58] sm:$0xff]  }
 0x149   : > { %1258 = vst.msk [vmem:[#allocation2 + $0xd8] sm:$0x7f] %vm856_vm3, %v1226_v59  ;;  %v1157_v4 = vsel %vm1118_vm4, %v1155_v31, %v1156_v36  ;;  %v1224_v6 = vadd.f32 %v1156_v36, %v1079_v61  ;;  %v1616_v41 = vadd.f32 %v1586_v1, %v1508_v0  ;;  %8042 = vmatprep.mubr.msk.bf16.mxu0 %vm8782_vm2, %v8781_v5  ;;  %v1164_v11 = vrot.slane %v7816_v62, 1  ;;  %v1821_v59 = vld [vmem:[#allocation2 + $0x21] sm:$0xff] }
 0x14a   : > { %8076 = vmatprep.mubr.msk.bf16.mxu1 %vm8782_vm2, %v8781_v5  ;;  %1257 = vst.msk [vmem:[#allocation2 + $0xd0] sm:$0xff] %vm340_vm1, %v1225_v60  ;;  %v1223_v43 = vadd.f32 %v1157_v4, %v1078_v3  ;;  %v1039_v7 = vpop.f32.mrf.mxu0  ;;  %v7850_v45 = vpop.f32.mrf.mxu1  ;;  %v1591_v1 = vld [vmem:[#allocation2 + $0xa8] sm:$0xff] }
 0x14b   : > { %1256 = vst.msk [vmem:[#allocation2 + $0xc8] sm:$0x7f] %vm856_vm3, %v1224_v6  ;;  %v1161_v21 = vrot.slane %v1039_v7, 1  ;;  %v1590_v57 = vld [vmem:[#allocation2 + $0xa0] sm:$0xff]  ;;  %v1822_v4 = vld [vmem:[#allocation2 + $0x29] sm:$0x7f] }
 0x14c   : > { %1646 = vst.msk [vmem:[#allocation2 + $0x80] sm:$0xff] %vm340_vm1, %v1616_v41  ;;  %1255 = vst.msk [vmem:[#allocation2 + $0xc0] sm:$0xff] %vm340_vm1, %v1223_v43  ;;  %v7817_v8 = vpop.f32.mrf.mxu0  ;;  %v1511_v9 = vpop.f32.mrf.mxu1  ;;  %v9444_v6 = vld [vmem:[%s8842_s29 + $0x60] sm:$0xff]  }
 0x14d   : > { %v1165_v14 = vrot.slane %v7817_v8, 1  ;;  %v1617_v38 = vadd.f32 %v1587_v10, %v1511_v9  ;;  %v1592_v9 = vld [vmem:[#allocation2 + $0xb0] sm:$0xff] }
 0x14e   : > { %v1042_v18 = vpop.f32.mrf.mxu0  ;;  %v7851_v19 = vpop.f32.mrf.mxu1 }
 0x14f   : > { %v1166_v22 = vsel %vm1118_vm4, %v1164_v11, %v1165_v14  ;;  %v1230_v23 = vadd.f32 %v1165_v14, %v1085_v17  ;;  %1647 = vst.msk [vmem:[#allocation2 + $0x88] sm:$0xff] %vm340_vm1, %v1617_v38  ;;  %v1162_v24 = vrot.slane %v1042_v18, 1  ;;  %v1823_v11 = vld [vmem:[#allocation2 + $0x31] sm:$0xff] }
 0x150   : > { %v1229_v25 = vadd.f32 %v1166_v22, %v1084_v12  ;;  %v1516_v27 = vpop.f32.mrf.mxu1  ;;  %v1700_v29 = vpop.f32.mrf.mxu0  ;;  %8043 = vmatmul.mubr.msk.bf16.gmra.mxu0 %vm340_vm1, %v9409_v34  ;;  %8077 = vmatmul.mubr.msk.bf16.gmra.mxu1 %vm340_vm1, %v9263_v47  ;;  %v1824_v22 = vld [vmem:[#allocation2 + $0x39] sm:$0x7f] }
 0x151   : > { %1262 = vst.msk [vmem:[#allocation2 + $0xf8] sm:$0x7f] %vm856_vm3, %v1230_v23  ;;  %v1163_v30 = vsel %vm1118_vm4, %v1161_v21, %v1162_v24  ;;  %v1228_v32 = vadd.f32 %v1162_v24, %v1083_v26  ;;  %v1618_v44 = vadd.f32 %v1588_v28, %v1516_v27  ;;  %v1849_v37 = vadd.f32 %v1819_v2, %v1700_v29  ;;  %v1593_v21 = vld [vmem:[#allocation2 + $0xb8] sm:$0xff]  ;;  %v9459_v23 = vld [vmem:[%s8842_s29 + $0x68] sm:$0xff]  }
 0x152   : > { %8046 = vmatprep.mubr.msk.bf16.mxu0 %vm8782_vm2, %v8781_v5  ;;  %1261 = vst.msk [vmem:[#allocation2 + $0xf0] sm:$0xff] %vm340_vm1, %v1229_v25  ;;  %v1227_v42 = vadd.f32 %v1163_v30, %v1082_v35  ;;  %v7854_v48 = vpop.f32.mrf.mxu1  ;;  %v7884_v40 = vpop.f32.mrf.mxu0  ;;  %8080 = vmatprep.mubr.msk.bf16.mxu1 %vm8782_vm2, %v8781_v5  ;;  %v1825_v35 = vld [vmem:[#allocation2 + $0x41] sm:$0xff] }
 0x153   : > { %1260 = vst.msk [vmem:[#allocation2 + $0xe8] sm:$0x7f] %vm856_vm3, %v1228_v32  ;;  %v1594_v29 = vld [vmem:[#allocation2 + $0xc0] sm:$0xff]  ;;  %v1595_v48 = vld [vmem:[#allocation2 + $0xc8] sm:$0xff] }
 0x154   : > { %1648 = vst.msk [vmem:[#allocation2 + $0x90] sm:$0xff] %vm340_vm1, %v1618_v44  ;;  %1879 = vst.msk [vmem:[#allocation2 + $0x11] sm:$0xff] %vm340_vm1, %v1849_v37  ;;  %v1519_v63 = vpop.f32.mrf.mxu1  ;;  %v1703_v46 = vpop.f32.mrf.mxu0 }
 0x155   : > { %1259 = vst.msk [vmem:[#allocation2 + $0xe0] sm:$0xff] %vm340_vm1, %v1227_v42  ;;  %v1619_v53 = vadd.f32 %v1589_v39, %v1519_v63  ;;  %v1850_v33 = vadd.f32 %v1820_v51, %v1703_v46  ;;  %v1826_v63 = vld [vmem:[#allocation2 + $0x49] sm:$0x7f]  ;;  %v9474_v39 = vld [vmem:[%s8842_s29 + $0x70] sm:$0xff]  }
 0x156   : > { %v7855_v55 = vpop.f32.mrf.mxu1  ;;  %v7885_v56 = vpop.f32.mrf.mxu0 }
 0x157   : > { %1649 = vst.msk [vmem:[#allocation2 + $0x98] sm:$0xff] %vm340_vm1, %v1619_v53  ;;  %v1596_v56 = vld [vmem:[#allocation2 + $0xd0] sm:$0xff] }
 0x158   : > { %1880 = vst.msk [vmem:[#allocation2 + $0x19] sm:$0x7f] %vm856_vm3, %v1850_v33  ;;  %v1524_v31 = vpop.f32.mrf.mxu1  ;;  %v1708_v58 = vpop.f32.mrf.mxu0  ;;  %8047 = vmatmul.mubr.msk.bf16.gmra.mxu0 %vm340_vm1, %v9429_v52  ;;  %8081 = vmatmul.mubr.msk.bf16.gmra.mxu1 %vm340_vm1, %v9288_v13 }
 0x159   : > { %v1620_v36 = vadd.f32 %v1590_v57, %v1524_v31  ;;  %v1851_v60 = vadd.f32 %v1821_v59, %v1708_v58  ;;  %8050 = vmatprep.mubr.msk.bf16.mxu0 %vm8782_vm2, %v8781_v5  ;;  %8084 = vmatprep.mubr.msk.bf16.mxu1 %vm8782_vm2, %v8781_v5  ;;  %v1827_v57 = vld [vmem:[#allocation2 + $0x51] sm:$0xff] }
 0x15a   : > { %v7858_v61 = vpop.f32.mrf.mxu1  ;;  %v7888_v62 = vpop.f32.mrf.mxu0 }
 0x15b   : > { %1650 = vst.msk [vmem:[#allocation2 + $0xa0] sm:$0xff] %vm340_vm1, %v1620_v36  ;;  %1881 = vst.msk [vmem:[#allocation2 + $0x21] sm:$0xff] %vm340_vm1, %v1851_v60  ;;  %v1597_v62 = vld [vmem:[#allocation2 + $0xd8] sm:$0xff] }
 0x15c   : > { %v1527_v0 = vpop.f32.mrf.mxu1  ;;  %v1711_v3 = vpop.f32.mrf.mxu0 }
 0x15d   : > { %v1621_v41 = vadd.f32 %v1591_v1, %v1527_v0  ;;  %v1852_v43 = vadd.f32 %v1822_v4, %v1711_v3  ;;  %v1828_v1 = vld [vmem:[#allocation2 + $0x59] sm:$0x7f] }
 0x15e   : > { %v7859_v7 = vpop.f32.mrf.mxu1  ;;  %v7889_v45 = vpop.f32.mrf.mxu0  ;;  %v9489_v3 = vld [vmem:[%s8842_s29 + $0x78] sm:$0xff]  }
 0x15f   : > { %1651 = vst.msk [vmem:[#allocation2 + $0xa8] sm:$0xff] %vm340_vm1, %v1621_v41 }
 0x160   : > { %1882 = vst.msk [vmem:[#allocation2 + $0x29] sm:$0x7f] %vm856_vm3, %v1852_v43  ;;  %v1532_v8 = vpop.f32.mrf.mxu1  ;;  %v1716_v10 = vpop.f32.mrf.mxu0  ;;  %8051 = vmatmul.mubr.msk.bf16.gmra.mxu0 %vm340_vm1, %v9444_v6  ;;  %8085 = vmatmul.mubr.msk.bf16.gmra.mxu1 %vm340_vm1, %v9308_v50 }
 0x161   : > { %v1622_v14 = vadd.f32 %v1592_v9, %v1532_v8  ;;  %v1853_v38 = vadd.f32 %v1823_v11, %v1716_v10  ;;  %8054 = vmatprep.mubr.msk.bf16.mxu0 %vm8782_vm2, %v8781_v5  ;;  %8088 = vmatprep.mubr.msk.bf16.mxu1 %vm8782_vm2, %v8781_v5  ;;  %v1598_v8 = vld [vmem:[#allocation2 + $0xe0] sm:$0xff] }
 0x162   : > { %v7862_v17 = vpop.f32.mrf.mxu1  ;;  %v7892_v18 = vpop.f32.mrf.mxu0  ;;  %v1829_v10 = vld [vmem:[#allocation2 + $0x61] sm:$0xff] }
 0x163   : > { %1652 = vst.msk [vmem:[#allocation2 + $0xb0] sm:$0xff] %vm340_vm1, %v1622_v14  ;;  %1883 = vst.msk [vmem:[#allocation2 + $0x31] sm:$0xff] %vm340_vm1, %v1853_v38 }
 0x164   : > { %v1535_v19 = vpop.f32.mrf.mxu1  ;;  %v1719_v12 = vpop.f32.mrf.mxu0 }
 0x165   : > { %v1623_v24 = vadd.f32 %v1593_v21, %v1535_v19  ;;  %v1854_v25 = vadd.f32 %v1824_v22, %v1719_v12  ;;  %v1599_v19 = vld [vmem:[#allocation2 + $0xe8] sm:$0xff] }
 0x166   : > { %v7863_v26 = vpop.f32.mrf.mxu1  ;;  %v7893_v27 = vpop.f32.mrf.mxu0  ;;  %v1830_v12 = vld [vmem:[#allocation2 + $0x69] sm:$0x7f] }
 0x167   : > { %1653 = vst.msk [vmem:[#allocation2 + $0xb8] sm:$0xff] %vm340_vm1, %v1623_v24 }
 0x168   : > { %1884 = vst.msk [vmem:[#allocation2 + $0x39] sm:$0x7f] %vm856_vm3, %v1854_v25  ;;  %v1540_v28 = vpop.f32.mrf.mxu1  ;;  %v1724_v2 = vpop.f32.mrf.mxu0  ;;  %8055 = vmatmul.mubr.msk.bf16.gmra.mxu0 %vm340_vm1, %v9459_v23  ;;  %8089 = vmatmul.mubr.msk.bf16.gmra.mxu1 %vm340_vm1, %v9329_v15 }
 0x169   : > { %v1624_v30 = vadd.f32 %v1594_v29, %v1540_v28  ;;  %v1855_v32 = vadd.f32 %v1825_v35, %v1724_v2  ;;  %8058 = vmatprep.mubr.msk.bf16.mxu0 %vm8782_vm2, %v8781_v5  ;;  %8092 = vmatprep.mubr.msk.bf16.mxu1 %vm8782_vm2, %v8781_v5  ;;  %v1600_v28 = vld [vmem:[#allocation2 + $0xf0] sm:$0xff]  ;;  %v8772_v35 = vld [vmem:[%s8842_s29 + $0x8] sm:$0xff]  }
 0x16a   : > { %v7866_v44 = vpop.f32.mrf.mxu1  ;;  %v7896_v37 = vpop.f32.mrf.mxu0  ;;  %v1831_v2 = vld [vmem:[#allocation2 + $0x71] sm:$0xff] }
 0x16b   : > { %1654 = vst.msk [vmem:[#allocation2 + $0xc0] sm:$0xff] %vm340_vm1, %v1624_v30  ;;  %1885 = vst.msk [vmem:[#allocation2 + $0x41] sm:$0xff] %vm340_vm1, %v1855_v32 }
 0x16c   : > { %v1543_v42 = vpop.f32.mrf.mxu1  ;;  %v1727_v40 = vpop.f32.mrf.mxu0 }
 0x16d   : > { %v1625_v46 = vadd.f32 %v1595_v48, %v1543_v42  ;;  %v1856_v51 = vadd.f32 %v1826_v63, %v1727_v40  ;;  %v1601_v48 = vld [vmem:[#allocation2 + $0xf8] sm:$0xff] }
 0x16e   : > { %v7867_v53 = vpop.f32.mrf.mxu1  ;;  %v7897_v33 = vpop.f32.mrf.mxu0  ;;  %v1832_v63 = vld [vmem:[#allocation2 + $0x79] sm:$0x7f] }
 0x16f   : > { %1655 = vst.msk [vmem:[#allocation2 + $0xc8] sm:$0xff] %vm340_vm1, %v1625_v46 }
 0x170   : > { %1886 = vst.msk [vmem:[#allocation2 + $0x49] sm:$0x7f] %vm856_vm3, %v1856_v51  ;;  %v1548_v55 = vpop.f32.mrf.mxu1  ;;  %v1732_v31 = vpop.f32.mrf.mxu0  ;;  %8059 = vmatmul.mubr.msk.bf16.gmra.mxu0 %vm340_vm1, %v9474_v39  ;;  %8093 = vmatmul.mubr.msk.bf16.gmra.mxu1 %vm340_vm1, %v9350_v54 }
 0x171   : > { %v1626_v58 = vadd.f32 %v1596_v56, %v1548_v55  ;;  %v1857_v59 = vadd.f32 %v1827_v57, %v1732_v31  ;;  %8062 = vmatprep.mubr.msk.bf16.mxu0 %vm8782_vm2, %v8781_v5  ;;  %8096 = vmatprep.mubr.msk.bf16.mxu1 %vm8782_vm2, %v8781_v5  ;;  %v1833_v56 = vld [vmem:[#allocation2 + $0x81] sm:$0xff] }
 0x172   : > { %v7870_v36 = vpop.f32.mrf.mxu1  ;;  %v7900_v60 = vpop.f32.mrf.mxu0 }
 0x173   : > { %1656 = vst.msk [vmem:[#allocation2 + $0xd0] sm:$0xff] %vm340_vm1, %v1626_v58  ;;  %1887 = vst.msk [vmem:[#allocation2 + $0x51] sm:$0xff] %vm340_vm1, %v1857_v59 }
 0x174   : > { %v1551_v61 = vpop.f32.mrf.mxu1  ;;  %v1735_v0 = vpop.f32.mrf.mxu0 }
 0x175   : > { %v1627_v4 = vadd.f32 %v1597_v62, %v1551_v61  ;;  %v1858_v41 = vadd.f32 %v1828_v1, %v1735_v0  ;;  %v1834_v61 = vld [vmem:[#allocation2 + $0x89] sm:$0x7f] }
 0x176   : > { %v7871_v43 = vpop.f32.mrf.mxu1  ;;  %v7901_v7 = vpop.f32.mrf.mxu0 }
 0x177   : > { %1657 = vst.msk [vmem:[#allocation2 + $0xd8] sm:$0xff] %vm340_vm1, %v1627_v4  ;;  %v2068_v4 = vld [vmem:[#allocation2 + $0x18] sm:$0x7f]  ;;  %v2067_v43 = vld [vmem:[#allocation2 + $0x10] sm:$0xff] }
 0x178   : > { %1888 = vst.msk [vmem:[#allocation2 + $0x59] sm:$0x7f] %vm856_vm3, %v1858_v41  ;;  %v1556_v45 = vpop.f32.mrf.mxu1  ;;  %v1740_v9 = vpop.f32.mrf.mxu0  ;;  %8063 = vmatmul.mubr.msk.bf16.gmra.mxu0 %vm340_vm1, %v9489_v3  ;;  %8097 = vmatmul.mubr.msk.bf16.gmra.mxu1 %vm340_vm1, %v9370_v16 }
 0x179   : > { %v1628_v11 = vadd.f32 %v1598_v8, %v1556_v45  ;;  %v1859_v14 = vadd.f32 %v1829_v10, %v1740_v9  ;;  %8100 = vmatprep.mubr.msk.bf16.mxu1 %vm8782_vm2, %v8781_v5  ;;  %8130 = vmatprep.mubr.msk.bf16.mxu0 %vm8782_vm2, %v8781_v5  ;;  %v1835_v10 = vld [vmem:[#allocation2 + $0x91] sm:$0xff] }
 0x17a   : > { %v7874_v38 = vpop.f32.mrf.mxu1  ;;  %v7904_v17 = vpop.f32.mrf.mxu0 }
 0x17b   : > { %1658 = vst.msk [vmem:[#allocation2 + $0xe0] sm:$0xff] %vm340_vm1, %v1628_v11  ;;  %1889 = vst.msk [vmem:[#allocation2 + $0x61] sm:$0xff] %vm340_vm1, %v1859_v14 }
 0x17c   : > { %v1559_v18 = vpop.f32.mrf.mxu1  ;;  %v1743_v21 = vpop.f32.mrf.mxu0 }
 0x17d   : > { %v1629_v22 = vadd.f32 %v1599_v19, %v1559_v18  ;;  %v1860_v24 = vadd.f32 %v1830_v12, %v1743_v21  ;;  %v1836_v21 = vld [vmem:[#allocation2 + $0x99] sm:$0x7f] }
 0x17e   : > { %v7875_v25 = vpop.f32.mrf.mxu1  ;;  %v7905_v26 = vpop.f32.mrf.mxu0 }
 0x17f   : > { %1659 = vst.msk [vmem:[#allocation2 + $0xe8] sm:$0xff] %vm340_vm1, %v1629_v22 }
 0x180   : > { %1890 = vst.msk [vmem:[#allocation2 + $0x69] sm:$0x7f] %vm856_vm3, %v1860_v24  ;;  %v1564_v27 = vpop.f32.mrf.mxu1  ;;  %v1748_v29 = vpop.f32.mrf.mxu0  ;;  %8101 = vmatmul.mubr.msk.bf16.gmra.mxu1 %vm340_vm1, %v9390_v49  ;;  %8131 = vmatmul.mubr.msk.bf16.vlgmr.msra.gmra.mxu0 %vm340_vm1, %v8772_v35  ;;  %v2070_v24 = vld [vmem:[#allocation2 + $0x28] sm:$0x7f] }
 0x181   : > { %v1630_v30 = vadd.f32 %v1600_v28, %v1564_v27  ;;  %v1861_v32 = vadd.f32 %v1831_v2, %v1748_v29  ;;  %8104 = vmatprep.mubr.msk.bf16.mxu1 %vm8782_vm2, %v8781_v5  ;;  %8134 = vmatprep.mubr.msk.bf16.mxu0 %vm8782_vm2, %v8781_v5  ;;  %v2069_v27 = vld [vmem:[#allocation2 + $0x20] sm:$0xff] }
 0x182   : > { %v7878_v44 = vpop.f32.mrf.mxu1  ;;  %v7908_v37 = vpop.f32.mrf.mxu0 }
 0x183   : > { %1660 = vst.msk [vmem:[#allocation2 + $0xf0] sm:$0xff] %vm340_vm1, %v1630_v30  ;;  %1891 = vst.msk [vmem:[#allocation2 + $0x71] sm:$0xff] %vm340_vm1, %v1861_v32  ;;  %v1837_v30 = vld [vmem:[#allocation2 + $0xa1] sm:$0xff] }
 0x184   : > { %v1567_v42 = vpop.f32.mrf.mxu1  ;;  %v1751_v40 = vpop.f32.mrf.mxu0 }
 0x185   : > { %v1631_v46 = vadd.f32 %v1601_v48, %v1567_v42  ;;  %v1862_v51 = vadd.f32 %v1832_v63, %v1751_v40  ;;  %v1838_v63 = vld [vmem:[#allocation2 + $0xa9] sm:$0x7f] }
 0x186   : > { %v7879_v53 = vpop.f32.mrf.mxu1  ;;  %v7909_v33 = vpop.f32.mrf.mxu0 }
 0x187   : > { %1661 = vst.msk [vmem:[#allocation2 + $0xf8] sm:$0xff] %vm340_vm1, %v1631_v46  ;;  %v2072_v53 = vld [vmem:[#allocation2 + $0x38] sm:$0x7f] }
 0x188   : > { %1892 = vst.msk [vmem:[#allocation2 + $0x79] sm:$0x7f] %vm856_vm3, %v1862_v51  ;;  %v1756_v55 = vpop.f32.mrf.mxu0  ;;  %v1948_v31 = vpop.f32.mrf.mxu1  ;;  %8105 = vmatmul.mubr.msk.bf16.gmra.mxu1 %vm340_vm1, %v9409_v34  ;;  %8135 = vmatmul.mubr.msk.bf16.gmra.mxu0 %vm340_vm1, %v9241_v20 }
 0x189   : > { %v1863_v57 = vadd.f32 %v1833_v56, %v1756_v55  ;;  %8108 = vmatprep.mubr.msk.bf16.mxu1 %vm8782_vm2, %v8781_v5  ;;  %8138 = vmatprep.mubr.msk.bf16.mxu0 %vm8782_vm2, %v8781_v5  ;;  %v2127_v36 = vrot.slane %v1948_v31, 1  ;;  %v2071_v56 = vld [vmem:[#allocation2 + $0x30] sm:$0xff] }
 0x18a   : > { %v7912_v58 = vpop.f32.mrf.mxu0  ;;  %v7946_v59 = vpop.f32.mrf.mxu1 }
 0x18b   : > { %1893 = vst.msk [vmem:[#allocation2 + $0x81] sm:$0xff] %vm340_vm1, %v1863_v57 }
 0x18c   : > { %v1759_v60 = vpop.f32.mrf.mxu0  ;;  %v1951_v62 = vpop.f32.mrf.mxu1 }
 0x18d   : > { %v1864_v0 = vadd.f32 %v1834_v61, %v1759_v60  ;;  %v2128_v1 = vrot.slane %v1951_v62, 1 }
 0x18e   : > { %v7913_v41 = vpop.f32.mrf.mxu0  ;;  %v7947_v20 = vpop.f32.mrf.mxu1 }
 0x18f   : > { %1894 = vst.msk [vmem:[#allocation2 + $0x89] sm:$0x7f] %vm856_vm3, %v1864_v0  ;;  %v2129_v7 = vsel %vm1118_vm4, %v2127_v36, %v2128_v1  ;;  %v2203_v45 = vadd.f32 %v2128_v1, %v2068_v4  ;;  %v1839_v36 = vld [vmem:[#allocation2 + $0xb1] sm:$0xff]  ;;  %v1840_v41 = vld [vmem:[#allocation2 + $0xb9] sm:$0x7f] }
 0x190   : > { %v2202_v8 = vadd.f32 %v2129_v7, %v2067_v43  ;;  %v1764_v9 = vpop.f32.mrf.mxu0  ;;  %v1956_v11 = vpop.f32.mrf.mxu1  ;;  %8109 = vmatmul.mubr.msk.bf16.gmra.mxu1 %vm340_vm1, %v9429_v52  ;;  %8139 = vmatmul.mubr.msk.bf16.gmra.mxu0 %vm340_vm1, %v9263_v47 }
 0x191   : > { %2233 = vst.msk [vmem:[#allocation2 + $0x18] sm:$0x7f] %vm856_vm3, %v2203_v45  ;;  %v1865_v14 = vadd.f32 %v1835_v10, %v1764_v9  ;;  %8112 = vmatprep.mubr.msk.bf16.mxu1 %vm8782_vm2, %v8781_v5  ;;  %8142 = vmatprep.mubr.msk.bf16.mxu0 %vm8782_vm2, %v8781_v5  ;;  %v2130_v18 = vrot.slane %v1956_v11, 1  ;;  %v2073_v11 = vld [vmem:[#allocation2 + $0x40] sm:$0xff] }
 0x192   : > { %2232 = vst.msk [vmem:[#allocation2 + $0x10] sm:$0xff] %vm340_vm1, %v2202_v8  ;;  %v7916_v38 = vpop.f32.mrf.mxu0  ;;  %v7950_v17 = vpop.f32.mrf.mxu1  ;;  %v2074_v8 = vld [vmem:[#allocation2 + $0x48] sm:$0x7f] }
 0x193   : > { %1895 = vst.msk [vmem:[#allocation2 + $0x91] sm:$0xff] %vm340_vm1, %v1865_v14 }
 0x194   : > { %v1767_v19 = vpop.f32.mrf.mxu0  ;;  %v1959_v12 = vpop.f32.mrf.mxu1 }
 0x195   : > { %v1866_v47 = vadd.f32 %v1836_v21, %v1767_v19  ;;  %v2131_v22 = vrot.slane %v1959_v12, 1  ;;  %v1841_v19 = vld [vmem:[#allocation2 + $0xc1] sm:$0xff] }
 0x196   : > { %v7917_v25 = vpop.f32.mrf.mxu0  ;;  %v7951_v26 = vpop.f32.mrf.mxu1 }
 0x197   : > { %1896 = vst.msk [vmem:[#allocation2 + $0x99] sm:$0x7f] %vm856_vm3, %v1866_v47  ;;  %v2132_v28 = vsel %vm1118_vm4, %v2130_v18, %v2131_v22  ;;  %v2205_v29 = vadd.f32 %v2131_v22, %v2070_v24  ;;  %v1842_v26 = vld [vmem:[#allocation2 + $0xc9] sm:$0x7f] }
 0x198   : > { %v2204_v2 = vadd.f32 %v2132_v28, %v2069_v27  ;;  %v1772_v35 = vpop.f32.mrf.mxu0  ;;  %v1964_v32 = vpop.f32.mrf.mxu1  ;;  %8113 = vmatmul.mubr.msk.bf16.gmra.mxu1 %vm340_vm1, %v9444_v6  ;;  %8143 = vmatmul.mubr.msk.bf16.gmra.mxu0 %vm340_vm1, %v9288_v13 }
 0x199   : > { %2235 = vst.msk [vmem:[#allocation2 + $0x28] sm:$0x7f] %vm856_vm3, %v2205_v29  ;;  %v1867_v44 = vadd.f32 %v1837_v30, %v1772_v35  ;;  %8116 = vmatprep.mubr.msk.bf16.mxu1 %vm8782_vm2, %v8781_v5  ;;  %8146 = vmatprep.mubr.msk.bf16.mxu0 %vm8782_vm2, %v8781_v5  ;;  %v2133_v48 = vrot.slane %v1964_v32, 1  ;;  %v2076_v29 = vld [vmem:[#allocation2 + $0x58] sm:$0x7f]  ;;  %v2075_v30 = vld [vmem:[#allocation2 + $0x50] sm:$0xff] }
 0x19a   : > { %2234 = vst.msk [vmem:[#allocation2 + $0x20] sm:$0xff] %vm340_vm1, %v2204_v2  ;;  %v7920_v37 = vpop.f32.mrf.mxu0  ;;  %v7954_v42 = vpop.f32.mrf.mxu1 }
 0x19b   : > { %1897 = vst.msk [vmem:[#allocation2 + $0xa1] sm:$0xff] %vm340_vm1, %v1867_v44 }
 0x19c   : > { %v1775_v40 = vpop.f32.mrf.mxu0  ;;  %v1967_v46 = vpop.f32.mrf.mxu1 }
 0x19d   : > { %v1868_v13 = vadd.f32 %v1838_v63, %v1775_v40  ;;  %v2134_v51 = vrot.slane %v1967_v46, 1 }
 0x19e   : > { %v7921_v33 = vpop.f32.mrf.mxu0  ;;  %v7955_v55 = vpop.f32.mrf.mxu1 }
 0x19f   : > { %1898 = vst.msk [vmem:[#allocation2 + $0xa9] sm:$0x7f] %vm856_vm3, %v1868_v13  ;;  %v2135_v31 = vsel %vm1118_vm4, %v2133_v48, %v2134_v51  ;;  %v2207_v57 = vadd.f32 %v2134_v51, %v2072_v53  ;;  %v1843_v48 = vld [vmem:[#allocation2 + $0xd1] sm:$0xff]  ;;  %v1844_v33 = vld [vmem:[#allocation2 + $0xd9] sm:$0x7f] }
 0x1a0   : > { %v2206_v58 = vadd.f32 %v2135_v31, %v2071_v56  ;;  %v1780_v59 = vpop.f32.mrf.mxu0  ;;  %v1972_v60 = vpop.f32.mrf.mxu1  ;;  %8117 = vmatmul.mubr.msk.bf16.gmra.mxu1 %vm340_vm1, %v9459_v23  ;;  %8147 = vmatmul.mubr.msk.bf16.gmra.mxu0 %vm340_vm1, %v9308_v50  ;;  %v6934_v50 = vld [vmem:[%s11299_s3 + $0x8] sm:$0x3] }
 0x1a1   : > { %2237 = vst.msk [vmem:[#allocation2 + $0x38] sm:$0x7f] %vm856_vm3, %v2207_v57  ;;  %v1869_v61 = vadd.f32 %v1839_v36, %v1780_v59  ;;  %8120 = vmatprep.mubr.msk.bf16.mxu1 %vm8782_vm2, %v8781_v5  ;;  %8150 = vmatprep.mubr.msk.bf16.mxu0 %vm8782_vm2, %v8781_v5  ;;  %v2136_v1 = vrot.slane %v1972_v60, 1  ;;  %v3650_v43 = vsel %vm389_vm0, %v6934_v50, 0  ;;  %v2078_v57 = vld [vmem:[#allocation2 + $0x68] sm:$0x7f] }
 0x1a2   : > { %2236 = vst.msk [vmem:[#allocation2 + $0x30] sm:$0xff] %vm340_vm1, %v2206_v58  ;;  %v7924_v62 = vpop.f32.mrf.mxu0  ;;  %v7958_v0 = vpop.f32.mrf.mxu1  ;;  %8667 = vmatprep.subr.msk.bf16.mxu1 %vm389_vm0, %v6934_v50  ;;  %v2077_v59 = vld [vmem:[#allocation2 + $0x60] sm:$0xff] }
 0x1a3   : > { %1899 = vst.msk [vmem:[#allocation2 + $0xb1] sm:$0xff] %vm340_vm1, %v1869_v61  ;;  %8191 = vmatpush3.bf16.msra.mxu1 %v3650_v43  ;;  %v1845_v0 = vld [vmem:[#allocation2 + $0xe1] sm:$0xff] }
 0x1a4   : > { %v1783_v4 = vpop.f32.mrf.mxu0  ;;  %v1975_v20 = vpop.f32.mrf.mxu1 }
 0x1a5   : > { %v1870_v7 = vadd.f32 %v1840_v41, %v1783_v4  ;;  %v2137_v45 = vrot.slane %v1975_v20, 1 }
 0x1a6   : > { %v7925_v9 = vpop.f32.mrf.mxu0  ;;  %v7959_v10 = vpop.f32.mrf.mxu1 }
 0x1a7   : > { %1900 = vst.msk [vmem:[#allocation2 + $0xb9] sm:$0x7f] %vm856_vm3, %v1870_v7  ;;  %v2138_v14 = vsel %vm1118_vm4, %v2136_v1, %v2137_v45  ;;  %v2209_v38 = vadd.f32 %v2137_v45, %v2074_v8  ;;  %v1846_v7 = vld [vmem:[#allocation2 + $0xe9] sm:$0x7f]  ;;  %v2080_v10 = vld [vmem:[#allocation2 + $0x78] sm:$0x7f] }
 0x1a8   : > { %v2208_v17 = vadd.f32 %v2138_v14, %v2073_v11  ;;  %v1788_v18 = vpop.f32.mrf.mxu0  ;;  %v1980_v21 = vpop.f32.mrf.mxu1  ;;  %8121 = vmatmul.mubr.msk.bf16.gmra.mxu1 %vm340_vm1, %v9474_v39  ;;  %8151 = vmatmul.mubr.msk.bf16.gmra.mxu0 %vm340_vm1, %v9329_v15  ;;  %v2079_v14 = vld [vmem:[#allocation2 + $0x70] sm:$0xff] }
 0x1a9   : > { %2239 = vst.msk [vmem:[#allocation2 + $0x48] sm:$0x7f] %vm856_vm3, %v2209_v38  ;;  %v1871_v12 = vadd.f32 %v1841_v19, %v1788_v18  ;;  %8124 = vmatprep.mubr.msk.bf16.mxu1 %vm8782_vm2, %v8781_v5  ;;  %8154 = vmatprep.mubr.msk.bf16.mxu0 %vm8782_vm2, %v8781_v5  ;;  %v2139_v24 = vrot.slane %v1980_v21, 1  ;;  %v1847_v21 = vld [vmem:[#allocation2 + $0xf1] sm:$0xff] }
 0x1aa   : > { %2238 = vst.msk [vmem:[#allocation2 + $0x40] sm:$0xff] %vm340_vm1, %v2208_v17  ;;  %v7928_v47 = vpop.f32.mrf.mxu0  ;;  %v7962_v22 = vpop.f32.mrf.mxu1 }
 0x1ab   : > { %1901 = vst.msk [vmem:[#allocation2 + $0xc1] sm:$0xff] %vm340_vm1, %v1871_v12 }
 0x1ac   : > { %v1791_v25 = vpop.f32.mrf.mxu0  ;;  %v1983_v27 = vpop.f32.mrf.mxu1 }
 0x1ad   : > { %v1872_v15 = vadd.f32 %v1842_v26, %v1791_v25  ;;  %v2140_v28 = vrot.slane %v1983_v27, 1  ;;  %v1848_v27 = vld [vmem:[#allocation2 + $0xf9] sm:$0x7f] }
 0x1ae   : > { %v7929_v2 = vpop.f32.mrf.mxu0  ;;  %v7963_v35 = vpop.f32.mrf.mxu1 }
 0x1af   : > { %1902 = vst.msk [vmem:[#allocation2 + $0xc9] sm:$0x7f] %vm856_vm3, %v1872_v15  ;;  %v2141_v32 = vsel %vm1118_vm4, %v2139_v24, %v2140_v28  ;;  %v2211_v44 = vadd.f32 %v2140_v28, %v2076_v29  ;;  %v2082_v2 = vld [vmem:[#allocation2 + $0x88] sm:$0x7f] }
 0x1b0   : > { %v2210_v37 = vadd.f32 %v2141_v32, %v2075_v30  ;;  %v1796_v42 = vpop.f32.mrf.mxu0  ;;  %v1988_v40 = vpop.f32.mrf.mxu1  ;;  %8125 = vmatmul.mubr.msk.bf16.gmra.mxu1 %vm340_vm1, %v9489_v3  ;;  %8155 = vmatmul.mubr.msk.bf16.gmra.mxu0 %vm340_vm1, %v9350_v54  ;;  %v2081_v30 = vld [vmem:[#allocation2 + $0x80] sm:$0xff] }
 0x1b1   : > { %2241 = vst.msk [vmem:[#allocation2 + $0x58] sm:$0x7f] %vm856_vm3, %v2211_v44  ;;  %v1873_v63 = vadd.f32 %v1843_v48, %v1796_v42  ;;  %8158 = vmatprep.mubr.msk.bf16.mxu0 %vm8782_vm2, %v8781_v5  ;;  %v2142_v51 = vrot.slane %v1988_v40, 1  ;;  %v2571_v40 = vld [vmem:[#allocation2] sm:$0xff] }
 0x1b2   : > { %2240 = vst.msk [vmem:[#allocation2 + $0x50] sm:$0xff] %vm340_vm1, %v2210_v37  ;;  %v7932_v46 = vpop.f32.mrf.mxu0  ;;  %v7966_v13 = vpop.f32.mrf.mxu1 }
 0x1b3   : > { %1903 = vst.msk [vmem:[#allocation2 + $0xd1] sm:$0xff] %vm340_vm1, %v1873_v63 }
 0x1b4   : > { %v1799_v53 = vpop.f32.mrf.mxu0  ;;  %v1991_v55 = vpop.f32.mrf.mxu1 }
 0x1b5   : > { %v1874_v56 = vadd.f32 %v1844_v33, %v1799_v53  ;;  %v2143_v31 = vrot.slane %v1991_v55, 1  ;;  %v2572_v55 = vld [vmem:[#allocation2 + $0x8] sm:$0xff] }
 0x1b6   : > { %v7933_v54 = vpop.f32.mrf.mxu0  ;;  %v7967_v58 = vpop.f32.mrf.mxu1 }
 0x1b7   : > { %1904 = vst.msk [vmem:[#allocation2 + $0xd9] sm:$0x7f] %vm856_vm3, %v1874_v56  ;;  %v2144_v36 = vsel %vm1118_vm4, %v2142_v51, %v2143_v31  ;;  %v2213_v60 = vadd.f32 %v2143_v31, %v2078_v57  ;;  %v2084_v57 = vld [vmem:[#allocation2 + $0x98] sm:$0x7f]  ;;  %v2083_v58 = vld [vmem:[#allocation2 + $0x90] sm:$0xff] }
 0x1b8   : > { %v2212_v61 = vadd.f32 %v2144_v36, %v2077_v59  ;;  %v1804_v62 = vpop.f32.mrf.mxu0  ;;  %v1996_v1 = vpop.f32.mrf.mxu1  ;;  %8159 = vmatmul.mubr.msk.bf16.gmra.mxu0 %vm340_vm1, %v9370_v16 }
 0x1b9   : > { %2243 = vst.msk [vmem:[#allocation2 + $0x68] sm:$0x7f] %vm856_vm3, %v2213_v60  ;;  %v1875_v50 = vadd.f32 %v1845_v0, %v1804_v62  ;;  %8162 = vmatprep.mubr.msk.bf16.mxu0 %vm8782_vm2, %v8781_v5  ;;  %v2145_v20 = vrot.slane %v1996_v1, 1  ;;  %v2573_v0 = vld [vmem:[#allocation2 + $0x10] sm:$0xff] }
 0x1ba   : > { %2242 = vst.msk [vmem:[#allocation2 + $0x60] sm:$0xff] %vm340_vm1, %v2212_v61  ;;  %v7936_v4 = vpop.f32.mrf.mxu0  ;;  %v7970_v41 = vpop.f32.mrf.mxu1 }
 0x1bb   : > { %1905 = vst.msk [vmem:[#allocation2 + $0xe1] sm:$0xff] %vm340_vm1, %v1875_v50 }
 0x1bc   : > { %v1807_v43 = vpop.f32.mrf.mxu0  ;;  %v1999_v45 = vpop.f32.mrf.mxu1 }
 0x1bd   : > { %v1876_v8 = vadd.f32 %v1846_v7, %v1807_v43  ;;  %v2146_v9 = vrot.slane %v1999_v45, 1  ;;  %v2574_v7 = vld [vmem:[#allocation2 + $0x18] sm:$0xff] }
 0x1be   : > { %v7937_v16 = vpop.f32.mrf.mxu0  ;;  %v7971_v11 = vpop.f32.mrf.mxu1 }
 0x1bf   : > { %1906 = vst.msk [vmem:[#allocation2 + $0xe9] sm:$0x7f] %vm856_vm3, %v1876_v8  ;;  %v2147_v38 = vsel %vm1118_vm4, %v2145_v20, %v2146_v9  ;;  %v2215_v17 = vadd.f32 %v2146_v9, %v2080_v10  ;;  %v2086_v9 = vld [vmem:[#allocation2 + $0xa8] sm:$0x7f]  ;;  %v2085_v16 = vld [vmem:[#allocation2 + $0xa0] sm:$0xff] }
 0x1c0   : > { %v2214_v18 = vadd.f32 %v2147_v38, %v2079_v14  ;;  %v1812_v19 = vpop.f32.mrf.mxu0  ;;  %v2004_v12 = vpop.f32.mrf.mxu1  ;;  %8163 = vmatmul.mubr.msk.bf16.gmra.mxu0 %vm340_vm1, %v9390_v49 }
 0x1c1   : > { %2245 = vst.msk [vmem:[#allocation2 + $0x78] sm:$0x7f] %vm856_vm3, %v2215_v17  ;;  %v1877_v47 = vadd.f32 %v1847_v21, %v1812_v19  ;;  %8166 = vmatprep.mubr.msk.bf16.mxu0 %vm8782_vm2, %v8781_v5  ;;  %v2148_v25 = vrot.slane %v2004_v12, 1  ;;  %v2575_v19 = vld [vmem:[#allocation2 + $0x20] sm:$0xff] }
 0x1c2   : > { %2244 = vst.msk [vmem:[#allocation2 + $0x70] sm:$0xff] %vm340_vm1, %v2214_v18  ;;  %v7940_v22 = vpop.f32.mrf.mxu0  ;;  %v7974_v24 = vpop.f32.mrf.mxu1 }
 0x1c3   : > { %1907 = vst.msk [vmem:[#allocation2 + $0xf1] sm:$0xff] %vm340_vm1, %v1877_v47 }
 0x1c4   : > { %v1815_v26 = vpop.f32.mrf.mxu0  ;;  %v2007_v15 = vpop.f32.mrf.mxu1 }
 0x1c5   : > { %v1878_v28 = vadd.f32 %v1848_v27, %v1815_v26  ;;  %v2149_v29 = vrot.slane %v2007_v15, 1  ;;  %v2576_v26 = vld [vmem:[#allocation2 + $0x28] sm:$0xff] }
 0x1c6   : > { %v7941_v49 = vpop.f32.mrf.mxu0  ;;  %v7975_v35 = vpop.f32.mrf.mxu1 }
 0x1c7   : > { %1908 = vst.msk [vmem:[#allocation2 + $0xf9] sm:$0x7f] %vm856_vm3, %v1878_v28  ;;  %v2150_v32 = vsel %vm1118_vm4, %v2148_v25, %v2149_v29  ;;  %v2217_v44 = vadd.f32 %v2149_v29, %v2082_v2  ;;  %v2088_v28 = vld [vmem:[#allocation2 + $0xb8] sm:$0x7f]  ;;  %v6968_v2 = vld [vmem:[%s11299_s3 + $0x6] sm:$0x3] }
 0x1c8   : > { %v2216_v37 = vadd.f32 %v2150_v32, %v2081_v30  ;;  %v2012_v42 = vpop.f32.mrf.mxu1  ;;  %v2452_v48 = vpop.f32.mrf.mxu0  ;;  %8167 = vmatmul.mubr.msk.bf16.gmra.mxu0 %vm340_vm1, %v9409_v34  ;;  %v2087_v49 = vld [vmem:[#allocation2 + $0xb0] sm:$0xff]  ;;  %8668 = vmatprep.subr.msk.bf16.mxu0 %vm389_vm0, %v6968_v2  ;;  %v3983_v32 = vsel %vm389_vm0, %v6968_v2, 0 }
 0x1c9   : > { %2247 = vst.msk [vmem:[#allocation2 + $0x88] sm:$0x7f] %vm856_vm3, %v2217_v44  ;;  %v2601_v63 = vadd.f32 %v2571_v40, %v2452_v48  ;;  %8170 = vmatprep.mubr.msk.bf16.mxu0 %vm8782_vm2, %v8781_v5  ;;  %v2151_v51 = vrot.slane %v2012_v42, 1  ;;  %v2577_v48 = vld [vmem:[#allocation2 + $0x30] sm:$0xff]  ;;  %8225 = vmatpush3.bf16.msra.mxu0 %v3983_v32 }
 0x1ca   : > { %2246 = vst.msk [vmem:[#allocation2 + $0x80] sm:$0xff] %vm340_vm1, %v2216_v37  ;;  %v7978_v46 = vpop.f32.mrf.mxu1  ;;  %v8008_v13 = vpop.f32.mrf.mxu0  ;;  %8292 = vmatprep.subr.bf16.mxu0 %v8781_v5 }
 0x1cb   : > { %2631 = vst.msk [vmem:[#allocation2] sm:$0xff] %vm340_vm1, %v2601_v63 }
 0x1cc   : > { %v2015_v53 = vpop.f32.mrf.mxu1  ;;  %v2455_v33 = vpop.f32.mrf.mxu0 }
 0x1cd   : > { %v2152_v56 = vrot.slane %v2015_v53, 1  ;;  %v2602_v31 = vadd.f32 %v2572_v55, %v2455_v33  ;;  %v2578_v33 = vld [vmem:[#allocation2 + $0x38] sm:$0xff] }
 0x1ce   : > { %v7979_v34 = vpop.f32.mrf.mxu1  ;;  %v8009_v54 = vpop.f32.mrf.mxu0 }
 0x1cf   : > { %v2153_v59 = vsel %vm1118_vm4, %v2151_v51, %v2152_v56  ;;  %v2219_v36 = vadd.f32 %v2152_v56, %v2084_v57  ;;  %2632 = vst.msk [vmem:[#allocation2 + $0x8] sm:$0xff] %vm340_vm1, %v2602_v31  ;;  %v2090_v56 = vld [vmem:[#allocation2 + $0xc8] sm:$0x7f]  ;;  %v2089_v34 = vld [vmem:[#allocation2 + $0xc0] sm:$0xff] }
 0x1d0   : > { %v2218_v60 = vadd.f32 %v2153_v59, %v2083_v58  ;;  %v2020_v61 = vpop.f32.mrf.mxu1  ;;  %v2460_v62 = vpop.f32.mrf.mxu0  ;;  %8171 = vmatmul.mubr.msk.bf16.gmra.mxu0 %vm340_vm1, %v9429_v52 }
 0x1d1   : > { %2249 = vst.msk [vmem:[#allocation2 + $0x98] sm:$0x7f] %vm856_vm3, %v2219_v36  ;;  %v2603_v1 = vadd.f32 %v2573_v0, %v2460_v62  ;;  %8174 = vmatprep.mubr.msk.bf16.mxu0 %vm8782_vm2, %v8781_v5  ;;  %v2154_v41 = vrot.slane %v2020_v61, 1  ;;  %v2579_v61 = vld [vmem:[#allocation2 + $0x40] sm:$0xff] }
 0x1d2   : > { %2248 = vst.msk [vmem:[#allocation2 + $0x90] sm:$0xff] %vm340_vm1, %v2218_v60  ;;  %v7982_v50 = vpop.f32.mrf.mxu1  ;;  %v8012_v4 = vpop.f32.mrf.mxu0 }
 0x1d3   : > { %2633 = vst.msk [vmem:[#allocation2 + $0x10] sm:$0xff] %vm340_vm1, %v2603_v1 }
 0x1d4   : > { %v2023_v20 = vpop.f32.mrf.mxu1  ;;  %v2463_v43 = vpop.f32.mrf.mxu0 }
 0x1d5   : > { %v2155_v45 = vrot.slane %v2023_v20, 1  ;;  %v2604_v8 = vadd.f32 %v2574_v7, %v2463_v43  ;;  %v2580_v20 = vld [vmem:[#allocation2 + $0x48] sm:$0xff] }
 0x1d6   : > { %v7983_v52 = vpop.f32.mrf.mxu1  ;;  %v8013_v10 = vpop.f32.mrf.mxu0 }
 0x1d7   : > { %v2156_v11 = vsel %vm1118_vm4, %v2154_v41, %v2155_v45  ;;  %v2221_v14 = vadd.f32 %v2155_v45, %v2086_v9  ;;  %2634 = vst.msk [vmem:[#allocation2 + $0x18] sm:$0xff] %vm340_vm1, %v2604_v8  ;;  %v2092_v45 = vld [vmem:[#allocation2 + $0xd8] sm:$0x7f]  ;;  %v2091_v9 = vld [vmem:[#allocation2 + $0xd0] sm:$0xff] }
 0x1d8   : > { %v2220_v38 = vadd.f32 %v2156_v11, %v2085_v16  ;;  %v2028_v17 = vpop.f32.mrf.mxu1  ;;  %v2468_v18 = vpop.f32.mrf.mxu0  ;;  %8175 = vmatmul.mubr.msk.bf16.gmra.mxu0 %vm340_vm1, %v9444_v6 }
 0x1d9   : > { %2251 = vst.msk [vmem:[#allocation2 + $0xa8] sm:$0x7f] %vm856_vm3, %v2221_v14  ;;  %v2605_v21 = vadd.f32 %v2575_v19, %v2468_v18  ;;  %8178 = vmatprep.mubr.msk.bf16.mxu0 %vm8782_vm2, %v8781_v5  ;;  %v2157_v22 = vrot.slane %v2028_v17, 1 }
 0x1da   : > { %2250 = vst.msk [vmem:[#allocation2 + $0xa0] sm:$0xff] %vm340_vm1, %v2220_v38  ;;  %v7986_v12 = vpop.f32.mrf.mxu1  ;;  %v8016_v47 = vpop.f32.mrf.mxu0  ;;  %v2581_v38 = vld [vmem:[#allocation2 + $0x50] sm:$0xff] }
 0x1db   : > { %2635 = vst.msk [vmem:[#allocation2 + $0x20] sm:$0xff] %vm340_vm1, %v2605_v21 }
 0x1dc   : > { %v2031_v24 = vpop.f32.mrf.mxu1  ;;  %v2471_v25 = vpop.f32.mrf.mxu0 }
 0x1dd   : > { %v2158_v27 = vrot.slane %v2031_v24, 1  ;;  %v2606_v15 = vadd.f32 %v2576_v26, %v2471_v25  ;;  %v2094_v26 = vld [vmem:[#allocation2 + $0xe8] sm:$0x7f] }
 0x1de   : > { %v7987_v6 = vpop.f32.mrf.mxu1  ;;  %v8017_v29 = vpop.f32.mrf.mxu0 }
 0x1df   : > { %v2159_v35 = vsel %vm1118_vm4, %v2157_v22, %v2158_v27  ;;  %v2223_v30 = vadd.f32 %v2158_v27, %v2088_v28  ;;  %2636 = vst.msk [vmem:[#allocation2 + $0x28] sm:$0xff] %vm340_vm1, %v2606_v15  ;;  %v2582_v22 = vld [vmem:[#allocation2 + $0x58] sm:$0xff]  ;;  %v2093_v28 = vld [vmem:[#allocation2 + $0xe0] sm:$0xff] }
 0x1e0   : > { %v2222_v44 = vadd.f32 %v2159_v35, %v2087_v49  ;;  %v2036_v37 = vpop.f32.mrf.mxu1  ;;  %v2476_v42 = vpop.f32.mrf.mxu0  ;;  %8179 = vmatmul.mubr.msk.bf16.gmra.mxu0 %vm340_vm1, %v9459_v23  ;;  %v2583_v35 = vld [vmem:[#allocation2 + $0x60] sm:$0xff] }
 0x1e1   : > { %2253 = vst.msk [vmem:[#allocation2 + $0xb8] sm:$0x7f] %vm856_vm3, %v2223_v30  ;;  %v2607_v40 = vadd.f32 %v2577_v48, %v2476_v42  ;;  %8182 = vmatprep.mubr.msk.bf16.mxu0 %vm8782_vm2, %v8781_v5  ;;  %v2160_v13 = vrot.slane %v2036_v37, 1 }
 0x1e2   : > { %2252 = vst.msk [vmem:[#allocation2 + $0xb0] sm:$0xff] %vm340_vm1, %v2222_v44  ;;  %v7990_v63 = vpop.f32.mrf.mxu1  ;;  %v8020_v46 = vpop.f32.mrf.mxu0 }
 0x1e3   : > { %2637 = vst.msk [vmem:[#allocation2 + $0x30] sm:$0xff] %vm340_vm1, %v2607_v40  ;;  %v2584_v40 = vld [vmem:[#allocation2 + $0x68] sm:$0xff] }
 0x1e4   : > { %v2039_v51 = vpop.f32.mrf.mxu1  ;;  %v2479_v53 = vpop.f32.mrf.mxu0 }
 0x1e5   : > { %v2161_v23 = vrot.slane %v2039_v51, 1  ;;  %v2608_v55 = vadd.f32 %v2578_v33, %v2479_v53  ;;  %v2095_v33 = vld [vmem:[#allocation2 + $0xf0] sm:$0xff] }
 0x1e6   : > { %v7991_v31 = vpop.f32.mrf.mxu1  ;;  %v8021_v57 = vpop.f32.mrf.mxu0 }
 0x1e7   : > { %v2162_v54 = vsel %vm1118_vm4, %v2160_v13, %v2161_v23  ;;  %v2225_v58 = vadd.f32 %v2161_v23, %v2090_v56  ;;  %2638 = vst.msk [vmem:[#allocation2 + $0x38] sm:$0xff] %vm340_vm1, %v2608_v55  ;;  %v2096_v13 = vld [vmem:[#allocation2 + $0xf8] sm:$0x7f]  ;;  %v2585_v57 = vld [vmem:[#allocation2 + $0x70] sm:$0xff] }
 0x1e8   : > { %v2224_v59 = vadd.f32 %v2162_v54, %v2089_v34  ;;  %v2044_v36 = vpop.f32.mrf.mxu1  ;;  %v2484_v60 = vpop.f32.mrf.mxu0  ;;  %8183 = vmatmul.mubr.msk.bf16.gmra.mxu0 %vm340_vm1, %v9474_v39  ;;  %v2819_v54 = vld [vmem:[#allocation2 + $0x1] sm:$0xff] }
 0x1e9   : > { %2255 = vst.msk [vmem:[#allocation2 + $0xc8] sm:$0x7f] %vm856_vm3, %v2225_v58  ;;  %v2609_v62 = vadd.f32 %v2579_v61, %v2484_v60  ;;  %8186 = vmatprep.mubr.msk.bf16.mxu0 %vm8782_vm2, %v8781_v5  ;;  %v2163_v50 = vrot.slane %v2044_v36, 1 }
 0x1ea   : > { %2254 = vst.msk [vmem:[#allocation2 + $0xc0] sm:$0xff] %vm340_vm1, %v2224_v59  ;;  %v7994_v0 = vpop.f32.mrf.mxu1  ;;  %v8024_v1 = vpop.f32.mrf.mxu0 }
 0x1eb   : > { %2639 = vst.msk [vmem:[#allocation2 + $0x40] sm:$0xff] %vm340_vm1, %v2609_v62  ;;  %v2586_v62 = vld [vmem:[#allocation2 + $0x78] sm:$0xff]  ;;  %v2820_v1 = vld [vmem:[#allocation2 + $0x9] sm:$0x7f] }
 0x1ec   : > { %v2047_v4 = vpop.f32.mrf.mxu1  ;;  %v2487_v41 = vpop.f32.mrf.mxu0 }
 0x1ed   : > { %v2164_v43 = vrot.slane %v2047_v4, 1  ;;  %v2610_v7 = vadd.f32 %v2580_v20, %v2487_v41 }
 0x1ee   : > { %v7995_v39 = vpop.f32.mrf.mxu1  ;;  %v8025_v8 = vpop.f32.mrf.mxu0 }
 0x1ef   : > { %v2165_v52 = vsel %vm1118_vm4, %v2163_v50, %v2164_v43  ;;  %v2227_v10 = vadd.f32 %v2164_v43, %v2092_v45  ;;  %2640 = vst.msk [vmem:[#allocation2 + $0x48] sm:$0xff] %vm340_vm1, %v2610_v7  ;;  %v2587_v7 = vld [vmem:[#allocation2 + $0x80] sm:$0xff]  ;;  %v2821_v39 = vld [vmem:[#allocation2 + $0x11] sm:$0xff] }
 0x1f0   : > { %v2226_v16 = vadd.f32 %v2165_v52, %v2091_v9  ;;  %v2052_v11 = vpop.f32.mrf.mxu1  ;;  %v2492_v14 = vpop.f32.mrf.mxu0  ;;  %8187 = vmatmul.mubr.msk.bf16.gmra.mxu0 %vm340_vm1, %v9489_v3 }
 0x1f1   : > { %2257 = vst.msk [vmem:[#allocation2 + $0xd8] sm:$0x7f] %vm856_vm3, %v2227_v10  ;;  %v2611_v17 = vadd.f32 %v2581_v38, %v2492_v14  ;;  %v2166_v21 = vrot.slane %v2052_v11, 1 }
 0x1f2   : > { %2256 = vst.msk [vmem:[#allocation2 + $0xd0] sm:$0xff] %vm340_vm1, %v2226_v16  ;;  %v7998_v18 = vpop.f32.mrf.mxu1  ;;  %v8028_v19 = vpop.f32.mrf.mxu0 }
 0x1f3   : > { %2641 = vst.msk [vmem:[#allocation2 + $0x50] sm:$0xff] %vm340_vm1, %v2611_v17 }
 0x1f4   : > { %v2055_v12 = vpop.f32.mrf.mxu1  ;;  %v2495_v47 = vpop.f32.mrf.mxu0 }
 0x1f5   : > { %v2167_v24 = vrot.slane %v2055_v12, 1  ;;  %v2612_v25 = vadd.f32 %v2582_v22, %v2495_v47  ;;  %v2822_v47 = vld [vmem:[#allocation2 + $0x19] sm:$0x7f] }
 0x1f6   : > { %v7999_v27 = vpop.f32.mrf.mxu1  ;;  %v8029_v15 = vpop.f32.mrf.mxu0 }
 0x1f7   : > { %v2168_v3 = vsel %vm1118_vm4, %v2166_v21, %v2167_v24  ;;  %v2229_v6 = vadd.f32 %v2167_v24, %v2094_v26  ;;  %2642 = vst.msk [vmem:[#allocation2 + $0x58] sm:$0xff] %vm340_vm1, %v2612_v25  ;;  %v2588_v21 = vld [vmem:[#allocation2 + $0x88] sm:$0xff]  ;;  %v2589_v15 = vld [vmem:[#allocation2 + $0x90] sm:$0xff] }
 0x1f8   : > { %v2228_v29 = vadd.f32 %v2168_v3, %v2093_v28  ;;  %v2060_v2 = vpop.f32.mrf.mxu1  ;;  %v2500_v49 = vpop.f32.mrf.mxu0  ;;  %v2823_v3 = vld [vmem:[#allocation2 + $0x21] sm:$0xff] }
 0x1f9   : > { %2259 = vst.msk [vmem:[#allocation2 + $0xe8] sm:$0x7f] %vm856_vm3, %v2229_v6  ;;  %v2613_v30 = vadd.f32 %v2583_v35, %v2500_v49  ;;  %v2169_v37 = vrot.slane %v2060_v2, 1  ;;  %v2590_v35 = vld [vmem:[#allocation2 + $0x98] sm:$0xff] }
 0x1fa   : > { %2258 = vst.msk [vmem:[#allocation2 + $0xe0] sm:$0xff] %vm340_vm1, %v2228_v29  ;;  %v8002_v32 = vpop.f32.mrf.mxu1  ;;  %v8032_v44 = vpop.f32.mrf.mxu0 }
 0x1fb   : > { %2643 = vst.msk [vmem:[#allocation2 + $0x60] sm:$0xff] %vm340_vm1, %v2613_v30  ;;  %v2824_v44 = vld [vmem:[#allocation2 + $0x29] sm:$0x7f] }
 0x1fc   : > { %v2063_v42 = vpop.f32.mrf.mxu1  ;;  %v2503_v48 = vpop.f32.mrf.mxu0 }
 0x1fd   : > { %v2170_v63 = vrot.slane %v2063_v42, 1  ;;  %v2614_v46 = vadd.f32 %v2584_v40, %v2503_v48 }
 0x1fe   : > { %v8003_v51 = vpop.f32.mrf.mxu1  ;;  %v8033_v53 = vpop.f32.mrf.mxu0 }
 0x1ff   : > { %v2171_v23 = vsel %vm1118_vm4, %v2169_v37, %v2170_v63  ;;  %v2231_v55 = vadd.f32 %v2170_v63, %v2096_v13  ;;  %2644 = vst.msk [vmem:[#allocation2 + $0x68] sm:$0xff] %vm340_vm1, %v2614_v46  ;;  %v2591_v46 = vld [vmem:[#allocation2 + $0xa0] sm:$0xff]  ;;  %v2825_v51 = vld [vmem:[#allocation2 + $0x31] sm:$0xff] }
 0x200   : > { %v2230_v56 = vadd.f32 %v2171_v23, %v2095_v33  ;;  %v2508_v31 = vpop.f32.mrf.mxu0  ;;  %v2700_v34 = vpop.f32.mrf.mxu1 }
 0x201   : > { %2261 = vst.msk [vmem:[#allocation2 + $0xf8] sm:$0x7f] %vm856_vm3, %v2231_v55  ;;  %v2615_v58 = vadd.f32 %v2585_v57, %v2508_v31  ;;  %v2849_v59 = vadd.f32 %v2819_v54, %v2700_v34  ;;  %v2592_v31 = vld [vmem:[#allocation2 + $0xa8] sm:$0xff]  ;;  %v2826_v34 = vld [vmem:[#allocation2 + $0x39] sm:$0x7f] }
 0x202   : > { %2260 = vst.msk [vmem:[#allocation2 + $0xf0] sm:$0xff] %vm340_vm1, %v2230_v56  ;;  %v8036_v36 = vpop.f32.mrf.mxu0  ;;  %v8070_v60 = vpop.f32.mrf.mxu1 }
 0x203   : > { %2645 = vst.msk [vmem:[#allocation2 + $0x70] sm:$0xff] %vm340_vm1, %v2615_v58  ;;  %2879 = vst.msk [vmem:[#allocation2 + $0x1] sm:$0xff] %vm340_vm1, %v2849_v59  ;;  %v9700_v60 = vld [vmem:[%s11299_s3 + $0xa] sm:$0x3] }
 0x204   : > { %v2511_v61 = vpop.f32.mrf.mxu0  ;;  %v2703_v0 = vpop.f32.mrf.mxu1  ;;  %8669 = vmatprep.subr.msk.bf16.mxu1 %vm389_vm0, %v9700_v60 }
 0x205   : > { %v2616_v50 = vadd.f32 %v2586_v62, %v2511_v61  ;;  %v2850_v4 = vadd.f32 %v2820_v1, %v2703_v0  ;;  %v2593_v62 = vld [vmem:[#allocation2 + $0xb0] sm:$0xff]  ;;  %v2827_v1 = vld [vmem:[#allocation2 + $0x41] sm:$0xff] }
 0x206   : > { %v8037_v41 = vpop.f32.mrf.mxu0  ;;  %v8071_v20 = vpop.f32.mrf.mxu1 }
 0x207   : > { %2646 = vst.msk [vmem:[#allocation2 + $0x78] sm:$0xff] %vm340_vm1, %v2616_v50 }
 0x208   : > { %2880 = vst.msk [vmem:[#allocation2 + $0x9] sm:$0x7f] %vm856_vm3, %v2850_v4  ;;  %v2516_v43 = vpop.f32.mrf.mxu0  ;;  %v2708_v45 = vpop.f32.mrf.mxu1  ;;  %v3293_v8 = vld [vmem:[#allocation2 + $0xf8] sm:$0xff] }
 0x209   : > { %v3292_v9 = vld [vmem:[#allocation2 + $0xf0] sm:$0xff]  ;;  %v2617_v52 = vadd.f32 %v2587_v7, %v2516_v43  ;;  %v2851_v10 = vadd.f32 %v2821_v39, %v2708_v45  ;;  %v3325_v16 = vmax.f32 %v3293_v8, 0.0  ;;  %v2594_v7 = vld [vmem:[#allocation2 + $0xb8] sm:$0xff]  ;;  %v2828_v39 = vld [vmem:[#allocation2 + $0x49] sm:$0x7f] }
 0x20a   : > { %v3324_v11 = vmax.f32 %v3292_v9, 0.0  ;;  %v8040_v14 = vpop.f32.mrf.mxu0  ;;  %v8074_v38 = vpop.f32.mrf.mxu1 }
 0x20b   : > { %2647 = vst.msk [vmem:[#allocation2 + $0x80] sm:$0xff] %vm340_vm1, %v2617_v52  ;;  %2881 = vst.msk [vmem:[#allocation2 + $0x11] sm:$0xff] %vm340_vm1, %v2851_v10  ;;  %v7342_v17 = vpack.c.bf16 %v3325_v16, %v3325_v16  ;;  %v2829_v38 = vld [vmem:[#allocation2 + $0x51] sm:$0xff] }
 0x20c   : > { %v7341_v18 = vpack.c.bf16 %v3324_v11, %v3324_v11  ;;  %v2519_v19 = vpop.f32.mrf.mxu0  ;;  %v2711_v12 = vpop.f32.mrf.mxu1  ;;  %v2595_v11 = vld [vmem:[#allocation2 + $0xc0] sm:$0xff] }
 0x20d   : > { %v2618_v22 = vadd.f32 %v2588_v21, %v2519_v19  ;;  %v2852_v24 = vadd.f32 %v2822_v47, %v2711_v12  ;;  %3486 = vst.msk [vmem:[#allocation3 + $0x7c] sm:$0xf] %vm3454_vm5, %v7342_v17  ;;  %v2596_v47 = vld [vmem:[#allocation2 + $0xc8] sm:$0xff] }
 0x20e   : > { %v8041_v25 = vpop.f32.mrf.mxu0  ;;  %v8075_v26 = vpop.f32.mrf.mxu1  ;;  %3485 = vst.msk [vmem:[#allocation3 + $0x78] sm:$0xf] %vm3454_vm5, %v7341_v18 }
 0x20f   : > { %2648 = vst.msk [vmem:[#allocation2 + $0x88] sm:$0xff] %vm340_vm1, %v2618_v22 }
 0x210   : > { %2882 = vst.msk [vmem:[#allocation2 + $0x19] sm:$0x7f] %vm856_vm3, %v2852_v24  ;;  %v2524_v27 = vpop.f32.mrf.mxu0  ;;  %v2716_v28 = vpop.f32.mrf.mxu1  ;;  %v2830_v24 = vld [vmem:[#allocation2 + $0x59] sm:$0x7f] }
 0x211   : > { %v2619_v6 = vadd.f32 %v2589_v15, %v2524_v27  ;;  %v2853_v29 = vadd.f32 %v2823_v3, %v2716_v28  ;;  %v2597_v3 = vld [vmem:[#allocation2 + $0xd0] sm:$0xff] }
 0x212   : > { %v8044_v2 = vpop.f32.mrf.mxu0  ;;  %v8078_v49 = vpop.f32.mrf.mxu1 }
 0x213   : > { %2649 = vst.msk [vmem:[#allocation2 + $0x90] sm:$0xff] %vm340_vm1, %v2619_v6  ;;  %2883 = vst.msk [vmem:[#allocation2 + $0x21] sm:$0xff] %vm340_vm1, %v2853_v29  ;;  %v2831_v29 = vld [vmem:[#allocation2 + $0x61] sm:$0xff] }
 0x214   : > { %v2527_v30 = vpop.f32.mrf.mxu0  ;;  %v2719_v32 = vpop.f32.mrf.mxu1 }
 0x215   : > { %v2620_v37 = vadd.f32 %v2590_v35, %v2527_v30  ;;  %v2854_v42 = vadd.f32 %v2824_v44, %v2719_v32  ;;  %v2598_v44 = vld [vmem:[#allocation2 + $0xd8] sm:$0xff] }
 0x216   : > { %v8045_v48 = vpop.f32.mrf.mxu0  ;;  %v8079_v40 = vpop.f32.mrf.mxu1 }
 0x217   : > { %2650 = vst.msk [vmem:[#allocation2 + $0x98] sm:$0xff] %vm340_vm1, %v2620_v37 }
 0x218   : > { %2884 = vst.msk [vmem:[#allocation2 + $0x29] sm:$0x7f] %vm856_vm3, %v2854_v42  ;;  %v2532_v63 = vpop.f32.mrf.mxu0  ;;  %v2724_v13 = vpop.f32.mrf.mxu1  ;;  %v2832_v42 = vld [vmem:[#allocation2 + $0x69] sm:$0x7f] }
 0x219   : > { %v2621_v53 = vadd.f32 %v2591_v46, %v2532_v63  ;;  %v2855_v33 = vadd.f32 %v2825_v51, %v2724_v13  ;;  %v2599_v51 = vld [vmem:[#allocation2 + $0xe0] sm:$0xff] }
 0x21a   : > { %v8048_v23 = vpop.f32.mrf.mxu0  ;;  %v8082_v55 = vpop.f32.mrf.mxu1 }
 0x21b   : > { %2651 = vst.msk [vmem:[#allocation2 + $0xa0] sm:$0xff] %vm340_vm1, %v2621_v53  ;;  %2885 = vst.msk [vmem:[#allocation2 + $0x31] sm:$0xff] %vm340_vm1, %v2855_v33  ;;  %v2833_v33 = vld [vmem:[#allocation2 + $0x71] sm:$0xff] }
 0x21c   : > { %v2535_v56 = vpop.f32.mrf.mxu0  ;;  %v2727_v57 = vpop.f32.mrf.mxu1 }
 0x21d   : > { %v2622_v54 = vadd.f32 %v2592_v31, %v2535_v56  ;;  %v2856_v58 = vadd.f32 %v2826_v34, %v2727_v57  ;;  %v2600_v34 = vld [vmem:[#allocation2 + $0xe8] sm:$0xff] }
 0x21e   : > { %v8049_v59 = vpop.f32.mrf.mxu0  ;;  %v8083_v36 = vpop.f32.mrf.mxu1 }
 0x21f   : > { %2652 = vst.msk [vmem:[#allocation2 + $0xa8] sm:$0xff] %vm340_vm1, %v2622_v54 }
 0x220   : > { %2886 = vst.msk [vmem:[#allocation2 + $0x39] sm:$0x7f] %vm856_vm3, %v2856_v58  ;;  %v2540_v61 = vpop.f32.mrf.mxu0  ;;  %v2732_v0 = vpop.f32.mrf.mxu1  ;;  %v2834_v58 = vld [vmem:[#allocation2 + $0x79] sm:$0x7f] }
 0x221   : > { %v2623_v50 = vadd.f32 %v2593_v62, %v2540_v61  ;;  %v2857_v4 = vadd.f32 %v2827_v1, %v2732_v0  ;;  %v2835_v1 = vld [vmem:[#allocation2 + $0x81] sm:$0xff] }
 0x222   : > { %v8052_v41 = vpop.f32.mrf.mxu0  ;;  %v8086_v20 = vpop.f32.mrf.mxu1 }
 0x223   : > { %2653 = vst.msk [vmem:[#allocation2 + $0xb0] sm:$0xff] %vm340_vm1, %v2623_v50  ;;  %2887 = vst.msk [vmem:[#allocation2 + $0x41] sm:$0xff] %vm340_vm1, %v2857_v4 }
 0x224   : > { %v2543_v43 = vpop.f32.mrf.mxu0  ;;  %v2735_v45 = vpop.f32.mrf.mxu1 }
 0x225   : > { %v2624_v8 = vadd.f32 %v2594_v7, %v2543_v43  ;;  %v2858_v9 = vadd.f32 %v2828_v39, %v2735_v45  ;;  %v2836_v7 = vld [vmem:[#allocation2 + $0x89] sm:$0x7f] }
 0x226   : > { %v8053_v52 = vpop.f32.mrf.mxu0  ;;  %v8087_v10 = vpop.f32.mrf.mxu1 }
 0x227   : > { %2654 = vst.msk [vmem:[#allocation2 + $0xb8] sm:$0xff] %vm340_vm1, %v2624_v8  ;;  %v3068_v52 = vld [vmem:[#allocation2 + $0x8] sm:$0x7f] }
 0x228   : > { %2888 = vst.msk [vmem:[#allocation2 + $0x49] sm:$0x7f] %vm856_vm3, %v2858_v9  ;;  %v2548_v16 = vpop.f32.mrf.mxu0  ;;  %v2740_v14 = vpop.f32.mrf.mxu1 }
 0x229   : > { %v2625_v17 = vadd.f32 %v2595_v11, %v2548_v16  ;;  %v2859_v18 = vadd.f32 %v2829_v38, %v2740_v14  ;;  %v3067_v11 = vld [vmem:[#allocation2] sm:$0xff] }
 0x22a   : > { %v8056_v19 = vpop.f32.mrf.mxu0  ;;  %v8090_v21 = vpop.f32.mrf.mxu1 }
 0x22b   : > { %2655 = vst.msk [vmem:[#allocation2 + $0xc0] sm:$0xff] %vm340_vm1, %v2625_v17  ;;  %2889 = vst.msk [vmem:[#allocation2 + $0x51] sm:$0xff] %vm340_vm1, %v2859_v18  ;;  %v2837_v19 = vld [vmem:[#allocation2 + $0x91] sm:$0xff] }
 0x22c   : > { %v2551_v12 = vpop.f32.mrf.mxu0  ;;  %v2743_v22 = vpop.f32.mrf.mxu1 }
 0x22d   : > { %v2626_v25 = vadd.f32 %v2596_v47, %v2551_v12  ;;  %v2860_v26 = vadd.f32 %v2830_v24, %v2743_v22 }
 0x22e   : > { %v8057_v27 = vpop.f32.mrf.mxu0  ;;  %v8091_v15 = vpop.f32.mrf.mxu1 }
 0x22f   : > { %2656 = vst.msk [vmem:[#allocation2 + $0xc8] sm:$0xff] %vm340_vm1, %v2626_v25  ;;  %v2838_v25 = vld [vmem:[#allocation2 + $0x99] sm:$0x7f] }
 0x230   : > { %2890 = vst.msk [vmem:[#allocation2 + $0x59] sm:$0x7f] %vm856_vm3, %v2860_v26  ;;  %v2556_v28 = vpop.f32.mrf.mxu0  ;;  %v2748_v6 = vpop.f32.mrf.mxu1 }
 0x231   : > { %v2627_v2 = vadd.f32 %v2597_v3, %v2556_v28  ;;  %v2861_v49 = vadd.f32 %v2831_v29, %v2748_v6  ;;  %v3070_v3 = vld [vmem:[#allocation2 + $0x18] sm:$0x7f] }
 0x232   : > { %v8060_v35 = vpop.f32.mrf.mxu0  ;;  %v8094_v30 = vpop.f32.mrf.mxu1 }
 0x233   : > { %2657 = vst.msk [vmem:[#allocation2 + $0xd0] sm:$0xff] %vm340_vm1, %v2627_v2  ;;  %2891 = vst.msk [vmem:[#allocation2 + $0x61] sm:$0xff] %vm340_vm1, %v2861_v49  ;;  %v3069_v2 = vld [vmem:[#allocation2 + $0x10] sm:$0xff] }
 0x234   : > { %v2559_v32 = vpop.f32.mrf.mxu0  ;;  %v2751_v37 = vpop.f32.mrf.mxu1 }
 0x235   : > { %v2628_v48 = vadd.f32 %v2598_v44, %v2559_v32  ;;  %v2862_v40 = vadd.f32 %v2832_v42, %v2751_v37  ;;  %v2839_v44 = vld [vmem:[#allocation2 + $0xa1] sm:$0xff] }
 0x236   : > { %v8061_v63 = vpop.f32.mrf.mxu0  ;;  %v8095_v46 = vpop.f32.mrf.mxu1 }
 0x237   : > { %2658 = vst.msk [vmem:[#allocation2 + $0xd8] sm:$0xff] %vm340_vm1, %v2628_v48 }
 0x238   : > { %2892 = vst.msk [vmem:[#allocation2 + $0x69] sm:$0x7f] %vm856_vm3, %v2862_v40  ;;  %v2564_v13 = vpop.f32.mrf.mxu0  ;;  %v2756_v53 = vpop.f32.mrf.mxu1 }
 0x239   : > { %v2629_v23 = vadd.f32 %v2599_v51, %v2564_v13  ;;  %v2863_v55 = vadd.f32 %v2833_v33, %v2756_v53 }
 0x23a   : > { %v8064_v56 = vpop.f32.mrf.mxu0  ;;  %v8098_v31 = vpop.f32.mrf.mxu1 }
 0x23b   : > { %2659 = vst.msk [vmem:[#allocation2 + $0xe0] sm:$0xff] %vm340_vm1, %v2629_v23  ;;  %2893 = vst.msk [vmem:[#allocation2 + $0x71] sm:$0xff] %vm340_vm1, %v2863_v55  ;;  %v2840_v23 = vld [vmem:[#allocation2 + $0xa9] sm:$0x7f] }
 0x23c   : > { %v2567_v57 = vpop.f32.mrf.mxu0  ;;  %v2759_v54 = vpop.f32.mrf.mxu1 }
 0x23d   : > { %v2630_v59 = vadd.f32 %v2600_v34, %v2567_v57  ;;  %v2864_v36 = vadd.f32 %v2834_v58, %v2759_v54  ;;  %v3072_v54 = vld [vmem:[#allocation2 + $0x28] sm:$0x7f] }
 0x23e   : > { %v8065_v61 = vpop.f32.mrf.mxu0  ;;  %v8099_v62 = vpop.f32.mrf.mxu1 }
 0x23f   : > { %2660 = vst.msk [vmem:[#allocation2 + $0xe8] sm:$0xff] %vm340_vm1, %v2630_v59 }
 0x240   : > { %2894 = vst.msk [vmem:[#allocation2 + $0x79] sm:$0x7f] %vm856_vm3, %v2864_v36  ;;  %v2764_v0 = vpop.f32.mrf.mxu1  ;;  %v2948_v50 = vpop.f32.mrf.mxu0  ;;  %v3071_v36 = vld [vmem:[#allocation2 + $0x20] sm:$0xff] }
 0x241   : > { %v2865_v4 = vadd.f32 %v2835_v1, %v2764_v0  ;;  %v3127_v39 = vrot.slane %v2948_v50, 1 }
 0x242   : > { %v8102_v41 = vpop.f32.mrf.mxu1  ;;  %v8132_v20 = vpop.f32.mrf.mxu0 }
 0x243   : > { %2895 = vst.msk [vmem:[#allocation2 + $0x81] sm:$0xff] %vm340_vm1, %v2865_v4  ;;  %v2841_v4 = vld [vmem:[#allocation2 + $0xb1] sm:$0xff] }
 0x244   : > { %v2767_v43 = vpop.f32.mrf.mxu1  ;;  %v2951_v45 = vpop.f32.mrf.mxu0 }
 0x245   : > { %v2866_v8 = vadd.f32 %v2836_v7, %v2767_v43  ;;  %v3128_v9 = vrot.slane %v2951_v45, 1 }
 0x246   : > { %v8103_v10 = vpop.f32.mrf.mxu1  ;;  %v8133_v16 = vpop.f32.mrf.mxu0 }
 0x247   : > { %2896 = vst.msk [vmem:[#allocation2 + $0x89] sm:$0x7f] %vm856_vm3, %v2866_v8  ;;  %v3129_v14 = vsel %vm1118_vm4, %v3127_v39, %v3128_v9  ;;  %v3203_v38 = vadd.f32 %v3128_v9, %v3068_v52  ;;  %v2842_v52 = vld [vmem:[#allocation2 + $0xb9] sm:$0x7f] }
 0x248   : > { %v3202_v17 = vadd.f32 %v3129_v14, %v3067_v11  ;;  %v2772_v18 = vpop.f32.mrf.mxu1  ;;  %v2956_v21 = vpop.f32.mrf.mxu0 }
 0x249   : > { %3233 = vst.msk [vmem:[#allocation2 + $0x8] sm:$0x7f] %vm856_vm3, %v3203_v38  ;;  %v2867_v12 = vadd.f32 %v2837_v19, %v2772_v18  ;;  %v3130_v27 = vrot.slane %v2956_v21, 1  ;;  %v3074_v19 = vld [vmem:[#allocation2 + $0x38] sm:$0x7f] }
 0x24a   : > { %3232 = vst.msk [vmem:[#allocation2] sm:$0xff] %vm340_vm1, %v3202_v17  ;;  %v8106_v47 = vpop.f32.mrf.mxu1  ;;  %v8136_v22 = vpop.f32.mrf.mxu0 }
 0x24b   : > { %2897 = vst.msk [vmem:[#allocation2 + $0x91] sm:$0xff] %vm340_vm1, %v2867_v12  ;;  %v3073_v47 = vld [vmem:[#allocation2 + $0x30] sm:$0xff] }
 0x24c   : > { %v2775_v24 = vpop.f32.mrf.mxu1  ;;  %v2959_v26 = vpop.f32.mrf.mxu0 }
 0x24d   : > { %v2868_v15 = vadd.f32 %v2838_v25, %v2775_v24  ;;  %v3131_v28 = vrot.slane %v2959_v26, 1 }
 0x24e   : > { %v8107_v6 = vpop.f32.mrf.mxu1  ;;  %v8137_v29 = vpop.f32.mrf.mxu0 }
 0x24f   : > { %2898 = vst.msk [vmem:[#allocation2 + $0x99] sm:$0x7f] %vm856_vm3, %v2868_v15  ;;  %v3132_v49 = vsel %vm1118_vm4, %v3130_v27, %v3131_v28  ;;  %v3205_v35 = vadd.f32 %v3131_v28, %v3070_v3  ;;  %v2843_v27 = vld [vmem:[#allocation2 + $0xc1] sm:$0xff] }
 0x250   : > { %v3204_v30 = vadd.f32 %v3132_v49, %v3069_v2  ;;  %v2780_v32 = vpop.f32.mrf.mxu1  ;;  %v2964_v37 = vpop.f32.mrf.mxu0  ;;  %v3263_v42 = vld [vmem:[#allocation2 + $0x8] sm:$0xff]  ;;  %v7002_v3 = vld [vmem:[%s11299_s3 + $0x2] sm:$0x3] }
 0x251   : > { %3235 = vst.msk [vmem:[#allocation2 + $0x18] sm:$0x7f] %vm856_vm3, %v3205_v35  ;;  %v2869_v48 = vadd.f32 %v2839_v44, %v2780_v32  ;;  %v3262_v40 = vld [vmem:[#allocation2] sm:$0xff]  ;;  %v3295_v63 = vmax.f32 %v3263_v42, 0.0  ;;  %v3133_v31 = vrot.slane %v2964_v37, 1  ;;  %v4245_v42 = vsel %vm389_vm0, %v9700_v60, 0 }
 0x252   : > { %3234 = vst.msk [vmem:[#allocation2 + $0x10] sm:$0xff] %vm340_vm1, %v3204_v30  ;;  %v8110_v46 = vpop.f32.mrf.mxu1  ;;  %v8140_v13 = vpop.f32.mrf.mxu0  ;;  %v3294_v51 = vmax.f32 %v3262_v40, 0.0  ;;  %v2844_v44 = vld [vmem:[#allocation2 + $0xc9] sm:$0x7f] }
 0x253   : > { %2899 = vst.msk [vmem:[#allocation2 + $0xa1] sm:$0xff] %vm340_vm1, %v2869_v48  ;;  %v7312_v53 = vpack.c.bf16 %v3295_v63, %v3295_v63  ;;  %v4769_v48 = vsel %vm389_vm0, %v7002_v3, 0  ;;  %v2848_v3 = vld [vmem:[#allocation2 + $0xe9] sm:$0x7f] }
 0x254   : > { %v2783_v33 = vpop.f32.mrf.mxu1  ;;  %v2967_v55 = vpop.f32.mrf.mxu0  ;;  %v7311_v56 = vpack.c.bf16 %v3294_v51, %v3294_v51 }
 0x255   : > { %v2870_v57 = vadd.f32 %v2840_v23, %v2783_v33  ;;  %v3134_v34 = vrot.slane %v2967_v55, 1  ;;  %3456 = vst.msk [vmem:[#allocation3 + $0x4] sm:$0xf] %vm3454_vm5, %v7312_v53  ;;  %v3076_v33 = vld [vmem:[#allocation2 + $0x48] sm:$0x7f] }
 0x256   : > { %v8111_v58 = vpop.f32.mrf.mxu1  ;;  %v8141_v59 = vpop.f32.mrf.mxu0  ;;  %3455 = vst.msk [vmem:[#allocation3] sm:$0xf] %vm3454_vm5, %v7311_v56  ;;  %v3075_v56 = vld [vmem:[#allocation2 + $0x40] sm:$0xff] }
 0x257   : > { %2900 = vst.msk [vmem:[#allocation2 + $0xa9] sm:$0x7f] %vm856_vm3, %v2870_v57  ;;  %v3135_v61 = vsel %vm1118_vm4, %v3133_v31, %v3134_v34  ;;  %v3207_v62 = vadd.f32 %v3134_v34, %v3072_v54  ;;  %v2845_v54 = vld [vmem:[#allocation2 + $0xd1] sm:$0xff] }
 0x258   : > { %v3265_v0 = vld [vmem:[#allocation2 + $0x18] sm:$0xff]  ;;  %v3206_v1 = vadd.f32 %v3135_v61, %v3071_v36  ;;  %v2788_v50 = vpop.f32.mrf.mxu1  ;;  %v2972_v41 = vpop.f32.mrf.mxu0 }
 0x259   : > { %v3264_v20 = vld [vmem:[#allocation2 + $0x10] sm:$0xff]  ;;  %v3297_v43 = vmax.f32 %v3265_v0, 0.0  ;;  %3237 = vst.msk [vmem:[#allocation2 + $0x28] sm:$0x7f] %vm856_vm3, %v3207_v62  ;;  %v2871_v7 = vadd.f32 %v2841_v4, %v2788_v50  ;;  %v3136_v16 = vrot.slane %v2972_v41, 1 }
 0x25a   : > { %v3296_v45 = vmax.f32 %v3264_v20, 0.0  ;;  %3236 = vst.msk [vmem:[#allocation2 + $0x20] sm:$0xff] %vm340_vm1, %v3206_v1  ;;  %v8114_v39 = vpop.f32.mrf.mxu1  ;;  %v8144_v8 = vpop.f32.mrf.mxu0  ;;  %v2846_v41 = vld [vmem:[#allocation2 + $0xd9] sm:$0x7f] }
 0x25b   : > { %v7314_v9 = vpack.c.bf16 %v3297_v43, %v3297_v43  ;;  %2901 = vst.msk [vmem:[#allocation2 + $0xb1] sm:$0xff] %vm340_vm1, %v2871_v7 }
 0x25c   : > { %v7313_v10 = vpack.c.bf16 %v3296_v45, %v3296_v45  ;;  %v2791_v11 = vpop.f32.mrf.mxu1  ;;  %v2975_v14 = vpop.f32.mrf.mxu0 }
 0x25d   : > { %3458 = vst.msk [vmem:[#allocation3 + $0xc] sm:$0xf] %vm3454_vm5, %v7314_v9  ;;  %v2872_v38 = vadd.f32 %v2842_v52, %v2791_v11  ;;  %v3137_v17 = vrot.slane %v2975_v14, 1  ;;  %v9739_v18 = vld [vmem:[#allocation3] sm:$0xff]   ;;  %v3078_v52 = vld [vmem:[#allocation2 + $0x58] sm:$0x7f] }
 0x25e   : > { %3457 = vst.msk [vmem:[#allocation3 + $0x8] sm:$0xf] %vm3454_vm5, %v7313_v10  ;;  %v8115_v21 = vpop.f32.mrf.mxu1  ;;  %v8145_v12 = vpop.f32.mrf.mxu0  ;;  %8192 = vmatprep.mubr.msk.bf16.mxu1 %vm340_vm1, %v9739_v18  ;;  %8226 = vmatprep.mubr.msk.bf16.mxu0 %vm340_vm1, %v9739_v18  ;;  %v3077_v11 = vld [vmem:[#allocation2 + $0x50] sm:$0xff] }
 0x25f   : > { %2902 = vst.msk [vmem:[#allocation2 + $0xb9] sm:$0x7f] %vm856_vm3, %v2872_v38  ;;  %v3138_v22 = vsel %vm1118_vm4, %v3136_v16, %v3137_v17  ;;  %v3209_v24 = vadd.f32 %v3137_v17, %v3074_v19  ;;  %v2847_v21 = vld [vmem:[#allocation2 + $0xe1] sm:$0xff] }
 0x260   : > { %v3208_v25 = vadd.f32 %v3138_v22, %v3073_v47  ;;  %v2796_v26 = vpop.f32.mrf.mxu1  ;;  %v2980_v15 = vpop.f32.mrf.mxu0  ;;  %v3267_v28 = vld [vmem:[#allocation2 + $0x28] sm:$0xff] }
 0x261   : > { %3239 = vst.msk [vmem:[#allocation2 + $0x38] sm:$0x7f] %vm856_vm3, %v3209_v24  ;;  %v2873_v6 = vadd.f32 %v2843_v27, %v2796_v26  ;;  %v3266_v29 = vld [vmem:[#allocation2 + $0x20] sm:$0xff]  ;;  %v3299_v2 = vmax.f32 %v3267_v28, 0.0  ;;  %v3139_v32 = vrot.slane %v2980_v15, 1 }
 0x262   : > { %3238 = vst.msk [vmem:[#allocation2 + $0x30] sm:$0xff] %vm340_vm1, %v3208_v25  ;;  %v8118_v49 = vpop.f32.mrf.mxu1  ;;  %v8148_v35 = vpop.f32.mrf.mxu0  ;;  %v3298_v30 = vmax.f32 %v3266_v29, 0.0 }
 0x263   : > { %2903 = vst.msk [vmem:[#allocation2 + $0xc1] sm:$0xff] %vm340_vm1, %v2873_v6  ;;  %v7316_v37 = vpack.c.bf16 %v3299_v2, %v3299_v2 }
 0x264   : > { %v2799_v40 = vpop.f32.mrf.mxu1  ;;  %v2983_v63 = vpop.f32.mrf.mxu0  ;;  %v7315_v46 = vpack.c.bf16 %v3298_v30, %v3298_v30 }
 0x265   : > { %v2874_v13 = vadd.f32 %v2844_v44, %v2799_v40  ;;  %v3140_v51 = vrot.slane %v2983_v63, 1  ;;  %v9757_v53 = vld [vmem:[#allocation3 + $0x8] sm:$0xff]   ;;  %3460 = vst.msk [vmem:[#allocation3 + $0x14] sm:$0xf] %vm3454_vm5, %v7316_v37 }
 0x266   : > { %v8119_v23 = vpop.f32.mrf.mxu1  ;;  %v8149_v55 = vpop.f32.mrf.mxu0  ;;  %3459 = vst.msk [vmem:[#allocation3 + $0x10] sm:$0xf] %vm3454_vm5, %v7315_v46  ;;  %8193 = vmatmul.mubr.msk.bf16.vlgmr.msra.gmra.mxu1 %vm340_vm1, %v9757_v53  ;;  %8227 = vmatmul.mubr.msk.bf16.vlgmr.msra.gmra.mxu0 %vm340_vm1, %v9757_v53  ;;  %v3080_v44 = vld [vmem:[#allocation2 + $0x68] sm:$0x7f] }
 0x267   : > { %2904 = vst.msk [vmem:[#allocation2 + $0xc9] sm:$0x7f] %vm856_vm3, %v2874_v13  ;;  %v3141_v60 = vsel %vm1118_vm4, %v3139_v32, %v3140_v51  ;;  %v3211_v31 = vadd.f32 %v3140_v51, %v3076_v33  ;;  %8259 = vmatpush3.bf16.msra.mxu1 %v4245_v42  ;;  %8293 = vmatpush3.bf16.msra.mxu0 %v4769_v48  ;;  %v3079_v48 = vld [vmem:[#allocation2 + $0x60] sm:$0xff] }
 0x268   : > { %v3210_v57 = vadd.f32 %v3141_v60, %v3075_v56  ;;  %v2804_v34 = vpop.f32.mrf.mxu1  ;;  %v2988_v58 = vpop.f32.mrf.mxu0  ;;  %v3269_v59 = vld [vmem:[#allocation2 + $0x38] sm:$0xff]  ;;  %8354 = vmatprep.subr.bf16.mxu1 %v8781_v5  ;;  %8416 = vmatprep.subr.bf16.mxu0 %v8781_v5 }
 0x269   : > { %v3268_v36 = vld [vmem:[#allocation2 + $0x30] sm:$0xff]  ;;  %3241 = vst.msk [vmem:[#allocation2 + $0x48] sm:$0x7f] %vm856_vm3, %v3211_v31  ;;  %v2875_v61 = vadd.f32 %v2845_v54, %v2804_v34  ;;  %v3301_v62 = vmax.f32 %v3269_v59, 0.0  ;;  %v3142_v4 = vrot.slane %v2988_v58, 1 }
 0x26a   : > { %v3300_v0 = vmax.f32 %v3268_v36, 0.0  ;;  %3240 = vst.msk [vmem:[#allocation2 + $0x40] sm:$0xff] %vm340_vm1, %v3210_v57  ;;  %v8122_v1 = vpop.f32.mrf.mxu1  ;;  %v8152_v50 = vpop.f32.mrf.mxu0  ;;  %v3082_v59 = vld [vmem:[#allocation2 + $0x78] sm:$0x7f] }
 0x26b   : > { %2905 = vst.msk [vmem:[#allocation2 + $0xd1] sm:$0xff] %vm340_vm1, %v2875_v61  ;;  %v7318_v20 = vpack.c.bf16 %v3301_v62, %v3301_v62  ;;  %v3081_v61 = vld [vmem:[#allocation2 + $0x70] sm:$0xff] }
 0x26c   : > { %v7317_v43 = vpack.c.bf16 %v3300_v0, %v3300_v0  ;;  %v2807_v7 = vpop.f32.mrf.mxu1  ;;  %v2991_v45 = vpop.f32.mrf.mxu0 }
 0x26d   : > { %v2876_v39 = vadd.f32 %v2846_v41, %v2807_v7  ;;  %v3143_v8 = vrot.slane %v2991_v45, 1  ;;  %v9772_v9 = vld [vmem:[#allocation3 + $0x10] sm:$0xff]   ;;  %3462 = vst.msk [vmem:[#allocation3 + $0x1c] sm:$0xf] %vm3454_vm5, %v7318_v20 }
 0x26e   : > { %3461 = vst.msk [vmem:[#allocation3 + $0x18] sm:$0xf] %vm3454_vm5, %v7317_v43  ;;  %v8123_v10 = vpop.f32.mrf.mxu1  ;;  %v8153_v16 = vpop.f32.mrf.mxu0  ;;  %8196 = vmatprep.mubr.msk.bf16.mxu1 %vm340_vm1, %v9772_v9  ;;  %8230 = vmatprep.mubr.msk.bf16.mxu0 %vm340_vm1, %v9772_v9 }
 0x26f   : > { %2906 = vst.msk [vmem:[#allocation2 + $0xd9] sm:$0x7f] %vm856_vm3, %v2876_v39  ;;  %v3144_v14 = vsel %vm1118_vm4, %v3142_v4, %v3143_v8  ;;  %v3213_v38 = vadd.f32 %v3143_v8, %v3078_v52 }
 0x270   : > { %v3212_v17 = vadd.f32 %v3144_v14, %v3077_v11  ;;  %v2812_v19 = vpop.f32.mrf.mxu1  ;;  %v2996_v12 = vpop.f32.mrf.mxu0  ;;  %v3271_v47 = vld [vmem:[#allocation2 + $0x48] sm:$0xff] }
 0x271   : > { %3243 = vst.msk [vmem:[#allocation2 + $0x58] sm:$0x7f] %vm856_vm3, %v3213_v38  ;;  %v2877_v22 = vadd.f32 %v2847_v21, %v2812_v19  ;;  %v3270_v24 = vld [vmem:[#allocation2 + $0x40] sm:$0xff]  ;;  %v3303_v25 = vmax.f32 %v3271_v47, 0.0  ;;  %v3145_v28 = vrot.slane %v2996_v12, 1 }
 0x272   : > { %3242 = vst.msk [vmem:[#allocation2 + $0x50] sm:$0xff] %vm340_vm1, %v3212_v17  ;;  %v8126_v26 = vpop.f32.mrf.mxu1  ;;  %v8156_v27 = vpop.f32.mrf.mxu0  ;;  %v3302_v15 = vmax.f32 %v3270_v24, 0.0  ;;  %v3084_v11 = vld [vmem:[#allocation2 + $0x88] sm:$0x7f]  ;;  %v3083_v38 = vld [vmem:[#allocation2 + $0x80] sm:$0xff] }
 0x273   : > { %2907 = vst.msk [vmem:[#allocation2 + $0xe1] sm:$0xff] %vm340_vm1, %v2877_v22  ;;  %v7320_v6 = vpack.c.bf16 %v3303_v25, %v3303_v25 }
 0x274   : > { %v2815_v29 = vpop.f32.mrf.mxu1  ;;  %v2999_v2 = vpop.f32.mrf.mxu0  ;;  %v7319_v49 = vpack.c.bf16 %v3302_v15, %v3302_v15 }
 0x275   : > { %v2878_v35 = vadd.f32 %v2848_v3, %v2815_v29  ;;  %v3146_v30 = vrot.slane %v2999_v2, 1  ;;  %v9785_v32 = vld [vmem:[#allocation3 + $0x18] sm:$0xff]   ;;  %3464 = vst.msk [vmem:[#allocation3 + $0x24] sm:$0xf] %vm3454_vm5, %v7320_v6 }
 0x276   : > { %v8157_v37 = vpop.f32.mrf.mxu0  ;;  %3463 = vst.msk [vmem:[#allocation3 + $0x20] sm:$0xf] %vm3454_vm5, %v7319_v49  ;;  %v8127_v42 = vpop.f32.mrf.mxu1  ;;  %8197 = vmatmul.mubr.msk.bf16.gmra.mxu1 %vm340_vm1, %v9785_v32  ;;  %8231 = vmatmul.mubr.msk.bf16.gmra.mxu0 %vm340_vm1, %v9785_v32  ;;  %v3086_v2 = vld [vmem:[#allocation2 + $0x98] sm:$0x7f] }
 0x277   : > { %2908 = vst.msk [vmem:[#allocation2 + $0xe9] sm:$0x7f] %vm856_vm3, %v2878_v35  ;;  %v3147_v40 = vsel %vm1118_vm4, %v3145_v28, %v3146_v30  ;;  %v3215_v63 = vadd.f32 %v3146_v30, %v3080_v44  ;;  %v3085_v35 = vld [vmem:[#allocation2 + $0x90] sm:$0xff] }
 0x278   : > { %v3214_v46 = vadd.f32 %v3147_v40, %v3079_v48  ;;  %v3004_v13 = vpop.f32.mrf.mxu0  ;;  %v3273_v51 = vld [vmem:[#allocation2 + $0x58] sm:$0xff] }
 0x279   : > { %v3272_v33 = vld [vmem:[#allocation2 + $0x50] sm:$0xff]  ;;  %3245 = vst.msk [vmem:[#allocation2 + $0x68] sm:$0x7f] %vm856_vm3, %v3215_v63  ;;  %v3305_v23 = vmax.f32 %v3273_v51, 0.0  ;;  %v3148_v60 = vrot.slane %v3004_v13, 1 }
 0x27a   : > { %v3304_v55 = vmax.f32 %v3272_v33, 0.0  ;;  %3244 = vst.msk [vmem:[#allocation2 + $0x60] sm:$0xff] %vm340_vm1, %v3214_v46  ;;  %v8160_v56 = vpop.f32.mrf.mxu0 }
 0x27b   : > { %v7322_v31 = vpack.c.bf16 %v3305_v23, %v3305_v23 }
 0x27c   : > { %v7321_v57 = vpack.c.bf16 %v3304_v55, %v3304_v55  ;;  %v3007_v34 = vpop.f32.mrf.mxu0 }
 0x27d   : > { %v3149_v54 = vrot.slane %v3007_v34, 1  ;;  %v9797_v58 = vld [vmem:[#allocation3 + $0x20] sm:$0xff]   ;;  %3466 = vst.msk [vmem:[#allocation3 + $0x2c] sm:$0xf] %vm3454_vm5, %v7322_v31  ;;  %v3088_v31 = vld [vmem:[#allocation2 + $0xa8] sm:$0x7f] }
 0x27e   : > { %3465 = vst.msk [vmem:[#allocation3 + $0x28] sm:$0xf] %vm3454_vm5, %v7321_v57  ;;  %v8161_v36 = vpop.f32.mrf.mxu0  ;;  %8200 = vmatprep.mubr.msk.bf16.mxu1 %vm340_vm1, %v9797_v58  ;;  %8234 = vmatprep.mubr.msk.bf16.mxu0 %vm340_vm1, %v9797_v58  ;;  %v3087_v34 = vld [vmem:[#allocation2 + $0xa0] sm:$0xff] }
 0x27f   : > { %v3150_v62 = vsel %vm1118_vm4, %v3148_v60, %v3149_v54  ;;  %v3217_v0 = vadd.f32 %v3149_v54, %v3082_v59 }
 0x280   : > { %v3216_v1 = vadd.f32 %v3150_v62, %v3081_v61  ;;  %v3012_v50 = vpop.f32.mrf.mxu0  ;;  %v3275_v4 = vld [vmem:[#allocation2 + $0x68] sm:$0xff] }
 0x281   : > { %3247 = vst.msk [vmem:[#allocation2 + $0x78] sm:$0x7f] %vm856_vm3, %v3217_v0  ;;  %v3274_v41 = vld [vmem:[#allocation2 + $0x60] sm:$0xff]  ;;  %v3307_v20 = vmax.f32 %v3275_v4, 0.0  ;;  %v3151_v45 = vrot.slane %v3012_v50, 1 }
 0x282   : > { %3246 = vst.msk [vmem:[#allocation2 + $0x70] sm:$0xff] %vm340_vm1, %v3216_v1  ;;  %v8164_v43 = vpop.f32.mrf.mxu0  ;;  %v3306_v7 = vmax.f32 %v3274_v41, 0.0 }
 0x283   : > { %v7324_v39 = vpack.c.bf16 %v3307_v20, %v3307_v20 }
 0x284   : > { %v3015_v8 = vpop.f32.mrf.mxu0  ;;  %v7323_v52 = vpack.c.bf16 %v3306_v7, %v3306_v7 }
 0x285   : > { %v3152_v10 = vrot.slane %v3015_v8, 1  ;;  %v9808_v16 = vld [vmem:[#allocation3 + $0x28] sm:$0xff]   ;;  %3468 = vst.msk [vmem:[#allocation3 + $0x34] sm:$0xf] %vm3454_vm5, %v7324_v39  ;;  %v3090_v8 = vld [vmem:[#allocation2 + $0xb8] sm:$0x7f] }
 0x286   : > { %v8165_v14 = vpop.f32.mrf.mxu0  ;;  %3467 = vst.msk [vmem:[#allocation3 + $0x30] sm:$0xf] %vm3454_vm5, %v7323_v52  ;;  %8201 = vmatmul.mubr.msk.bf16.gmra.mxu1 %vm340_vm1, %v9808_v16  ;;  %8235 = vmatmul.mubr.msk.bf16.gmra.mxu0 %vm340_vm1, %v9808_v16 }
 0x287   : > { %v3153_v17 = vsel %vm1118_vm4, %v3151_v45, %v3152_v10  ;;  %v3219_v19 = vadd.f32 %v3152_v10, %v3084_v11  ;;  %v3089_v10 = vld [vmem:[#allocation2 + $0xb0] sm:$0xff] }
 0x288   : > { %v3218_v21 = vadd.f32 %v3153_v17, %v3083_v38  ;;  %v3020_v12 = vpop.f32.mrf.mxu0  ;;  %v3277_v47 = vld [vmem:[#allocation2 + $0x78] sm:$0xff] }
 0x289   : > { %v3276_v22 = vld [vmem:[#allocation2 + $0x70] sm:$0xff]  ;;  %3249 = vst.msk [vmem:[#allocation2 + $0x88] sm:$0x7f] %vm856_vm3, %v3219_v19  ;;  %v3309_v24 = vmax.f32 %v3277_v47, 0.0  ;;  %v3154_v27 = vrot.slane %v3020_v12, 1 }
 0x28a   : > { %v3308_v25 = vmax.f32 %v3276_v22, 0.0  ;;  %3248 = vst.msk [vmem:[#allocation2 + $0x80] sm:$0xff] %vm340_vm1, %v3218_v21  ;;  %v8168_v26 = vpop.f32.mrf.mxu0 }
 0x28b   : > { %v7326_v15 = vpack.c.bf16 %v3309_v24, %v3309_v24 }
 0x28c   : > { %v7325_v28 = vpack.c.bf16 %v3308_v25, %v3308_v25  ;;  %v3023_v3 = vpop.f32.mrf.mxu0 }
 0x28d   : > { %v3155_v6 = vrot.slane %v3023_v3, 1  ;;  %v9819_v29 = vld [vmem:[#allocation3 + $0x30] sm:$0xff]   ;;  %3470 = vst.msk [vmem:[#allocation3 + $0x3c] sm:$0xf] %vm3454_vm5, %v7326_v15  ;;  %v3092_v3 = vld [vmem:[#allocation2 + $0xc8] sm:$0x7f] }
 0x28e   : > { %3469 = vst.msk [vmem:[#allocation3 + $0x38] sm:$0xf] %vm3454_vm5, %v7325_v28  ;;  %v8169_v49 = vpop.f32.mrf.mxu0  ;;  %8204 = vmatprep.mubr.msk.bf16.mxu1 %vm340_vm1, %v9819_v29  ;;  %8238 = vmatprep.mubr.msk.bf16.mxu0 %vm340_vm1, %v9819_v29 }
 0x28f   : > { %v3156_v30 = vsel %vm1118_vm4, %v3154_v27, %v3155_v6  ;;  %v3221_v44 = vadd.f32 %v3155_v6, %v3086_v2  ;;  %v3091_v2 = vld [vmem:[#allocation2 + $0xc0] sm:$0xff] }
 0x290   : > { %v3220_v37 = vadd.f32 %v3156_v30, %v3085_v35  ;;  %v3028_v42 = vpop.f32.mrf.mxu0  ;;  %v3279_v48 = vld [vmem:[#allocation2 + $0x88] sm:$0xff] }
 0x291   : > { %3251 = vst.msk [vmem:[#allocation2 + $0x98] sm:$0x7f] %vm856_vm3, %v3221_v44  ;;  %v3278_v40 = vld [vmem:[#allocation2 + $0x80] sm:$0xff]  ;;  %v3311_v63 = vmax.f32 %v3279_v48, 0.0  ;;  %v3157_v51 = vrot.slane %v3028_v42, 1 }
 0x292   : > { %3250 = vst.msk [vmem:[#allocation2 + $0x90] sm:$0xff] %vm340_vm1, %v3220_v37  ;;  %v8172_v46 = vpop.f32.mrf.mxu0  ;;  %v3310_v13 = vmax.f32 %v3278_v40, 0.0 }
 0x293   : > { %v7328_v33 = vpack.c.bf16 %v3311_v63, %v3311_v63 }
 0x294   : > { %v3031_v23 = vpop.f32.mrf.mxu0  ;;  %v7327_v55 = vpack.c.bf16 %v3310_v13, %v3310_v13 }
 0x295   : > { %v3158_v56 = vrot.slane %v3031_v23, 1  ;;  %v9830_v60 = vld [vmem:[#allocation3 + $0x38] sm:$0xff]   ;;  %3472 = vst.msk [vmem:[#allocation3 + $0x44] sm:$0xf] %vm3454_vm5, %v7328_v33 }
 0x296   : > { %v8173_v57 = vpop.f32.mrf.mxu0  ;;  %3471 = vst.msk [vmem:[#allocation3 + $0x40] sm:$0xf] %vm3454_vm5, %v7327_v55  ;;  %8205 = vmatmul.mubr.msk.bf16.gmra.mxu1 %vm340_vm1, %v9830_v60  ;;  %8239 = vmatmul.mubr.msk.bf16.gmra.mxu0 %vm340_vm1, %v9830_v60 }
 0x297   : > { %v3159_v54 = vsel %vm1118_vm4, %v3157_v51, %v3158_v56  ;;  %v3223_v59 = vadd.f32 %v3158_v56, %v3088_v31  ;;  %v3094_v56 = vld [vmem:[#allocation2 + $0xd8] sm:$0x7f]  ;;  %v3093_v57 = vld [vmem:[#allocation2 + $0xd0] sm:$0xff] }
 0x298   : > { %v3222_v36 = vadd.f32 %v3159_v54, %v3087_v34  ;;  %v3036_v61 = vpop.f32.mrf.mxu0  ;;  %v3281_v62 = vld [vmem:[#allocation2 + $0x98] sm:$0xff] }
 0x299   : > { %v3280_v0 = vld [vmem:[#allocation2 + $0x90] sm:$0xff]  ;;  %3253 = vst.msk [vmem:[#allocation2 + $0xa8] sm:$0x7f] %vm856_vm3, %v3223_v59  ;;  %v3313_v1 = vmax.f32 %v3281_v62, 0.0  ;;  %v3160_v41 = vrot.slane %v3036_v61, 1 }
 0x29a   : > { %v3312_v50 = vmax.f32 %v3280_v0, 0.0  ;;  %3252 = vst.msk [vmem:[#allocation2 + $0xa0] sm:$0xff] %vm340_vm1, %v3222_v36  ;;  %v8176_v4 = vpop.f32.mrf.mxu0 }
 0x29b   : > { %v7330_v20 = vpack.c.bf16 %v3313_v1, %v3313_v1 }
 0x29c   : > { %v7329_v43 = vpack.c.bf16 %v3312_v50, %v3312_v50  ;;  %v3039_v7 = vpop.f32.mrf.mxu0 }
 0x29d   : > { %v3161_v45 = vrot.slane %v3039_v7, 1  ;;  %v9841_v39 = vld [vmem:[#allocation3 + $0x40] sm:$0xff]   ;;  %3474 = vst.msk [vmem:[#allocation3 + $0x4c] sm:$0xf] %vm3454_vm5, %v7330_v20 }
 0x29e   : > { %3473 = vst.msk [vmem:[#allocation3 + $0x48] sm:$0xf] %vm3454_vm5, %v7329_v43  ;;  %v8177_v52 = vpop.f32.mrf.mxu0  ;;  %8208 = vmatprep.mubr.msk.bf16.mxu1 %vm340_vm1, %v9841_v39  ;;  %8242 = vmatprep.mubr.msk.bf16.mxu0 %vm340_vm1, %v9841_v39 }
 0x29f   : > { %v3162_v11 = vsel %vm1118_vm4, %v3160_v41, %v3161_v45  ;;  %v3225_v14 = vadd.f32 %v3161_v45, %v3090_v8  ;;  %v3096_v8 = vld [vmem:[#allocation2 + $0xe8] sm:$0x7f] }
 0x2a0   : > { %v3224_v38 = vadd.f32 %v3162_v11, %v3089_v10  ;;  %v3044_v17 = vpop.f32.mrf.mxu0  ;;  %v3283_v19 = vld [vmem:[#allocation2 + $0xa8] sm:$0xff]  ;;  %v3095_v10 = vld [vmem:[#allocation2 + $0xe0] sm:$0xff] }
 0x2a1   : > { %3255 = vst.msk [vmem:[#allocation2 + $0xb8] sm:$0x7f] %vm856_vm3, %v3225_v14  ;;  %v3282_v21 = vld [vmem:[#allocation2 + $0xa0] sm:$0xff]  ;;  %v3315_v12 = vmax.f32 %v3283_v19, 0.0  ;;  %v3163_v24 = vrot.slane %v3044_v17, 1 }
 0x2a2   : > { %3254 = vst.msk [vmem:[#allocation2 + $0xb0] sm:$0xff] %vm340_vm1, %v3224_v38  ;;  %v8180_v47 = vpop.f32.mrf.mxu0  ;;  %v3314_v22 = vmax.f32 %v3282_v21, 0.0 }
 0x2a3   : > { %v7332_v25 = vpack.c.bf16 %v3315_v12, %v3315_v12 }
 0x2a4   : > { %v3047_v26 = vpop.f32.mrf.mxu0  ;;  %v7331_v27 = vpack.c.bf16 %v3314_v22, %v3314_v22 }
 0x2a5   : > { %v3164_v15 = vrot.slane %v3047_v26, 1  ;;  %v9852_v28 = vld [vmem:[#allocation3 + $0x48] sm:$0xff]   ;;  %3476 = vst.msk [vmem:[#allocation3 + $0x54] sm:$0xf] %vm3454_vm5, %v7332_v25 }
 0x2a6   : > { %v8181_v6 = vpop.f32.mrf.mxu0  ;;  %3475 = vst.msk [vmem:[#allocation3 + $0x50] sm:$0xf] %vm3454_vm5, %v7331_v27  ;;  %8209 = vmatmul.mubr.msk.bf16.gmra.mxu1 %vm340_vm1, %v9852_v28  ;;  %8243 = vmatmul.mubr.msk.bf16.gmra.mxu0 %vm340_vm1, %v9852_v28 }
 0x2a7   : > { %v3165_v49 = vsel %vm1118_vm4, %v3163_v24, %v3164_v15  ;;  %v3227_v35 = vadd.f32 %v3164_v15, %v3092_v3 }
 0x2a8   : > { %v3226_v30 = vadd.f32 %v3165_v49, %v3091_v2  ;;  %v3052_v44 = vpop.f32.mrf.mxu0  ;;  %v3285_v37 = vld [vmem:[#allocation2 + $0xb8] sm:$0xff] }
 0x2a9   : > { %v3284_v42 = vld [vmem:[#allocation2 + $0xb0] sm:$0xff]  ;;  %3257 = vst.msk [vmem:[#allocation2 + $0xc8] sm:$0x7f] %vm856_vm3, %v3227_v35  ;;  %v3317_v48 = vmax.f32 %v3285_v37, 0.0  ;;  %v3166_v46 = vrot.slane %v3052_v44, 1  ;;  %v8741_v35 = vld [vmem:[#allocation3 + $0x78] sm:$0xff]  }
 0x2aa   : > { %v3316_v40 = vmax.f32 %v3284_v42, 0.0  ;;  %3256 = vst.msk [vmem:[#allocation2 + $0xc0] sm:$0xff] %vm340_vm1, %v3226_v30  ;;  %v8184_v63 = vpop.f32.mrf.mxu0  ;;  %v5015_v30 = vld [vmem:[%s11299_s3] sm:$0x3]  ;;  %v7168_v44 = vld [vmem:[%s11299_s3 + $0x4] sm:$0x3] }
 0x2ab   : > { %v7334_v13 = vpack.c.bf16 %v3317_v48, %v3317_v48  ;;  %v9907_v37 = vld [vmem:[#allocation3] sm:$0xff]   ;;  %v5017_v42 = vsel %vm389_vm0, %v5015_v30, 0  ;;  %v5265_v48 = vsel %vm389_vm0, %v7168_v44, 0  ;;  %v7407_v63 = vld [vmem:[%s8842_s29 + $0x8] sm:$0xff]  }
 0x2ac   : > { %v7333_v51 = vpack.c.bf16 %v3316_v40, %v3316_v40  ;;  %v3055_v33 = vpop.f32.mrf.mxu0  ;;  %v10002_v40 = vld [vmem:[#allocation3 + $0x48] sm:$0xff]  }
 0x2ad   : > { %v3167_v23 = vrot.slane %v3055_v33, 1  ;;  %v9863_v55 = vld [vmem:[#allocation3 + $0x50] sm:$0xff]   ;;  %3478 = vst.msk [vmem:[#allocation3 + $0x5c] sm:$0xf] %vm3454_vm5, %v7334_v13  ;;  %v7349_v13 = vunpack.c.l.bf16 %v7407_v63 }
 0x2ae   : > { %3477 = vst.msk [vmem:[#allocation3 + $0x58] sm:$0xf] %vm3454_vm5, %v7333_v51  ;;  %v8185_v31 = vpop.f32.mrf.mxu0  ;;  %8212 = vmatprep.mubr.msk.bf16.mxu1 %vm340_vm1, %v9863_v55  ;;  %8246 = vmatprep.mubr.msk.bf16.mxu0 %vm340_vm1, %v9863_v55  ;;  %v10015_v51 = vld [vmem:[#allocation3 + $0x50] sm:$0xff]  }
 0x2af   : > { %v3168_v34 = vsel %vm1118_vm4, %v3166_v46, %v3167_v23  ;;  %v3229_v54 = vadd.f32 %v3167_v23, %v3094_v56  ;;  %v7344_v46 = vld [vmem:[%s8842_s29] sm:$0xff]   ;;  %v7350_v31 = vunpack.c.h.bf16 %v7407_v63 }
 0x2b0   : > { %v3228_v59 = vadd.f32 %v3168_v34, %v3093_v57  ;;  %v3060_v36 = vpop.f32.mrf.mxu0  ;;  %v3287_v61 = vld [vmem:[#allocation2 + $0xc8] sm:$0xff]  ;;  %v7345_v33 = vunpack.c.l.bf16 %v7344_v46 }
 0x2b1   : > { %3259 = vst.msk [vmem:[#allocation2 + $0xd8] sm:$0x7f] %vm856_vm3, %v3229_v54  ;;  %v3286_v62 = vld [vmem:[#allocation2 + $0xc0] sm:$0xff]  ;;  %v3319_v0 = vmax.f32 %v3287_v61, 0.0  ;;  %v3169_v4 = vrot.slane %v3060_v36, 1 }
 0x2b2   : > { %3258 = vst.msk [vmem:[#allocation2 + $0xd0] sm:$0xff] %vm340_vm1, %v3228_v59  ;;  %v8188_v1 = vpop.f32.mrf.mxu0  ;;  %v3318_v50 = vmax.f32 %v3286_v62, 0.0  ;;  %v7346_v59 = vunpack.c.h.bf16 %v7344_v46 }
 0x2b3   : > { %v7336_v41 = vpack.c.bf16 %v3319_v0, %v3319_v0 }
 0x2b4   : > { %v3063_v20 = vpop.f32.mrf.mxu0  ;;  %v7335_v43 = vpack.c.bf16 %v3318_v50, %v3318_v50 }
 0x2b5   : > { %v3170_v7 = vrot.slane %v3063_v20, 1  ;;  %v9874_v45 = vld [vmem:[#allocation3 + $0x58] sm:$0xff]   ;;  %3480 = vst.msk [vmem:[#allocation3 + $0x64] sm:$0xf] %vm3454_vm5, %v7336_v41 }
 0x2b6   : > { %v8189_v52 = vpop.f32.mrf.mxu0  ;;  %3479 = vst.msk [vmem:[#allocation3 + $0x60] sm:$0xf] %vm3454_vm5, %v7335_v43  ;;  %8213 = vmatmul.mubr.msk.bf16.gmra.mxu1 %vm340_vm1, %v9874_v45  ;;  %8247 = vmatmul.mubr.msk.bf16.gmra.mxu0 %vm340_vm1, %v9874_v45  ;;  %v10042_v41 = vld [vmem:[#allocation3 + $0x58] sm:$0xff]  }
 0x2b7   : > { %v3171_v11 = vsel %vm1118_vm4, %v3169_v4, %v3170_v7  ;;  %v3231_v14 = vadd.f32 %v3170_v7, %v3096_v8  ;;  %v7409_v7 = vld [vmem:[%s8842_s29 + $0x18] sm:$0xff]  }
 0x2b8   : > { %v3230_v38 = vadd.f32 %v3171_v11, %v3095_v10  ;;  %v3289_v17 = vld [vmem:[#allocation2 + $0xd8] sm:$0xff]  ;;  %v7357_v8 = vunpack.c.l.bf16 %v7409_v7 }
 0x2b9   : > { %v3288_v19 = vld [vmem:[#allocation2 + $0xd0] sm:$0xff]  ;;  %3261 = vst.msk [vmem:[#allocation2 + $0xe8] sm:$0x7f] %vm856_vm3, %v3231_v14  ;;  %v3321_v21 = vmax.f32 %v3289_v17, 0.0 }
 0x2ba   : > { %v3320_v12 = vmax.f32 %v3288_v19, 0.0  ;;  %3260 = vst.msk [vmem:[#allocation2 + $0xe0] sm:$0xff] %vm340_vm1, %v3230_v38 }
 0x2bb   : > { %v7338_v47 = vpack.c.bf16 %v3321_v21, %v3321_v21 }
 0x2bc   : > { %v7337_v22 = vpack.c.bf16 %v3320_v12, %v3320_v12 }
 0x2bd   : > { %v8738_v24 = vld [vmem:[#allocation3 + $0x60] sm:$0xff]   ;;  %3482 = vst.msk [vmem:[#allocation3 + $0x6c] sm:$0xf] %vm3454_vm5, %v7338_v47  ;;  %v7358_v47 = vunpack.c.h.bf16 %v7409_v7 }
 0x2be   : > { %3481 = vst.msk [vmem:[#allocation3 + $0x68] sm:$0xf] %vm3454_vm5, %v7337_v22  ;;  %8216 = vmatprep.mubr.msk.bf16.mxu1 %vm340_vm1, %v8738_v24  ;;  %8250 = vmatprep.mubr.msk.bf16.mxu0 %vm340_vm1, %v8738_v24  ;;  %v10059_v10 = vld [vmem:[#allocation3 + $0x60] sm:$0xff]  }
 0x2c0   : > { %v3291_v25 = vld [vmem:[#allocation2 + $0xe8] sm:$0xff] }
 0x2c1   : > { %v3290_v26 = vld [vmem:[#allocation2 + $0xe0] sm:$0xff]  ;;  %v3323_v27 = vmax.f32 %v3291_v25, 0.0 }
 0x2c2   : > { %v3322_v15 = vmax.f32 %v3290_v26, 0.0 }
 0x2c3   : > { %v7340_v3 = vpack.c.bf16 %v3323_v27, %v3323_v27 }
 0x2c4   : > { %v7339_v6 = vpack.c.bf16 %v3322_v15, %v3322_v15 }
 0x2c5   : > { %v8739_v2 = vld [vmem:[#allocation3 + $0x68] sm:$0xff]   ;;  %3484 = vst.msk [vmem:[#allocation3 + $0x74] sm:$0xf] %vm3454_vm5, %v7340_v3 }
 0x2c6   : > { %3483 = vst.msk [vmem:[#allocation3 + $0x70] sm:$0xf] %vm3454_vm5, %v7339_v6  ;;  %8217 = vmatmul.mubr.msk.bf16.gmra.mxu1 %vm340_vm1, %v8739_v2  ;;  %8251 = vmatmul.mubr.msk.bf16.gmra.mxu0 %vm340_vm1, %v8739_v2 }
 0x2cd   : > { %v8740_v49 = vld [vmem:[#allocation3 + $0x70] sm:$0xff]  }
 0x2ce   : > { %8220 = vmatprep.mubr.msk.bf16.mxu1 %vm340_vm1, %v8740_v49  ;;  %8254 = vmatprep.mubr.msk.bf16.mxu0 %vm340_vm1, %v8740_v49 }
 0x2cf   : > { %8221 = vmatmul.mubr.msk.bf16.gmra.mxu1 %vm340_vm1, %v8741_v35  ;;  %8255 = vmatmul.mubr.msk.bf16.gmra.mxu0 %vm340_vm1, %v8741_v35 }
 0x2d0   : > { %8260 = vmatprep.mubr.msk.bf16.mxu1 %vm340_vm1, %v9739_v18  ;;  %8294 = vmatprep.mubr.msk.bf16.mxu0 %vm8782_vm2, %v8781_v5  ;;  %v9921_v18 = vld [vmem:[#allocation3 + $0x8] sm:$0xff]  }
 0x2d7   : > { %8261 = vmatmul.mubr.msk.bf16.vlgmr.msra.gmra.mxu1 %vm340_vm1, %v9757_v53  ;;  %8295 = vmatmul.mubr.msk.bf16.vlgmr.msra.gmra.mxu0 %vm340_vm1, %v9907_v37  ;;  %v9931_v53 = vld [vmem:[#allocation3 + $0x10] sm:$0xff]  }
 0x2d8   : > { %8355 = vmatpush3.bf16.msra.mxu1 %v5017_v42  ;;  %8264 = vmatprep.mubr.msk.bf16.mxu1 %vm340_vm1, %v9772_v9  ;;  %v9941_v9 = vld [vmem:[#allocation3 + $0x18] sm:$0xff]  }
 0x2d9   : > { %8298 = vmatprep.mubr.msk.bf16.mxu0 %vm8782_vm2, %v8781_v5  ;;  %8417 = vmatpush3.bf16.msra.mxu0 %v5265_v48 }
 0x2da   : > { %8478 = vmatprep.subr.bf16.mxu1 %v8781_v5  ;;  %8540 = vmatprep.subr.bf16.mxu0 %v8781_v5 }
 0x2df   : > { %8265 = vmatmul.mubr.msk.bf16.gmra.mxu1 %vm340_vm1, %v9785_v32  ;;  %8299 = vmatmul.mubr.msk.bf16.gmra.mxu0 %vm340_vm1, %v9921_v18  ;;  %v9951_v32 = vld [vmem:[#allocation3 + $0x20] sm:$0xff]  }
 0x2e0   : > { %8268 = vmatprep.mubr.msk.bf16.mxu1 %vm340_vm1, %v9797_v58  ;;  %8302 = vmatprep.mubr.msk.bf16.mxu0 %vm8782_vm2, %v8781_v5  ;;  %v9961_v58 = vld [vmem:[#allocation3 + $0x28] sm:$0xff]  }
 0x2e7   : > { %8269 = vmatmul.mubr.msk.bf16.gmra.mxu1 %vm340_vm1, %v9808_v16  ;;  %8303 = vmatmul.mubr.msk.bf16.gmra.mxu0 %vm340_vm1, %v9931_v53  ;;  %v9970_v16 = vld [vmem:[#allocation3 + $0x30] sm:$0xff]  }
 0x2e8   : > { %8272 = vmatprep.mubr.msk.bf16.mxu1 %vm340_vm1, %v9819_v29  ;;  %8306 = vmatprep.mubr.msk.bf16.mxu0 %vm8782_vm2, %v8781_v5  ;;  %v9978_v29 = vld [vmem:[#allocation3 + $0x38] sm:$0xff]  }
 0x2ef   : > { %8273 = vmatmul.mubr.msk.bf16.gmra.mxu1 %vm340_vm1, %v9830_v60  ;;  %8307 = vmatmul.mubr.msk.bf16.gmra.mxu0 %vm340_vm1, %v9941_v9  ;;  %v7244_v60 = vld [vmem:[%s11299_s3 + $0xe] sm:$0x3] }
 0x2f0   : > { %8276 = vmatprep.mubr.msk.bf16.mxu1 %vm340_vm1, %v9841_v39  ;;  %8310 = vmatprep.mubr.msk.bf16.mxu0 %vm8782_vm2, %v8781_v5  ;;  %v9990_v39 = vld [vmem:[#allocation3 + $0x40] sm:$0xff]  }
 0x2f7   : > { %8277 = vmatmul.mubr.msk.bf16.gmra.mxu1 %vm340_vm1, %v9852_v28  ;;  %8311 = vmatmul.mubr.msk.bf16.gmra.mxu0 %vm340_vm1, %v9951_v32  ;;  %v5769_v28 = vsel %vm389_vm0, %v7244_v60, 0 }
 0x2f8   : > { %8280 = vmatprep.mubr.msk.bf16.mxu1 %vm340_vm1, %v9863_v55  ;;  %8314 = vmatprep.mubr.msk.bf16.mxu0 %vm8782_vm2, %v8781_v5  ;;  %v10020_v55 = vld [vmem:[%s11300_s4] ss:$0 sm:$0xff] }
 0x2ff   : > { %8281 = vmatmul.mubr.msk.bf16.gmra.mxu1 %vm340_vm1, %v9874_v45  ;;  %8315 = vmatmul.mubr.msk.bf16.gmra.mxu0 %vm340_vm1, %v9961_v58  ;;  %v7408_v45 = vld [vmem:[%s8842_s29 + $0x10] sm:$0xff]  }
 0x300   : > { %8284 = vmatprep.mubr.msk.bf16.mxu1 %vm340_vm1, %v8738_v24  ;;  %8318 = vmatprep.mubr.msk.bf16.mxu0 %vm8782_vm2, %v8781_v5  ;;  %v7353_v11 = vunpack.c.l.bf16 %v7408_v45  ;;  %v7354_v27 = vunpack.c.h.bf16 %v7408_v45 }
 0x307   : > { %8285 = vmatmul.mubr.msk.bf16.gmra.mxu1 %vm340_vm1, %v8739_v2  ;;  %8319 = vmatmul.mubr.msk.bf16.gmra.mxu0 %vm340_vm1, %v9970_v16 }
 0x308   : > { %8288 = vmatprep.mubr.msk.bf16.mxu1 %vm340_vm1, %v8740_v49  ;;  %8322 = vmatprep.mubr.msk.bf16.mxu0 %vm8782_vm2, %v8781_v5 }
 0x30f   : > { %8289 = vmatmul.mubr.msk.bf16.gmra.mxu1 %vm340_vm1, %v8741_v35  ;;  %8323 = vmatmul.mubr.msk.bf16.gmra.mxu0 %vm340_vm1, %v9978_v29 }
 0x310   : > { %8326 = vmatprep.mubr.msk.bf16.mxu0 %vm8782_vm2, %v8781_v5  ;;  %8356 = vmatprep.mubr.msk.bf16.mxu1 %vm8782_vm2, %v8781_v5 }
 0x317   : > { %8327 = vmatmul.mubr.msk.bf16.gmra.mxu0 %vm340_vm1, %v9990_v39  ;;  %8357 = vmatmul.mubr.msk.bf16.vlgmr.msra.gmra.mxu1 %vm340_vm1, %v9907_v37 }
 0x318   : > { %8479 = vmatpush3.bf16.msra.mxu1 %v5769_v28  ;;  %8330 = vmatprep.mubr.msk.bf16.mxu0 %vm8782_vm2, %v8781_v5  ;;  %v10088_v28 = vld [vmem:[#allocation3 + $0x68] sm:$0xff]  }
 0x319   : > { %8360 = vmatprep.mubr.msk.bf16.mxu1 %vm8782_vm2, %v8781_v5  ;;  %8602 = vmatprep.subr.bf16.mxu1 %v8781_v5 }
 0x31f   : > { %8331 = vmatmul.mubr.msk.bf16.gmra.mxu0 %vm340_vm1, %v10002_v40  ;;  %8361 = vmatmul.mubr.msk.bf16.gmra.mxu1 %vm340_vm1, %v9921_v18 }
 0x320   : > { %8334 = vmatprep.mubr.msk.bf16.mxu0 %vm8782_vm2, %v8781_v5  ;;  %8364 = vmatprep.mubr.msk.bf16.mxu1 %vm8782_vm2, %v8781_v5 }
 0x326   : > { %v8194_v23 = vpop.f32.mrf.mxu1  ;;  %v8228_v0 = vpop.f32.mrf.mxu0 }
 0x327   : > { %v3879_v56 = vadd.f32 %v8194_v23, %v7349_v13  ;;  %8335 = vmatmul.mubr.msk.bf16.gmra.mxu0 %vm340_vm1, %v10015_v51  ;;  %8365 = vmatmul.mubr.msk.bf16.gmra.mxu1 %vm340_vm1, %v9931_v53  ;;  %v7411_v13 = vld [vmem:[%s8842_s29 + $0x28] sm:$0xff]  }
 0x328   : > { %v3686_v57 = vpop.f32.mrf.mxu1  ;;  %8338 = vmatprep.mubr.msk.bf16.mxu0 %vm8782_vm2, %v8781_v5  ;;  %8368 = vmatprep.mubr.msk.bf16.mxu1 %vm8782_vm2, %v8781_v5  ;;  %v4019_v43 = vpop.f32.mrf.mxu0  ;;  %v7365_v23 = vunpack.c.l.bf16 %v7411_v13 }
 0x329   : > { %v3918_v34 = vadd.f32 %v10020_v55, %v3879_v56  ;;  %v3877_v54 = vadd.f32 %v7345_v33, %v3686_v57  ;;  %v7410_v33 = vld [vmem:[%s8842_s29 + $0x20] sm:$0xff]  }
 0x32a   : > { %v8195_v36 = vpop.f32.mrf.mxu1  ;;  %v8229_v52 = vpop.f32.mrf.mxu0  ;;  %v7361_v57 = vunpack.c.l.bf16 %v7410_v33 }
 0x32b   : > { %3950 = vst.msk [vmem:[%s10029_s19 + $0x10] sm:$0xff] %vm340_vm1, %v3918_v34  ;;  %v3916_v61 = vadd.f32 %v10020_v55, %v3877_v54  ;;  %v3880_v62 = vadd.f32 %v8195_v36, %v7350_v31  ;;  %v10105_v31 = vld [vmem:[#allocation3 + $0x70] sm:$0xff]  }
 0x32c   : > { %v3689_v1 = vpop.f32.mrf.mxu1  ;;  %v4022_v24 = vpop.f32.mrf.mxu0 }
 0x32d   : > { %3948 = vst.msk [vmem:[%s10029_s19] sm:$0xff] %vm340_vm1, %v3916_v61  ;;  %v3919_v50 = vadd.f32 %v10020_v55, %v3880_v62  ;;  %v3878_v4 = vadd.f32 %v7346_v59, %v3689_v1 }
 0x32f   : > { %3951 = vst.msk [vmem:[%s10029_s19 + $0x18] sm:$0xff] %vm340_vm1, %v3919_v50  ;;  %v3917_v20 = vadd.f32 %v10020_v55, %v3878_v4  ;;  %8339 = vmatmul.mubr.msk.bf16.gmra.mxu0 %vm340_vm1, %v10042_v41  ;;  %8369 = vmatmul.mubr.msk.bf16.gmra.mxu1 %vm340_vm1, %v9941_v9 }
 0x330   : > { %8342 = vmatprep.mubr.msk.bf16.mxu0 %vm8782_vm2, %v8781_v5  ;;  %8372 = vmatprep.mubr.msk.bf16.mxu1 %vm8782_vm2, %v8781_v5 }
 0x331   : > { %3949 = vst.msk [vmem:[%s10029_s19 + $0x8] sm:$0xff] %vm340_vm1, %v3917_v20 }
 0x336   : > { %v4148_v14 = vld [vmem:[%s10029_s19 + $0x11] sm:$0xff]  ;;  %v4149_v38 = vld [vmem:[%s10029_s19 + $0x19] sm:$0x7f]  ;;  %v8198_v17 = vpop.f32.mrf.mxu1  ;;  %v8232_v44 = vpop.f32.mrf.mxu0 }
 0x337   : > { %v4180_v19 = vadd.f32 %v8228_v0, %v4148_v14  ;;  %v4181_v21 = vadd.f32 %v8229_v52, %v4149_v38  ;;  %v3883_v12 = vadd.f32 %v8198_v17, %v7357_v8  ;;  %8343 = vmatmul.mubr.msk.bf16.gmra.mxu0 %vm340_vm1, %v10059_v10  ;;  %8373 = vmatmul.mubr.msk.bf16.gmra.mxu1 %vm340_vm1, %v9951_v32  ;;  %v7366_v0 = vunpack.c.h.bf16 %v7411_v13  ;;  %v7275_v17 = vld [vmem:[%s11299_s3 + $0xc] sm:$0x3] }
 0x338   : > { %v4146_v22 = vld [vmem:[%s10029_s19 + $0x1] sm:$0xff]  ;;  %v4147_v25 = vld [vmem:[%s10029_s19 + $0x9] sm:$0x7f]  ;;  %v3702_v26 = vpop.f32.mrf.mxu1  ;;  %8346 = vmatprep.mubr.msk.bf16.mxu0 %vm8782_vm2, %v8781_v5  ;;  %8376 = vmatprep.mubr.msk.bf16.mxu1 %vm8782_vm2, %v8781_v5  ;;  %v4035_v46 = vpop.f32.mrf.mxu0 }
 0x339   : > { %4212 = vst.msk [vmem:[%s10029_s19 + $0x11] sm:$0xff] %vm340_vm1, %v4180_v19  ;;  %v4178_v15 = vadd.f32 %v4146_v22, %v4019_v43  ;;  %v4179_v3 = vadd.f32 %v4147_v25, %v4022_v24  ;;  %v3922_v6 = vadd.f32 %v10020_v55, %v3883_v12  ;;  %v3881_v2 = vadd.f32 %v7353_v11, %v3702_v26  ;;  %v7413_v26 = vld [vmem:[%s8842_s29 + $0x38] sm:$0xff]  }
 0x33a   : > { %4213 = vst.msk [vmem:[%s10029_s19 + $0x19] sm:$0x7f] %vm856_vm3, %v4181_v21  ;;  %v8199_v49 = vpop.f32.mrf.mxu1  ;;  %v8233_v56 = vpop.f32.mrf.mxu0  ;;  %v7362_v43 = vunpack.c.h.bf16 %v7410_v33  ;;  %v6017_v22 = vsel %vm389_vm0, %v7275_v17, 0 }
 0x33b   : > { %4210 = vst.msk [vmem:[%s10029_s19 + $0x1] sm:$0xff] %vm340_vm1, %v4178_v15  ;;  %3954 = vst.msk [vmem:[%s10029_s19 + $0x30] sm:$0xff] %vm340_vm1, %v3922_v6  ;;  %v3920_v35 = vadd.f32 %v10020_v55, %v3881_v2  ;;  %v3884_v30 = vadd.f32 %v8199_v49, %v7358_v47  ;;  %v7373_v15 = vunpack.c.l.bf16 %v7413_v26 }
 0x33c   : > { %4211 = vst.msk [vmem:[%s10029_s19 + $0x9] sm:$0x7f] %vm856_vm3, %v4179_v3  ;;  %v3705_v42 = vpop.f32.mrf.mxu1  ;;  %v4038_v50 = vpop.f32.mrf.mxu0 }
 0x33d   : > { %3952 = vst.msk [vmem:[%s10029_s19 + $0x20] sm:$0xff] %vm340_vm1, %v3920_v35  ;;  %v3923_v48 = vadd.f32 %v10020_v55, %v3884_v30  ;;  %v3882_v60 = vadd.f32 %v7354_v27, %v3705_v42  ;;  %v7412_v27 = vld [vmem:[%s8842_s29 + $0x30] sm:$0xff]   ;;  %v7374_v42 = vunpack.c.h.bf16 %v7413_v26 }
 0x33e   : > { %v7369_v6 = vunpack.c.l.bf16 %v7412_v27  ;;  %v7370_v13 = vunpack.c.h.bf16 %v7412_v27 }
 0x33f   : > { %3955 = vst.msk [vmem:[%s10029_s19 + $0x38] sm:$0xff] %vm340_vm1, %v3923_v48  ;;  %v3921_v63 = vadd.f32 %v10020_v55, %v3882_v60  ;;  %8347 = vmatmul.mubr.msk.bf16.gmra.mxu0 %vm340_vm1, %v10088_v28  ;;  %8377 = vmatmul.mubr.msk.bf16.gmra.mxu1 %vm340_vm1, %v9961_v58 }
 0x340   : > { %8350 = vmatprep.mubr.msk.bf16.mxu0 %vm8782_vm2, %v8781_v5  ;;  %8380 = vmatprep.mubr.msk.bf16.mxu1 %vm8782_vm2, %v8781_v5 }
 0x341   : > { %3953 = vst.msk [vmem:[%s10029_s19 + $0x28] sm:$0xff] %vm340_vm1, %v3921_v63 }
 0x346   : > { %v4152_v34 = vld [vmem:[%s10029_s19 + $0x31] sm:$0xff]  ;;  %v4153_v54 = vld [vmem:[%s10029_s19 + $0x39] sm:$0x7f]  ;;  %v8202_v59 = vpop.f32.mrf.mxu1  ;;  %v8236_v19 = vpop.f32.mrf.mxu0 }
 0x347   : > { %v4184_v36 = vadd.f32 %v8232_v44, %v4152_v34  ;;  %v4185_v61 = vadd.f32 %v8233_v56, %v4153_v54  ;;  %v3887_v62 = vadd.f32 %v8202_v59, %v7365_v23  ;;  %8351 = vmatmul.mubr.msk.bf16.gmra.mxu0 %vm340_vm1, %v10105_v31  ;;  %8381 = vmatmul.mubr.msk.bf16.gmra.mxu1 %vm340_vm1, %v9970_v16 }
 0x348   : > { %v4150_v1 = vld [vmem:[%s10029_s19 + $0x21] sm:$0xff]  ;;  %v4151_v4 = vld [vmem:[%s10029_s19 + $0x29] sm:$0x7f]  ;;  %v3718_v20 = vpop.f32.mrf.mxu1  ;;  %8384 = vmatprep.mubr.msk.bf16.mxu1 %vm8782_vm2, %v8781_v5  ;;  %8418 = vmatprep.mubr.msk.bf16.mxu0 %vm8782_vm2, %v8781_v5  ;;  %v4051_v25 = vpop.f32.mrf.mxu0 }
 0x349   : > { %4216 = vst.msk [vmem:[%s10029_s19 + $0x31] sm:$0xff] %vm340_vm1, %v4184_v36  ;;  %v4182_v7 = vadd.f32 %v4150_v1, %v4035_v46  ;;  %v4183_v45 = vadd.f32 %v4151_v4, %v4038_v50  ;;  %v3926_v8 = vadd.f32 %v10020_v55, %v3887_v62  ;;  %v3885_v52 = vadd.f32 %v7361_v57, %v3718_v20  ;;  %v7415_v50 = vld [vmem:[%s8842_s29 + $0x48] sm:$0xff]   ;;  %v7414_v4 = vld [vmem:[%s8842_s29 + $0x40] sm:$0xff]  }
 0x34a   : > { %4217 = vst.msk [vmem:[%s10029_s19 + $0x39] sm:$0x7f] %vm856_vm3, %v4185_v61  ;;  %v8203_v11 = vpop.f32.mrf.mxu1  ;;  %v8237_v3 = vpop.f32.mrf.mxu0  ;;  %v7381_v20 = vunpack.c.l.bf16 %v7415_v50 }
 0x34b   : > { %4214 = vst.msk [vmem:[%s10029_s19 + $0x21] sm:$0xff] %vm340_vm1, %v4182_v7  ;;  %3958 = vst.msk [vmem:[%s10029_s19 + $0x50] sm:$0xff] %vm340_vm1, %v3926_v8  ;;  %v3924_v14 = vadd.f32 %v10020_v55, %v3885_v52  ;;  %v3888_v38 = vadd.f32 %v8203_v11, %v7366_v0  ;;  %v7377_v7 = vunpack.c.l.bf16 %v7414_v4 }
 0x34c   : > { %4215 = vst.msk [vmem:[%s10029_s19 + $0x29] sm:$0x7f] %vm856_vm3, %v4183_v45  ;;  %v3721_v21 = vpop.f32.mrf.mxu1  ;;  %v4054_v60 = vpop.f32.mrf.mxu0 }
 0x34d   : > { %3956 = vst.msk [vmem:[%s10029_s19 + $0x40] sm:$0xff] %vm340_vm1, %v3924_v14  ;;  %v3927_v12 = vadd.f32 %v10020_v55, %v3888_v38  ;;  %v3886_v47 = vadd.f32 %v7362_v43, %v3721_v21  ;;  %v7382_v38 = vunpack.c.h.bf16 %v7415_v50 }
 0x34f   : > { %3959 = vst.msk [vmem:[%s10029_s19 + $0x58] sm:$0xff] %vm340_vm1, %v3927_v12  ;;  %v3925_v24 = vadd.f32 %v10020_v55, %v3886_v47  ;;  %8385 = vmatmul.mubr.msk.bf16.gmra.mxu1 %vm340_vm1, %v9978_v29  ;;  %8419 = vmatmul.mubr.msk.bf16.vlgmr.msra.gmra.mxu0 %vm340_vm1, %v9907_v37  ;;  %v7378_v47 = vunpack.c.h.bf16 %v7414_v4 }
 0x350   : > { %8388 = vmatprep.mubr.msk.bf16.mxu1 %vm8782_vm2, %v8781_v5  ;;  %8422 = vmatprep.mubr.msk.bf16.mxu0 %vm8782_vm2, %v8781_v5 }
 0x351   : > { %3957 = vst.msk [vmem:[%s10029_s19 + $0x48] sm:$0xff] %vm340_vm1, %v3925_v24  ;;  %8541 = vmatpush3.bf16.msra.mxu0 %v6017_v22 }
 0x356   : > { %v4156_v2 = vld [vmem:[%s10029_s19 + $0x51] sm:$0xff]  ;;  %v4157_v37 = vld [vmem:[%s10029_s19 + $0x59] sm:$0x7f]  ;;  %v8206_v49 = vpop.f32.mrf.mxu1  ;;  %v8240_v59 = vpop.f32.mrf.mxu0 }
 0x357   : > { %v4188_v35 = vadd.f32 %v8236_v19, %v4156_v2  ;;  %v4189_v30 = vadd.f32 %v8237_v3, %v4157_v37  ;;  %v3891_v44 = vadd.f32 %v8206_v49, %v7373_v15  ;;  %8389 = vmatmul.mubr.msk.bf16.gmra.mxu1 %vm340_vm1, %v9990_v39  ;;  %8423 = vmatmul.mubr.msk.bf16.gmra.mxu0 %vm340_vm1, %v9921_v18 }
 0x358   : > { %v4154_v48 = vld [vmem:[%s10029_s19 + $0x41] sm:$0xff]  ;;  %v4155_v63 = vld [vmem:[%s10029_s19 + $0x49] sm:$0x7f]  ;;  %v3734_v46 = vpop.f32.mrf.mxu1  ;;  %8392 = vmatprep.mubr.msk.bf16.mxu1 %vm8782_vm2, %v8781_v5  ;;  %8426 = vmatprep.mubr.msk.bf16.mxu0 %vm8782_vm2, %v8781_v5  ;;  %v4067_v1 = vpop.f32.mrf.mxu0 }
 0x359   : > { %4220 = vst.msk [vmem:[%s10029_s19 + $0x51] sm:$0xff] %vm340_vm1, %v4188_v35  ;;  %v4186_v18 = vadd.f32 %v4154_v48, %v4051_v25  ;;  %v4187_v33 = vadd.f32 %v4155_v63, %v4054_v60  ;;  %v3930_v23 = vadd.f32 %v10020_v55, %v3891_v44  ;;  %v3889_v56 = vadd.f32 %v7369_v6, %v3734_v46 }
 0x35a   : > { %4221 = vst.msk [vmem:[%s10029_s19 + $0x59] sm:$0x7f] %vm856_vm3, %v4189_v30  ;;  %v8207_v57 = vpop.f32.mrf.mxu1  ;;  %v8241_v43 = vpop.f32.mrf.mxu0  ;;  %v7417_v30 = vld [vmem:[%s8842_s29 + $0x58] sm:$0xff]  }
 0x35b   : > { %4218 = vst.msk [vmem:[%s10029_s19 + $0x41] sm:$0xff] %vm340_vm1, %v4186_v18  ;;  %3962 = vst.msk [vmem:[%s10029_s19 + $0x70] sm:$0xff] %vm340_vm1, %v3930_v23  ;;  %v3928_v34 = vadd.f32 %v10020_v55, %v3889_v56  ;;  %v3892_v54 = vadd.f32 %v8207_v57, %v7374_v42  ;;  %v7416_v42 = vld [vmem:[%s8842_s29 + $0x50] sm:$0xff]   ;;  %v7389_v48 = vunpack.c.l.bf16 %v7417_v30  ;;  %v7390_v56 = vunpack.c.h.bf16 %v7417_v30 }
 0x35c   : > { %4219 = vst.msk [vmem:[%s10029_s19 + $0x49] sm:$0x7f] %vm856_vm3, %v4187_v33  ;;  %v3737_v36 = vpop.f32.mrf.mxu1  ;;  %v4070_v19 = vpop.f32.mrf.mxu0  ;;  %v7385_v60 = vunpack.c.l.bf16 %v7416_v42 }
 0x35d   : > { %3960 = vst.msk [vmem:[%s10029_s19 + $0x60] sm:$0xff] %vm340_vm1, %v3928_v34  ;;  %v3931_v61 = vadd.f32 %v10020_v55, %v3892_v54  ;;  %v3890_v62 = vadd.f32 %v7370_v13, %v3737_v36  ;;  %v7386_v36 = vunpack.c.h.bf16 %v7416_v42 }
 0x35f   : > { %3963 = vst.msk [vmem:[%s10029_s19 + $0x78] sm:$0xff] %vm340_vm1, %v3931_v61  ;;  %v3929_v0 = vadd.f32 %v10020_v55, %v3890_v62  ;;  %8393 = vmatmul.mubr.msk.bf16.gmra.mxu1 %vm340_vm1, %v10002_v40  ;;  %8427 = vmatmul.mubr.msk.bf16.gmra.mxu0 %vm340_vm1, %v9931_v53 }
 0x360   : > { %8396 = vmatprep.mubr.msk.bf16.mxu1 %vm8782_vm2, %v8781_v5  ;;  %8430 = vmatprep.mubr.msk.bf16.mxu0 %vm8782_vm2, %v8781_v5 }
 0x361   : > { %3961 = vst.msk [vmem:[%s10029_s19 + $0x68] sm:$0xff] %vm340_vm1, %v3929_v0 }
 0x366   : > { %v4160_v45 = vld [vmem:[%s10029_s19 + $0x71] sm:$0xff]  ;;  %v4161_v8 = vld [vmem:[%s10029_s19 + $0x79] sm:$0x7f]  ;;  %v8210_v53 = vpop.f32.mrf.mxu1  ;;  %v8244_v26 = vpop.f32.mrf.mxu0 }
 0x367   : > { %v4192_v52 = vadd.f32 %v8240_v59, %v4160_v45  ;;  %v4193_v11 = vadd.f32 %v8241_v43, %v4161_v8  ;;  %v3895_v14 = vadd.f32 %v8210_v53, %v7381_v20  ;;  %8397 = vmatmul.mubr.msk.bf16.gmra.mxu1 %vm340_vm1, %v10015_v51  ;;  %8431 = vmatmul.mubr.msk.bf16.gmra.mxu0 %vm340_vm1, %v9941_v9 }
 0x368   : > { %v4158_v17 = vld [vmem:[%s10029_s19 + $0x61] sm:$0xff]  ;;  %v4159_v21 = vld [vmem:[%s10029_s19 + $0x69] sm:$0x7f]  ;;  %v3750_v12 = vpop.f32.mrf.mxu1  ;;  %8400 = vmatprep.mubr.msk.bf16.mxu1 %vm8782_vm2, %v8781_v5  ;;  %8434 = vmatprep.mubr.msk.bf16.mxu0 %vm8782_vm2, %v8781_v5  ;;  %v4083_v49 = vpop.f32.mrf.mxu0 }
 0x369   : > { %4224 = vst.msk [vmem:[%s10029_s19 + $0x71] sm:$0xff] %vm340_vm1, %v4192_v52  ;;  %v4190_v9 = vadd.f32 %v4158_v17, %v4067_v1  ;;  %v4191_v22 = vadd.f32 %v4159_v21, %v4070_v19  ;;  %v3934_v24 = vadd.f32 %v10020_v55, %v3895_v14  ;;  %v3893_v25 = vadd.f32 %v7377_v7, %v3750_v12  ;;  %v7419_v52 = vld [vmem:[%s8842_s29 + $0x68] sm:$0xff]  }
 0x36a   : > { %4225 = vst.msk [vmem:[%s10029_s19 + $0x79] sm:$0x7f] %vm856_vm3, %v4193_v11  ;;  %v8211_v27 = vpop.f32.mrf.mxu1  ;;  %v8245_v44 = vpop.f32.mrf.mxu0  ;;  %v7418_v11 = vld [vmem:[%s8842_s29 + $0x60] sm:$0xff]   ;;  %v7397_v14 = vunpack.c.l.bf16 %v7419_v52 }
 0x36b   : > { %4222 = vst.msk [vmem:[%s10029_s19 + $0x61] sm:$0xff] %vm340_vm1, %v4190_v9  ;;  %3966 = vst.msk [vmem:[%s10029_s19 + $0x90] sm:$0xff] %vm340_vm1, %v3934_v24  ;;  %v3932_v15 = vadd.f32 %v10020_v55, %v3893_v25  ;;  %v3896_v3 = vadd.f32 %v8211_v27, %v7382_v38  ;;  %v7393_v17 = vunpack.c.l.bf16 %v7418_v11  ;;  %v7398_v24 = vunpack.c.h.bf16 %v7419_v52 }
 0x36c   : > { %4223 = vst.msk [vmem:[%s10029_s19 + $0x69] sm:$0x7f] %vm856_vm3, %v4191_v22  ;;  %v3753_v6 = vpop.f32.mrf.mxu1  ;;  %v4086_v13 = vpop.f32.mrf.mxu0 }
 0x36d   : > { %3964 = vst.msk [vmem:[%s10029_s19 + $0x80] sm:$0xff] %vm340_vm1, %v3932_v15  ;;  %v3935_v2 = vadd.f32 %v10020_v55, %v3896_v3  ;;  %v3894_v37 = vadd.f32 %v7378_v47, %v3753_v6  ;;  %v7394_v3 = vunpack.c.h.bf16 %v7418_v11 }
 0x36f   : > { %3967 = vst.msk [vmem:[%s10029_s19 + $0x98] sm:$0xff] %vm340_vm1, %v3935_v2  ;;  %v3933_v35 = vadd.f32 %v10020_v55, %v3894_v37  ;;  %8401 = vmatmul.mubr.msk.bf16.gmra.mxu1 %vm340_vm1, %v10042_v41  ;;  %8435 = vmatmul.mubr.msk.bf16.gmra.mxu0 %vm340_vm1, %v9951_v32 }
 0x370   : > { %8404 = vmatprep.mubr.msk.bf16.mxu1 %vm8782_vm2, %v8781_v5  ;;  %8438 = vmatprep.mubr.msk.bf16.mxu0 %vm8782_vm2, %v8781_v5 }
 0x371   : > { %3965 = vst.msk [vmem:[%s10029_s19 + $0x88] sm:$0xff] %vm340_vm1, %v3933_v35 }
 0x376   : > { %v4164_v63 = vld [vmem:[%s10029_s19 + $0x91] sm:$0xff]  ;;  %v4165_v46 = vld [vmem:[%s10029_s19 + $0x99] sm:$0x7f]  ;;  %v8214_v32 = vpop.f32.mrf.mxu1  ;;  %v8248_v54 = vpop.f32.mrf.mxu0 }
 0x377   : > { %v4196_v18 = vadd.f32 %v8244_v26, %v4164_v63  ;;  %v4197_v33 = vadd.f32 %v8245_v44, %v4165_v46  ;;  %v3899_v23 = vadd.f32 %v8214_v32, %v7389_v48  ;;  %8405 = vmatmul.mubr.msk.bf16.gmra.mxu1 %vm340_vm1, %v10059_v10  ;;  %8439 = vmatmul.mubr.msk.bf16.gmra.mxu0 %vm340_vm1, %v9961_v58  ;;  %v7291_v44 = vld [vmem:[%s11299_s3 + $0x10] sm:$0x3] }
 0x378   : > { %v4162_v57 = vld [vmem:[%s10029_s19 + $0x81] sm:$0xff]  ;;  %v4163_v34 = vld [vmem:[%s10029_s19 + $0x89] sm:$0x7f]  ;;  %v3766_v59 = vpop.f32.mrf.mxu1  ;;  %8408 = vmatprep.mubr.msk.bf16.mxu1 %vm8782_vm2, %v8781_v5  ;;  %8442 = vmatprep.mubr.msk.bf16.mxu0 %vm8782_vm2, %v8781_v5  ;;  %v4099_v20 = vpop.f32.mrf.mxu0 }
 0x379   : > { %4228 = vst.msk [vmem:[%s10029_s19 + $0x91] sm:$0xff] %vm340_vm1, %v4196_v18  ;;  %v4194_v58 = vadd.f32 %v4162_v57, %v4083_v49  ;;  %v4195_v61 = vadd.f32 %v4163_v34, %v4086_v13  ;;  %v3938_v62 = vadd.f32 %v10020_v55, %v3899_v23  ;;  %v3897_v0 = vadd.f32 %v7385_v60, %v3766_v59  ;;  %v7421_v49 = vld [vmem:[%s8842_s29 + $0x78] sm:$0xff]   ;;  %v7420_v60 = vld [vmem:[%s8842_s29 + $0x70] sm:$0xff]  }
 0x37a   : > { %4229 = vst.msk [vmem:[%s10029_s19 + $0x99] sm:$0x7f] %vm856_vm3, %v4197_v33  ;;  %v8215_v1 = vpop.f32.mrf.mxu1  ;;  %v8249_v53 = vpop.f32.mrf.mxu0  ;;  %v7405_v13 = vunpack.c.l.bf16 %v7421_v49  ;;  %v10315_v33 = vld [vmem:[#allocation3 + $0x8] sm:$0xff]   ;;  %v6265_v23 = vsel %vm389_vm0, %v7291_v44, 0 }
 0x37b   : > { %4226 = vst.msk [vmem:[%s10029_s19 + $0x81] sm:$0xff] %vm340_vm1, %v4194_v58  ;;  %3970 = vst.msk [vmem:[%s10029_s19 + $0xb0] sm:$0xff] %vm340_vm1, %v3938_v62  ;;  %v3936_v50 = vadd.f32 %v10020_v55, %v3897_v0  ;;  %v3900_v4 = vadd.f32 %v8215_v1, %v7390_v56  ;;  %v7401_v56 = vunpack.c.l.bf16 %v7420_v60  ;;  %v7402_v0 = vunpack.c.h.bf16 %v7420_v60 }
 0x37c   : > { %4227 = vst.msk [vmem:[%s10029_s19 + $0x89] sm:$0x7f] %vm856_vm3, %v4195_v61  ;;  %v3769_v43 = vpop.f32.mrf.mxu1  ;;  %v4102_v38 = vpop.f32.mrf.mxu0 }
 0x37d   : > { %3968 = vst.msk [vmem:[%s10029_s19 + $0xa0] sm:$0xff] %vm340_vm1, %v3936_v50  ;;  %v3939_v7 = vadd.f32 %v10020_v55, %v3900_v4  ;;  %v3898_v45 = vadd.f32 %v7386_v36, %v3769_v43  ;;  %v7406_v36 = vunpack.c.h.bf16 %v7421_v49 }
 0x37f   : > { %3971 = vst.msk [vmem:[%s10029_s19 + $0xb8] sm:$0xff] %vm340_vm1, %v3939_v7  ;;  %v3937_v8 = vadd.f32 %v10020_v55, %v3898_v45  ;;  %8409 = vmatmul.mubr.msk.bf16.gmra.mxu1 %vm340_vm1, %v10088_v28  ;;  %8443 = vmatmul.mubr.msk.bf16.gmra.mxu0 %vm340_vm1, %v9970_v16  ;;  %v10341_v45 = vld [vmem:[#allocation3 + $0x10] sm:$0xff]  }
 0x380   : > { %8412 = vmatprep.mubr.msk.bf16.mxu1 %vm8782_vm2, %v8781_v5  ;;  %8446 = vmatprep.mubr.msk.bf16.mxu0 %vm8782_vm2, %v8781_v5 }
 0x381   : > { %3969 = vst.msk [vmem:[%s10029_s19 + $0xa8] sm:$0xff] %vm340_vm1, %v3937_v8 }
 0x386   : > { %v4168_v19 = vld [vmem:[%s10029_s19 + $0xb1] sm:$0xff]  ;;  %v4169_v21 = vld [vmem:[%s10029_s19 + $0xb9] sm:$0x7f]  ;;  %v8218_v16 = vpop.f32.mrf.mxu1  ;;  %v10281_v12 = vpop.f32.mrf.mxu0 }
 0x387   : > { %v4200_v47 = vadd.f32 %v8248_v54, %v4168_v19  ;;  %v4201_v9 = vadd.f32 %v8249_v53, %v4169_v21  ;;  %v3903_v22 = vadd.f32 %v8218_v16, %v7397_v14  ;;  %8413 = vmatmul.mubr.msk.bf16.gmra.mxu1 %vm340_vm1, %v10105_v31  ;;  %8447 = vmatmul.mubr.msk.bf16.gmra.mxu0 %vm340_vm1, %v9978_v29 }
 0x388   : > { %v4166_v25 = vld [vmem:[%s10029_s19 + $0xa1] sm:$0xff]  ;;  %v4167_v26 = vld [vmem:[%s10029_s19 + $0xa9] sm:$0x7f]  ;;  %v3782_v27 = vpop.f32.mrf.mxu1  ;;  %v10289_v15 = vpop.f32.mrf.mxu0  ;;  %8450 = vmatprep.mubr.msk.bf16.mxu0 %vm8782_vm2, %v8781_v5  ;;  %8480 = vmatprep.mubr.msk.bf16.mxu1 %vm8782_vm2, %v8781_v5 }
 0x389   : > { %4232 = vst.msk [vmem:[%s10029_s19 + $0xb1] sm:$0xff] %vm340_vm1, %v4200_v47  ;;  %v4198_v29 = vadd.f32 %v4166_v25, %v4099_v20  ;;  %v4199_v6 = vadd.f32 %v4167_v26, %v4102_v38  ;;  %v3942_v2 = vadd.f32 %v10020_v55, %v3903_v22  ;;  %v3901_v37 = vadd.f32 %v7393_v17, %v3782_v27  ;;  %v4411_v27 = vld [vmem:[%s10029_s19 + $0x18] sm:$0x7f] }
 0x38a   : > { %4233 = vst.msk [vmem:[%s10029_s19 + $0xb9] sm:$0x7f] %vm856_vm3, %v4201_v9  ;;  %v8219_v35 = vpop.f32.mrf.mxu1  ;;  %v8253_v30 = vpop.f32.mrf.mxu0 }
 0x38b   : > { %4230 = vst.msk [vmem:[%s10029_s19 + $0xa1] sm:$0xff] %vm340_vm1, %v4198_v29  ;;  %3974 = vst.msk [vmem:[%s10029_s19 + $0xd0] sm:$0xff] %vm340_vm1, %v3942_v2  ;;  %v3940_v42 = vadd.f32 %v10020_v55, %v3901_v37  ;;  %v3904_v48 = vadd.f32 %v8219_v35, %v7398_v24  ;;  %v10376_v29 = vld [vmem:[#allocation3 + $0x18] sm:$0xff]   ;;  %v4410_v2 = vld [vmem:[%s10029_s19 + $0x10] sm:$0xff] }
 0x38c   : > { %4231 = vst.msk [vmem:[%s10029_s19 + $0xa9] sm:$0x7f] %vm856_vm3, %v4199_v6  ;;  %v3785_v63 = vpop.f32.mrf.mxu1  ;;  %v4118_v46 = vpop.f32.mrf.mxu0 }
 0x38d   : > { %3972 = vst.msk [vmem:[%s10029_s19 + $0xc0] sm:$0xff] %vm340_vm1, %v3940_v42  ;;  %v3943_v32 = vadd.f32 %v10020_v55, %v3904_v48  ;;  %v3902_v18 = vadd.f32 %v7394_v3, %v3785_v63  ;;  %v4409_v48 = vld [vmem:[%s10029_s19 + $0x8] sm:$0x7f] }
 0x38f   : > { %3975 = vst.msk [vmem:[%s10029_s19 + $0xd8] sm:$0xff] %vm340_vm1, %v3943_v32  ;;  %v3941_v57 = vadd.f32 %v10020_v55, %v3902_v18  ;;  %v8222_v34 = vpop.f32.mrf.mxu1  ;;  %v10321_v54 = vpop.f32.mrf.mxu0  ;;  %8451 = vmatmul.mubr.msk.bf16.gmra.mxu0 %vm340_vm1, %v9990_v39  ;;  %8481 = vmatmul.mubr.msk.bf16.vlgmr.msra.gmra.mxu1 %vm340_vm1, %v10315_v33  ;;  %v4408_v32 = vld [vmem:[%s10029_s19] sm:$0xff] }
 0x390   : > { %v3907_v59 = vadd.f32 %v8222_v34, %v7405_v13  ;;  %8603 = vmatpush3.bf16.msra.mxu1 %v6265_v23  ;;  %8454 = vmatprep.mubr.msk.bf16.mxu0 %vm8782_vm2, %v8781_v5 }
 0x391   : > { %3973 = vst.msk [vmem:[%s10029_s19 + $0xc8] sm:$0xff] %vm340_vm1, %v3941_v57  ;;  %v3798_v58 = vpop.f32.mrf.mxu1  ;;  %v10331_v61 = vpop.f32.mrf.mxu0  ;;  %8484 = vmatprep.mubr.msk.bf16.mxu1 %vm8782_vm2, %v8781_v5 }
 0x392   : > { %v3946_v39 = vadd.f32 %v10020_v55, %v3907_v59  ;;  %v3905_v62 = vadd.f32 %v7401_v56, %v3798_v58 }
 0x393   : > { %v8223_v1 = vpop.f32.mrf.mxu1  ;;  %v8257_v50 = vpop.f32.mrf.mxu0 }
 0x394   : > { %3978 = vst.msk [vmem:[%s10029_s19 + $0xf0] sm:$0xff] %vm340_vm1, %v3946_v39  ;;  %v3944_v4 = vadd.f32 %v10020_v55, %v3905_v62  ;;  %v3908_v20 = vadd.f32 %v8223_v1, %v7406_v36  ;;  %v4415_v1 = vld [vmem:[%s10029_s19 + $0x38] sm:$0x7f] }
 0x395   : > { %v3801_v43 = vpop.f32.mrf.mxu1  ;;  %v10339_v7 = vpop.f32.mrf.mxu0 }
 0x396   : > { %v4172_v8 = vld [vmem:[%s10029_s19 + $0xd1] sm:$0xff]  ;;  %v4173_v53 = vld [vmem:[%s10029_s19 + $0xd9] sm:$0x7f]  ;;  %3976 = vst.msk [vmem:[%s10029_s19 + $0xe0] sm:$0xff] %vm340_vm1, %v3944_v4  ;;  %v3947_v52 = vadd.f32 %v10020_v55, %v3908_v20  ;;  %v3906_v11 = vadd.f32 %v7402_v0, %v3801_v43  ;;  %v10419_v4 = vld [vmem:[#allocation3 + $0x20] sm:$0xff]  }
 0x397   : > { %v4204_v14 = vadd.f32 %v10281_v12, %v4172_v8  ;;  %v4205_v38 = vadd.f32 %v8253_v30, %v4173_v53  ;;  %v8262_v17 = vpop.f32.mrf.mxu1  ;;  %v10349_v19 = vpop.f32.mrf.mxu0  ;;  %8455 = vmatmul.mubr.msk.bf16.gmra.mxu0 %vm340_vm1, %v10002_v40  ;;  %8485 = vmatmul.mubr.msk.bf16.gmra.mxu1 %vm340_vm1, %v10341_v45  ;;  %v4414_v43 = vld [vmem:[%s10029_s19 + $0x30] sm:$0xff] }
 0x398   : > { %v4170_v21 = vld [vmem:[%s10029_s19 + $0xc1] sm:$0xff]  ;;  %v4171_v16 = vld [vmem:[%s10029_s19 + $0xc9] sm:$0x7f]  ;;  %3979 = vst.msk [vmem:[%s10029_s19 + $0xf8] sm:$0xff] %vm340_vm1, %v3947_v52  ;;  %v3945_v47 = vadd.f32 %v10020_v55, %v3906_v11  ;;  %8458 = vmatprep.mubr.msk.bf16.mxu0 %vm8782_vm2, %v8781_v5  ;;  %8488 = vmatprep.mubr.msk.bf16.mxu1 %vm8782_vm2, %v8781_v5  ;;  %v4475_v25 = vrot.slane %v8262_v17, 1 }
 0x399   : > { %4236 = vst.msk [vmem:[%s10029_s19 + $0xd1] sm:$0xff] %vm340_vm1, %v4204_v14  ;;  %v4202_v40 = vadd.f32 %v4170_v21, %v10289_v15  ;;  %v4203_v12 = vadd.f32 %v4171_v16, %v4118_v46  ;;  %v4281_v9 = vpop.f32.mrf.mxu1  ;;  %v8296_v22 = vpop.f32.mrf.mxu0  ;;  %v4413_v14 = vld [vmem:[%s10029_s19 + $0x28] sm:$0x7f]  ;;  %v4412_v16 = vld [vmem:[%s10029_s19 + $0x20] sm:$0xff] }
 0x39a   : > { %4237 = vst.msk [vmem:[%s10029_s19 + $0xd9] sm:$0x7f] %vm856_vm3, %v4205_v38  ;;  %v4472_v6 = vrot.slane %v4281_v9, 1 }
 0x39b   : > { %3977 = vst.msk [vmem:[%s10029_s19 + $0xe8] sm:$0xff] %vm340_vm1, %v3945_v47  ;;  %4234 = vst.msk [vmem:[%s10029_s19 + $0xc1] sm:$0xff] %vm340_vm1, %v4202_v40  ;;  %v8263_v55 = vpop.f32.mrf.mxu1  ;;  %v4808_v24 = vpop.f32.mrf.mxu0 }
 0x39c   : > { %4235 = vst.msk [vmem:[%s10029_s19 + $0xc9] sm:$0x7f] %vm856_vm3, %v4203_v12  ;;  %v4476_v26 = vrot.slane %v8263_v55, 1 }
 0x39d   : > { %v4284_v3 = vpop.f32.mrf.mxu1  ;;  %v8297_v15 = vpop.f32.mrf.mxu0 }
 0x39e   : > { %v4477_v37 = vsel %vm1118_vm4, %v4475_v25, %v4476_v26  ;;  %v4555_v49 = vadd.f32 %v4476_v26, %v4411_v27  ;;  %v4473_v35 = vrot.slane %v4284_v3, 1  ;;  %v4419_v3 = vld [vmem:[%s10029_s19 + $0x58] sm:$0x7f] }
 0x39f   : > { %v4176_v30 = vld [vmem:[%s10029_s19 + $0xf1] sm:$0xff]  ;;  %v4177_v44 = vld [vmem:[%s10029_s19 + $0xf9] sm:$0x7f]  ;;  %v4554_v42 = vadd.f32 %v4477_v37, %v4410_v2  ;;  %v8266_v60 = vpop.f32.mrf.mxu1  ;;  %v10383_v63 = vpop.f32.mrf.mxu0  ;;  %8459 = vmatmul.mubr.msk.bf16.gmra.mxu0 %vm340_vm1, %v10015_v51  ;;  %8489 = vmatmul.mubr.msk.bf16.gmra.mxu1 %vm340_vm1, %v10376_v29 }
 0x3a0   : > { %v4208_v46 = vadd.f32 %v10321_v54, %v4176_v30  ;;  %v4209_v13 = vadd.f32 %v8257_v50, %v4177_v44  ;;  %4587 = vst.msk [vmem:[%s10029_s19 + $0x18] sm:$0x7f] %vm856_vm3, %v4555_v49  ;;  %v4474_v18 = vsel %vm1118_vm4, %v4472_v6, %v4473_v35  ;;  %v4553_v23 = vadd.f32 %v4473_v35, %v4409_v48  ;;  %v4418_v37 = vld [vmem:[%s10029_s19 + $0x50] sm:$0xff]  ;;  %v4417_v48 = vld [vmem:[%s10029_s19 + $0x48] sm:$0x7f] }
 0x3a1   : > { %8462 = vmatprep.mubr.msk.bf16.mxu0 %vm8782_vm2, %v8781_v5  ;;  %4586 = vst.msk [vmem:[%s10029_s19 + $0x10] sm:$0xff] %vm340_vm1, %v4554_v42  ;;  %v4552_v57 = vadd.f32 %v4474_v18, %v4408_v32  ;;  %v4297_v34 = vpop.f32.mrf.mxu1  ;;  %v8300_v54 = vpop.f32.mrf.mxu0  ;;  %8492 = vmatprep.mubr.msk.bf16.mxu1 %vm8782_vm2, %v8781_v5  ;;  %v4481_v62 = vrot.slane %v8266_v60, 1  ;;  %v4416_v18 = vld [vmem:[%s10029_s19 + $0x40] sm:$0xff] }
 0x3a2   : > { %v4174_v51 = vld [vmem:[%s10029_s19 + $0xe1] sm:$0xff]  ;;  %v4175_v56 = vld [vmem:[%s10029_s19 + $0xe9] sm:$0x7f]  ;;  %4240 = vst.msk [vmem:[%s10029_s19 + $0xf1] sm:$0xff] %vm340_vm1, %v4208_v46  ;;  %v4478_v20 = vrot.slane %v4297_v34, 1 }
 0x3a3   : > { %4241 = vst.msk [vmem:[%s10029_s19 + $0xf9] sm:$0x7f] %vm856_vm3, %v4209_v13  ;;  %v4206_v59 = vadd.f32 %v4174_v51, %v10331_v61  ;;  %v4207_v36 = vadd.f32 %v4175_v56, %v10339_v7  ;;  %4585 = vst.msk [vmem:[%s10029_s19 + $0x8] sm:$0x7f] %vm856_vm3, %v4553_v23  ;;  %v8267_v58 = vpop.f32.mrf.mxu1  ;;  %v10412_v39 = vpop.f32.mrf.mxu0 }
 0x3a4   : > { %4584 = vst.msk [vmem:[%s10029_s19] sm:$0xff] %vm340_vm1, %v4552_v57  ;;  %v4482_v0 = vrot.slane %v8267_v58, 1 }
 0x3a5   : > { %4238 = vst.msk [vmem:[%s10029_s19 + $0xe1] sm:$0xff] %vm340_vm1, %v4206_v59  ;;  %v4300_v50 = vpop.f32.mrf.mxu1  ;;  %v8301_v61 = vpop.f32.mrf.mxu0 }
 0x3a6   : > { %4239 = vst.msk [vmem:[%s10029_s19 + $0xe9] sm:$0x7f] %vm856_vm3, %v4207_v36  ;;  %v4483_v7 = vsel %vm1118_vm4, %v4481_v62, %v4482_v0  ;;  %v4559_v8 = vadd.f32 %v4482_v0, %v4415_v1  ;;  %v4479_v53 = vrot.slane %v4300_v50, 1  ;;  %v4423_v61 = vld [vmem:[%s10029_s19 + $0x78] sm:$0x7f] }
 0x3a7   : > { %v7034_v52 = vld [vmem:[%s10029_s19 + $0x18] sm:$0xff]  ;;  %v4558_v11 = vadd.f32 %v4483_v7, %v4414_v43  ;;  %v8270_v38 = vpop.f32.mrf.mxu1  ;;  %v4821_v17 = vpop.f32.mrf.mxu0  ;;  %8463 = vmatmul.mubr.msk.bf16.gmra.mxu0 %vm340_vm1, %v10042_v41  ;;  %8493 = vmatmul.mubr.msk.bf16.gmra.mxu1 %vm340_vm1, %v10419_v4  ;;  %v10486_v7 = vld [vmem:[#allocation3 + $0x30] sm:$0xff]  }
 0x3a8   : > { %v4956_v21 = vadd.f32 %v7034_v52, %v4808_v24  ;;  %4591 = vst.msk [vmem:[%s10029_s19 + $0x38] sm:$0x7f] %vm856_vm3, %v4559_v8  ;;  %v4480_v47 = vsel %vm1118_vm4, %v4478_v20, %v4479_v53  ;;  %v4557_v40 = vadd.f32 %v4479_v53, %v4413_v14  ;;  %8466 = vmatprep.mubr.msk.bf16.mxu0 %vm8782_vm2, %v8781_v5  ;;  %v7033_v41 = vld [vmem:[%s10029_s19 + $0x10] sm:$0xff]  ;;  %v4487_v26 = vrot.slane %v8270_v38, 1  ;;  %v4421_v14 = vld [vmem:[%s10029_s19 + $0x68] sm:$0x7f] }
 0x3a9   : > { %8496 = vmatprep.mubr.msk.bf16.mxu1 %vm8782_vm2, %v8781_v5  ;;  %4590 = vst.msk [vmem:[%s10029_s19 + $0x30] sm:$0xff] %vm340_vm1, %v4558_v11  ;;  %v4556_v12 = vadd.f32 %v4480_v47, %v4412_v16  ;;  %v4313_v9 = vpop.f32.mrf.mxu1  ;;  %v8304_v22 = vpop.f32.mrf.mxu0  ;;  %v4955_v55 = vadd.f32 %v7033_v41, %v10349_v19  ;;  %v10450_v19 = vld [vmem:[#allocation3 + $0x28] sm:$0xff]   ;;  %v4422_v8 = vld [vmem:[%s10029_s19 + $0x70] sm:$0xff] }
 0x3aa   : > { %7064 = vst.msk [vmem:[%s10029_s19 + $0x18] sm:$0xff] %vm340_vm1, %v4956_v21  ;;  %v4484_v2 = vrot.slane %v4313_v9, 1  ;;  %v4420_v21 = vld [vmem:[%s10029_s19 + $0x60] sm:$0xff] }
 0x3ab   : > { %4589 = vst.msk [vmem:[%s10029_s19 + $0x28] sm:$0x7f] %vm856_vm3, %v4557_v40  ;;  %v8271_v24 = vpop.f32.mrf.mxu1  ;;  %v4824_v25 = vpop.f32.mrf.mxu0 }
 0x3ac   : > { %4588 = vst.msk [vmem:[%s10029_s19 + $0x20] sm:$0xff] %vm340_vm1, %v4556_v12  ;;  %7063 = vst.msk [vmem:[%s10029_s19 + $0x10] sm:$0xff] %vm340_vm1, %v4955_v55  ;;  %v4488_v27 = vrot.slane %v8271_v24, 1 }
 0x3ad   : > { %v4316_v15 = vpop.f32.mrf.mxu1  ;;  %v8305_v6 = vpop.f32.mrf.mxu0 }
 0x3ae   : > { %v4489_v49 = vsel %vm1118_vm4, %v4487_v26, %v4488_v27  ;;  %v4563_v35 = vadd.f32 %v4488_v27, %v4419_v3  ;;  %v4485_v30 = vrot.slane %v4316_v15, 1 }
 0x3af   : > { %v4562_v44 = vadd.f32 %v4489_v49, %v4418_v37  ;;  %v7038_v42 = vld [vmem:[%s10029_s19 + $0x38] sm:$0xff]  ;;  %v8274_v60 = vpop.f32.mrf.mxu1  ;;  %v4829_v46 = vpop.f32.mrf.mxu0  ;;  %8467 = vmatmul.mubr.msk.bf16.gmra.mxu0 %vm340_vm1, %v10059_v10  ;;  %8497 = vmatmul.mubr.msk.bf16.gmra.mxu1 %vm340_vm1, %v10450_v19 }
 0x3b0   : > { %v7037_v13 = vld [vmem:[%s10029_s19 + $0x30] sm:$0xff]  ;;  %4595 = vst.msk [vmem:[%s10029_s19 + $0x58] sm:$0x7f] %vm856_vm3, %v4563_v35  ;;  %v4960_v32 = vadd.f32 %v7038_v42, %v4824_v25  ;;  %v4486_v23 = vsel %vm1118_vm4, %v4484_v2, %v4485_v30  ;;  %v4561_v51 = vadd.f32 %v4485_v30, %v4417_v48  ;;  %8470 = vmatprep.mubr.msk.bf16.mxu0 %vm8782_vm2, %v8781_v5  ;;  %v4493_v1 = vrot.slane %v8274_v60, 1  ;;  %v4427_v37 = vld [vmem:[%s10029_s19 + $0x98] sm:$0x7f] }
 0x3b1   : > { %8500 = vmatprep.mubr.msk.bf16.mxu1 %vm8782_vm2, %v8781_v5  ;;  %v4959_v10 = vadd.f32 %v7037_v13, %v4821_v17  ;;  %4594 = vst.msk [vmem:[%s10029_s19 + $0x50] sm:$0xff] %vm340_vm1, %v4562_v44  ;;  %v4560_v56 = vadd.f32 %v4486_v23, %v4416_v18  ;;  %v4329_v57 = vpop.f32.mrf.mxu1  ;;  %v8308_v34 = vpop.f32.mrf.mxu0  ;;  %v10522_v30 = vld [vmem:[#allocation3 + $0x38] sm:$0xff]   ;;  %v4426_v42 = vld [vmem:[%s10029_s19 + $0x90] sm:$0xff] }
 0x3b2   : > { %v7036_v54 = vld [vmem:[%s10029_s19 + $0x28] sm:$0xff]  ;;  %7068 = vst.msk [vmem:[%s10029_s19 + $0x38] sm:$0xff] %vm340_vm1, %v4960_v32 }
 0x3b3   : > { %4593 = vst.msk [vmem:[%s10029_s19 + $0x48] sm:$0x7f] %vm856_vm3, %v4561_v51  ;;  %v7035_v59 = vld [vmem:[%s10029_s19 + $0x20] sm:$0xff]  ;;  %v4958_v36 = vadd.f32 %v7036_v54, %v10412_v39  ;;  %v8275_v58 = vpop.f32.mrf.mxu1  ;;  %v4832_v62 = vpop.f32.mrf.mxu0  ;;  %v4490_v39 = vrot.slane %v4329_v57, 1  ;;  %v4425_v32 = vld [vmem:[%s10029_s19 + $0x88] sm:$0x7f] }
 0x3b4   : > { %7067 = vst.msk [vmem:[%s10029_s19 + $0x30] sm:$0xff] %vm340_vm1, %v4959_v10  ;;  %4592 = vst.msk [vmem:[%s10029_s19 + $0x40] sm:$0xff] %vm340_vm1, %v4560_v56  ;;  %v4957_v0 = vadd.f32 %v7035_v59, %v10383_v63  ;;  %v4494_v50 = vrot.slane %v8275_v58, 1  ;;  %v4424_v51 = vld [vmem:[%s10029_s19 + $0x80] sm:$0xff] }
 0x3b5   : > { %7066 = vst.msk [vmem:[%s10029_s19 + $0x28] sm:$0xff] %vm340_vm1, %v4958_v36  ;;  %v4332_v20 = vpop.f32.mrf.mxu1  ;;  %v8309_v43 = vpop.f32.mrf.mxu0 }
 0x3b6   : > { %7065 = vst.msk [vmem:[%s10029_s19 + $0x20] sm:$0xff] %vm340_vm1, %v4957_v0  ;;  %v4495_v53 = vsel %vm1118_vm4, %v4493_v1, %v4494_v50  ;;  %v4567_v63 = vadd.f32 %v4494_v50, %v4423_v61  ;;  %v4491_v52 = vrot.slane %v4332_v20, 1  ;;  %v4431_v61 = vld [vmem:[%s10029_s19 + $0xb8] sm:$0x7f] }
 0x3b7   : > { %v4566_v11 = vadd.f32 %v4495_v53, %v4422_v8  ;;  %v8278_v38 = vpop.f32.mrf.mxu1  ;;  %v4837_v17 = vpop.f32.mrf.mxu0  ;;  %8471 = vmatmul.mubr.msk.bf16.gmra.mxu0 %vm340_vm1, %v10088_v28  ;;  %8501 = vmatmul.mubr.msk.bf16.gmra.mxu1 %vm340_vm1, %v10486_v7  ;;  %v7042_v3 = vld [vmem:[%s10029_s19 + $0x58] sm:$0xff]  ;;  %v4430_v53 = vld [vmem:[%s10029_s19 + $0xb0] sm:$0xff] }
 0x3b8   : > { %4599 = vst.msk [vmem:[%s10029_s19 + $0x78] sm:$0x7f] %vm856_vm3, %v4567_v63  ;;  %v4492_v16 = vsel %vm1118_vm4, %v4490_v39, %v4491_v52  ;;  %v4565_v47 = vadd.f32 %v4491_v52, %v4421_v14  ;;  %v7041_v40 = vld [vmem:[%s10029_s19 + $0x50] sm:$0xff]  ;;  %8474 = vmatprep.mubr.msk.bf16.mxu0 %vm8782_vm2, %v8781_v5  ;;  %8504 = vmatprep.mubr.msk.bf16.mxu1 %vm8782_vm2, %v8781_v5  ;;  %v4499_v15 = vrot.slane %v8278_v38, 1  ;;  %v10552_v39 = vld [vmem:[#allocation3 + $0x40] sm:$0xff]  }
 0x3b9   : > { %4598 = vst.msk [vmem:[%s10029_s19 + $0x70] sm:$0xff] %vm340_vm1, %v4566_v11  ;;  %v4564_v41 = vadd.f32 %v4492_v16, %v4420_v21  ;;  %v4963_v12 = vadd.f32 %v7041_v40, %v4837_v17  ;;  %v4345_v9 = vpop.f32.mrf.mxu1  ;;  %v8312_v22 = vpop.f32.mrf.mxu0  ;;  %v4429_v38 = vld [vmem:[%s10029_s19 + $0xa8] sm:$0x7f] }
 0x3ba   : > { %v7040_v28 = vld [vmem:[%s10029_s19 + $0x48] sm:$0xff]  ;;  %4597 = vst.msk [vmem:[%s10029_s19 + $0x68] sm:$0x7f] %vm856_vm3, %v4565_v47  ;;  %v4496_v44 = vrot.slane %v4345_v9, 1  ;;  %v4428_v47 = vld [vmem:[%s10029_s19 + $0xa0] sm:$0xff] }
 0x3bb   : > { %v7039_v55 = vld [vmem:[%s10029_s19 + $0x40] sm:$0xff]  ;;  %v4962_v24 = vadd.f32 %v7040_v28, %v4832_v62  ;;  %4596 = vst.msk [vmem:[%s10029_s19 + $0x60] sm:$0xff] %vm340_vm1, %v4564_v41  ;;  %7071 = vst.msk [vmem:[%s10029_s19 + $0x50] sm:$0xff] %vm340_vm1, %v4963_v12  ;;  %v8279_v26 = vpop.f32.mrf.mxu1  ;;  %v4840_v27 = vpop.f32.mrf.mxu0 }
 0x3bc   : > { %v4961_v25 = vadd.f32 %v7039_v55, %v4829_v46  ;;  %v4500_v6 = vrot.slane %v8279_v26, 1  ;;  %v4964_v2 = vadd.f32 %v7042_v3, %v4840_v27 }
 0x3bd   : > { %7070 = vst.msk [vmem:[%s10029_s19 + $0x48] sm:$0xff] %vm340_vm1, %v4962_v24  ;;  %v4348_v49 = vpop.f32.mrf.mxu1  ;;  %v8313_v35 = vpop.f32.mrf.mxu0 }
 0x3be   : > { %7069 = vst.msk [vmem:[%s10029_s19 + $0x40] sm:$0xff] %vm340_vm1, %v4961_v25  ;;  %v4501_v48 = vsel %vm1118_vm4, %v4499_v15, %v4500_v6  ;;  %v4571_v60 = vadd.f32 %v4500_v6, %v4427_v37  ;;  %7072 = vst.msk [vmem:[%s10029_s19 + $0x58] sm:$0xff] %vm340_vm1, %v4964_v2  ;;  %v4497_v46 = vrot.slane %v4348_v49, 1  ;;  %v4435_v15 = vld [vmem:[%s10029_s19 + $0xd8] sm:$0x7f]  ;;  %v10582_v37 = vld [vmem:[#allocation3 + $0x48] sm:$0xff]  }
 0x3bf   : > { %v4570_v13 = vadd.f32 %v4501_v48, %v4426_v42  ;;  %v8282_v18 = vpop.f32.mrf.mxu1  ;;  %v4845_v23 = vpop.f32.mrf.mxu0  ;;  %8475 = vmatmul.mubr.msk.bf16.gmra.mxu0 %vm340_vm1, %v10105_v31  ;;  %8505 = vmatmul.mubr.msk.bf16.gmra.mxu1 %vm340_vm1, %v10522_v30  ;;  %v7046_v25 = vld [vmem:[%s10029_s19 + $0x78] sm:$0xff]  ;;  %v4434_v35 = vld [vmem:[%s10029_s19 + $0xd0] sm:$0xff] }
 0x3c0   : > { %4603 = vst.msk [vmem:[%s10029_s19 + $0x98] sm:$0x7f] %vm856_vm3, %v4571_v60  ;;  %v4498_v10 = vsel %vm1118_vm4, %v4496_v44, %v4497_v46  ;;  %v4569_v56 = vadd.f32 %v4497_v46, %v4425_v32  ;;  %8508 = vmatprep.mubr.msk.bf16.mxu1 %vm8782_vm2, %v8781_v5  ;;  %8542 = vmatprep.mubr.msk.bf16.mxu0 %vm8782_vm2, %v8781_v5  ;;  %v4505_v0 = vrot.slane %v8282_v18, 1  ;;  %v7045_v16 = vld [vmem:[%s10029_s19 + $0x70] sm:$0xff]  ;;  %v4433_v46 = vld [vmem:[%s10029_s19 + $0xc8] sm:$0x7f] }
 0x3c1   : > { %4602 = vst.msk [vmem:[%s10029_s19 + $0x90] sm:$0xff] %vm340_vm1, %v4570_v13  ;;  %v4568_v31 = vadd.f32 %v4498_v10, %v4424_v51  ;;  %v4361_v57 = vpop.f32.mrf.mxu1  ;;  %v8316_v34 = vpop.f32.mrf.mxu0  ;;  %v7044_v62 = vld [vmem:[%s10029_s19 + $0x68] sm:$0xff] }
 0x3c2   : > { %4601 = vst.msk [vmem:[%s10029_s19 + $0x88] sm:$0x7f] %vm856_vm3, %v4569_v56  ;;  %v7043_v54 = vld [vmem:[%s10029_s19 + $0x60] sm:$0xff]  ;;  %v4502_v8 = vrot.slane %v4361_v57, 1 }
 0x3c3   : > { %4600 = vst.msk [vmem:[%s10029_s19 + $0x80] sm:$0xff] %vm340_vm1, %v4568_v31  ;;  %v4965_v59 = vadd.f32 %v7043_v54, %v4845_v23  ;;  %v8283_v36 = vpop.f32.mrf.mxu1  ;;  %v4848_v58 = vpop.f32.mrf.mxu0  ;;  %v4432_v23 = vld [vmem:[%s10029_s19 + $0xc0] sm:$0xff] }
 0x3c4   : > { %v4506_v1 = vrot.slane %v8283_v36, 1  ;;  %v4966_v50 = vadd.f32 %v7044_v62, %v4848_v58 }
 0x3c5   : > { %7073 = vst.msk [vmem:[%s10029_s19 + $0x60] sm:$0xff] %vm340_vm1, %v4965_v59  ;;  %v4364_v20 = vpop.f32.mrf.mxu1  ;;  %v8317_v43 = vpop.f32.mrf.mxu0 }
 0x3c6   : > { %v4507_v63 = vsel %vm1118_vm4, %v4505_v0, %v4506_v1  ;;  %v4575_v52 = vadd.f32 %v4506_v1, %v4431_v61  ;;  %7074 = vst.msk [vmem:[%s10029_s19 + $0x68] sm:$0xff] %vm340_vm1, %v4966_v50  ;;  %v4503_v11 = vrot.slane %v4364_v20, 1  ;;  %v4439_v1 = vld [vmem:[%s10029_s19 + $0xf8] sm:$0x7f]  ;;  %v10612_v20 = vld [vmem:[#allocation3 + $0x50] sm:$0xff]  }
 0x3c7   : > { %v4574_v14 = vadd.f32 %v4507_v63, %v4430_v53  ;;  %v8286_v17 = vpop.f32.mrf.mxu1  ;;  %v4853_v21 = vpop.f32.mrf.mxu0  ;;  %8509 = vmatmul.mubr.msk.bf16.gmra.mxu1 %vm340_vm1, %v10552_v39  ;;  %8543 = vmatmul.mubr.msk.bf16.vlgmr.msra.gmra.mxu0 %vm340_vm1, %v10315_v33 }
 0x3c8   : > { %4607 = vst.msk [vmem:[%s10029_s19 + $0xb8] sm:$0x7f] %vm856_vm3, %v4575_v52  ;;  %v4504_v40 = vsel %vm1118_vm4, %v4502_v8, %v4503_v11  ;;  %v4573_v28 = vadd.f32 %v4503_v11, %v4429_v38  ;;  %v4967_v41 = vadd.f32 %v7045_v16, %v4853_v21  ;;  %8512 = vmatprep.mubr.msk.bf16.mxu1 %vm8782_vm2, %v8781_v5  ;;  %v4511_v26 = vrot.slane %v8286_v17, 1  ;;  %v4438_v8 = vld [vmem:[%s10029_s19 + $0xf0] sm:$0xff] }
 0x3c9   : > { %8546 = vmatprep.mubr.msk.bf16.mxu0 %vm8782_vm2, %v8781_v5  ;;  %4606 = vst.msk [vmem:[%s10029_s19 + $0xb0] sm:$0xff] %vm340_vm1, %v4574_v14  ;;  %v4572_v12 = vadd.f32 %v4504_v40, %v4428_v47  ;;  %v4377_v9 = vpop.f32.mrf.mxu1  ;;  %v8320_v22 = vpop.f32.mrf.mxu0  ;;  %v7048_v36 = vld [vmem:[%s10029_s19 + $0x88] sm:$0xff]  ;;  %v7049_v17 = vld [vmem:[%s10029_s19 + $0x90] sm:$0xff]  ;;  %v4436_v47 = vld [vmem:[%s10029_s19 + $0xe0] sm:$0xff] }
 0x3ca   : > { %4605 = vst.msk [vmem:[%s10029_s19 + $0xa8] sm:$0x7f] %vm856_vm3, %v4573_v28  ;;  %v4508_v49 = vrot.slane %v4377_v9, 1  ;;  %v7047_v18 = vld [vmem:[%s10029_s19 + $0x80] sm:$0xff]  ;;  %v4437_v14 = vld [vmem:[%s10029_s19 + $0xe8] sm:$0x7f] }
 0x3cb   : > { %7075 = vst.msk [vmem:[%s10029_s19 + $0x70] sm:$0xff] %vm340_vm1, %v4967_v41  ;;  %4604 = vst.msk [vmem:[%s10029_s19 + $0xa0] sm:$0xff] %vm340_vm1, %v4572_v12  ;;  %v8287_v55 = vpop.f32.mrf.mxu1  ;;  %v4856_v24 = vpop.f32.mrf.mxu0  ;;  %v7108_v16 = vld [vmem:[%s10029_s19 + $0x11] sm:$0xff] }
 0x3cc   : > { %v4512_v27 = vrot.slane %v8287_v55, 1  ;;  %v4968_v3 = vadd.f32 %v7046_v25, %v4856_v24  ;;  %v7050_v25 = vld [vmem:[%s10029_s19 + $0x98] sm:$0xff] }
 0x3cd   : > { %v4380_v6 = vpop.f32.mrf.mxu1  ;;  %v8321_v2 = vpop.f32.mrf.mxu0 }
 0x3ce   : > { %v4513_v44 = vsel %vm1118_vm4, %v4511_v26, %v4512_v27  ;;  %v4579_v42 = vadd.f32 %v4512_v27, %v4435_v15  ;;  %7076 = vst.msk [vmem:[%s10029_s19 + $0x78] sm:$0xff] %vm340_vm1, %v4968_v3  ;;  %v4509_v48 = vrot.slane %v4380_v6, 1  ;;  %v7109_v27 = vld [vmem:[%s10029_s19 + $0x19] sm:$0x7f] }
 0x3cf   : > { %v4578_v60 = vadd.f32 %v4513_v44, %v4434_v35  ;;  %v8290_v13 = vpop.f32.mrf.mxu1  ;;  %v4861_v32 = vpop.f32.mrf.mxu0  ;;  %8513 = vmatmul.mubr.msk.bf16.gmra.mxu1 %vm340_vm1, %v10582_v37  ;;  %8547 = vmatmul.mubr.msk.bf16.gmra.mxu0 %vm340_vm1, %v10341_v45 }
 0x3d0   : > { %4611 = vst.msk [vmem:[%s10029_s19 + $0xd8] sm:$0x7f] %vm856_vm3, %v4579_v42  ;;  %v4510_v51 = vsel %vm1118_vm4, %v4508_v49, %v4509_v48  ;;  %v4577_v10 = vadd.f32 %v4509_v48, %v4433_v46  ;;  %v4969_v56 = vadd.f32 %v7047_v18, %v4861_v32  ;;  %8516 = vmatprep.mubr.msk.bf16.mxu1 %vm8782_vm2, %v8781_v5  ;;  %v4517_v58 = vrot.slane %v8290_v13, 1  ;;  %v10645_v49 = vld [vmem:[#allocation3 + $0x58] sm:$0xff]   ;;  %v7110_v48 = vld [vmem:[%s10029_s19 + $0x21] sm:$0xff] }
 0x3d1   : > { %8550 = vmatprep.mubr.msk.bf16.mxu0 %vm8782_vm2, %v8781_v5  ;;  %4610 = vst.msk [vmem:[%s10029_s19 + $0xd0] sm:$0xff] %vm340_vm1, %v4578_v60  ;;  %v4576_v31 = vadd.f32 %v4510_v51, %v4432_v23  ;;  %v4393_v57 = vpop.f32.mrf.mxu1  ;;  %v8324_v34 = vpop.f32.mrf.mxu0  ;;  %v7052_v23 = vld [vmem:[%s10029_s19 + $0xa8] sm:$0xff] }
 0x3d2   : > { %4609 = vst.msk [vmem:[%s10029_s19 + $0xc8] sm:$0x7f] %vm856_vm3, %v4577_v10  ;;  %v4514_v43 = vrot.slane %v4393_v57, 1  ;;  %v7051_v44 = vld [vmem:[%s10029_s19 + $0xa0] sm:$0xff]  ;;  %v7111_v10 = vld [vmem:[%s10029_s19 + $0x29] sm:$0x7f] }
 0x3d3   : > { %7077 = vst.msk [vmem:[%s10029_s19 + $0x80] sm:$0xff] %vm340_vm1, %v4969_v56  ;;  %4608 = vst.msk [vmem:[%s10029_s19 + $0xc0] sm:$0xff] %vm340_vm1, %v4576_v31  ;;  %v8291_v54 = vpop.f32.mrf.mxu1  ;;  %v4864_v59 = vpop.f32.mrf.mxu0 }
 0x3d4   : > { %v4518_v62 = vrot.slane %v8291_v54, 1  ;;  %v4970_v0 = vadd.f32 %v7048_v36, %v4864_v59  ;;  %v10667_v54 = vld [vmem:[#allocation3 + $0x60] sm:$0xff]   ;;  %v7053_v36 = vld [vmem:[%s10029_s19 + $0xb0] sm:$0xff] }
 0x3d5   : > { %v4396_v50 = vpop.f32.mrf.mxu1  ;;  %v8325_v61 = vpop.f32.mrf.mxu0 }
 0x3d6   : > { %v4519_v53 = vsel %vm1118_vm4, %v4517_v58, %v4518_v62  ;;  %v4583_v63 = vadd.f32 %v4518_v62, %v4439_v1  ;;  %7078 = vst.msk [vmem:[%s10029_s19 + $0x88] sm:$0xff] %vm340_vm1, %v4970_v0  ;;  %v4515_v52 = vrot.slane %v4396_v50, 1  ;;  %v7112_v62 = vld [vmem:[%s10029_s19 + $0x31] sm:$0xff] }
 0x3d7   : > { %v4582_v11 = vadd.f32 %v4519_v53, %v4438_v8  ;;  %v4869_v38 = vpop.f32.mrf.mxu0  ;;  %v5053_v21 = vpop.f32.mrf.mxu1  ;;  %8517 = vmatmul.mubr.msk.bf16.gmra.mxu1 %vm340_vm1, %v10612_v20  ;;  %8551 = vmatmul.mubr.msk.bf16.gmra.mxu0 %vm340_vm1, %v10376_v29  ;;  %v7054_v8 = vld [vmem:[%s10029_s19 + $0xb8] sm:$0xff] }
 0x3d8   : > { %4615 = vst.msk [vmem:[%s10029_s19 + $0xf8] sm:$0x7f] %vm856_vm3, %v4583_v63  ;;  %v4516_v40 = vsel %vm1118_vm4, %v4514_v43, %v4515_v52  ;;  %v4581_v28 = vadd.f32 %v4515_v52, %v4437_v14  ;;  %v4971_v41 = vadd.f32 %v7049_v17, %v4869_v38  ;;  %v5202_v12 = vadd.f32 %v7108_v16, %v5053_v21  ;;  %v7113_v63 = vld [vmem:[%s10029_s19 + $0x39] sm:$0x7f]  ;;  %v10689_v17 = vld [vmem:[#allocation3 + $0x68] sm:$0xff]  }
 0x3d9   : > { %8520 = vmatprep.mubr.msk.bf16.mxu1 %vm8782_vm2, %v8781_v5  ;;  %4614 = vst.msk [vmem:[%s10029_s19 + $0xf0] sm:$0xff] %vm340_vm1, %v4582_v11  ;;  %v4580_v9 = vadd.f32 %v4516_v40, %v4436_v47  ;;  %v8328_v22 = vpop.f32.mrf.mxu0  ;;  %v8358_v55 = vpop.f32.mrf.mxu1  ;;  %8554 = vmatprep.mubr.msk.bf16.mxu0 %vm8782_vm2, %v8781_v5  ;;  %v7114_v40 = vld [vmem:[%s10029_s19 + $0x41] sm:$0xff] }
 0x3da   : > { %4613 = vst.msk [vmem:[%s10029_s19 + $0xe8] sm:$0x7f] %vm856_vm3, %v4581_v28  ;;  %v7055_v16 = vld [vmem:[%s10029_s19 + $0xc0] sm:$0xff]  ;;  %v7056_v55 = vld [vmem:[%s10029_s19 + $0xc8] sm:$0xff] }
 0x3db   : > { %7079 = vst.msk [vmem:[%s10029_s19 + $0x90] sm:$0xff] %vm340_vm1, %v4971_v41  ;;  %7138 = vst.msk [vmem:[%s10029_s19 + $0x11] sm:$0xff] %vm340_vm1, %v5202_v12  ;;  %v4872_v24 = vpop.f32.mrf.mxu0  ;;  %v5056_v26 = vpop.f32.mrf.mxu1 }
 0x3dc   : > { %4612 = vst.msk [vmem:[%s10029_s19 + $0xe0] sm:$0xff] %vm340_vm1, %v4580_v9  ;;  %v4972_v3 = vadd.f32 %v7050_v25, %v4872_v24  ;;  %v5203_v15 = vadd.f32 %v7109_v27, %v5056_v26  ;;  %v7115_v25 = vld [vmem:[%s10029_s19 + $0x49] sm:$0x7f] }
 0x3dd   : > { %v8329_v6 = vpop.f32.mrf.mxu0  ;;  %v8359_v2 = vpop.f32.mrf.mxu1 }
 0x3de   : > { %7080 = vst.msk [vmem:[%s10029_s19 + $0x98] sm:$0xff] %vm340_vm1, %v4972_v3  ;;  %v10711_v6 = vld [vmem:[#allocation3 + $0x70] sm:$0xff]  }
 0x3df   : > { %7139 = vst.msk [vmem:[%s10029_s19 + $0x19] sm:$0x7f] %vm856_vm3, %v5203_v15  ;;  %v4877_v35 = vpop.f32.mrf.mxu0  ;;  %v5061_v42 = vpop.f32.mrf.mxu1  ;;  %8521 = vmatmul.mubr.msk.bf16.gmra.mxu1 %vm340_vm1, %v10645_v49  ;;  %8555 = vmatmul.mubr.msk.bf16.gmra.mxu0 %vm340_vm1, %v10419_v4 }
 0x3e0   : > { %v4973_v60 = vadd.f32 %v7051_v44, %v4877_v35  ;;  %v5204_v46 = vadd.f32 %v7110_v48, %v5061_v42  ;;  %8524 = vmatprep.mubr.msk.bf16.mxu1 %vm8782_vm2, %v8781_v5  ;;  %8558 = vmatprep.mubr.msk.bf16.mxu0 %vm8782_vm2, %v8781_v5  ;;  %v7057_v35 = vld [vmem:[%s10029_s19 + $0xd0] sm:$0xff] }
 0x3e1   : > { %v8332_v13 = vpop.f32.mrf.mxu0  ;;  %v8362_v32 = vpop.f32.mrf.mxu1  ;;  %v7116_v42 = vld [vmem:[%s10029_s19 + $0x51] sm:$0xff] }
 0x3e2   : > { %7081 = vst.msk [vmem:[%s10029_s19 + $0xa0] sm:$0xff] %vm340_vm1, %v4973_v60  ;;  %7140 = vst.msk [vmem:[%s10029_s19 + $0x21] sm:$0xff] %vm340_vm1, %v5204_v46 }
 0x3e3   : > { %v4880_v18 = vpop.f32.mrf.mxu0  ;;  %v5064_v51 = vpop.f32.mrf.mxu1 }
 0x3e4   : > { %v4974_v56 = vadd.f32 %v7052_v23, %v4880_v18  ;;  %v5205_v31 = vadd.f32 %v7111_v10, %v5064_v51  ;;  %v7058_v18 = vld [vmem:[%s10029_s19 + $0xd8] sm:$0xff] }
 0x3e5   : > { %v8333_v57 = vpop.f32.mrf.mxu0  ;;  %v8363_v34 = vpop.f32.mrf.mxu1  ;;  %v7117_v51 = vld [vmem:[%s10029_s19 + $0x59] sm:$0x7f] }
 0x3e6   : > { %7082 = vst.msk [vmem:[%s10029_s19 + $0xa8] sm:$0xff] %vm340_vm1, %v4974_v56  ;;  %v10733_v34 = vld [vmem:[#allocation3 + $0x78] sm:$0xff]  }
 0x3e7   : > { %7141 = vst.msk [vmem:[%s10029_s19 + $0x29] sm:$0x7f] %vm856_vm3, %v5205_v31  ;;  %v4885_v59 = vpop.f32.mrf.mxu0  ;;  %v5069_v58 = vpop.f32.mrf.mxu1  ;;  %8525 = vmatmul.mubr.msk.bf16.gmra.mxu1 %vm340_vm1, %v10667_v54  ;;  %8559 = vmatmul.mubr.msk.bf16.gmra.mxu0 %vm340_vm1, %v10450_v19 }
 0x3e8   : > { %v4975_v0 = vadd.f32 %v7053_v36, %v4885_v59  ;;  %v5206_v1 = vadd.f32 %v7112_v62, %v5069_v58  ;;  %8528 = vmatprep.mubr.msk.bf16.mxu1 %vm8782_vm2, %v8781_v5  ;;  %8562 = vmatprep.mubr.msk.bf16.mxu0 %vm8782_vm2, %v8781_v5  ;;  %v7059_v36 = vld [vmem:[%s10029_s19 + $0xe0] sm:$0xff] }
 0x3e9   : > { %v8336_v50 = vpop.f32.mrf.mxu0  ;;  %v8366_v61 = vpop.f32.mrf.mxu1  ;;  %v7118_v62 = vld [vmem:[%s10029_s19 + $0x61] sm:$0xff] }
 0x3ea   : > { %7083 = vst.msk [vmem:[%s10029_s19 + $0xb0] sm:$0xff] %vm340_vm1, %v4975_v0  ;;  %7142 = vst.msk [vmem:[%s10029_s19 + $0x31] sm:$0xff] %vm340_vm1, %v5206_v1 }
 0x3eb   : > { %v4888_v43 = vpop.f32.mrf.mxu0  ;;  %v5072_v53 = vpop.f32.mrf.mxu1 }
 0x3ec   : > { %v4976_v52 = vadd.f32 %v7054_v8, %v4888_v43  ;;  %v5207_v11 = vadd.f32 %v7113_v63, %v5072_v53  ;;  %v7060_v8 = vld [vmem:[%s10029_s19 + $0xe8] sm:$0xff] }
 0x3ed   : > { %v8337_v14 = vpop.f32.mrf.mxu0  ;;  %v8367_v38 = vpop.f32.mrf.mxu1  ;;  %v7119_v63 = vld [vmem:[%s10029_s19 + $0x69] sm:$0x7f] }
 0x3ee   : > { %7084 = vst.msk [vmem:[%s10029_s19 + $0xb8] sm:$0xff] %vm340_vm1, %v4976_v52 }
 0x3ef   : > { %7143 = vst.msk [vmem:[%s10029_s19 + $0x39] sm:$0x7f] %vm856_vm3, %v5207_v11  ;;  %v4893_v21 = vpop.f32.mrf.mxu0  ;;  %v5077_v47 = vpop.f32.mrf.mxu1  ;;  %8529 = vmatmul.mubr.msk.bf16.gmra.mxu1 %vm340_vm1, %v10689_v17  ;;  %8563 = vmatmul.mubr.msk.bf16.gmra.mxu0 %vm340_vm1, %v10486_v7 }
 0x3f0   : > { %v4977_v28 = vadd.f32 %v7055_v16, %v4893_v21  ;;  %v5208_v41 = vadd.f32 %v7114_v40, %v5077_v47  ;;  %8532 = vmatprep.mubr.msk.bf16.mxu1 %vm8782_vm2, %v8781_v5  ;;  %8566 = vmatprep.mubr.msk.bf16.mxu0 %vm8782_vm2, %v8781_v5  ;;  %v7061_v16 = vld [vmem:[%s10029_s19 + $0xf0] sm:$0xff] }
 0x3f1   : > { %v8340_v12 = vpop.f32.mrf.mxu0  ;;  %v8370_v9 = vpop.f32.mrf.mxu1  ;;  %v7120_v40 = vld [vmem:[%s10029_s19 + $0x71] sm:$0xff] }
 0x3f2   : > { %7085 = vst.msk [vmem:[%s10029_s19 + $0xc0] sm:$0xff] %vm340_vm1, %v4977_v28  ;;  %7144 = vst.msk [vmem:[%s10029_s19 + $0x41] sm:$0xff] %vm340_vm1, %v5208_v41 }
 0x3f3   : > { %v4896_v22 = vpop.f32.mrf.mxu0  ;;  %v5080_v24 = vpop.f32.mrf.mxu1 }
 0x3f4   : > { %v4978_v26 = vadd.f32 %v7056_v55, %v4896_v22  ;;  %v5209_v27 = vadd.f32 %v7115_v25, %v5080_v24  ;;  %v7062_v55 = vld [vmem:[%s10029_s19 + $0xf8] sm:$0xff] }
 0x3f5   : > { %v8341_v3 = vpop.f32.mrf.mxu0  ;;  %v8371_v15 = vpop.f32.mrf.mxu1  ;;  %v7121_v24 = vld [vmem:[%s10029_s19 + $0x79] sm:$0x7f] }
 0x3f6   : > { %7086 = vst.msk [vmem:[%s10029_s19 + $0xc8] sm:$0xff] %vm340_vm1, %v4978_v26 }
 0x3f7   : > { %7145 = vst.msk [vmem:[%s10029_s19 + $0x49] sm:$0x7f] %vm856_vm3, %v5209_v27  ;;  %v4901_v2 = vpop.f32.mrf.mxu0  ;;  %v5085_v44 = vpop.f32.mrf.mxu1  ;;  %8533 = vmatmul.mubr.msk.bf16.gmra.mxu1 %vm340_vm1, %v10711_v6  ;;  %8567 = vmatmul.mubr.msk.bf16.gmra.mxu0 %vm340_vm1, %v10522_v30 }
 0x3f8   : > { %v4979_v48 = vadd.f32 %v7057_v35, %v4901_v2  ;;  %v5210_v60 = vadd.f32 %v7116_v42, %v5085_v44  ;;  %8536 = vmatprep.mubr.msk.bf16.mxu1 %vm8782_vm2, %v8781_v5  ;;  %8570 = vmatprep.mubr.msk.bf16.mxu0 %vm8782_vm2, %v8781_v5  ;;  %v7122_v2 = vld [vmem:[%s10029_s19 + $0x81] sm:$0xff] }
 0x3f9   : > { %v8344_v46 = vpop.f32.mrf.mxu0  ;;  %v8374_v13 = vpop.f32.mrf.mxu1 }
 0x3fa   : > { %7087 = vst.msk [vmem:[%s10029_s19 + $0xd0] sm:$0xff] %vm340_vm1, %v4979_v48  ;;  %7146 = vst.msk [vmem:[%s10029_s19 + $0x51] sm:$0xff] %vm340_vm1, %v5210_v60  ;;  %v7123_v46 = vld [vmem:[%s10029_s19 + $0x89] sm:$0x7f] }
 0x3fb   : > { %v4904_v32 = vpop.f32.mrf.mxu0  ;;  %v5088_v23 = vpop.f32.mrf.mxu1 }
 0x3fc   : > { %v4980_v10 = vadd.f32 %v7058_v18, %v4904_v32  ;;  %v5211_v56 = vadd.f32 %v7117_v51, %v5088_v23  ;;  %v7185_v23 = vld [vmem:[%s10029_s19 + $0x18] sm:$0x7f] }
 0x3fd   : > { %v8345_v31 = vpop.f32.mrf.mxu0  ;;  %v8375_v57 = vpop.f32.mrf.mxu1 }
 0x3fe   : > { %7088 = vst.msk [vmem:[%s10029_s19 + $0xd8] sm:$0xff] %vm340_vm1, %v4980_v10 }
 0x3ff   : > { %7147 = vst.msk [vmem:[%s10029_s19 + $0x59] sm:$0x7f] %vm856_vm3, %v5211_v56  ;;  %v4909_v59 = vpop.f32.mrf.mxu0  ;;  %v5093_v58 = vpop.f32.mrf.mxu1  ;;  %8537 = vmatmul.mubr.msk.bf16.gmra.mxu1 %vm340_vm1, %v10733_v34  ;;  %8571 = vmatmul.mubr.msk.bf16.gmra.mxu0 %vm340_vm1, %v10552_v39  ;;  %v7184_v56 = vld [vmem:[%s10029_s19 + $0x10] sm:$0xff] }
 0x400   : > { %v4981_v0 = vadd.f32 %v7059_v36, %v4909_v59  ;;  %v5212_v1 = vadd.f32 %v7118_v62, %v5093_v58  ;;  %8574 = vmatprep.mubr.msk.bf16.mxu0 %vm8782_vm2, %v8781_v5  ;;  %8604 = vmatprep.mubr.msk.bf16.mxu1 %vm8782_vm2, %v8781_v5  ;;  %v7124_v58 = vld [vmem:[%s10029_s19 + $0x91] sm:$0xff] }
 0x401   : > { %v8348_v50 = vpop.f32.mrf.mxu0  ;;  %v8378_v61 = vpop.f32.mrf.mxu1 }
 0x402   : > { %7089 = vst.msk [vmem:[%s10029_s19 + $0xe0] sm:$0xff] %vm340_vm1, %v4981_v0  ;;  %7148 = vst.msk [vmem:[%s10029_s19 + $0x61] sm:$0xff] %vm340_vm1, %v5212_v1 }
 0x403   : > { %v4912_v43 = vpop.f32.mrf.mxu0  ;;  %v5096_v53 = vpop.f32.mrf.mxu1 }
 0x404   : > { %v4982_v52 = vadd.f32 %v7060_v8, %v4912_v43  ;;  %v5213_v11 = vadd.f32 %v7119_v63, %v5096_v53 }
 0x405   : > { %v8349_v14 = vpop.f32.mrf.mxu0  ;;  %v8379_v38 = vpop.f32.mrf.mxu1 }
 0x406   : > { %7090 = vst.msk [vmem:[%s10029_s19 + $0xe8] sm:$0xff] %vm340_vm1, %v4982_v52  ;;  %v7187_v52 = vld [vmem:[%s10029_s19 + $0x28] sm:$0x7f]  ;;  %v7186_v38 = vld [vmem:[%s10029_s19 + $0x20] sm:$0xff] }
 0x407   : > { %7149 = vst.msk [vmem:[%s10029_s19 + $0x69] sm:$0x7f] %vm856_vm3, %v5213_v11  ;;  %v4917_v21 = vpop.f32.mrf.mxu0  ;;  %v5101_v47 = vpop.f32.mrf.mxu1  ;;  %8575 = vmatmul.mubr.msk.bf16.gmra.mxu0 %vm340_vm1, %v10582_v37  ;;  %8605 = vmatmul.mubr.msk.bf16.vlgmr.msra.gmra.mxu1 %vm340_vm1, %v10315_v33 }
 0x408   : > { %v4983_v28 = vadd.f32 %v7061_v16, %v4917_v21  ;;  %v5214_v41 = vadd.f32 %v7120_v40, %v5101_v47  ;;  %8578 = vmatprep.mubr.msk.bf16.mxu0 %vm8782_vm2, %v8781_v5  ;;  %8608 = vmatprep.mubr.msk.bf16.mxu1 %vm8782_vm2, %v8781_v5 }
 0x409   : > { %v8352_v12 = vpop.f32.mrf.mxu0  ;;  %v8382_v9 = vpop.f32.mrf.mxu1 }
 0x40a   : > { %7091 = vst.msk [vmem:[%s10029_s19 + $0xf0] sm:$0xff] %vm340_vm1, %v4983_v28  ;;  %7150 = vst.msk [vmem:[%s10029_s19 + $0x71] sm:$0xff] %vm340_vm1, %v5214_v41  ;;  %v7126_v28 = vld [vmem:[%s10029_s19 + $0xa1] sm:$0xff] }
 0x40b   : > { %v4920_v22 = vpop.f32.mrf.mxu0  ;;  %v5104_v33 = vpop.f32.mrf.mxu1 }
 0x40c   : > { %v4984_v25 = vadd.f32 %v7062_v55, %v4920_v22  ;;  %v5215_v26 = vadd.f32 %v7121_v24, %v5104_v33 }
 0x40d   : > { %v8353_v27 = vpop.f32.mrf.mxu0  ;;  %v8383_v3 = vpop.f32.mrf.mxu1 }
 0x40e   : > { %7092 = vst.msk [vmem:[%s10029_s19 + $0xf8] sm:$0xff] %vm340_vm1, %v4984_v25  ;;  %v7189_v27 = vld [vmem:[%s10029_s19 + $0x38] sm:$0x7f] }
 0x40f   : > { %7151 = vst.msk [vmem:[%s10029_s19 + $0x79] sm:$0x7f] %vm856_vm3, %v5215_v26  ;;  %v5109_v15 = vpop.f32.mrf.mxu1  ;;  %v5301_v35 = vpop.f32.mrf.mxu0  ;;  %8579 = vmatmul.mubr.msk.bf16.gmra.mxu0 %vm340_vm1, %v10612_v20  ;;  %8609 = vmatmul.mubr.msk.bf16.gmra.mxu1 %vm340_vm1, %v10341_v45 }
 0x410   : > { %v5216_v44 = vadd.f32 %v7122_v2, %v5109_v15  ;;  %8582 = vmatprep.mubr.msk.bf16.mxu0 %vm8782_vm2, %v8781_v5  ;;  %8612 = vmatprep.mubr.msk.bf16.mxu1 %vm8782_vm2, %v8781_v5  ;;  %v5480_v32 = vrot.slane %v5301_v35, 1  ;;  %v7188_v2 = vld [vmem:[%s10029_s19 + $0x30] sm:$0xff] }
 0x411   : > { %v8386_v42 = vpop.f32.mrf.mxu1  ;;  %v8420_v48 = vpop.f32.mrf.mxu0 }
 0x412   : > { %7152 = vst.msk [vmem:[%s10029_s19 + $0x81] sm:$0xff] %vm340_vm1, %v5216_v44 }
 0x413   : > { %v5112_v60 = vpop.f32.mrf.mxu1  ;;  %v5304_v13 = vpop.f32.mrf.mxu0 }
 0x414   : > { %v5217_v45 = vadd.f32 %v7123_v46, %v5112_v60  ;;  %v5481_v18 = vrot.slane %v5304_v13, 1  ;;  %v7128_v60 = vld [vmem:[%s10029_s19 + $0xb1] sm:$0xff] }
 0x415   : > { %v8387_v51 = vpop.f32.mrf.mxu1  ;;  %v8421_v10 = vpop.f32.mrf.mxu0 }
 0x416   : > { %7153 = vst.msk [vmem:[%s10029_s19 + $0x89] sm:$0x7f] %vm856_vm3, %v5217_v45  ;;  %v5482_v31 = vsel %vm1118_vm4, %v5480_v32, %v5481_v18  ;;  %v5556_v57 = vadd.f32 %v7185_v23, %v5481_v18 }
 0x417   : > { %v5555_v59 = vadd.f32 %v7184_v56, %v5482_v31  ;;  %v5117_v36 = vpop.f32.mrf.mxu1  ;;  %v5309_v62 = vpop.f32.mrf.mxu0  ;;  %8583 = vmatmul.mubr.msk.bf16.gmra.mxu0 %vm340_vm1, %v10645_v49  ;;  %8613 = vmatmul.mubr.msk.bf16.gmra.mxu1 %vm340_vm1, %v10376_v29  ;;  %v7125_v29 = vld [vmem:[%s10029_s19 + $0x99] sm:$0x7f]  ;;  %v7191_v31 = vld [vmem:[%s10029_s19 + $0x48] sm:$0x7f] }
 0x418   : > { %7215 = vst.msk [vmem:[%s10029_s19 + $0x18] sm:$0x7f] %vm856_vm3, %v5556_v57  ;;  %v5218_v0 = vadd.f32 %v7124_v58, %v5117_v36  ;;  %8586 = vmatprep.mubr.msk.bf16.mxu0 %vm8782_vm2, %v8781_v5  ;;  %8616 = vmatprep.mubr.msk.bf16.mxu1 %vm8782_vm2, %v8781_v5  ;;  %v5483_v8 = vrot.slane %v5309_v62, 1  ;;  %v7190_v36 = vld [vmem:[%s10029_s19 + $0x40] sm:$0xff] }
 0x419   : > { %7214 = vst.msk [vmem:[%s10029_s19 + $0x10] sm:$0xff] %vm340_vm1, %v5555_v59  ;;  %v8390_v1 = vpop.f32.mrf.mxu1  ;;  %v8424_v50 = vpop.f32.mrf.mxu0 }
 0x41a   : > { %7154 = vst.msk [vmem:[%s10029_s19 + $0x91] sm:$0xff] %vm340_vm1, %v5218_v0  ;;  %v7130_v50 = vld [vmem:[%s10029_s19 + $0xc1] sm:$0xff] }
 0x41b   : > { %v5120_v61 = vpop.f32.mrf.mxu1  ;;  %v5312_v43 = vpop.f32.mrf.mxu0 }
 0x41c   : > { %v5219_v53 = vadd.f32 %v7125_v29, %v5120_v61  ;;  %v5484_v63 = vrot.slane %v5312_v43, 1 }
 0x41d   : > { %v8391_v11 = vpop.f32.mrf.mxu1  ;;  %v8425_v14 = vpop.f32.mrf.mxu0 }
 0x41e   : > { %7155 = vst.msk [vmem:[%s10029_s19 + $0x99] sm:$0x7f] %vm856_vm3, %v5219_v53  ;;  %v5485_v21 = vsel %vm1118_vm4, %v5483_v8, %v5484_v63  ;;  %v5558_v16 = vadd.f32 %v7187_v52, %v5484_v63 }
 0x41f   : > { %v5557_v47 = vadd.f32 %v7186_v38, %v5485_v21  ;;  %v5125_v40 = vpop.f32.mrf.mxu1  ;;  %v5317_v41 = vpop.f32.mrf.mxu0  ;;  %8587 = vmatmul.mubr.msk.bf16.gmra.mxu0 %vm340_vm1, %v10667_v54  ;;  %8617 = vmatmul.mubr.msk.bf16.gmra.mxu1 %vm340_vm1, %v10419_v4  ;;  %v7127_v4 = vld [vmem:[%s10029_s19 + $0xa9] sm:$0x7f]  ;;  %v7193_v38 = vld [vmem:[%s10029_s19 + $0x58] sm:$0x7f] }
 0x420   : > { %7217 = vst.msk [vmem:[%s10029_s19 + $0x28] sm:$0x7f] %vm856_vm3, %v5558_v16  ;;  %v5220_v12 = vadd.f32 %v7126_v28, %v5125_v40  ;;  %8590 = vmatprep.mubr.msk.bf16.mxu0 %vm8782_vm2, %v8781_v5  ;;  %8620 = vmatprep.mubr.msk.bf16.mxu1 %vm8782_vm2, %v8781_v5  ;;  %v5486_v24 = vrot.slane %v5317_v41, 1 }
 0x421   : > { %7216 = vst.msk [vmem:[%s10029_s19 + $0x20] sm:$0xff] %vm340_vm1, %v5557_v47  ;;  %v8394_v9 = vpop.f32.mrf.mxu1  ;;  %v8428_v22 = vpop.f32.mrf.mxu0  ;;  %v7192_v47 = vld [vmem:[%s10029_s19 + $0x50] sm:$0xff] }
 0x422   : > { %7156 = vst.msk [vmem:[%s10029_s19 + $0xa1] sm:$0xff] %vm340_vm1, %v5220_v12  ;;  %v7132_v9 = vld [vmem:[%s10029_s19 + $0xd1] sm:$0xff] }
 0x423   : > { %v5128_v55 = vpop.f32.mrf.mxu1  ;;  %v5320_v33 = vpop.f32.mrf.mxu0 }
 0x424   : > { %v5221_v25 = vadd.f32 %v7127_v4, %v5128_v55  ;;  %v5487_v26 = vrot.slane %v5320_v33, 1 }
 0x425   : > { %v8395_v3 = vpop.f32.mrf.mxu1  ;;  %v8429_v15 = vpop.f32.mrf.mxu0 }
 0x426   : > { %7157 = vst.msk [vmem:[%s10029_s19 + $0xa9] sm:$0x7f] %vm856_vm3, %v5221_v25  ;;  %v5488_v35 = vsel %vm1118_vm4, %v5486_v24, %v5487_v26  ;;  %v5560_v44 = vadd.f32 %v7189_v27, %v5487_v26  ;;  %v7133_v25 = vld [vmem:[%s10029_s19 + $0xd9] sm:$0x7f]  ;;  %v7195_v15 = vld [vmem:[%s10029_s19 + $0x68] sm:$0x7f] }
 0x427   : > { %v5559_v42 = vadd.f32 %v7188_v2, %v5488_v35  ;;  %v5133_v48 = vpop.f32.mrf.mxu1  ;;  %v5325_v46 = vpop.f32.mrf.mxu0  ;;  %8591 = vmatmul.mubr.msk.bf16.gmra.mxu0 %vm340_vm1, %v10689_v17  ;;  %8621 = vmatmul.mubr.msk.bf16.gmra.mxu1 %vm340_vm1, %v10450_v19  ;;  %v7129_v19 = vld [vmem:[%s10029_s19 + $0xb9] sm:$0x7f] }
 0x428   : > { %7219 = vst.msk [vmem:[%s10029_s19 + $0x38] sm:$0x7f] %vm856_vm3, %v5560_v44  ;;  %v5222_v13 = vadd.f32 %v7128_v60, %v5133_v48  ;;  %8594 = vmatprep.mubr.msk.bf16.mxu0 %vm8782_vm2, %v8781_v5  ;;  %8624 = vmatprep.mubr.msk.bf16.mxu1 %vm8782_vm2, %v8781_v5  ;;  %v5489_v51 = vrot.slane %v5325_v46, 1  ;;  %v7194_v44 = vld [vmem:[%s10029_s19 + $0x60] sm:$0xff] }
 0x429   : > { %7218 = vst.msk [vmem:[%s10029_s19 + $0x30] sm:$0xff] %vm340_vm1, %v5559_v42  ;;  %v8398_v32 = vpop.f32.mrf.mxu1  ;;  %v8432_v45 = vpop.f32.mrf.mxu0 }
 0x42a   : > { %7158 = vst.msk [vmem:[%s10029_s19 + $0xb1] sm:$0xff] %vm340_vm1, %v5222_v13  ;;  %v7134_v13 = vld [vmem:[%s10029_s19 + $0xe1] sm:$0xff] }
 0x42b   : > { %v5136_v18 = vpop.f32.mrf.mxu1  ;;  %v5328_v23 = vpop.f32.mrf.mxu0 }
 0x42c   : > { %v5223_v10 = vadd.f32 %v7129_v19, %v5136_v18  ;;  %v5490_v56 = vrot.slane %v5328_v23, 1 }
 0x42d   : > { %v8399_v57 = vpop.f32.mrf.mxu1  ;;  %v8433_v59 = vpop.f32.mrf.mxu0 }
 0x42e   : > { %7159 = vst.msk [vmem:[%s10029_s19 + $0xb9] sm:$0x7f] %vm856_vm3, %v5223_v10  ;;  %v5491_v58 = vsel %vm1118_vm4, %v5489_v51, %v5490_v56  ;;  %v5562_v62 = vadd.f32 %v7191_v31, %v5490_v56  ;;  %v7135_v51 = vld [vmem:[%s10029_s19 + $0xe9] sm:$0x7f]  ;;  %v7197_v57 = vld [vmem:[%s10029_s19 + $0x78] sm:$0x7f] }
 0x42f   : > { %v5561_v0 = vadd.f32 %v7190_v36, %v5491_v58  ;;  %v5141_v1 = vpop.f32.mrf.mxu1  ;;  %v5333_v61 = vpop.f32.mrf.mxu0  ;;  %8595 = vmatmul.mubr.msk.bf16.gmra.mxu0 %vm340_vm1, %v10711_v6  ;;  %8625 = vmatmul.mubr.msk.bf16.gmra.mxu1 %vm340_vm1, %v10486_v7  ;;  %v7131_v7 = vld [vmem:[%s10029_s19 + $0xc9] sm:$0x7f]  ;;  %v7196_v58 = vld [vmem:[%s10029_s19 + $0x70] sm:$0xff] }
 0x430   : > { %7221 = vst.msk [vmem:[%s10029_s19 + $0x48] sm:$0x7f] %vm856_vm3, %v5562_v62  ;;  %v5224_v29 = vadd.f32 %v7130_v50, %v5141_v1  ;;  %8598 = vmatprep.mubr.msk.bf16.mxu0 %vm8782_vm2, %v8781_v5  ;;  %8628 = vmatprep.mubr.msk.bf16.mxu1 %vm8782_vm2, %v8781_v5  ;;  %v5492_v52 = vrot.slane %v5333_v61, 1  ;;  %v7136_v61 = vld [vmem:[%s10029_s19 + $0xf1] sm:$0xff] }
 0x431   : > { %7220 = vst.msk [vmem:[%s10029_s19 + $0x40] sm:$0xff] %vm340_vm1, %v5561_v0  ;;  %v8402_v43 = vpop.f32.mrf.mxu1  ;;  %v8436_v8 = vpop.f32.mrf.mxu0 }
 0x432   : > { %7160 = vst.msk [vmem:[%s10029_s19 + $0xc1] sm:$0xff] %vm340_vm1, %v5224_v29 }
 0x433   : > { %v5144_v53 = vpop.f32.mrf.mxu1  ;;  %v5336_v63 = vpop.f32.mrf.mxu0 }
 0x434   : > { %v5225_v11 = vadd.f32 %v7131_v7, %v5144_v53  ;;  %v5493_v14 = vrot.slane %v5336_v63, 1  ;;  %v7137_v63 = vld [vmem:[%s10029_s19 + $0xf9] sm:$0x7f] }
 0x435   : > { %v8403_v21 = vpop.f32.mrf.mxu1  ;;  %v8437_v16 = vpop.f32.mrf.mxu0 }
 0x436   : > { %7161 = vst.msk [vmem:[%s10029_s19 + $0xc9] sm:$0x7f] %vm856_vm3, %v5225_v11  ;;  %v5494_v40 = vsel %vm1118_vm4, %v5492_v52, %v5493_v14  ;;  %v5564_v28 = vadd.f32 %v7193_v38, %v5493_v14  ;;  %v7199_v38 = vld [vmem:[%s10029_s19 + $0x88] sm:$0x7f] }
 0x437   : > { %v5563_v41 = vadd.f32 %v7192_v47, %v5494_v40  ;;  %v5149_v12 = vpop.f32.mrf.mxu1  ;;  %v5341_v22 = vpop.f32.mrf.mxu0  ;;  %8599 = vmatmul.mubr.msk.bf16.gmra.mxu0 %vm340_vm1, %v10733_v34  ;;  %8629 = vmatmul.mubr.msk.bf16.gmra.mxu1 %vm340_vm1, %v10522_v30  ;;  %v7198_v47 = vld [vmem:[%s10029_s19 + $0x80] sm:$0xff] }
 0x438   : > { %7223 = vst.msk [vmem:[%s10029_s19 + $0x58] sm:$0x7f] %vm856_vm3, %v5564_v28  ;;  %v5226_v55 = vadd.f32 %v7132_v9, %v5149_v12  ;;  %8632 = vmatprep.mubr.msk.bf16.mxu1 %vm8782_vm2, %v8781_v5  ;;  %v5495_v30 = vrot.slane %v5341_v22, 1  ;;  %v5924_v22 = vld [vmem:[%s10029_s19] sm:$0xff] }
 0x439   : > { %7222 = vst.msk [vmem:[%s10029_s19 + $0x50] sm:$0xff] %vm340_vm1, %v5563_v41  ;;  %v8406_v4 = vpop.f32.mrf.mxu1  ;;  %v8440_v33 = vpop.f32.mrf.mxu0 }
 0x43a   : > { %7162 = vst.msk [vmem:[%s10029_s19 + $0xd1] sm:$0xff] %vm340_vm1, %v5226_v55 }
 0x43b   : > { %v5152_v24 = vpop.f32.mrf.mxu1  ;;  %v5344_v26 = vpop.f32.mrf.mxu0 }
 0x43c   : > { %v5227_v27 = vadd.f32 %v7133_v25, %v5152_v24  ;;  %v5496_v3 = vrot.slane %v5344_v26, 1  ;;  %v5925_v26 = vld [vmem:[%s10029_s19 + $0x8] sm:$0xff] }
 0x43d   : > { %v8407_v2 = vpop.f32.mrf.mxu1  ;;  %v8441_v35 = vpop.f32.mrf.mxu0 }
 0x43e   : > { %7163 = vst.msk [vmem:[%s10029_s19 + $0xd9] sm:$0x7f] %vm856_vm3, %v5227_v27  ;;  %v5497_v42 = vsel %vm1118_vm4, %v5495_v30, %v5496_v3  ;;  %v5566_v48 = vadd.f32 %v7195_v15, %v5496_v3  ;;  %v7201_v3 = vld [vmem:[%s10029_s19 + $0x98] sm:$0x7f]  ;;  %v7200_v35 = vld [vmem:[%s10029_s19 + $0x90] sm:$0xff] }
 0x43f   : > { %v5565_v60 = vadd.f32 %v7194_v44, %v5497_v42  ;;  %v5157_v46 = vpop.f32.mrf.mxu1  ;;  %v5349_v32 = vpop.f32.mrf.mxu0  ;;  %8633 = vmatmul.mubr.msk.bf16.gmra.mxu1 %vm340_vm1, %v10552_v39 }
 0x440   : > { %7225 = vst.msk [vmem:[%s10029_s19 + $0x68] sm:$0x7f] %vm856_vm3, %v5566_v48  ;;  %v5228_v45 = vadd.f32 %v7134_v13, %v5157_v46  ;;  %8636 = vmatprep.mubr.msk.bf16.mxu1 %vm8782_vm2, %v8781_v5  ;;  %v5498_v39 = vrot.slane %v5349_v32, 1  ;;  %v5926_v13 = vld [vmem:[%s10029_s19 + $0x10] sm:$0xff] }
 0x441   : > { %7224 = vst.msk [vmem:[%s10029_s19 + $0x60] sm:$0xff] %vm340_vm1, %v5565_v60  ;;  %v8410_v18 = vpop.f32.mrf.mxu1  ;;  %v8444_v19 = vpop.f32.mrf.mxu0 }
 0x442   : > { %7164 = vst.msk [vmem:[%s10029_s19 + $0xe1] sm:$0xff] %vm340_vm1, %v5228_v45 }
 0x443   : > { %v5160_v23 = vpop.f32.mrf.mxu1  ;;  %v5352_v10 = vpop.f32.mrf.mxu0 }
 0x444   : > { %v5229_v56 = vadd.f32 %v7135_v51, %v5160_v23  ;;  %v5499_v31 = vrot.slane %v5352_v10, 1  ;;  %v5927_v51 = vld [vmem:[%s10029_s19 + $0x18] sm:$0xff] }
 0x445   : > { %v8411_v59 = vpop.f32.mrf.mxu1  ;;  %v8445_v36 = vpop.f32.mrf.mxu0 }
 0x446   : > { %7165 = vst.msk [vmem:[%s10029_s19 + $0xe9] sm:$0x7f] %vm856_vm3, %v5229_v56  ;;  %v5500_v62 = vsel %vm1118_vm4, %v5498_v39, %v5499_v31  ;;  %v5568_v0 = vadd.f32 %v7197_v57, %v5499_v31  ;;  %v7203_v56 = vld [vmem:[%s10029_s19 + $0xa8] sm:$0x7f]  ;;  %v7202_v59 = vld [vmem:[%s10029_s19 + $0xa0] sm:$0xff] }
 0x447   : > { %v5567_v1 = vadd.f32 %v7196_v58, %v5500_v62  ;;  %v5165_v50 = vpop.f32.mrf.mxu1  ;;  %v5357_v29 = vpop.f32.mrf.mxu0  ;;  %8637 = vmatmul.mubr.msk.bf16.gmra.mxu1 %vm340_vm1, %v10582_v37 }
 0x448   : > { %7227 = vst.msk [vmem:[%s10029_s19 + $0x78] sm:$0x7f] %vm856_vm3, %v5568_v0  ;;  %v5230_v43 = vadd.f32 %v7136_v61, %v5165_v50  ;;  %8640 = vmatprep.mubr.msk.bf16.mxu1 %vm8782_vm2, %v8781_v5  ;;  %v5501_v37 = vrot.slane %v5357_v29, 1  ;;  %v5928_v50 = vld [vmem:[%s10029_s19 + $0x20] sm:$0xff] }
 0x449   : > { %7226 = vst.msk [vmem:[%s10029_s19 + $0x70] sm:$0xff] %vm340_vm1, %v5567_v1  ;;  %v8414_v8 = vpop.f32.mrf.mxu1  ;;  %v8448_v53 = vpop.f32.mrf.mxu0 }
 0x44a   : > { %7166 = vst.msk [vmem:[%s10029_s19 + $0xf1] sm:$0xff] %vm340_vm1, %v5230_v43 }
 0x44b   : > { %v5168_v7 = vpop.f32.mrf.mxu1  ;;  %v5360_v52 = vpop.f32.mrf.mxu0 }
 0x44c   : > { %v5231_v11 = vadd.f32 %v7137_v63, %v5168_v7  ;;  %v5502_v14 = vrot.slane %v5360_v52, 1  ;;  %v5929_v7 = vld [vmem:[%s10029_s19 + $0x28] sm:$0xff] }
 0x44d   : > { %v8415_v21 = vpop.f32.mrf.mxu1  ;;  %v8449_v16 = vpop.f32.mrf.mxu0 }
 0x44e   : > { %7167 = vst.msk [vmem:[%s10029_s19 + $0xf9] sm:$0x7f] %vm856_vm3, %v5231_v11  ;;  %v5503_v40 = vsel %vm1118_vm4, %v5501_v37, %v5502_v14  ;;  %v5570_v28 = vadd.f32 %v7199_v38, %v5502_v14  ;;  %v7205_v37 = vld [vmem:[%s10029_s19 + $0xb8] sm:$0x7f]  ;;  %v7204_v38 = vld [vmem:[%s10029_s19 + $0xb0] sm:$0xff] }
 0x44f   : > { %v5569_v41 = vadd.f32 %v7198_v47, %v5503_v40  ;;  %v5365_v12 = vpop.f32.mrf.mxu0  ;;  %v5805_v9 = vpop.f32.mrf.mxu1  ;;  %8641 = vmatmul.mubr.msk.bf16.gmra.mxu1 %vm340_vm1, %v10612_v20 }
 0x450   : > { %7229 = vst.msk [vmem:[%s10029_s19 + $0x88] sm:$0x7f] %vm856_vm3, %v5570_v28  ;;  %v5954_v55 = vadd.f32 %v5924_v22, %v5805_v9  ;;  %8644 = vmatprep.mubr.msk.bf16.mxu1 %vm8782_vm2, %v8781_v5  ;;  %v5504_v20 = vrot.slane %v5365_v12, 1 }
 0x451   : > { %7228 = vst.msk [vmem:[%s10029_s19 + $0x80] sm:$0xff] %vm340_vm1, %v5569_v41  ;;  %v8452_v4 = vpop.f32.mrf.mxu0  ;;  %v8482_v33 = vpop.f32.mrf.mxu1  ;;  %v5930_v41 = vld [vmem:[%s10029_s19 + $0x30] sm:$0xff] }
 0x452   : > { %5984 = vst.msk [vmem:[%s10029_s19] sm:$0xff] %vm340_vm1, %v5954_v55  ;;  %v5931_v33 = vld [vmem:[%s10029_s19 + $0x38] sm:$0xff] }
 0x453   : > { %v5368_v24 = vpop.f32.mrf.mxu0  ;;  %v5808_v25 = vpop.f32.mrf.mxu1 }
 0x454   : > { %v5505_v30 = vrot.slane %v5368_v24, 1  ;;  %v5955_v27 = vadd.f32 %v5925_v26, %v5808_v25  ;;  %v7207_v26 = vld [vmem:[%s10029_s19 + $0xc8] sm:$0x7f] }
 0x455   : > { %v8453_v15 = vpop.f32.mrf.mxu0  ;;  %v8483_v2 = vpop.f32.mrf.mxu1 }
 0x456   : > { %v5506_v44 = vsel %vm1118_vm4, %v5504_v20, %v5505_v30  ;;  %v5572_v42 = vadd.f32 %v7201_v3, %v5505_v30  ;;  %5985 = vst.msk [vmem:[%s10029_s19 + $0x8] sm:$0xff] %vm340_vm1, %v5955_v27  ;;  %v7206_v27 = vld [vmem:[%s10029_s19 + $0xc0] sm:$0xff] }
 0x457   : > { %v5571_v48 = vadd.f32 %v7200_v35, %v5506_v44  ;;  %v5373_v60 = vpop.f32.mrf.mxu0  ;;  %v5813_v46 = vpop.f32.mrf.mxu1  ;;  %8645 = vmatmul.mubr.msk.bf16.gmra.mxu1 %vm340_vm1, %v10645_v49 }
 0x458   : > { %7231 = vst.msk [vmem:[%s10029_s19 + $0x98] sm:$0x7f] %vm856_vm3, %v5572_v42  ;;  %v5956_v32 = vadd.f32 %v5926_v13, %v5813_v46  ;;  %8648 = vmatprep.mubr.msk.bf16.mxu1 %vm8782_vm2, %v8781_v5  ;;  %v5507_v49 = vrot.slane %v5373_v60, 1  ;;  %v5932_v42 = vld [vmem:[%s10029_s19 + $0x40] sm:$0xff] }
 0x459   : > { %7230 = vst.msk [vmem:[%s10029_s19 + $0x90] sm:$0xff] %vm340_vm1, %v5571_v48  ;;  %v8456_v45 = vpop.f32.mrf.mxu0  ;;  %v8486_v18 = vpop.f32.mrf.mxu1 }
 0x45a   : > { %5986 = vst.msk [vmem:[%s10029_s19 + $0x10] sm:$0xff] %vm340_vm1, %v5956_v32  ;;  %v5933_v45 = vld [vmem:[%s10029_s19 + $0x48] sm:$0xff] }
 0x45b   : > { %v5376_v19 = vpop.f32.mrf.mxu0  ;;  %v5816_v23 = vpop.f32.mrf.mxu1 }
 0x45c   : > { %v5508_v10 = vrot.slane %v5376_v19, 1  ;;  %v5957_v39 = vadd.f32 %v5927_v51, %v5816_v23  ;;  %v7209_v23 = vld [vmem:[%s10029_s19 + $0xd8] sm:$0x7f] }
 0x45d   : > { %v8457_v31 = vpop.f32.mrf.mxu0  ;;  %v8487_v57 = vpop.f32.mrf.mxu1 }
 0x45e   : > { %v5509_v36 = vsel %vm1118_vm4, %v5507_v49, %v5508_v10  ;;  %v5574_v58 = vadd.f32 %v7203_v56, %v5508_v10  ;;  %5987 = vst.msk [vmem:[%s10029_s19 + $0x18] sm:$0xff] %vm340_vm1, %v5957_v39  ;;  %v7208_v49 = vld [vmem:[%s10029_s19 + $0xd0] sm:$0xff] }
 0x45f   : > { %v5573_v62 = vadd.f32 %v7202_v59, %v5509_v36  ;;  %v5381_v0 = vpop.f32.mrf.mxu0  ;;  %v5821_v1 = vpop.f32.mrf.mxu1  ;;  %8649 = vmatmul.mubr.msk.bf16.gmra.mxu1 %vm340_vm1, %v10667_v54  ;;  %v5934_v59 = vld [vmem:[%s10029_s19 + $0x50] sm:$0xff] }
 0x460   : > { %7233 = vst.msk [vmem:[%s10029_s19 + $0xa8] sm:$0x7f] %vm856_vm3, %v5574_v58  ;;  %v5958_v61 = vadd.f32 %v5928_v50, %v5821_v1  ;;  %8652 = vmatprep.mubr.msk.bf16.mxu1 %vm8782_vm2, %v8781_v5  ;;  %v5510_v54 = vrot.slane %v5381_v0, 1  ;;  %v5935_v50 = vld [vmem:[%s10029_s19 + $0x58] sm:$0xff] }
 0x461   : > { %7232 = vst.msk [vmem:[%s10029_s19 + $0xa0] sm:$0xff] %vm340_vm1, %v5573_v62  ;;  %v8460_v29 = vpop.f32.mrf.mxu0  ;;  %v8490_v43 = vpop.f32.mrf.mxu1 }
 0x462   : > { %5988 = vst.msk [vmem:[%s10029_s19 + $0x20] sm:$0xff] %vm340_vm1, %v5958_v61  ;;  %v7211_v43 = vld [vmem:[%s10029_s19 + $0xe8] sm:$0x7f] }
 0x463   : > { %v5384_v8 = vpop.f32.mrf.mxu0  ;;  %v5824_v53 = vpop.f32.mrf.mxu1 }
 0x464   : > { %v5511_v63 = vrot.slane %v5384_v8, 1  ;;  %v5959_v52 = vadd.f32 %v5929_v7, %v5824_v53  ;;  %v7210_v7 = vld [vmem:[%s10029_s19 + $0xe0] sm:$0xff] }
 0x465   : > { %v8461_v11 = vpop.f32.mrf.mxu0  ;;  %v8491_v14 = vpop.f32.mrf.mxu1 }
 0x466   : > { %v5512_v21 = vsel %vm1118_vm4, %v5510_v54, %v5511_v63  ;;  %v5576_v16 = vadd.f32 %v7205_v37, %v5511_v63  ;;  %5989 = vst.msk [vmem:[%s10029_s19 + $0x28] sm:$0xff] %vm340_vm1, %v5959_v52  ;;  %v5936_v14 = vld [vmem:[%s10029_s19 + $0x60] sm:$0xff] }
 0x467   : > { %v5575_v47 = vadd.f32 %v7204_v38, %v5512_v21  ;;  %v5389_v40 = vpop.f32.mrf.mxu0  ;;  %v5829_v28 = vpop.f32.mrf.mxu1  ;;  %8653 = vmatmul.mubr.msk.bf16.gmra.mxu1 %vm340_vm1, %v10689_v17 }
 0x468   : > { %7235 = vst.msk [vmem:[%s10029_s19 + $0xb8] sm:$0x7f] %vm856_vm3, %v5576_v16  ;;  %v5960_v12 = vadd.f32 %v5930_v41, %v5829_v28  ;;  %8656 = vmatprep.mubr.msk.bf16.mxu1 %vm8782_vm2, %v8781_v5  ;;  %v5513_v17 = vrot.slane %v5389_v40, 1  ;;  %v5937_v28 = vld [vmem:[%s10029_s19 + $0x68] sm:$0xff] }
 0x469   : > { %7234 = vst.msk [vmem:[%s10029_s19 + $0xb0] sm:$0xff] %vm340_vm1, %v5575_v47  ;;  %v8464_v9 = vpop.f32.mrf.mxu0  ;;  %v8494_v22 = vpop.f32.mrf.mxu1 }
 0x46a   : > { %5990 = vst.msk [vmem:[%s10029_s19 + $0x30] sm:$0xff] %vm340_vm1, %v5960_v12  ;;  %v7213_v22 = vld [vmem:[%s10029_s19 + $0xf8] sm:$0x7f] }
 0x46b   : > { %v5392_v55 = vpop.f32.mrf.mxu0  ;;  %v5832_v4 = vpop.f32.mrf.mxu1 }
 0x46c   : > { %v5514_v24 = vrot.slane %v5392_v55, 1  ;;  %v5961_v25 = vadd.f32 %v5931_v33, %v5832_v4  ;;  %v7212_v33 = vld [vmem:[%s10029_s19 + $0xf0] sm:$0xff] }
 0x46d   : > { %v8465_v20 = vpop.f32.mrf.mxu0  ;;  %v8495_v30 = vpop.f32.mrf.mxu1 }
 0x46e   : > { %v5515_v3 = vsel %vm1118_vm4, %v5513_v17, %v5514_v24  ;;  %v5578_v15 = vadd.f32 %v7207_v26, %v5514_v24  ;;  %5991 = vst.msk [vmem:[%s10029_s19 + $0x38] sm:$0xff] %vm340_vm1, %v5961_v25  ;;  %v5938_v20 = vld [vmem:[%s10029_s19 + $0x70] sm:$0xff] }
 0x46f   : > { %v5577_v2 = vadd.f32 %v7206_v27, %v5515_v3  ;;  %v5397_v35 = vpop.f32.mrf.mxu0  ;;  %v5837_v44 = vpop.f32.mrf.mxu1  ;;  %8657 = vmatmul.mubr.msk.bf16.gmra.mxu1 %vm340_vm1, %v10711_v6  ;;  %v6172_v27 = vld [vmem:[%s10029_s19 + $0x1] sm:$0xff] }
 0x470   : > { %7237 = vst.msk [vmem:[%s10029_s19 + $0xc8] sm:$0x7f] %vm856_vm3, %v5578_v15  ;;  %v5962_v48 = vadd.f32 %v5932_v42, %v5837_v44  ;;  %8660 = vmatprep.mubr.msk.bf16.mxu1 %vm8782_vm2, %v8781_v5  ;;  %v5516_v6 = vrot.slane %v5397_v35, 1  ;;  %v5939_v42 = vld [vmem:[%s10029_s19 + $0x78] sm:$0xff] }
 0x471   : > { %7236 = vst.msk [vmem:[%s10029_s19 + $0xc0] sm:$0xff] %vm340_vm1, %v5577_v2  ;;  %v8468_v60 = vpop.f32.mrf.mxu0  ;;  %v8498_v46 = vpop.f32.mrf.mxu1 }
 0x472   : > { %5992 = vst.msk [vmem:[%s10029_s19 + $0x40] sm:$0xff] %vm340_vm1, %v5962_v48  ;;  %v6173_v60 = vld [vmem:[%s10029_s19 + $0x9] sm:$0x7f] }
 0x473   : > { %v5400_v13 = vpop.f32.mrf.mxu0  ;;  %v5840_v32 = vpop.f32.mrf.mxu1 }
 0x474   : > { %v5517_v18 = vrot.slane %v5400_v13, 1  ;;  %v5963_v19 = vadd.f32 %v5933_v45, %v5840_v32 }
 0x475   : > { %v8469_v51 = vpop.f32.mrf.mxu0  ;;  %v8499_v5 = vpop.f32.mrf.mxu1 }
 0x476   : > { %v5518_v10 = vsel %vm1118_vm4, %v5516_v6, %v5517_v18  ;;  %v5580_v39 = vadd.f32 %v7209_v23, %v5517_v18  ;;  %5993 = vst.msk [vmem:[%s10029_s19 + $0x48] sm:$0xff] %vm340_vm1, %v5963_v19  ;;  %v5940_v18 = vld [vmem:[%s10029_s19 + $0x80] sm:$0xff]  ;;  %v6174_v23 = vld [vmem:[%s10029_s19 + $0x11] sm:$0xff] }
 0x477   : > { %v5579_v56 = vadd.f32 %v7208_v49, %v5518_v10  ;;  %v5405_v31 = vpop.f32.mrf.mxu0  ;;  %v5845_v57 = vpop.f32.mrf.mxu1  ;;  %8661 = vmatmul.mubr.msk.bf16.gmra.mxu1 %vm340_vm1, %v10733_v34 }
 0x478   : > { %7239 = vst.msk [vmem:[%s10029_s19 + $0xd8] sm:$0x7f] %vm856_vm3, %v5580_v39  ;;  %v5964_v36 = vadd.f32 %v5934_v59, %v5845_v57  ;;  %v5519_v61 = vrot.slane %v5405_v31, 1  ;;  %v6175_v57 = vld [vmem:[%s10029_s19 + $0x19] sm:$0x7f] }
 0x479   : > { %7238 = vst.msk [vmem:[%s10029_s19 + $0xd0] sm:$0xff] %vm340_vm1, %v5579_v56  ;;  %v8472_v58 = vpop.f32.mrf.mxu0  ;;  %v8502_v62 = vpop.f32.mrf.mxu1  ;;  %v5941_v56 = vld [vmem:[%s10029_s19 + $0x88] sm:$0xff] }
 0x47a   : > { %5994 = vst.msk [vmem:[%s10029_s19 + $0x50] sm:$0xff] %vm340_vm1, %v5964_v36 }
 0x47b   : > { %v5408_v0 = vpop.f32.mrf.mxu0  ;;  %v5848_v1 = vpop.f32.mrf.mxu1 }
 0x47c   : > { %v5520_v29 = vrot.slane %v5408_v0, 1  ;;  %v5965_v34 = vadd.f32 %v5935_v50, %v5848_v1  ;;  %v5942_v1 = vld [vmem:[%s10029_s19 + $0x90] sm:$0xff] }
 0x47d   : > { %v8473_v8 = vpop.f32.mrf.mxu0  ;;  %v8503_v53 = vpop.f32.mrf.mxu1 }
 0x47e   : > { %v5521_v54 = vsel %vm1118_vm4, %v5519_v61, %v5520_v29  ;;  %v5582_v63 = vadd.f32 %v7211_v43, %v5520_v29  ;;  %5995 = vst.msk [vmem:[%s10029_s19 + $0x58] sm:$0xff] %vm340_vm1, %v5965_v34  ;;  %v6176_v61 = vld [vmem:[%s10029_s19 + $0x21] sm:$0xff] }
 0x47f   : > { %v5581_v52 = vadd.f32 %v7210_v7, %v5521_v54  ;;  %v5413_v37 = vpop.f32.mrf.mxu0  ;;  %v5853_v11 = vpop.f32.mrf.mxu1  ;;  %v5943_v7 = vld [vmem:[%s10029_s19 + $0x98] sm:$0xff] }
 0x480   : > { %7241 = vst.msk [vmem:[%s10029_s19 + $0xe8] sm:$0x7f] %vm856_vm3, %v5582_v63  ;;  %v5966_v38 = vadd.f32 %v5936_v14, %v5853_v11  ;;  %v5522_v41 = vrot.slane %v5413_v37, 1  ;;  %v6177_v63 = vld [vmem:[%s10029_s19 + $0x29] sm:$0x7f] }
 0x481   : > { %7240 = vst.msk [vmem:[%s10029_s19 + $0xe0] sm:$0xff] %vm340_vm1, %v5581_v52  ;;  %v8476_v21 = vpop.f32.mrf.mxu0  ;;  %v8506_v16 = vpop.f32.mrf.mxu1 }
 0x482   : > { %5996 = vst.msk [vmem:[%s10029_s19 + $0x60] sm:$0xff] %vm340_vm1, %v5966_v38  ;;  %v5944_v21 = vld [vmem:[%s10029_s19 + $0xa0] sm:$0xff] }
 0x483   : > { %v5416_v47 = vpop.f32.mrf.mxu0  ;;  %v5856_v40 = vpop.f32.mrf.mxu1 }
 0x484   : > { %v5523_v12 = vrot.slane %v5416_v47, 1  ;;  %v5967_v9 = vadd.f32 %v5937_v28, %v5856_v40  ;;  %v6178_v47 = vld [vmem:[%s10029_s19 + $0x31] sm:$0xff] }
 0x485   : > { %v8477_v55 = vpop.f32.mrf.mxu0  ;;  %v8507_v4 = vpop.f32.mrf.mxu1 }
 0x486   : > { %v5524_v17 = vsel %vm1118_vm4, %v5522_v41, %v5523_v12  ;;  %v5584_v24 = vadd.f32 %v7213_v22, %v5523_v12  ;;  %5997 = vst.msk [vmem:[%s10029_s19 + $0x68] sm:$0xff] %vm340_vm1, %v5967_v9  ;;  %v5945_v22 = vld [vmem:[%s10029_s19 + $0xa8] sm:$0xff]  ;;  %v6179_v4 = vld [vmem:[%s10029_s19 + $0x39] sm:$0x7f] }
 0x487   : > { %v5583_v25 = vadd.f32 %v7212_v33, %v5524_v17  ;;  %v5861_v26 = vpop.f32.mrf.mxu1  ;;  %v6053_v30 = vpop.f32.mrf.mxu0 }
 0x488   : > { %7243 = vst.msk [vmem:[%s10029_s19 + $0xf8] sm:$0x7f] %vm856_vm3, %v5584_v24  ;;  %v5968_v3 = vadd.f32 %v5938_v20, %v5861_v26  ;;  %v6202_v15 = vadd.f32 %v6172_v27, %v6053_v30  ;;  %v5946_v20 = vld [vmem:[%s10029_s19 + $0xb0] sm:$0xff]  ;;  %v6180_v27 = vld [vmem:[%s10029_s19 + $0x41] sm:$0xff] }
 0x489   : > { %7242 = vst.msk [vmem:[%s10029_s19 + $0xf0] sm:$0xff] %vm340_vm1, %v5583_v25  ;;  %v8510_v2 = vpop.f32.mrf.mxu1  ;;  %v8544_v35 = vpop.f32.mrf.mxu0 }
 0x48a   : > { %5998 = vst.msk [vmem:[%s10029_s19 + $0x70] sm:$0xff] %vm340_vm1, %v5968_v3  ;;  %6232 = vst.msk [vmem:[%s10029_s19 + $0x1] sm:$0xff] %vm340_vm1, %v6202_v15 }
 0x48b   : > { %v5864_v44 = vpop.f32.mrf.mxu1  ;;  %v6056_v48 = vpop.f32.mrf.mxu0 }
 0x48c   : > { %v5969_v46 = vadd.f32 %v5939_v42, %v5864_v44  ;;  %v6203_v13 = vadd.f32 %v6173_v60, %v6056_v48  ;;  %v5947_v42 = vld [vmem:[%s10029_s19 + $0xb8] sm:$0xff]  ;;  %v6181_v60 = vld [vmem:[%s10029_s19 + $0x49] sm:$0x7f] }
 0x48d   : > { %v8511_v32 = vpop.f32.mrf.mxu1  ;;  %v8545_v45 = vpop.f32.mrf.mxu0 }
 0x48e   : > { %5999 = vst.msk [vmem:[%s10029_s19 + $0x78] sm:$0xff] %vm340_vm1, %v5969_v46 }
 0x48f   : > { %6233 = vst.msk [vmem:[%s10029_s19 + $0x9] sm:$0x7f] %vm856_vm3, %v6203_v13  ;;  %v5869_v6 = vpop.f32.mrf.mxu1  ;;  %v6061_v19 = vpop.f32.mrf.mxu0 }
 0x490   : > { %v5970_v51 = vadd.f32 %v5940_v18, %v5869_v6  ;;  %v6204_v5 = vadd.f32 %v6174_v23, %v6061_v19  ;;  %v5948_v18 = vld [vmem:[%s10029_s19 + $0xc0] sm:$0xff]  ;;  %v6182_v23 = vld [vmem:[%s10029_s19 + $0x51] sm:$0xff] }
 0x491   : > { %v8514_v49 = vpop.f32.mrf.mxu1  ;;  %v8548_v10 = vpop.f32.mrf.mxu0 }
 0x492   : > { %6000 = vst.msk [vmem:[%s10029_s19 + $0x80] sm:$0xff] %vm340_vm1, %v5970_v51  ;;  %6234 = vst.msk [vmem:[%s10029_s19 + $0x11] sm:$0xff] %vm340_vm1, %v6204_v5 }
 0x493   : > { %v5872_v39 = vpop.f32.mrf.mxu1  ;;  %v6064_v31 = vpop.f32.mrf.mxu0 }
 0x494   : > { %v5971_v59 = vadd.f32 %v5941_v56, %v5872_v39  ;;  %v6205_v36 = vadd.f32 %v6175_v57, %v6064_v31  ;;  %v5949_v56 = vld [vmem:[%s10029_s19 + $0xc8] sm:$0xff]  ;;  %v6183_v57 = vld [vmem:[%s10029_s19 + $0x59] sm:$0x7f] }
 0x495   : > { %v8515_v58 = vpop.f32.mrf.mxu1  ;;  %v8549_v62 = vpop.f32.mrf.mxu0 }
 0x496   : > { %6001 = vst.msk [vmem:[%s10029_s19 + $0x88] sm:$0xff] %vm340_vm1, %v5971_v59 }
 0x497   : > { %6235 = vst.msk [vmem:[%s10029_s19 + $0x19] sm:$0x7f] %vm856_vm3, %v6205_v36  ;;  %v5877_v0 = vpop.f32.mrf.mxu1  ;;  %v6069_v50 = vpop.f32.mrf.mxu0 }
 0x498   : > { %v5972_v29 = vadd.f32 %v5942_v1, %v5877_v0  ;;  %v6206_v34 = vadd.f32 %v6176_v61, %v6069_v50  ;;  %v5950_v1 = vld [vmem:[%s10029_s19 + $0xd0] sm:$0xff]  ;;  %v6184_v61 = vld [vmem:[%s10029_s19 + $0x61] sm:$0xff] }
 0x499   : > { %v8518_v43 = vpop.f32.mrf.mxu1  ;;  %v8552_v8 = vpop.f32.mrf.mxu0 }
 0x49a   : > { %6002 = vst.msk [vmem:[%s10029_s19 + $0x90] sm:$0xff] %vm340_vm1, %v5972_v29  ;;  %6236 = vst.msk [vmem:[%s10029_s19 + $0x21] sm:$0xff] %vm340_vm1, %v6206_v34 }
 0x49b   : > { %v5880_v53 = vpop.f32.mrf.mxu1  ;;  %v6072_v54 = vpop.f32.mrf.mxu0 }
 0x49c   : > { %v5973_v52 = vadd.f32 %v5943_v7, %v5880_v53  ;;  %v6207_v37 = vadd.f32 %v6177_v63, %v6072_v54  ;;  %v5951_v7 = vld [vmem:[%s10029_s19 + $0xd8] sm:$0xff]  ;;  %v6185_v63 = vld [vmem:[%s10029_s19 + $0x69] sm:$0x7f] }
 0x49d   : > { %v8519_v11 = vpop.f32.mrf.mxu1  ;;  %v8553_v14 = vpop.f32.mrf.mxu0 }
 0x49e   : > { %6003 = vst.msk [vmem:[%s10029_s19 + $0x98] sm:$0xff] %vm340_vm1, %v5973_v52 }
 0x49f   : > { %6237 = vst.msk [vmem:[%s10029_s19 + $0x29] sm:$0x7f] %vm856_vm3, %v6207_v37  ;;  %v5885_v38 = vpop.f32.mrf.mxu1  ;;  %v6077_v16 = vpop.f32.mrf.mxu0 }
 0x4a0   : > { %v5974_v40 = vadd.f32 %v5944_v21, %v5885_v38  ;;  %v6208_v28 = vadd.f32 %v6178_v47, %v6077_v16  ;;  %v5952_v21 = vld [vmem:[%s10029_s19 + $0xe0] sm:$0xff]  ;;  %v6186_v47 = vld [vmem:[%s10029_s19 + $0x71] sm:$0xff] }
 0x4a1   : > { %v8522_v41 = vpop.f32.mrf.mxu1  ;;  %v8556_v12 = vpop.f32.mrf.mxu0 }
 0x4a2   : > { %6004 = vst.msk [vmem:[%s10029_s19 + $0xa0] sm:$0xff] %vm340_vm1, %v5974_v40  ;;  %6238 = vst.msk [vmem:[%s10029_s19 + $0x31] sm:$0xff] %vm340_vm1, %v6208_v28 }
 0x4a3   : > { %v5888_v9 = vpop.f32.mrf.mxu1  ;;  %v6080_v55 = vpop.f32.mrf.mxu0 }
 0x4a4   : > { %v5975_v33 = vadd.f32 %v5945_v22, %v5888_v9  ;;  %v6209_v17 = vadd.f32 %v6179_v4, %v6080_v55  ;;  %v5953_v22 = vld [vmem:[%s10029_s19 + $0xe8] sm:$0xff]  ;;  %v6187_v4 = vld [vmem:[%s10029_s19 + $0x79] sm:$0x7f] }
 0x4a5   : > { %v8523_v24 = vpop.f32.mrf.mxu1  ;;  %v8557_v25 = vpop.f32.mrf.mxu0 }
 0x4a6   : > { %6005 = vst.msk [vmem:[%s10029_s19 + $0xa8] sm:$0xff] %vm340_vm1, %v5975_v33 }
 0x4a7   : > { %6239 = vst.msk [vmem:[%s10029_s19 + $0x39] sm:$0x7f] %vm856_vm3, %v6209_v17  ;;  %v5893_v26 = vpop.f32.mrf.mxu1  ;;  %v6085_v30 = vpop.f32.mrf.mxu0 }
 0x4a8   : > { %v5976_v3 = vadd.f32 %v5946_v20, %v5893_v26  ;;  %v6210_v15 = vadd.f32 %v6180_v27, %v6085_v30  ;;  %v6188_v20 = vld [vmem:[%s10029_s19 + $0x81] sm:$0xff] }
 0x4a9   : > { %v8526_v2 = vpop.f32.mrf.mxu1  ;;  %v8560_v35 = vpop.f32.mrf.mxu0 }
 0x4aa   : > { %6006 = vst.msk [vmem:[%s10029_s19 + $0xb0] sm:$0xff] %vm340_vm1, %v5976_v3  ;;  %6240 = vst.msk [vmem:[%s10029_s19 + $0x41] sm:$0xff] %vm340_vm1, %v6210_v15  ;;  %v6189_v35 = vld [vmem:[%s10029_s19 + $0x89] sm:$0x7f] }
 0x4ab   : > { %v5896_v44 = vpop.f32.mrf.mxu1  ;;  %v6088_v48 = vpop.f32.mrf.mxu0 }
 0x4ac   : > { %v5977_v46 = vadd.f32 %v5947_v42, %v5896_v44  ;;  %v6211_v13 = vadd.f32 %v6181_v60, %v6088_v48 }
 0x4ad   : > { %v8527_v32 = vpop.f32.mrf.mxu1  ;;  %v8561_v45 = vpop.f32.mrf.mxu0 }
 0x4ae   : > { %6007 = vst.msk [vmem:[%s10029_s19 + $0xb8] sm:$0xff] %vm340_vm1, %v5977_v46  ;;  %v6421_v46 = vld [vmem:[%s10029_s19 + $0x8] sm:$0x7f]  ;;  %v6420_v45 = vld [vmem:[%s10029_s19] sm:$0xff] }
 0x4af   : > { %6241 = vst.msk [vmem:[%s10029_s19 + $0x49] sm:$0x7f] %vm856_vm3, %v6211_v13  ;;  %v5901_v6 = vpop.f32.mrf.mxu1  ;;  %v6093_v19 = vpop.f32.mrf.mxu0 }
 0x4b0   : > { %v5978_v51 = vadd.f32 %v5948_v18, %v5901_v6  ;;  %v6212_v5 = vadd.f32 %v6182_v23, %v6093_v19 }
 0x4b1   : > { %v8530_v49 = vpop.f32.mrf.mxu1  ;;  %v8564_v10 = vpop.f32.mrf.mxu0 }
 0x4b2   : > { %6008 = vst.msk [vmem:[%s10029_s19 + $0xc0] sm:$0xff] %vm340_vm1, %v5978_v51  ;;  %6242 = vst.msk [vmem:[%s10029_s19 + $0x51] sm:$0xff] %vm340_vm1, %v6212_v5  ;;  %v6190_v51 = vld [vmem:[%s10029_s19 + $0x91] sm:$0xff] }
 0x4b3   : > { %v5904_v39 = vpop.f32.mrf.mxu1  ;;  %v6096_v31 = vpop.f32.mrf.mxu0 }
 0x4b4   : > { %v5979_v59 = vadd.f32 %v5949_v56, %v5904_v39  ;;  %v6213_v36 = vadd.f32 %v6183_v57, %v6096_v31  ;;  %v6191_v31 = vld [vmem:[%s10029_s19 + $0x99] sm:$0x7f] }
 0x4b5   : > { %v8531_v58 = vpop.f32.mrf.mxu1  ;;  %v8565_v62 = vpop.f32.mrf.mxu0 }
 0x4b6   : > { %6009 = vst.msk [vmem:[%s10029_s19 + $0xc8] sm:$0xff] %vm340_vm1, %v5979_v59  ;;  %v6423_v62 = vld [vmem:[%s10029_s19 + $0x18] sm:$0x7f] }
 0x4b7   : > { %6243 = vst.msk [vmem:[%s10029_s19 + $0x59] sm:$0x7f] %vm856_vm3, %v6213_v36  ;;  %v5909_v0 = vpop.f32.mrf.mxu1  ;;  %v6101_v50 = vpop.f32.mrf.mxu0 }
 0x4b8   : > { %v5980_v29 = vadd.f32 %v5950_v1, %v5909_v0  ;;  %v6214_v34 = vadd.f32 %v6184_v61, %v6101_v50  ;;  %v6422_v50 = vld [vmem:[%s10029_s19 + $0x10] sm:$0xff] }
 0x4b9   : > { %v8534_v43 = vpop.f32.mrf.mxu1  ;;  %v8568_v8 = vpop.f32.mrf.mxu0 }
 0x4ba   : > { %6010 = vst.msk [vmem:[%s10029_s19 + $0xd0] sm:$0xff] %vm340_vm1, %v5980_v29  ;;  %6244 = vst.msk [vmem:[%s10029_s19 + $0x61] sm:$0xff] %vm340_vm1, %v6214_v34  ;;  %v6192_v8 = vld [vmem:[%s10029_s19 + $0xa1] sm:$0xff] }
 0x4bb   : > { %v5912_v53 = vpop.f32.mrf.mxu1  ;;  %v6104_v54 = vpop.f32.mrf.mxu0 }
 0x4bc   : > { %v5981_v52 = vadd.f32 %v5951_v7, %v5912_v53  ;;  %v6215_v37 = vadd.f32 %v6185_v63, %v6104_v54 }
 0x4bd   : > { %v8535_v11 = vpop.f32.mrf.mxu1  ;;  %v8569_v14 = vpop.f32.mrf.mxu0 }
 0x4be   : > { %6011 = vst.msk [vmem:[%s10029_s19 + $0xd8] sm:$0xff] %vm340_vm1, %v5981_v52 }
 0x4bf   : > { %6245 = vst.msk [vmem:[%s10029_s19 + $0x69] sm:$0x7f] %vm856_vm3, %v6215_v37  ;;  %v5917_v38 = vpop.f32.mrf.mxu1  ;;  %v6109_v16 = vpop.f32.mrf.mxu0  ;;  %v6193_v37 = vld [vmem:[%s10029_s19 + $0xa9] sm:$0x7f] }
 0x4c0   : > { %v5982_v40 = vadd.f32 %v5952_v21, %v5917_v38  ;;  %v6216_v28 = vadd.f32 %v6186_v47, %v6109_v16  ;;  %v6425_v16 = vld [vmem:[%s10029_s19 + $0x28] sm:$0x7f] }
 0x4c1   : > { %v8538_v41 = vpop.f32.mrf.mxu1  ;;  %v8572_v12 = vpop.f32.mrf.mxu0 }
 0x4c2   : > { %6012 = vst.msk [vmem:[%s10029_s19 + $0xe0] sm:$0xff] %vm340_vm1, %v5982_v40  ;;  %6246 = vst.msk [vmem:[%s10029_s19 + $0x71] sm:$0xff] %vm340_vm1, %v6216_v28  ;;  %v6424_v28 = vld [vmem:[%s10029_s19 + $0x20] sm:$0xff] }
 0x4c3   : > { %v5920_v9 = vpop.f32.mrf.mxu1  ;;  %v6112_v55 = vpop.f32.mrf.mxu0 }
 0x4c4   : > { %v5983_v33 = vadd.f32 %v5953_v22, %v5920_v9  ;;  %v6217_v17 = vadd.f32 %v6187_v4, %v6112_v55  ;;  %v6194_v55 = vld [vmem:[%s10029_s19 + $0xb1] sm:$0xff] }
 0x4c5   : > { %v8539_v24 = vpop.f32.mrf.mxu1  ;;  %v8573_v25 = vpop.f32.mrf.mxu0 }
 0x4c6   : > { %6013 = vst.msk [vmem:[%s10029_s19 + $0xe8] sm:$0xff] %vm340_vm1, %v5983_v33 }
 0x4c7   : > { %6247 = vst.msk [vmem:[%s10029_s19 + $0x79] sm:$0x7f] %vm856_vm3, %v6217_v17  ;;  %v6117_v26 = vpop.f32.mrf.mxu0  ;;  %v6301_v30 = vpop.f32.mrf.mxu1 }
 0x4c8   : > { %v6218_v27 = vadd.f32 %v6188_v20, %v6117_v26  ;;  %v6480_v42 = vrot.slane %v6301_v30, 1  ;;  %v6195_v26 = vld [vmem:[%s10029_s19 + $0xb9] sm:$0x7f] }
 0x4c9   : > { %v8576_v3 = vpop.f32.mrf.mxu0  ;;  %v8606_v15 = vpop.f32.mrf.mxu1 }
 0x4ca   : > { %6248 = vst.msk [vmem:[%s10029_s19 + $0x81] sm:$0xff] %vm340_vm1, %v6218_v27  ;;  %v6427_v15 = vld [vmem:[%s10029_s19 + $0x38] sm:$0x7f] }
 0x4cb   : > { %v6120_v2 = vpop.f32.mrf.mxu0  ;;  %v6304_v44 = vpop.f32.mrf.mxu1 }
 0x4cc   : > { %v6219_v48 = vadd.f32 %v6189_v35, %v6120_v2  ;;  %v6481_v60 = vrot.slane %v6304_v44, 1  ;;  %v6426_v44 = vld [vmem:[%s10029_s19 + $0x30] sm:$0xff] }
 0x4cd   : > { %v8577_v13 = vpop.f32.mrf.mxu0  ;;  %v8607_v32 = vpop.f32.mrf.mxu1 }
 0x4ce   : > { %6249 = vst.msk [vmem:[%s10029_s19 + $0x89] sm:$0x7f] %vm856_vm3, %v6219_v48  ;;  %v6482_v6 = vsel %vm1118_vm4, %v6480_v42, %v6481_v60  ;;  %v6556_v18 = vadd.f32 %v6481_v60, %v6421_v46  ;;  %v6196_v13 = vld [vmem:[%s10029_s19 + $0xc1] sm:$0xff] }
 0x4cf   : > { %v6555_v19 = vadd.f32 %v6482_v6, %v6420_v45  ;;  %v6125_v23 = vpop.f32.mrf.mxu0  ;;  %v6309_v5 = vpop.f32.mrf.mxu1 }
 0x4d0   : > { %6586 = vst.msk [vmem:[%s10029_s19 + $0x8] sm:$0x7f] %vm856_vm3, %v6556_v18  ;;  %v6220_v49 = vadd.f32 %v6190_v51, %v6125_v23  ;;  %v6483_v59 = vrot.slane %v6309_v5, 1  ;;  %v6197_v23 = vld [vmem:[%s10029_s19 + $0xc9] sm:$0x7f] }
 0x4d1   : > { %6585 = vst.msk [vmem:[%s10029_s19] sm:$0xff] %vm340_vm1, %v6555_v19  ;;  %v8580_v10 = vpop.f32.mrf.mxu0  ;;  %v8610_v39 = vpop.f32.mrf.mxu1 }
 0x4d2   : > { %6250 = vst.msk [vmem:[%s10029_s19 + $0x91] sm:$0xff] %vm340_vm1, %v6220_v49  ;;  %v6429_v39 = vld [vmem:[%s10029_s19 + $0x48] sm:$0x7f] }
 0x4d3   : > { %v6128_v56 = vpop.f32.mrf.mxu0  ;;  %v6312_v57 = vpop.f32.mrf.mxu1 }
 0x4d4   : > { %v6221_v36 = vadd.f32 %v6191_v31, %v6128_v56  ;;  %v6484_v58 = vrot.slane %v6312_v57, 1  ;;  %v6428_v57 = vld [vmem:[%s10029_s19 + $0x40] sm:$0xff] }
 0x4d5   : > { %v8581_v0 = vpop.f32.mrf.mxu0  ;;  %v8611_v1 = vpop.f32.mrf.mxu1 }
 0x4d6   : > { %6251 = vst.msk [vmem:[%s10029_s19 + $0x99] sm:$0x7f] %vm856_vm3, %v6221_v36  ;;  %v6485_v61 = vsel %vm1118_vm4, %v6483_v59, %v6484_v58  ;;  %v6558_v29 = vadd.f32 %v6484_v58, %v6423_v62  ;;  %v6198_v0 = vld [vmem:[%s10029_s19 + $0xd1] sm:$0xff] }
 0x4d7   : > { %v6557_v34 = vadd.f32 %v6485_v61, %v6422_v50  ;;  %v6133_v43 = vpop.f32.mrf.mxu0  ;;  %v6317_v53 = vpop.f32.mrf.mxu1 }
 0x4d8   : > { %6588 = vst.msk [vmem:[%s10029_s19 + $0x18] sm:$0x7f] %vm856_vm3, %v6558_v29  ;;  %v6222_v7 = vadd.f32 %v6192_v8, %v6133_v43  ;;  %v6486_v14 = vrot.slane %v6317_v53, 1  ;;  %v6199_v43 = vld [vmem:[%s10029_s19 + $0xd9] sm:$0x7f] }
 0x4d9   : > { %6587 = vst.msk [vmem:[%s10029_s19 + $0x10] sm:$0xff] %vm340_vm1, %v6557_v34  ;;  %v8584_v54 = vpop.f32.mrf.mxu0  ;;  %v8614_v63 = vpop.f32.mrf.mxu1 }
 0x4da   : > { %6252 = vst.msk [vmem:[%s10029_s19 + $0xa1] sm:$0xff] %vm340_vm1, %v6222_v7  ;;  %v6431_v63 = vld [vmem:[%s10029_s19 + $0x58] sm:$0x7f] }
 0x4db   : > { %v6136_v52 = vpop.f32.mrf.mxu0  ;;  %v6320_v11 = vpop.f32.mrf.mxu1 }
 0x4dc   : > { %v6223_v38 = vadd.f32 %v6193_v37, %v6136_v52  ;;  %v6487_v21 = vrot.slane %v6320_v11, 1  ;;  %v6430_v11 = vld [vmem:[%s10029_s19 + $0x50] sm:$0xff] }
 0x4dd   : > { %v8585_v47 = vpop.f32.mrf.mxu0  ;;  %v8615_v40 = vpop.f32.mrf.mxu1 }
 0x4de   : > { %6253 = vst.msk [vmem:[%s10029_s19 + $0xa9] sm:$0x7f] %vm856_vm3, %v6223_v38  ;;  %v6488_v41 = vsel %vm1118_vm4, %v6486_v14, %v6487_v21  ;;  %v6560_v12 = vadd.f32 %v6487_v21, %v6425_v16  ;;  %v6200_v47 = vld [vmem:[%s10029_s19 + $0xe1] sm:$0xff] }
 0x4df   : > { %v6559_v9 = vadd.f32 %v6488_v41, %v6424_v28  ;;  %v6141_v22 = vpop.f32.mrf.mxu0  ;;  %v6325_v4 = vpop.f32.mrf.mxu1 }
 0x4e0   : > { %6590 = vst.msk [vmem:[%s10029_s19 + $0x28] sm:$0x7f] %vm856_vm3, %v6560_v12  ;;  %v6224_v33 = vadd.f32 %v6194_v55, %v6141_v22  ;;  %v6489_v30 = vrot.slane %v6325_v4, 1  ;;  %v6201_v22 = vld [vmem:[%s10029_s19 + $0xe9] sm:$0x7f] }
 0x4e1   : > { %6589 = vst.msk [vmem:[%s10029_s19 + $0x20] sm:$0xff] %vm340_vm1, %v6559_v9  ;;  %v8588_v17 = vpop.f32.mrf.mxu0  ;;  %v8618_v24 = vpop.f32.mrf.mxu1 }
 0x4e2   : > { %6254 = vst.msk [vmem:[%s10029_s19 + $0xb1] sm:$0xff] %vm340_vm1, %v6224_v33  ;;  %v6433_v24 = vld [vmem:[%s10029_s19 + $0x68] sm:$0x7f] }
 0x4e3   : > { %v6144_v25 = vpop.f32.mrf.mxu0  ;;  %v6328_v20 = vpop.f32.mrf.mxu1 }
 0x4e4   : > { %v6225_v27 = vadd.f32 %v6195_v26, %v6144_v25  ;;  %v6490_v3 = vrot.slane %v6328_v20, 1  ;;  %v6432_v20 = vld [vmem:[%s10029_s19 + $0x60] sm:$0xff] }
 0x4e5   : > { %v8589_v2 = vpop.f32.mrf.mxu0  ;;  %v8619_v35 = vpop.f32.mrf.mxu1 }
 0x4e6   : > { %6255 = vst.msk [vmem:[%s10029_s19 + $0xb9] sm:$0x7f] %vm856_vm3, %v6225_v27  ;;  %v6491_v42 = vsel %vm1118_vm4, %v6489_v30, %v6490_v3  ;;  %v6562_v48 = vadd.f32 %v6490_v3, %v6427_v15 }
 0x4e7   : > { %v6561_v60 = vadd.f32 %v6491_v42, %v6426_v44  ;;  %v6149_v46 = vpop.f32.mrf.mxu0  ;;  %v6333_v32 = vpop.f32.mrf.mxu1 }
 0x4e8   : > { %6592 = vst.msk [vmem:[%s10029_s19 + $0x38] sm:$0x7f] %vm856_vm3, %v6562_v48  ;;  %v6226_v45 = vadd.f32 %v6196_v13, %v6149_v46  ;;  %v6492_v5 = vrot.slane %v6333_v32, 1  ;;  %v6435_v48 = vld [vmem:[%s10029_s19 + $0x78] sm:$0x7f]  ;;  %v6434_v46 = vld [vmem:[%s10029_s19 + $0x70] sm:$0xff] }
 0x4e9   : > { %6591 = vst.msk [vmem:[%s10029_s19 + $0x30] sm:$0xff] %vm340_vm1, %v6561_v60  ;;  %v8592_v6 = vpop.f32.mrf.mxu0  ;;  %v8622_v18 = vpop.f32.mrf.mxu1 }
 0x4ea   : > { %6256 = vst.msk [vmem:[%s10029_s19 + $0xc1] sm:$0xff] %vm340_vm1, %v6226_v45 }
 0x4eb   : > { %v6152_v19 = vpop.f32.mrf.mxu0  ;;  %v6336_v51 = vpop.f32.mrf.mxu1 }
 0x4ec   : > { %v6227_v49 = vadd.f32 %v6197_v23, %v6152_v19  ;;  %v6493_v10 = vrot.slane %v6336_v51, 1 }
 0x4ed   : > { %v8593_v56 = vpop.f32.mrf.mxu0  ;;  %v8623_v31 = vpop.f32.mrf.mxu1 }
 0x4ee   : > { %6257 = vst.msk [vmem:[%s10029_s19 + $0xc9] sm:$0x7f] %vm856_vm3, %v6227_v49  ;;  %v6494_v59 = vsel %vm1118_vm4, %v6492_v5, %v6493_v10  ;;  %v6564_v36 = vadd.f32 %v6493_v10, %v6429_v39  ;;  %v6437_v5 = vld [vmem:[%s10029_s19 + $0x88] sm:$0x7f]  ;;  %v6436_v10 = vld [vmem:[%s10029_s19 + $0x80] sm:$0xff] }
 0x4ef   : > { %v6563_v58 = vadd.f32 %v6494_v59, %v6428_v57  ;;  %v6157_v62 = vpop.f32.mrf.mxu0  ;;  %v6341_v1 = vpop.f32.mrf.mxu1 }
 0x4f0   : > { %6594 = vst.msk [vmem:[%s10029_s19 + $0x48] sm:$0x7f] %vm856_vm3, %v6564_v36  ;;  %v6228_v50 = vadd.f32 %v6198_v0, %v6157_v62  ;;  %v6495_v53 = vrot.slane %v6341_v1, 1  ;;  %v6439_v0 = vld [vmem:[%s10029_s19 + $0x98] sm:$0x7f] }
 0x4f1   : > { %6593 = vst.msk [vmem:[%s10029_s19 + $0x40] sm:$0xff] %vm340_vm1, %v6563_v58  ;;  %v8596_v61 = vpop.f32.mrf.mxu0  ;;  %v8626_v29 = vpop.f32.mrf.mxu1 }
 0x4f2   : > { %6258 = vst.msk [vmem:[%s10029_s19 + $0xd1] sm:$0xff] %vm340_vm1, %v6228_v50  ;;  %v6438_v50 = vld [vmem:[%s10029_s19 + $0x90] sm:$0xff] }
 0x4f3   : > { %v6160_v34 = vpop.f32.mrf.mxu0  ;;  %v6344_v8 = vpop.f32.mrf.mxu1 }
 0x4f4   : > { %v6229_v7 = vadd.f32 %v6199_v43, %v6160_v34  ;;  %v6496_v54 = vrot.slane %v6344_v8, 1 }
 0x4f5   : > { %v8597_v52 = vpop.f32.mrf.mxu0  ;;  %v8627_v37 = vpop.f32.mrf.mxu1 }
 0x4f6   : > { %6259 = vst.msk [vmem:[%s10029_s19 + $0xd9] sm:$0x7f] %vm856_vm3, %v6229_v7  ;;  %v6497_v14 = vsel %vm1118_vm4, %v6495_v53, %v6496_v54  ;;  %v6566_v38 = vadd.f32 %v6496_v54, %v6431_v63  ;;  %v6441_v63 = vld [vmem:[%s10029_s19 + $0xa8] sm:$0x7f]  ;;  %v6440_v37 = vld [vmem:[%s10029_s19 + $0xa0] sm:$0xff] }
 0x4f7   : > { %v6565_v21 = vadd.f32 %v6497_v14, %v6430_v11  ;;  %v6165_v16 = vpop.f32.mrf.mxu0  ;;  %v6349_v40 = vpop.f32.mrf.mxu1 }
 0x4f8   : > { %6596 = vst.msk [vmem:[%s10029_s19 + $0x58] sm:$0x7f] %vm856_vm3, %v6566_v38  ;;  %v6230_v28 = vadd.f32 %v6200_v47, %v6165_v16  ;;  %v6498_v4 = vrot.slane %v6349_v40, 1 }
 0x4f9   : > { %6595 = vst.msk [vmem:[%s10029_s19 + $0x50] sm:$0xff] %vm340_vm1, %v6565_v21  ;;  %v8600_v41 = vpop.f32.mrf.mxu0  ;;  %v8630_v12 = vpop.f32.mrf.mxu1 }
 0x4fa   : > { %6260 = vst.msk [vmem:[%s10029_s19 + $0xe1] sm:$0xff] %vm340_vm1, %v6230_v28  ;;  %v6443_v41 = vld [vmem:[%s10029_s19 + $0xb8] sm:$0x7f] }
 0x4fb   : > { %v6168_v9 = vpop.f32.mrf.mxu0  ;;  %v6352_v55 = vpop.f32.mrf.mxu1 }
 0x4fc   : > { %v6231_v33 = vadd.f32 %v6201_v22, %v6168_v9  ;;  %v6499_v17 = vrot.slane %v6352_v55, 1  ;;  %v6442_v9 = vld [vmem:[%s10029_s19 + $0xb0] sm:$0xff] }
 0x4fd   : > { %v8601_v25 = vpop.f32.mrf.mxu0  ;;  %v8631_v26 = vpop.f32.mrf.mxu1 }
 0x4fe   : > { %6261 = vst.msk [vmem:[%s10029_s19 + $0xe9] sm:$0x7f] %vm856_vm3, %v6231_v33  ;;  %v6500_v30 = vsel %vm1118_vm4, %v6498_v4, %v6499_v17  ;;  %v6568_v27 = vadd.f32 %v6499_v17, %v6433_v24 }
 0x4ff   : > { %v6567_v3 = vadd.f32 %v6500_v30, %v6432_v20  ;;  %v6357_v15 = vpop.f32.mrf.mxu1  ;;  %v6445_v20 = vld [vmem:[%s10029_s19 + $0xc8] sm:$0x7f] }
 0x500   : > { %6598 = vst.msk [vmem:[%s10029_s19 + $0x68] sm:$0x7f] %vm856_vm3, %v6568_v27  ;;  %v6501_v44 = vrot.slane %v6357_v15, 1  ;;  %v6444_v27 = vld [vmem:[%s10029_s19 + $0xc0] sm:$0xff] }
 0x501   : > { %6597 = vst.msk [vmem:[%s10029_s19 + $0x60] sm:$0xff] %vm340_vm1, %v6567_v3  ;;  %v8634_v2 = vpop.f32.mrf.mxu1 }
 0x503   : > { %v6360_v35 = vpop.f32.mrf.mxu1 }
 0x504   : > { %v6502_v42 = vrot.slane %v6360_v35, 1 }
 0x505   : > { %v8635_v60 = vpop.f32.mrf.mxu1 }
 0x506   : > { %v6503_v13 = vsel %vm1118_vm4, %v6501_v44, %v6502_v42  ;;  %v6570_v32 = vadd.f32 %v6502_v42, %v6435_v48 }
 0x507   : > { %v6569_v45 = vadd.f32 %v6503_v13, %v6434_v46  ;;  %v6365_v6 = vpop.f32.mrf.mxu1  ;;  %v6447_v46 = vld [vmem:[%s10029_s19 + $0xd8] sm:$0x7f] }
 0x508   : > { %6600 = vst.msk [vmem:[%s10029_s19 + $0x78] sm:$0x7f] %vm856_vm3, %v6570_v32  ;;  %v6504_v23 = vrot.slane %v6365_v6, 1  ;;  %v6446_v32 = vld [vmem:[%s10029_s19 + $0xd0] sm:$0xff] }
 0x509   : > { %6599 = vst.msk [vmem:[%s10029_s19 + $0x70] sm:$0xff] %vm340_vm1, %v6569_v45  ;;  %v8638_v18 = vpop.f32.mrf.mxu1 }
 0x50b   : > { %v6368_v19 = vpop.f32.mrf.mxu1 }
 0x50c   : > { %v6505_v51 = vrot.slane %v6368_v19, 1 }
 0x50d   : > { %v8639_v49 = vpop.f32.mrf.mxu1 }
 0x50e   : > { %v6506_v39 = vsel %vm1118_vm4, %v6504_v23, %v6505_v51  ;;  %v6572_v56 = vadd.f32 %v6505_v51, %v6437_v5 }
 0x50f   : > { %v6571_v31 = vadd.f32 %v6506_v39, %v6436_v10  ;;  %v6373_v57 = vpop.f32.mrf.mxu1  ;;  %v6449_v10 = vld [vmem:[%s10029_s19 + $0xe8] sm:$0x7f] }
 0x510   : > { %6602 = vst.msk [vmem:[%s10029_s19 + $0x88] sm:$0x7f] %vm856_vm3, %v6572_v56  ;;  %v6507_v58 = vrot.slane %v6373_v57, 1  ;;  %v6448_v56 = vld [vmem:[%s10029_s19 + $0xe0] sm:$0xff] }
 0x511   : > { %6601 = vst.msk [vmem:[%s10029_s19 + $0x80] sm:$0xff] %vm340_vm1, %v6571_v31  ;;  %v8642_v59 = vpop.f32.mrf.mxu1 }
 0x513   : > { %v6376_v36 = vpop.f32.mrf.mxu1 }
 0x514   : > { %v6508_v62 = vrot.slane %v6376_v36, 1 }
 0x515   : > { %v8643_v1 = vpop.f32.mrf.mxu1 }
 0x516   : > { %v6509_v61 = vsel %vm1118_vm4, %v6507_v58, %v6508_v62  ;;  %v6574_v29 = vadd.f32 %v6508_v62, %v6439_v0 }
 0x517   : > { %v6573_v34 = vadd.f32 %v6509_v61, %v6438_v50  ;;  %v6381_v43 = vpop.f32.mrf.mxu1 }
 0x518   : > { %6604 = vst.msk [vmem:[%s10029_s19 + $0x98] sm:$0x7f] %vm856_vm3, %v6574_v29  ;;  %v6510_v7 = vrot.slane %v6381_v43, 1 }
 0x519   : > { %6603 = vst.msk [vmem:[%s10029_s19 + $0x90] sm:$0xff] %vm340_vm1, %v6573_v34  ;;  %v8646_v8 = vpop.f32.mrf.mxu1 }
 0x51b   : > { %v6384_v53 = vpop.f32.mrf.mxu1 }
 0x51c   : > { %v6511_v54 = vrot.slane %v6384_v53, 1 }
 0x51d   : > { %v8647_v52 = vpop.f32.mrf.mxu1 }
 0x51e   : > { %v6512_v11 = vsel %vm1118_vm4, %v6510_v7, %v6511_v54  ;;  %v6576_v14 = vadd.f32 %v6511_v54, %v6441_v63 }
 0x51f   : > { %v6575_v38 = vadd.f32 %v6512_v11, %v6440_v37  ;;  %v6389_v21 = vpop.f32.mrf.mxu1 }
 0x520   : > { %6606 = vst.msk [vmem:[%s10029_s19 + $0xa8] sm:$0x7f] %vm856_vm3, %v6576_v14  ;;  %v6513_v40 = vrot.slane %v6389_v21, 1 }
 0x521   : > { %6605 = vst.msk [vmem:[%s10029_s19 + $0xa0] sm:$0xff] %vm340_vm1, %v6575_v38  ;;  %v8650_v16 = vpop.f32.mrf.mxu1 }
 0x523   : > { %v6392_v47 = vpop.f32.mrf.mxu1 }
 0x524   : > { %v6514_v28 = vrot.slane %v6392_v47, 1 }
 0x525   : > { %v8651_v12 = vpop.f32.mrf.mxu1 }
 0x526   : > { %v6515_v22 = vsel %vm1118_vm4, %v6513_v40, %v6514_v28  ;;  %v6578_v55 = vadd.f32 %v6514_v28, %v6443_v41 }
 0x527   : > { %v6577_v4 = vadd.f32 %v6515_v22, %v6442_v9  ;;  %v6397_v33 = vpop.f32.mrf.mxu1 }
 0x528   : > { %6608 = vst.msk [vmem:[%s10029_s19 + $0xb8] sm:$0x7f] %vm856_vm3, %v6578_v55  ;;  %v6516_v25 = vrot.slane %v6397_v33, 1 }
 0x529   : > { %6607 = vst.msk [vmem:[%s10029_s19 + $0xb0] sm:$0xff] %vm340_vm1, %v6577_v4  ;;  %v8654_v17 = vpop.f32.mrf.mxu1 }
 0x52b   : > { %v6400_v24 = vpop.f32.mrf.mxu1 }
 0x52c   : > { %v6517_v26 = vrot.slane %v6400_v24, 1 }
 0x52d   : > { %v8655_v30 = vpop.f32.mrf.mxu1 }
 0x52e   : > { %v6518_v3 = vsel %vm1118_vm4, %v6516_v25, %v6517_v26  ;;  %v6580_v15 = vadd.f32 %v6517_v26, %v6445_v20 }
 0x52f   : > { %v6579_v2 = vadd.f32 %v6518_v3, %v6444_v27  ;;  %v6405_v35 = vpop.f32.mrf.mxu1 }
 0x530   : > { %6610 = vst.msk [vmem:[%s10029_s19 + $0xc8] sm:$0x7f] %vm856_vm3, %v6580_v15  ;;  %v6519_v48 = vrot.slane %v6405_v35, 1 }
 0x531   : > { %6609 = vst.msk [vmem:[%s10029_s19 + $0xc0] sm:$0xff] %vm340_vm1, %v6579_v2  ;;  %v8658_v44 = vpop.f32.mrf.mxu1 }
 0x533   : > { %v6408_v42 = vpop.f32.mrf.mxu1 }
 0x534   : > { %v6520_v60 = vrot.slane %v6408_v42, 1 }
 0x535   : > { %v8659_v13 = vpop.f32.mrf.mxu1 }
 0x536   : > { %v6521_v45 = vsel %vm1118_vm4, %v6519_v48, %v6520_v60  ;;  %v6582_v6 = vadd.f32 %v6520_v60, %v6447_v46 }
 0x537   : > { %v6581_v18 = vadd.f32 %v6521_v45, %v6446_v32  ;;  %v6413_v19 = vpop.f32.mrf.mxu1 }
 0x538   : > { %6612 = vst.msk [vmem:[%s10029_s19 + $0xd8] sm:$0x7f] %vm856_vm3, %v6582_v6  ;;  %v6522_v5 = vrot.slane %v6413_v19, 1 }
 0x539   : > { %6611 = vst.msk [vmem:[%s10029_s19 + $0xd0] sm:$0xff] %vm340_vm1, %v6581_v18  ;;  %v8662_v23 = vpop.f32.mrf.mxu1 }
 0x53b   : > { %v6416_v51 = vpop.f32.mrf.mxu1 }
 0x53c   : > { %v6523_v49 = vrot.slane %v6416_v51, 1 }
 0x53d   : > { %v8663_v39 = vpop.f32.mrf.mxu1 }
 0x53e   : > { %v6524_v31 = vsel %vm1118_vm4, %v6522_v5, %v6523_v49  ;;  %v6584_v57 = vadd.f32 %v6523_v49, %v6449_v10 }
 0x53f   : > { %v6583_v59 = vadd.f32 %v6524_v31, %v6448_v56 }
 0x540   : > { %6614 = vst.msk [vmem:[%s10029_s19 + $0xe8] sm:$0x7f] %vm856_vm3, %v6584_v57 }
 0x541   : > { %6613 = vst.msk [vmem:[%s10029_s19 + $0xe0] sm:$0xff] %vm340_vm1, %v6583_v59 }
 0x542 PF: > { %s15_s18 = sadd.s32 1, %s8779_s18  }
 0x543   : > { %p12_p4 = scmp.ge.s32.totalorder %s15_s18, 4  }
 0x545   :  { %14 = sbr.rel (!%p12_p4) target bundleno = 1 (0x1), region = 90 }

</bundles_post_ra>
